<compile_context>
chip_gen: v5e
topology: v5e:2x2
jax: 0.10.0
libtpu: 0.0.40
codegen_flags: <defaults>
</compile_context>

<pallas_src>
import jax
import jax.numpy as jnp
from jax.experimental import pallas as pl
from jax.experimental.pallas import tpu as pltpu

NEG_SLOPE = 0.01  # F.leaky_relu default
D_IN, D_IN_PAD, D_H, D_OUT = 312, 384, 1280, 640


def _leaky_relu(x):
    return jnp.where(x > 0, x, NEG_SLOPE * x)


def mlp_kernel(x_ref, w1_ref, b1_ref, w2_ref, b2_ref, w3_ref, b3_ref, o_ref):
    # x_ref is already bf16, (tm, 384) with zero-padded tail columns.
    # Layer 1: (tm, 384) @ (384, 1280) + (1, 1280); bf16 MXU, f32 accumulate.
    h = jnp.dot(x_ref[...], w1_ref[...], preferred_element_type=jnp.float32)
    h = _leaky_relu(h + b1_ref[...])
    # Layer 2: (tm, 1280) @ (1280, 1280) + (1, 1280)
    h = jnp.dot(h.astype(jnp.bfloat16), w2_ref[...],
                preferred_element_type=jnp.float32)
    h = _leaky_relu(h + b2_ref[...])
    # Layer 3: (tm, 1280) @ (1280, 640) + (1, 640)
    h = jnp.dot(h.astype(jnp.bfloat16), w3_ref[...],
                preferred_element_type=jnp.float32)
    h = _leaky_relu(h + b3_ref[...])
    o_ref[...] = h.astype(o_ref.dtype)


def word_embedding_forward(x, params, *, tm=None, out_dtype=None):
    """x: (B, 312). params: bf16 transposed weights (w1 padded to 384 rows),
    f32 biases. Returns (B, 640) in out_dtype (defaults to x.dtype)."""
    B, d_in = x.shape
    assert d_in == D_IN, d_in
    out_dtype = out_dtype or x.dtype

    w1, b1 = params["w1"], params["b1"]
    w2, b2 = params["w2"], params["b2"]
    w3, b3 = params["w3"], params["b3"]
    assert w1.shape == (D_IN_PAD, D_H), w1.shape

    # Cast + pad activations OUTSIDE the kernel: bf16 halves input DMA and the
    # x double-buffer; padding 312->384 makes the layer-1 contraction aligned.
    x_bf16 = jnp.pad(x.astype(jnp.bfloat16),
                     ((0, 0), (0, D_IN_PAD - D_IN)))

    # Batch tile: whole batch when small; otherwise 512-row tiles (multiple of
    # 128, MXU-friendly on all generations; grid splits across TCs via
    # "parallel" semantics on v7x).
    if tm is None:
        tm = B if B <= 512 else 512
    tm = max(1, min(tm, B))
    if tm < B:
        # Enforce the (8,128) sublane rule for non-full-extent blocks.
        tm = max(8, (tm // 8) * 8)
    grid = (pl.cdiv(B, tm),)

    # Weights / biases are replicated across the batch grid: constant block
    # index, single-buffered (nothing to pipeline) -> ~halves weight VMEM.
    def rep(shape):
        return pl.BlockSpec(shape, lambda i: tuple(0 for _ in shape),
                            pipeline_mode=pl.Buffered(1))

    flops = 2 * B * (D_IN_PAD * D_H + D_H * D_H + D_H * D_OUT)
    bytes_accessed = (
        x_bf16.size * x_bf16.dtype.itemsize
        + sum(int(p.size) * p.dtype.itemsize for p in (w1, b1, w2, b2, w3, b3))
        + B * D_OUT * jnp.dtype(out_dtype).itemsize)

    return pl.pallas_call(
        mlp_kernel,
        out_shape=jax.ShapeDtypeStruct((B, D_OUT), out_dtype),
        grid_spec=pltpu.PrefetchScalarGridSpec(
            num_scalar_prefetch=0,
            grid=grid,
            in_specs=[
                pl.BlockSpec((tm, D_IN_PAD), lambda i: (i, 0)),
                rep(w1.shape), rep(b1.shape),
                rep(w2.shape), rep(b2.shape),
                rep(w3.shape), rep(b3.shape),
            ],
            out_specs=pl.BlockSpec((tm, D_OUT), lambda i: (i, 0)),
        ),
        compiler_params=pltpu.CompilerParams(
            dimension_semantics=("parallel",),
            vmem_limit_bytes=48 << 20,
        ),
        cost_estimate=pl.CostEstimate(
            flops=flops, bytes_accessed=bytes_accessed, transcendentals=0),
    )(x_bf16, w1, b1, w2, b2, w3, b3)


def init_params(key):
    """nn.Linear-style init; weights stored transposed (in, out) in bf16.
    w1 is zero-padded along the input dim to 384 rows (result unchanged)."""
    dims = [(D_IN, D_H), (D_H, D_H), (D_H, D_OUT)]
    params = {}
    for idx, (d_in, d_out) in enumerate(dims, start=1):
        key, kw, kb = jax.random.split(key, 3)
        bound = 1.0 / jnp.sqrt(d_in)
        w = jax.random.uniform(kw, (d_in, d_out), jnp.float32, -bound, bound)
        b = jax.random.uniform(kb, (1, d_out), jnp.float32, -bound, bound)
        if idx == 1:
            w = jnp.pad(w, ((0, D_IN_PAD - D_IN), (0, 0)))  # zero rows
        params[f"w{idx}"] = w.astype(jnp.bfloat16)   # bf16 weights (MXU path)
        params[f"b{idx}"] = b                        # f32 biases
    return params


def reference_forward(x, params):
    """Pure-JAX reference with the same bf16-weight / f32-accumulate recipe."""
    h = jnp.pad(x.astype(jnp.bfloat16), ((0, 0), (0, D_IN_PAD - D_IN)))
    for i in (1, 2, 3):
        h = jnp.dot(h.astype(jnp.bfloat16), params[f"w{i}"],
                    preferred_element_type=jnp.float32)
        h = _leaky_relu(h + params[f"b{i}"])
    return h.astype(x.dtype)


if __name__ == "__main__":
    key = jax.random.PRNGKey(0)
    kx, kp = jax.random.split(key)
    B = 16
    x = jax.random.normal(kx, (B, D_IN), jnp.float32)
    params = init_params(kp)

    out = jax.block_until_ready(word_embedding_forward(x, params))

    ref = reference_forward(x, params)
    assert out.shape == (B, D_OUT), out.shape
    assert out.dtype == x.dtype, out.dtype
    assert jnp.allclose(out, ref, atol=1e-2, rtol=1e-2), "mismatch vs reference"

    print("KERNEL_OK")
</pallas_src>

<mosaic_0001>
module attributes {stable_mosaic.version = 11 : i64} {
  func.func @mlp_kernel(%arg0: i32, %arg1: memref<16x384xbf16, #tpu.memory_space<vmem>>, %arg2: memref<384x1280xbf16, #tpu.memory_space<vmem>>, %arg3: memref<1x1280xf32, #tpu.memory_space<vmem>>, %arg4: memref<1280x1280xbf16, #tpu.memory_space<vmem>>, %arg5: memref<1x1280xf32, #tpu.memory_space<vmem>>, %arg6: memref<1280x640xbf16, #tpu.memory_space<vmem>>, %arg7: memref<1x640xf32, #tpu.memory_space<vmem>>, %arg8: memref<16x640xf32, #tpu.memory_space<vmem>>) attributes {dimension_semantics = [#tpu.dimension_semantics<parallel>], iteration_bounds = array<i64: 1>, scalar_prefetch = 0 : i64, scratch_operands = 0 : i64, tpu.core_type = #tpu.core_type<tc>, window_params = [{transform_indices = @transform_0, window_bounds = array<i64: 16, 384>}, {pipeline_mode = #tpu.pipeline_mode<synchronous>, transform_indices = @transform_1, window_bounds = array<i64: 384, 1280>}, {pipeline_mode = #tpu.pipeline_mode<synchronous>, transform_indices = @transform_2, window_bounds = array<i64: 1, 1280>}, {pipeline_mode = #tpu.pipeline_mode<synchronous>, transform_indices = @transform_3, window_bounds = array<i64: 1280, 1280>}, {pipeline_mode = #tpu.pipeline_mode<synchronous>, transform_indices = @transform_4, window_bounds = array<i64: 1, 1280>}, {pipeline_mode = #tpu.pipeline_mode<synchronous>, transform_indices = @transform_5, window_bounds = array<i64: 1280, 640>}, {pipeline_mode = #tpu.pipeline_mode<synchronous>, transform_indices = @transform_6, window_bounds = array<i64: 1, 640>}, {transform_indices = @transform_7, window_bounds = array<i64: 16, 640>}]} {
    %c0 = arith.constant 0 : index
    %c0_0 = arith.constant 0 : index
    %0 = vector.load %arg1[%c0, %c0_0] : memref<16x384xbf16, #tpu.memory_space<vmem>>, vector<16x384xbf16>
    %c0_1 = arith.constant 0 : index
    %c0_2 = arith.constant 0 : index
    %1 = vector.load %arg2[%c0_1, %c0_2] : memref<384x1280xbf16, #tpu.memory_space<vmem>>, vector<384x1280xbf16>
    %cst = arith.constant dense<0.000000e+00> : vector<16x1280xf32>
    %2 = tpu.matmul %0, %1, %cst {dimension_numbers = #tpu.dot_dimension_numbers<[1], [0], [0], [1], [0, 0, 1, 1], [], []>} : vector<16x384xbf16>, vector<384x1280xbf16>, vector<16x1280xf32> -> vector<16x1280xf32>
    %c0_3 = arith.constant 0 : index
    %c0_4 = arith.constant 0 : index
    %3 = vector.load %arg3[%c0_3, %c0_4] : memref<1x1280xf32, #tpu.memory_space<vmem>>, vector<1x1280xf32>
    %4 = vector.broadcast %3 : vector<1x1280xf32> to vector<16x1280xf32>
    %5 = arith.addf %2, %4 : vector<16x1280xf32>
    %cst_5 = arith.constant 0.000000e+00 : f32
    %6 = vector.broadcast %cst_5 : f32 to vector<16x1280xf32>
    %7 = arith.cmpf ogt, %5, %6 : vector<16x1280xf32>
    %cst_6 = arith.constant 0.00999999977 : f32
    %8 = vector.broadcast %cst_6 : f32 to vector<16x1280xf32>
    %9 = arith.mulf %8, %5 : vector<16x1280xf32>
    %10 = arith.select %7, %5, %9 : vector<16x1280xi1>, vector<16x1280xf32>
    %11 = arith.truncf %10 : vector<16x1280xf32> to vector<16x1280xbf16>
    %c0_7 = arith.constant 0 : index
    %c0_8 = arith.constant 0 : index
    %12 = vector.load %arg4[%c0_7, %c0_8] : memref<1280x1280xbf16, #tpu.memory_space<vmem>>, vector<1280x1280xbf16>
    %cst_9 = arith.constant dense<0.000000e+00> : vector<16x1280xf32>
    %13 = tpu.matmul %11, %12, %cst_9 {dimension_numbers = #tpu.dot_dimension_numbers<[1], [0], [0], [1], [0, 0, 1, 1], [], []>} : vector<16x1280xbf16>, vector<1280x1280xbf16>, vector<16x1280xf32> -> vector<16x1280xf32>
    %c0_10 = arith.constant 0 : index
    %c0_11 = arith.constant 0 : index
    %14 = vector.load %arg5[%c0_10, %c0_11] : memref<1x1280xf32, #tpu.memory_space<vmem>>, vector<1x1280xf32>
    %15 = vector.broadcast %14 : vector<1x1280xf32> to vector<16x1280xf32>
    %16 = arith.addf %13, %15 : vector<16x1280xf32>
    %cst_12 = arith.constant 0.000000e+00 : f32
    %17 = vector.broadcast %cst_12 : f32 to vector<16x1280xf32>
    %18 = arith.cmpf ogt, %16, %17 : vector<16x1280xf32>
    %cst_13 = arith.constant 0.00999999977 : f32
    %19 = vector.broadcast %cst_13 : f32 to vector<16x1280xf32>
    %20 = arith.mulf %19, %16 : vector<16x1280xf32>
    %21 = arith.select %18, %16, %20 : vector<16x1280xi1>, vector<16x1280xf32>
    %22 = arith.truncf %21 : vector<16x1280xf32> to vector<16x1280xbf16>
    %c0_14 = arith.constant 0 : index
    %c0_15 = arith.constant 0 : index
    %23 = vector.load %arg6[%c0_14, %c0_15] : memref<1280x640xbf16, #tpu.memory_space<vmem>>, vector<1280x640xbf16>
    %cst_16 = arith.constant dense<0.000000e+00> : vector<16x640xf32>
    %24 = tpu.matmul %22, %23, %cst_16 {dimension_numbers = #tpu.dot_dimension_numbers<[1], [0], [0], [1], [0, 0, 1, 1], [], []>} : vector<16x1280xbf16>, vector<1280x640xbf16>, vector<16x640xf32> -> vector<16x640xf32>
    %c0_17 = arith.constant 0 : index
    %c0_18 = arith.constant 0 : index
    %25 = vector.load %arg7[%c0_17, %c0_18] : memref<1x640xf32, #tpu.memory_space<vmem>>, vector<1x640xf32>
    %26 = vector.broadcast %25 : vector<1x640xf32> to vector<16x640xf32>
    %27 = arith.addf %24, %26 : vector<16x640xf32>
    %cst_19 = arith.constant 0.000000e+00 : f32
    %28 = vector.broadcast %cst_19 : f32 to vector<16x640xf32>
    %29 = arith.cmpf ogt, %27, %28 : vector<16x640xf32>
    %cst_20 = arith.constant 0.00999999977 : f32
    %30 = vector.broadcast %cst_20 : f32 to vector<16x640xf32>
    %31 = arith.mulf %30, %27 : vector<16x640xf32>
    %32 = arith.select %29, %27, %31 : vector<16x640xi1>, vector<16x640xf32>
    %c0_21 = arith.constant 0 : index
    %c0_22 = arith.constant 0 : index
    %33 = vector.load %arg8[%c0_21, %c0_22] : memref<16x640xf32, #tpu.memory_space<vmem>>, vector<16x640xf32>
    tpu.vector_store %arg8[%c0_21, %c0_22], %32 {strides = array<i32>} : memref<16x640xf32, #tpu.memory_space<vmem>>, vector<16x640xf32>,
    return
  }
  func.func @transform_0(%arg0: i32) -> (i32, i32) {
    %c0_i32 = arith.constant 0 : i32
    %c0_i32_0 = arith.constant 0 : i32
    return %arg0, %c0_i32 : i32, i32
  }
  func.func @transform_1(%arg0: i32) -> (i32, i32) {
    %c0_i32 = arith.constant 0 : i32
    %c0_i32_0 = arith.constant 0 : i32
    %c0_i32_1 = arith.constant 0 : i32
    return %c0_i32, %c0_i32_0 : i32, i32
  }
  func.func @transform_2(%arg0: i32) -> (i32, i32) {
    %c0_i32 = arith.constant 0 : i32
    %c0_i32_0 = arith.constant 0 : i32
    %c0_i32_1 = arith.constant 0 : i32
    return %c0_i32, %c0_i32_0 : i32, i32
  }
  func.func @transform_3(%arg0: i32) -> (i32, i32) {
    %c0_i32 = arith.constant 0 : i32
    %c0_i32_0 = arith.constant 0 : i32
    %c0_i32_1 = arith.constant 0 : i32
    return %c0_i32, %c0_i32_0 : i32, i32
  }
  func.func @transform_4(%arg0: i32) -> (i32, i32) {
    %c0_i32 = arith.constant 0 : i32
    %c0_i32_0 = arith.constant 0 : i32
    %c0_i32_1 = arith.constant 0 : i32
    return %c0_i32, %c0_i32_0 : i32, i32
  }
  func.func @transform_5(%arg0: i32) -> (i32, i32) {
    %c0_i32 = arith.constant 0 : i32
    %c0_i32_0 = arith.constant 0 : i32
    %c0_i32_1 = arith.constant 0 : i32
    return %c0_i32, %c0_i32_0 : i32, i32
  }
  func.func @transform_6(%arg0: i32) -> (i32, i32) {
    %c0_i32 = arith.constant 0 : i32
    %c0_i32_0 = arith.constant 0 : i32
    %c0_i32_1 = arith.constant 0 : i32
    return %c0_i32, %c0_i32_0 : i32, i32
  }
  func.func @transform_7(%arg0: i32) -> (i32, i32) {
    %c0_i32 = arith.constant 0 : i32
    %c0_i32_0 = arith.constant 0 : i32
    return %arg0, %c0_i32 : i32, i32
  }
}

</mosaic_0001>

<bundles_post_ra>
// kernel: tpu_custom_call.1
= control target key start
LH: loop header
LB: loop body
LE: loop exit
PB: predicated region body
PF: predicated region fallthrough
CT: control target
= control target key end

     0   :  { %12 = vsyncpa [#allocation3], 0  ;;  %s20196_s0 = inlined_call_operand.hbm [shape: bf16[16,384], index: 0, kind: input, shape index: {}]   ;;  %s20197_s1 = inlined_call_operand.hbm [shape: bf16[384,1280], index: 1, kind: input, shape index: {}]   ;;  %s20198_s2 = inlined_call_operand.hbm [shape: f32[1,1280], index: 2, kind: input, shape index: {}]   ;;  %s20199_s3 = inlined_call_operand.hbm [shape: bf16[1280,1280], index: 3, kind: input, shape index: {}]   ;;  %s20200_s4 = inlined_call_operand.hbm [shape: f32[1,1280], index: 4, kind: input, shape index: {}]   ;;  %s20201_s5 = inlined_call_operand.hbm [shape: bf16[1280,640], index: 5, kind: input, shape index: {}]   ;;  %s20202_s6 = inlined_call_operand.hbm [shape: f32[1,640], index: 6, kind: input, shape index: {}]   ;;  %s20203_s7 = inlined_call_operand.hbm [shape: f32[16,640], index: 7, kind: output, shape index: {}]  }
   0x1   :  { %13 = vsyncpa [#allocation6], 0 }
   0x2   :  { %14 = vsyncpa [#allocation9], 0 }
   0x3   :  { %15 = vsyncpa [#allocation12], 0  ;;  %s34_s26 = sshll.u32 %s20197_s1, 4  ;;  %s35_s26 = int_to_ptr.hbm [resolvable:$true] %s34_s26 }
   0x4   :  { %16 = vsyncpa [#allocation4], 0  ;;  %s19168_s27 = smov [#allocation5]   ;;  %s58_s8 = sshll.u32 %s20199_s3, 4  ;;  %s59_s8 = int_to_ptr.hbm [resolvable:$true] %s58_s8 }
   0x5   :  { %s36_s28 = sshll.u32 %s19168_s27, 4  ;;  %s19169_s9 = smov 640   ;;  %s37_s28 = int_to_ptr.vmem [resolvable:$true] %s36_s28 }
   0x6   :  { %s19170_s10 = smov 40   ;;  %s19171_s11 = smov [#allocation8]  }
   0x7   :  { %42 = dma.hbm_to_vmem [thread:$0]  %s35_s26, 30720, %s37_s28, [#allocation6], %s19169_s9, %s19169_s9, %s19170_s10  }
   0x8   :  { %s60_s12 = sshll.u32 %s19171_s11, 4  ;;  %s82_s14 = sshll.u32 %s20201_s5, 4  ;;  %s61_s12 = int_to_ptr.vmem [resolvable:$true] %s60_s12  ;;  %s83_s14 = int_to_ptr.hbm [resolvable:$true] %s82_s14 }
   0x9   :  { %66 = dma.hbm_to_vmem [thread:$0]  %s59_s8, 102400, %s61_s12, [#allocation9], %s19169_s9, %s19169_s9, %s19170_s10  }
   0xa   :  { %s19172_s3 = smov [#allocation11]   ;;  %s21_s18 = sshll.u32 %s20196_s0, 4  ;;  %s22_s18 = int_to_ptr.hbm [resolvable:$true] %s21_s18 }
   0xb   :  { %s84_s15 = sshll.u32 %s19172_s3, 4  ;;  %s19173_s19 = smov 320   ;;  %s85_s15 = int_to_ptr.vmem [resolvable:$true] %s84_s15 }
   0xc   :  { %s19174_s20 = smov 20   ;;  %s19175_s21 = smov [#allocation2]  }
   0xd   :  { %90 = dma.hbm_to_vmem [thread:$0]  %s83_s14, 51200, %s85_s15, [#allocation12], %s19173_s19, %s19173_s19, %s19174_s20  }
   0xe   :  { %s23_s22 = sshll.u32 %s19175_s21, 4  ;;  %s19176_s5 = smov 192   ;;  %s24_s22 = int_to_ptr.vmem [resolvable:$true] %s23_s22 }
   0xf   :  { %s19177_s23 = smov 12   ;;  %s48_s26 = sshll.u32 %s20198_s2, 4  ;;  %s49_s26 = int_to_ptr.hbm [resolvable:$true] %s48_s26 }
  0x10   :  { %29 = dma.hbm_to_vmem [thread:$0]  %s22_s18, 384, %s24_s22, [#allocation3], %s19176_s5, %s19176_s5, %s19177_s23  }
  0x11   :  { %s19178_s27 = smov [#allocation7]   ;;  %s72_s30 = sshll.u32 %s20200_s4, 4  ;;  %s73_s30 = int_to_ptr.hbm [resolvable:$true] %s72_s30 }
  0x12   :  { %s50_s28 = sshll.u32 %s19178_s27, 4  ;;  %s19179_s8 = smov [#allocation10]   ;;  %s51_s28 = int_to_ptr.vmem [resolvable:$true] %s50_s28 }
  0x13   :  { %53 = dma.hbm_to_vmem [thread:$0]  %s49_s26, 160, %s51_s28, [#allocation6]  }
  0x14   :  { %s74_s11 = sshll.u32 %s19179_s8, 4  ;;  %s96_s1 = sshll.u32 %s20202_s6, 4  ;;  %s75_s11 = int_to_ptr.vmem [resolvable:$true] %s74_s11  ;;  %s97_s1 = int_to_ptr.hbm [resolvable:$true] %s96_s1 }
  0x15   :  { %77 = dma.hbm_to_vmem [thread:$0]  %s73_s30, 160, %s75_s11, [#allocation9]  }
  0x16   :  { %s19180_s2 = smov [#allocation13]  }
  0x17   :  { %s98_s14 = sshll.u32 %s19180_s2, 4  ;;  %s99_s14 = int_to_ptr.vmem [resolvable:$true] %s98_s14 }
  0x18   :  { %101 = dma.hbm_to_vmem [thread:$0]  %s97_s1, 80, %s99_s14, [#allocation12]  }
  0x19   :  { %19158 = dma.done.wait [#allocation3], 384  }
  0x1a   :  { %19159 = vsyncadd [#allocation3], 4294966912 }
  0x1b   :  { %19160 = dma.done.wait [#allocation6], 30880  }
  0x1c   :  { %19161 = vsyncadd [#allocation6], 4294936416 }
  0x1d   :  { %19162 = dma.done.wait [#allocation9], 102560  }
  0x1e   :  { %19163 = vsyncadd [#allocation9], 4294864736 }
  0x1f   :  { %19164 = dma.done.wait [#allocation12], 51280  }
  0x20   :  { %19165 = vsyncadd [#allocation12], 4294916016  ;;  %v12026_v0 = vld [vmem:[#allocation5 + $0x230] sm:$0xf]  ;;  %v17582_v1 = vld [vmem:[#allocation5 + $0x254] sm:$0xf0] }
  0x21   :  { %v12346_v2 = vld [vmem:[#allocation5 + $0x4b0] sm:$0xf]  ;;  %v12027_v3 = vor.u32 %v17582_v1, %v12026_v0  ;;  %v17662_v4 = vld [vmem:[#allocation5 + $0x4d4] sm:$0xf0]  ;;  %v17577_v9 = vld [vmem:[#allocation5 + $0x234] sm:$0xf] }
  0x22   :  { %v12666_v5 = vld [vmem:[#allocation5 + $0x730] sm:$0xf]  ;;  %v17742_v6 = vld [vmem:[#allocation5 + $0x754] sm:$0xf0]  ;;  %v12347_v7 = vor.u32 %v17662_v4, %v12346_v2  ;;  %v12028_v10 = vld [vmem:[#allocation5 + $0x258] sm:$0xf0] }
  0x23   :  { %v12667_v8 = vor.u32 %v17742_v6, %v12666_v5  ;;  %v11986_v11 = vld [vmem:[#allocation5 + $0x1e0] sm:$0xf]  ;;  %1614 = vmatpush.bf16.msra.mxu0 %v12027_v3  ;;  %v12031_v12 = vor.u32 %v17577_v9, %v12028_v10  ;;  %v17572_v13 = vld [vmem:[#allocation5 + $0x204] sm:$0xf0]  ;;  %v17567_v20 = vld [vmem:[#allocation5 + $0x1e4] sm:$0xf] }
  0x24   :  { %v12306_v14 = vld [vmem:[#allocation5 + $0x460] sm:$0xf]  ;;  %v17652_v15 = vld [vmem:[#allocation5 + $0x484] sm:$0xf0]  ;;  %1628 = vmatpush.bf16.msra.mxu1 %v12347_v7  ;;  %v11987_v16 = vor.u32 %v17572_v13, %v11986_v11  ;;  %v11988_v22 = vld [vmem:[#allocation5 + $0x208] sm:$0xf0] }
  0x25   :  { %1642 = vmatpush.bf16.msra.mxu2 %v12667_v8  ;;  %v12307_v17 = vor.u32 %v17652_v15, %v12306_v14  ;;  %v12626_v18 = vld [vmem:[#allocation5 + $0x6e0] sm:$0xf]  ;;  %v17732_v19 = vld [vmem:[#allocation5 + $0x704] sm:$0xf0]  ;;  %1656 = vmatpush.bf16.msra.mxu3 %v12031_v12  ;;  %v11946_v23 = vld [vmem:[#allocation5 + $0x190] sm:$0xf]  ;;  %v11991_v25 = vor.u32 %v17567_v20, %v11988_v22 }
  0x26   :  { %v12627_v21 = vor.u32 %v17732_v19, %v12626_v18  ;;  %v17562_v24 = vld [vmem:[#allocation5 + $0x1b4] sm:$0xf0]  ;;  %v12266_v26 = vld [vmem:[#allocation5 + $0x410] sm:$0xf]  ;;  %v17557_v31 = vld [vmem:[#allocation5 + $0x194] sm:$0xf] }
  0x27   :  { %v17642_v27 = vld [vmem:[#allocation5 + $0x434] sm:$0xf0]  ;;  %v12586_v28 = vld [vmem:[#allocation5 + $0x690] sm:$0xf]  ;;  %1615 = vmatpush.bf16.msra.mxu0 %v11987_v16  ;;  %v11947_v29 = vor.u32 %v17562_v24, %v11946_v23  ;;  %v11948_v32 = vld [vmem:[#allocation5 + $0x1b8] sm:$0xf0] }
  0x28   :  { %v17722_v30 = vld [vmem:[#allocation5 + $0x6b4] sm:$0xf0]  ;;  %1629 = vmatpush.bf16.msra.mxu1 %v12307_v17  ;;  %v12267_v33 = vor.u32 %v17642_v27, %v12266_v26  ;;  %v11906_v35 = vld [vmem:[#allocation5 + $0x140] sm:$0xf]  ;;  %v17552_v36 = vld [vmem:[#allocation5 + $0x164] sm:$0xf0]  ;;  %v11951_v38 = vor.u32 %v17557_v31, %v11948_v32 }
  0x29   :  { %1643 = vmatpush.bf16.msra.mxu2 %v12627_v21  ;;  %v12587_v34 = vor.u32 %v17722_v30, %v12586_v28  ;;  %v12226_v37 = vld [vmem:[#allocation5 + $0x3c0] sm:$0xf]  ;;  %1657 = vmatpush.bf16.msra.mxu3 %v11991_v25  ;;  %v17632_v39 = vld [vmem:[#allocation5 + $0x3e4] sm:$0xf0]  ;;  %v17547_v42 = vld [vmem:[#allocation5 + $0x144] sm:$0xf]  ;;  %v11907_v44 = vor.u32 %v17552_v36, %v11906_v35 }
  0x2a   :  { %v12546_v40 = vld [vmem:[#allocation5 + $0x640] sm:$0xf]  ;;  %v17712_v41 = vld [vmem:[#allocation5 + $0x664] sm:$0xf0]  ;;  %v11908_v43 = vld [vmem:[#allocation5 + $0x168] sm:$0xf0]  ;;  %v12227_v45 = vor.u32 %v17632_v39, %v12226_v37 }
  0x2b   :  { %1616 = vmatpush.bf16.msra.mxu0 %v11947_v29  ;;  %v12547_v46 = vor.u32 %v17712_v41, %v12546_v40  ;;  %v11866_v47 = vld [vmem:[#allocation5 + $0xf0] sm:$0xf]  ;;  %v17542_v48 = vld [vmem:[#allocation5 + $0x114] sm:$0xf0]  ;;  %v11911_v50 = vor.u32 %v17547_v42, %v11908_v43  ;;  %v17537_v54 = vld [vmem:[#allocation5 + $0xf4] sm:$0xf] }
  0x2c   :  { %1630 = vmatpush.bf16.msra.mxu1 %v12267_v33  ;;  %v12186_v49 = vld [vmem:[#allocation5 + $0x370] sm:$0xf]  ;;  %v17622_v51 = vld [vmem:[#allocation5 + $0x394] sm:$0xf0]  ;;  %v11868_v55 = vld [vmem:[#allocation5 + $0x118] sm:$0xf0]  ;;  %v11867_v56 = vor.u32 %v17542_v48, %v11866_v47 }
  0x2d   :  { %1644 = vmatpush.bf16.msra.mxu2 %v12587_v34  ;;  %1658 = vmatpush.bf16.msra.mxu3 %v11951_v38  ;;  %v12506_v52 = vld [vmem:[#allocation5 + $0x5f0] sm:$0xf]  ;;  %v17702_v53 = vld [vmem:[#allocation5 + $0x614] sm:$0xf0]  ;;  %v12187_v57 = vor.u32 %v17622_v51, %v12186_v49  ;;  %v11826_v59 = vld [vmem:[#allocation5 + $0xa0] sm:$0xf]  ;;  %v11871_v62 = vor.u32 %v17537_v54, %v11868_v55 }
  0x2e   :  { %v12507_v58 = vor.u32 %v17702_v53, %v12506_v52  ;;  %v17532_v60 = vld [vmem:[#allocation5 + $0xc4] sm:$0xf0]  ;;  %v12146_v61 = vld [vmem:[#allocation5 + $0x320] sm:$0xf]  ;;  %v17527_v2 = vld [vmem:[#allocation5 + $0xa4] sm:$0xf] }
  0x2f   :  { %1617 = vmatpush.bf16.msra.mxu0 %v11907_v44  ;;  %v17612_v63 = vld [vmem:[#allocation5 + $0x344] sm:$0xf0]  ;;  %v12466_v0 = vld [vmem:[#allocation5 + $0x5a0] sm:$0xf]  ;;  %v11828_v3 = vld [vmem:[#allocation5 + $0xc8] sm:$0xf0]  ;;  %v11827_v4 = vor.u32 %v17532_v60, %v11826_v59 }
  0x30   :  { %1631 = vmatpush.bf16.msra.mxu1 %v12227_v45  ;;  %v17692_v1 = vld [vmem:[#allocation5 + $0x5c4] sm:$0xf0]  ;;  %v12147_v5 = vor.u32 %v17612_v63, %v12146_v61  ;;  %v11786_v7 = vld [vmem:[#allocation5 + $0x50] sm:$0xf]  ;;  %v17522_v8 = vld [vmem:[#allocation5 + $0x74] sm:$0xf0]  ;;  %v11831_v10 = vor.u32 %v17527_v2, %v11828_v3 }
  0x31   :  { %1645 = vmatpush.bf16.msra.mxu2 %v12547_v46  ;;  %1659 = vmatpush.bf16.msra.mxu3 %v11911_v50  ;;  %v12467_v6 = vor.u32 %v17692_v1, %v12466_v0  ;;  %v12106_v9 = vld [vmem:[#allocation5 + $0x2d0] sm:$0xf]  ;;  %v17602_v11 = vld [vmem:[#allocation5 + $0x2f4] sm:$0xf0]  ;;  %v17517_v14 = vld [vmem:[#allocation5 + $0x54] sm:$0xf]  ;;  %v11787_v16 = vor.u32 %v17522_v8, %v11786_v7 }
  0x32   :  { %v12426_v12 = vld [vmem:[#allocation5 + $0x550] sm:$0xf]  ;;  %v17682_v13 = vld [vmem:[#allocation5 + $0x574] sm:$0xf0]  ;;  %v11788_v15 = vld [vmem:[#allocation5 + $0x78] sm:$0xf0]  ;;  %v12107_v19 = vor.u32 %v17602_v11, %v12106_v9 }
  0x33   :  { %1618 = vmatpush.bf16.msra.mxu0 %v11867_v56  ;;  %v11746_v17 = vld [vmem:[#allocation5] sm:$0xf]  ;;  %v17512_v18 = vld [vmem:[#allocation5 + $0x24] sm:$0xf0]  ;;  %v12427_v20 = vor.u32 %v17682_v13, %v12426_v12  ;;  %v11791_v24 = vor.u32 %v17517_v14, %v11788_v15  ;;  %v17507_v26 = vld [vmem:[#allocation5 + $0x4] sm:$0xf] }
  0x34   :  { %1632 = vmatpush.bf16.msra.mxu1 %v12187_v57  ;;  %v12066_v21 = vld [vmem:[#allocation5 + $0x280] sm:$0xf]  ;;  %v17592_v22 = vld [vmem:[#allocation5 + $0x2a4] sm:$0xf0]  ;;  %v11748_v27 = vld [vmem:[#allocation5 + $0x28] sm:$0xf0]  ;;  %v11747_v31 = vor.u32 %v17512_v18, %v11746_v17 }
  0x35   :  { %1646 = vmatpush.bf16.msra.mxu2 %v12507_v58  ;;  %1660 = vmatpush.bf16.msra.mxu3 %v11871_v62  ;;  %v12386_v23 = vld [vmem:[#allocation5 + $0x500] sm:$0xf]  ;;  %v17672_v25 = vld [vmem:[#allocation5 + $0x524] sm:$0xf0]  ;;  %v17657_v28 = vld [vmem:[#allocation5 + $0x4b4] sm:$0xf]  ;;  %v12067_v35 = vor.u32 %v17592_v22, %v12066_v21  ;;  %v11751_v39 = vor.u32 %v17507_v26, %v11748_v27 }
  0x36   :  { %v12348_v29 = vld [vmem:[#allocation5 + $0x4d8] sm:$0xf0]  ;;  %v17737_v30 = vld [vmem:[#allocation5 + $0x734] sm:$0xf]  ;;  %v12034_v33 = vld [vmem:[#allocation5 + $0x238] sm:$0xf]  ;;  %v12387_v36 = vor.u32 %v17672_v25, %v12386_v23 }
  0x37   :  { %1619 = vmatpush.bf16.msra.mxu0 %v11827_v4  ;;  %v12668_v32 = vld [vmem:[#allocation5 + $0x758] sm:$0xf0]  ;;  %v17583_v34 = vld [vmem:[#allocation5 + $0x25c] sm:$0xf0]  ;;  %v12354_v37 = vld [vmem:[#allocation5 + $0x4b8] sm:$0xf]  ;;  %v12351_v40 = vor.u32 %v17657_v28, %v12348_v29 }
  0x38   :  { %1633 = vmatpush.bf16.msra.mxu1 %v12147_v5  ;;  %v17663_v38 = vld [vmem:[#allocation5 + $0x4dc] sm:$0xf0]  ;;  %v12671_v41 = vor.u32 %v17737_v30, %v12668_v32  ;;  %v12035_v42 = vor.u32 %v17583_v34, %v12034_v33  ;;  %v17647_v43 = vld [vmem:[#allocation5 + $0x464] sm:$0xf]  ;;  %v12308_v44 = vld [vmem:[#allocation5 + $0x488] sm:$0xf0] }
  0x39   :  { %1647 = vmatpush.bf16.msra.mxu2 %v12467_v6  ;;  %1661 = vmatpush.bf16.msra.mxu3 %v11831_v10  ;;  %v17727_v45 = vld [vmem:[#allocation5 + $0x6e4] sm:$0xf]  ;;  %v12355_v46 = vor.u32 %v17663_v38, %v12354_v37  ;;  %v12628_v47 = vld [vmem:[#allocation5 + $0x708] sm:$0xf0]  ;;  %v11994_v48 = vld [vmem:[#allocation5 + $0x1e8] sm:$0xf]  ;;  %v12311_v53 = vor.u32 %v17647_v43, %v12308_v44 }
  0x3a   :  { %v17573_v49 = vld [vmem:[#allocation5 + $0x20c] sm:$0xf0]  ;;  %v12314_v50 = vld [vmem:[#allocation5 + $0x468] sm:$0xf]  ;;  %v17637_v52 = vld [vmem:[#allocation5 + $0x414] sm:$0xf]  ;;  %v12631_v57 = vor.u32 %v17727_v45, %v12628_v47 }
  0x3b   :  { %1620 = vmatpush.bf16.msra.mxu0 %v11787_v16  ;;  %v17653_v51 = vld [vmem:[#allocation5 + $0x48c] sm:$0xf0]  ;;  %v12268_v54 = vld [vmem:[#allocation5 + $0x438] sm:$0xf0]  ;;  %v17717_v55 = vld [vmem:[#allocation5 + $0x694] sm:$0xf]  ;;  %v11995_v58 = vor.u32 %v17573_v49, %v11994_v48 }
  0x3c   :  { %1634 = vmatpush.bf16.msra.mxu1 %v12107_v19  ;;  %v12588_v56 = vld [vmem:[#allocation5 + $0x6b8] sm:$0xf0]  ;;  %v11954_v59 = vld [vmem:[#allocation5 + $0x198] sm:$0xf]  ;;  %v17563_v60 = vld [vmem:[#allocation5 + $0x1bc] sm:$0xf0]  ;;  %v12315_v62 = vor.u32 %v17653_v51, %v12314_v50  ;;  %v12271_v6 = vor.u32 %v17637_v52, %v12268_v54 }
  0x3d   :  { %1648 = vmatpush.bf16.msra.mxu2 %v12427_v20  ;;  %1662 = vmatpush.bf16.msra.mxu3 %v11791_v24  ;;  %v11742_v61 = vld [vmem:[#allocation2 + $0x8] sm:$0xf]  ;;  %v17506_v63 = vld [vmem:[#allocation2 + $0x10] sm:$0xf0]  ;;  %v11734_v0 = vld [vmem:[#allocation2] sm:$0xf]  ;;  %v12591_v9 = vor.u32 %v17717_v55, %v12588_v56  ;;  %v11955_v10 = vor.u32 %v17563_v60, %v11954_v59 }
  0x3e   :  { %v17505_v1 = vld [vmem:[#allocation2 + $0x8] sm:$0xf0]  ;;  %v12274_v2 = vld [vmem:[#allocation5 + $0x418] sm:$0xf]  ;;  %v17643_v3 = vld [vmem:[#allocation5 + $0x43c] sm:$0xf0]  ;;  %v19249_v4 = vor.u32 %v17506_v63, %v11742_v61 }
  0x3f   :  { %1621 = vmatpush.bf16.msra.mxu0 %v11747_v31  ;;  %v19251_v5 = vor.u32 %v17505_v1, %v11734_v0  ;;  %v17627_v7 = vld [vmem:[#allocation5 + $0x3c4] sm:$0xf]  ;;  %v12228_v8 = vld [vmem:[#allocation5 + $0x3e8] sm:$0xf0]  ;;  %v12275_v14 = vor.u32 %v17643_v3, %v12274_v2  ;;  %v11914_v15 = vld [vmem:[#allocation5 + $0x148] sm:$0xf] }
  0x40   :  { %1635 = vmatpush.bf16.msra.mxu1 %v12067_v35  ;;  %v17707_v11 = vld [vmem:[#allocation5 + $0x644] sm:$0xf]  ;;  %v12548_v12 = vld [vmem:[#allocation5 + $0x668] sm:$0xf0]  ;;  %v17553_v16 = vld [vmem:[#allocation5 + $0x16c] sm:$0xf0]  ;;  %v12231_v21 = vor.u32 %v17627_v7, %v12228_v8 }
  0x41   :  { %1649 = vmatpush.bf16.msra.mxu2 %v12387_v36  ;;  %1663 = vmatpush.bf16.msra.mxu3 %v11751_v39  ;;  %v17504_v13 = vld [vmem:[#allocation2 + $0x4] sm:$0xf]  ;;  %v11736_v17 = vld [vmem:[#allocation2 + $0xc] sm:$0xf0]  ;;  %v12234_v18 = vld [vmem:[#allocation5 + $0x3c8] sm:$0xf]  ;;  %v12551_v22 = vor.u32 %v17707_v11, %v12548_v12  ;;  %v11915_v23 = vor.u32 %v17553_v16, %v11914_v15 }
  0x42   :  { %v17633_v19 = vld [vmem:[#allocation5 + $0x3ec] sm:$0xf0]  ;;  %1622 = vmatmul.bf16.vlgmr.msra.gmra.mxu0 %v19251_v5  ;;  %v19255_v20 = vor.u32 %v17504_v13, %v11736_v17  ;;  %v17617_v24 = vld [vmem:[#allocation5 + $0x374] sm:$0xf]  ;;  %v12188_v25 = vld [vmem:[#allocation5 + $0x398] sm:$0xf0] }
  0x43   :  { %1670 = vmatpush.bf16.msrb.mxu0 %v12351_v40  ;;  %v17697_v26 = vld [vmem:[#allocation5 + $0x5f4] sm:$0xf]  ;;  %v12235_v27 = vor.u32 %v17633_v19, %v12234_v18  ;;  %v12508_v28 = vld [vmem:[#allocation5 + $0x618] sm:$0xf0]  ;;  %v11874_v29 = vld [vmem:[#allocation5 + $0xf8] sm:$0xf]  ;;  %v12191_v33 = vor.u32 %v17617_v24, %v12188_v25 }
  0x44   :  { %1684 = vmatpush.bf16.msrb.mxu1 %v12671_v41  ;;  %1650 = vmatmul.bf16.vlgmr.msra.gmra.mxu2 %v19249_v4  ;;  %v17543_v30 = vld [vmem:[#allocation5 + $0x11c] sm:$0xf0]  ;;  %v12194_v31 = vld [vmem:[#allocation5 + $0x378] sm:$0xf]  ;;  %v12511_v34 = vor.u32 %v17697_v26, %v12508_v28  ;;  %v17607_v36 = vld [vmem:[#allocation5 + $0x324] sm:$0xf] }
  0x45   :  { %1698 = vmatpush.bf16.msrb.mxu2 %v12035_v42  ;;  %1712 = vmatpush.bf16.msrb.mxu3 %v12355_v46  ;;  %v17623_v32 = vld [vmem:[#allocation5 + $0x39c] sm:$0xf0]  ;;  %v11875_v35 = vor.u32 %v17543_v30, %v11874_v29  ;;  %v12148_v37 = vld [vmem:[#allocation5 + $0x348] sm:$0xf0]  ;;  %v17687_v38 = vld [vmem:[#allocation5 + $0x5a4] sm:$0xf] }
  0x46   :  { %1664 = vmatmul.bf16.vlgmr.msra.gmra.mxu3 %v19251_v5  ;;  %1636 = vmatmul.bf16.vlgmr.msra.gmra.mxu1 %v19255_v20  ;;  %v12195_v39 = vor.u32 %v17623_v32, %v12194_v31  ;;  %v12468_v40 = vld [vmem:[#allocation5 + $0x5c8] sm:$0xf0]  ;;  %v11834_v41 = vld [vmem:[#allocation5 + $0xa8] sm:$0xf]  ;;  %v17533_v42 = vld [vmem:[#allocation5 + $0xcc] sm:$0xf0]  ;;  %v12151_v45 = vor.u32 %v17607_v36, %v12148_v37 }
  0x47   :  { %1671 = vmatpush.bf16.msrb.mxu0 %v12311_v53  ;;  %v12154_v43 = vld [vmem:[#allocation5 + $0x328] sm:$0xf]  ;;  %v17613_v44 = vld [vmem:[#allocation5 + $0x34c] sm:$0xf0]  ;;  %v12471_v46 = vor.u32 %v17687_v38, %v12468_v40  ;;  %v11835_v47 = vor.u32 %v17533_v42, %v11834_v41  ;;  %v17597_v48 = vld [vmem:[#allocation5 + $0x2d4] sm:$0xf] }
  0x48   :  { %1685 = vmatpush.bf16.msrb.mxu1 %v12631_v57  ;;  %v12108_v49 = vld [vmem:[#allocation5 + $0x2f8] sm:$0xf0]  ;;  %v17677_v50 = vld [vmem:[#allocation5 + $0x554] sm:$0xf]  ;;  %v12155_v51 = vor.u32 %v17613_v44, %v12154_v43  ;;  %v11794_v53 = vld [vmem:[#allocation5 + $0x58] sm:$0xf] }
  0x49   :  { %1699 = vmatpush.bf16.msrb.mxu2 %v11995_v58  ;;  %1713 = vmatpush.bf16.msrb.mxu3 %v12315_v62  ;;  %v12428_v52 = vld [vmem:[#allocation5 + $0x578] sm:$0xf0]  ;;  %v17523_v54 = vld [vmem:[#allocation5 + $0x7c] sm:$0xf0]  ;;  %v12114_v55 = vld [vmem:[#allocation5 + $0x2d8] sm:$0xf]  ;;  %v12111_v57 = vor.u32 %v17597_v48, %v12108_v49 }
  0x4a   :  { %v17603_v56 = vld [vmem:[#allocation5 + $0x2fc] sm:$0xf0]  ;;  %v17587_v58 = vld [vmem:[#allocation5 + $0x284] sm:$0xf]  ;;  %v12068_v59 = vld [vmem:[#allocation5 + $0x2a8] sm:$0xf0]  ;;  %v12431_v60 = vor.u32 %v17677_v50, %v12428_v52  ;;  %v11795_v61 = vor.u32 %v17523_v54, %v11794_v53 }
  0x4b   :  { %1672 = vmatpush.bf16.msrb.mxu0 %v12271_v6  ;;  %v17667_v62 = vld [vmem:[#allocation5 + $0x504] sm:$0xf]  ;;  %v12388_v63 = vld [vmem:[#allocation5 + $0x528] sm:$0xf0]  ;;  %v11754_v0 = vld [vmem:[#allocation5 + $0x8] sm:$0xf]  ;;  %v12115_v1 = vor.u32 %v17603_v56, %v12114_v55 }
  0x4c   :  { %1686 = vmatpush.bf16.msrb.mxu1 %v12591_v9  ;;  %v17513_v2 = vld [vmem:[#allocation5 + $0x2c] sm:$0xf0]  ;;  %v12074_v3 = vld [vmem:[#allocation5 + $0x288] sm:$0xf]  ;;  %v12674_v7 = vld [vmem:[#allocation5 + $0x738] sm:$0xf] }
  0x4d   :  { %1700 = vmatpush.bf16.msrb.mxu2 %v11955_v10  ;;  %1714 = vmatpush.bf16.msrb.mxu3 %v12275_v14  ;;  %v17593_v6 = vld [vmem:[#allocation5 + $0x2ac] sm:$0xf0]  ;;  %v17743_v8 = vld [vmem:[#allocation5 + $0x75c] sm:$0xf0]  ;;  %v17578_v9 = vld [vmem:[#allocation5 + $0x23c] sm:$0xf]  ;;  %v12071_v10 = vor.u32 %v17587_v58, %v12068_v59  ;;  %v12391_v14 = vor.u32 %v17667_v62, %v12388_v63  ;;  %v11755_v15 = vor.u32 %v17513_v2, %v11754_v0 }
  0x4e   :  { %v12036_v11 = vld [vmem:[#allocation5 + $0x260] sm:$0xf0]  ;;  %v17658_v12 = vld [vmem:[#allocation5 + $0x4bc] sm:$0xf]  ;;  %v12075_v18 = vor.u32 %v17593_v6, %v12074_v3  ;;  %v12675_v19 = vor.u32 %v17743_v8, %v12674_v7  ;;  %v17733_v24 = vld [vmem:[#allocation5 + $0x70c] sm:$0xf0] }
  0x4f   :  { %1673 = vmatpush.bf16.msrb.mxu0 %v12231_v21  ;;  %v12356_v13 = vld [vmem:[#allocation5 + $0x4e0] sm:$0xf0]  ;;  %v17738_v16 = vld [vmem:[#allocation5 + $0x73c] sm:$0xf]  ;;  %v12039_v21 = vor.u32 %v17578_v9, %v12036_v11  ;;  %v17568_v25 = vld [vmem:[#allocation5 + $0x1ec] sm:$0xf] }
  0x50   :  { %1687 = vmatpush.bf16.msrb.mxu1 %v12551_v22  ;;  %v12676_v17 = vld [vmem:[#allocation5 + $0x760] sm:$0xf0]  ;;  %v12359_v22 = vor.u32 %v17658_v12, %v12356_v13  ;;  %v17648_v28 = vld [vmem:[#allocation5 + $0x46c] sm:$0xf]  ;;  %v12316_v29 = vld [vmem:[#allocation5 + $0x490] sm:$0xf0] }
  0x51   :  { %1701 = vmatpush.bf16.msrb.mxu2 %v11915_v23  ;;  %1715 = vmatpush.bf16.msrb.mxu3 %v12235_v27  ;;  %v12634_v23 = vld [vmem:[#allocation5 + $0x6e8] sm:$0xf]  ;;  %v12679_v26 = vor.u32 %v17738_v16, %v12676_v17  ;;  %v11996_v27 = vld [vmem:[#allocation5 + $0x210] sm:$0xf0]  ;;  %v17728_v30 = vld [vmem:[#allocation5 + $0x6ec] sm:$0xf] }
  0x52   :  { %v12636_v31 = vld [vmem:[#allocation5 + $0x710] sm:$0xf0]  ;;  %v12635_v32 = vor.u32 %v17733_v24, %v12634_v23  ;;  %v17723_v36 = vld [vmem:[#allocation5 + $0x6bc] sm:$0xf0]  ;;  %v17558_v37 = vld [vmem:[#allocation5 + $0x19c] sm:$0xf] }
  0x53   :  { %1674 = vmatpush.bf16.msrb.mxu0 %v12191_v33  ;;  %v11999_v33 = vor.u32 %v17568_v25, %v11996_v27  ;;  %v12639_v38 = vor.u32 %v17728_v30, %v12636_v31  ;;  %v17638_v40 = vld [vmem:[#allocation5 + $0x41c] sm:$0xf]  ;;  %v12276_v41 = vld [vmem:[#allocation5 + $0x440] sm:$0xf0]  ;;  %v17713_v48 = vld [vmem:[#allocation5 + $0x66c] sm:$0xf0] }
  0x54   :  { %1688 = vmatpush.bf16.msrb.mxu1 %v12511_v34  ;;  %v12319_v34 = vor.u32 %v17648_v28, %v12316_v29  ;;  %v17718_v42 = vld [vmem:[#allocation5 + $0x69c] sm:$0xf]  ;;  %v12596_v43 = vld [vmem:[#allocation5 + $0x6c0] sm:$0xf0]  ;;  %v17548_v49 = vld [vmem:[#allocation5 + $0x14c] sm:$0xf] }
  0x55   :  { %1702 = vmatpush.bf16.msrb.mxu2 %v11875_v35  ;;  %1716 = vmatpush.bf16.msrb.mxu3 %v12195_v39  ;;  %v12594_v35 = vld [vmem:[#allocation5 + $0x698] sm:$0xf]  ;;  %v11956_v39 = vld [vmem:[#allocation5 + $0x1c0] sm:$0xf0]  ;;  %v12599_v50 = vor.u32 %v17718_v42, %v12596_v43  ;;  %v17628_v52 = vld [vmem:[#allocation5 + $0x3cc] sm:$0xf] }
  0x56   :  { %v12595_v44 = vor.u32 %v17723_v36, %v12594_v35  ;;  %v12236_v53 = vld [vmem:[#allocation5 + $0x3f0] sm:$0xf0]  ;;  %v17708_v54 = vld [vmem:[#allocation5 + $0x64c] sm:$0xf]  ;;  %v12514_v59 = vld [vmem:[#allocation5 + $0x5f8] sm:$0xf] }
  0x57   :  { %1675 = vmatpush.bf16.msrb.mxu0 %v12151_v45  ;;  %v11959_v45 = vor.u32 %v17558_v37, %v11956_v39  ;;  %v12556_v55 = vld [vmem:[#allocation5 + $0x670] sm:$0xf0]  ;;  %v12239_v58 = vor.u32 %v17628_v52, %v12236_v53  ;;  %v11876_v63 = vld [vmem:[#allocation5 + $0x120] sm:$0xf0]  ;;  %v17618_v0 = vld [vmem:[#allocation5 + $0x37c] sm:$0xf] }
  0x58   :  { %1689 = vmatpush.bf16.msrb.mxu1 %v12471_v46  ;;  %v12279_v46 = vor.u32 %v17638_v40, %v12276_v41  ;;  %v12559_v62 = vor.u32 %v17708_v54, %v12556_v55  ;;  %v17698_v2 = vld [vmem:[#allocation5 + $0x5fc] sm:$0xf]  ;;  %v12516_v3 = vld [vmem:[#allocation5 + $0x620] sm:$0xf0]  ;;  %v12474_v9 = vld [vmem:[#allocation5 + $0x5a8] sm:$0xf] }
  0x59   :  { %1703 = vmatpush.bf16.msrb.mxu2 %v11835_v47  ;;  %1717 = vmatpush.bf16.msrb.mxu3 %v12155_v51  ;;  %v12554_v47 = vld [vmem:[#allocation5 + $0x648] sm:$0xf]  ;;  %v11916_v51 = vld [vmem:[#allocation5 + $0x170] sm:$0xf0]  ;;  %v17528_v11 = vld [vmem:[#allocation5 + $0xac] sm:$0xf]  ;;  %v12519_v12 = vor.u32 %v17698_v2, %v12516_v3 }
  0x5a   :  { %v12555_v56 = vor.u32 %v17713_v48, %v12554_v47  ;;  %v11836_v13 = vld [vmem:[#allocation5 + $0xd0] sm:$0xf0]  ;;  %v17688_v16 = vld [vmem:[#allocation5 + $0x5ac] sm:$0xf]  ;;  %v17683_v23 = vld [vmem:[#allocation5 + $0x57c] sm:$0xf0] }
  0x5b   :  { %1676 = vmatpush.bf16.msrb.mxu0 %v12111_v57  ;;  %v11919_v57 = vor.u32 %v17548_v49, %v11916_v51  ;;  %v12476_v17 = vld [vmem:[#allocation5 + $0x5d0] sm:$0xf0]  ;;  %v17518_v24 = vld [vmem:[#allocation5 + $0x5c] sm:$0xf]  ;;  %v12116_v28 = vld [vmem:[#allocation5 + $0x300] sm:$0xf0] }
  0x5c   :  { %1690 = vmatpush.bf16.msrb.mxu1 %v12431_v60  ;;  %v17703_v60 = vld [vmem:[#allocation5 + $0x61c] sm:$0xf0]  ;;  %v12479_v25 = vor.u32 %v17688_v16, %v12476_v17  ;;  %v17598_v27 = vld [vmem:[#allocation5 + $0x2dc] sm:$0xf]  ;;  %v12436_v30 = vld [vmem:[#allocation5 + $0x580] sm:$0xf0] }
  0x5d   :  { %1704 = vmatpush.bf16.msrb.mxu2 %v11795_v61  ;;  %1718 = vmatpush.bf16.msrb.mxu3 %v12115_v1  ;;  %v17538_v61 = vld [vmem:[#allocation5 + $0xfc] sm:$0xf]  ;;  %v12196_v1 = vld [vmem:[#allocation5 + $0x3a0] sm:$0xf0]  ;;  %v12515_v6 = vor.u32 %v17703_v60, %v12514_v59  ;;  %v12119_v35 = vor.u32 %v17598_v27, %v12116_v28  ;;  %v17508_v36 = vld [vmem:[#allocation5 + $0xc] sm:$0xf] }
  0x5e   :  { %v11879_v7 = vor.u32 %v17538_v61, %v11876_v63  ;;  %v12199_v8 = vor.u32 %v17618_v0, %v12196_v1  ;;  %v17678_v29 = vld [vmem:[#allocation5 + $0x55c] sm:$0xf]  ;;  %v11756_v37 = vld [vmem:[#allocation5 + $0x30] sm:$0xf0]  ;;  %v17668_v41 = vld [vmem:[#allocation5 + $0x50c] sm:$0xf] }
  0x5f   :  { %1677 = vmatpush.bf16.msrb.mxu0 %v12071_v10  ;;  %v17693_v10 = vld [vmem:[#allocation5 + $0x5cc] sm:$0xf0]  ;;  %v12439_v39 = vor.u32 %v17678_v29, %v12436_v30  ;;  %v12076_v40 = vld [vmem:[#allocation5 + $0x2b0] sm:$0xf0]  ;;  %v12042_v43 = vld [vmem:[#allocation5 + $0x240] sm:$0xf] }
  0x60   :  { %1691 = vmatpush.bf16.msrb.mxu1 %v12391_v14  ;;  %v17608_v14 = vld [vmem:[#allocation5 + $0x32c] sm:$0xf]  ;;  %v12396_v42 = vld [vmem:[#allocation5 + $0x530] sm:$0xf0]  ;;  %v17664_v47 = vld [vmem:[#allocation5 + $0x4e4] sm:$0xf0] }
  0x61   :  { %1705 = vmatpush.bf16.msrb.mxu2 %v11755_v15  ;;  %1719 = vmatpush.bf16.msrb.mxu3 %v12075_v18  ;;  %v12156_v15 = vld [vmem:[#allocation5 + $0x350] sm:$0xf0]  ;;  %v12475_v18 = vor.u32 %v17693_v10, %v12474_v9  ;;  %v12682_v48 = vld [vmem:[#allocation5 + $0x740] sm:$0xf]  ;;  %v17744_v49 = vld [vmem:[#allocation5 + $0x764] sm:$0xf0]  ;;  %v12399_v54 = vor.u32 %v17668_v41, %v12396_v42 }
  0x62   :  { %1678 = vmatmul.bf16.vlgmr.msrb.gmra.mxu0 %v19255_v20  ;;  %v17579_v52 = vld [vmem:[#allocation5 + $0x244] sm:$0xf]  ;;  %v12044_v53 = vld [vmem:[#allocation5 + $0x268] sm:$0xf0]  ;;  %v17574_v59 = vld [vmem:[#allocation5 + $0x214] sm:$0xf0] }
  0x63   :  { %1726 = vmatpush.bf16.msra.mxu0 %v12675_v19  ;;  %1692 = vmatmul.bf16.vlgmr.msrb.gmra.mxu1 %v19249_v4  ;;  %v11839_v19 = vor.u32 %v17528_v11, %v11836_v13  ;;  %v12322_v60 = vld [vmem:[#allocation5 + $0x470] sm:$0xf]  ;;  %v12047_v61 = vor.u32 %v17579_v52, %v12044_v53  ;;  %v17734_v0 = vld [vmem:[#allocation5 + $0x714] sm:$0xf0]  ;;  %v17569_v1 = vld [vmem:[#allocation5 + $0x1f4] sm:$0xf] }
  0x64   :  { %1740 = vmatpush.bf16.msra.mxu1 %v12039_v21  ;;  %1706 = vmatmul.bf16.vlgmr.msrb.gmra.mxu2 %v19251_v5  ;;  %v12159_v21 = vor.u32 %v17608_v14, %v12156_v15  ;;  %v12642_v63 = vld [vmem:[#allocation5 + $0x6f0] sm:$0xf]  ;;  %v12004_v2 = vld [vmem:[#allocation5 + $0x218] sm:$0xf0]  ;;  %v17564_v9 = vld [vmem:[#allocation5 + $0x1c4] sm:$0xf0] }
  0x65   :  { %1754 = vmatpush.bf16.msra.mxu2 %v12359_v22  ;;  %1768 = vmatpush.bf16.msra.mxu3 %v12679_v26  ;;  %v12434_v22 = vld [vmem:[#allocation5 + $0x558] sm:$0xf]  ;;  %v11796_v26 = vld [vmem:[#allocation5 + $0x80] sm:$0xf0]  ;;  %v12282_v10 = vld [vmem:[#allocation5 + $0x420] sm:$0xf]  ;;  %v12007_v11 = vor.u32 %v17569_v1, %v12004_v2 }
  0x66   :  { %1720 = vmatmul.bf16.vlgmr.msrb.gmra.mxu3 %v19255_v20  ;;  %v12435_v31 = vor.u32 %v17683_v23, %v12434_v22  ;;  %v12602_v13 = vld [vmem:[#allocation5 + $0x6a0] sm:$0xf]  ;;  %v17724_v14 = vld [vmem:[#allocation5 + $0x6c4] sm:$0xf0]  ;;  %v17559_v15 = vld [vmem:[#allocation5 + $0x1a4] sm:$0xf] }
  0x67   :  { %1727 = vmatpush.bf16.msra.mxu0 %v12635_v32  ;;  %v12394_v32 = vld [vmem:[#allocation5 + $0x508] sm:$0xf]  ;;  %v11964_v16 = vld [vmem:[#allocation5 + $0x1c8] sm:$0xf0]  ;;  %v17554_v22 = vld [vmem:[#allocation5 + $0x174] sm:$0xf0] }
  0x68   :  { %1741 = vmatpush.bf16.msra.mxu1 %v11999_v33  ;;  %v17673_v33 = vld [vmem:[#allocation5 + $0x52c] sm:$0xf0]  ;;  %v17714_v27 = vld [vmem:[#allocation5 + $0x674] sm:$0xf0]  ;;  %v17549_v28 = vld [vmem:[#allocation5 + $0x154] sm:$0xf] }
  0x69   :  { %1755 = vmatpush.bf16.msra.mxu2 %v12319_v34  ;;  %1769 = vmatpush.bf16.msra.mxu3 %v12639_v38  ;;  %v11799_v34 = vor.u32 %v17518_v24, %v11796_v26  ;;  %v17588_v38 = vld [vmem:[#allocation5 + $0x28c] sm:$0xf]  ;;  %v12242_v23 = vld [vmem:[#allocation5 + $0x3d0] sm:$0xf]  ;;  %v11967_v24 = vor.u32 %v17559_v15, %v11964_v16  ;;  %v11924_v29 = vld [vmem:[#allocation5 + $0x178] sm:$0xf0] }
  0x6a   :  { %v12079_v51 = vor.u32 %v17588_v38, %v12076_v40  ;;  %v12562_v26 = vld [vmem:[#allocation5 + $0x650] sm:$0xf]  ;;  %v12522_v38 = vld [vmem:[#allocation5 + $0x600] sm:$0xf]  ;;  %v17539_v40 = vld [vmem:[#allocation5 + $0x104] sm:$0xf] }
  0x6b   :  { %1728 = vmatpush.bf16.msra.mxu0 %v12595_v44  ;;  %v17584_v44 = vld [vmem:[#allocation5 + $0x264] sm:$0xf0]  ;;  %v11884_v41 = vld [vmem:[#allocation5 + $0x128] sm:$0xf0]  ;;  %v17529_v52 = vld [vmem:[#allocation5 + $0xb4] sm:$0xf] }
  0x6c   :  { %1742 = vmatpush.bf16.msra.mxu1 %v11959_v45  ;;  %v12362_v45 = vld [vmem:[#allocation5 + $0x4c0] sm:$0xf]  ;;  %v12043_v55 = vor.u32 %v17584_v44, %v12042_v43  ;;  %v11844_v53 = vld [vmem:[#allocation5 + $0xd8] sm:$0xf0]  ;;  %v11804_v1 = vld [vmem:[#allocation5 + $0x88] sm:$0xf0] }
  0x6d   :  { %1756 = vmatpush.bf16.msra.mxu2 %v12279_v46  ;;  %1770 = vmatpush.bf16.msra.mxu3 %v12599_v50  ;;  %v12395_v46 = vor.u32 %v17673_v33, %v12394_v32  ;;  %v11759_v50 = vor.u32 %v17508_v36, %v11756_v37  ;;  %v12563_v32 = vor.u32 %v17714_v27, %v12562_v26  ;;  %v11882_v33 = vld [vmem:[#allocation5 + $0x100] sm:$0xf]  ;;  %v17624_v37 = vld [vmem:[#allocation5 + $0x3a4] sm:$0xf0]  ;;  %v11764_v15 = vld [vmem:[#allocation5 + $0x38] sm:$0xf0] }
  0x6e   :  { %v11927_v36 = vor.u32 %v17549_v28, %v11924_v29  ;;  %v17659_v16 = vld [vmem:[#allocation5 + $0x4c4] sm:$0xf]  ;;  %v12370_v26 = vld [vmem:[#allocation5 + $0x4c8] sm:$0xf]  ;;  %v17665_v27 = vld [vmem:[#allocation5 + $0x4ec] sm:$0xf0] }
  0x6f   :  { %1729 = vmatpush.bf16.msra.mxu0 %v12555_v56  ;;  %v12363_v56 = vor.u32 %v17664_v47, %v12362_v45  ;;  %v11842_v45 = vld [vmem:[#allocation5 + $0xb0] sm:$0xf]  ;;  %s19181_s4 = smov [#allocation14]   ;;  %s11716_s16 = sshll.u32 %s20203_s7, 4  ;;  %s11717_s16 = int_to_ptr.hbm [resolvable:$true] %s11716_s16 }
  0x70   :  { %1743 = vmatpush.bf16.msra.mxu1 %v11919_v57  ;;  %v12683_v57 = vor.u32 %v17744_v49, %v12682_v48  ;;  %v12162_v47 = vld [vmem:[#allocation5 + $0x330] sm:$0xf]  ;;  %v11887_v48 = vor.u32 %v17539_v40, %v11884_v41  ;;  %v17614_v49 = vld [vmem:[#allocation5 + $0x354] sm:$0xf0]  ;;  %v17655_v40 = vld [vmem:[#allocation5 + $0x49c] sm:$0xf0] }
  0x71   :  { %1757 = vmatpush.bf16.msra.mxu2 %v12239_v58  ;;  %1771 = vmatpush.bf16.msra.mxu3 %v12559_v62  ;;  %v12002_v58 = vld [vmem:[#allocation5 + $0x1f0] sm:$0xf]  ;;  %v17654_v62 = vld [vmem:[#allocation5 + $0x494] sm:$0xf0]  ;;  %s11714_s6 = sshll.u32 %s19181_s4, 4  ;;  %s11715_s6 = int_to_ptr.vmem [resolvable:$true] %s11714_s6 }
  0x72   :  { %v12003_v3 = vor.u32 %v17574_v59, %v12002_v58  ;;  %v17524_v58 = vld [vmem:[#allocation5 + $0x84] sm:$0xf0]  ;;  %v12122_v59 = vld [vmem:[#allocation5 + $0x2e0] sm:$0xf] }
  0x73   :  { %1730 = vmatpush.bf16.msra.mxu0 %v12515_v6  ;;  %v12323_v6 = vor.u32 %v17654_v62, %v12322_v60  ;;  %v11847_v60 = vor.u32 %v17529_v52, %v11844_v53  ;;  %v12442_v62 = vld [vmem:[#allocation5 + $0x560] sm:$0xf]  ;;  %v17645_v52 = vld [vmem:[#allocation5 + $0x44c] sm:$0xf0] }
  0x74   :  { %1744 = vmatpush.bf16.msra.mxu1 %v11879_v7  ;;  %v12643_v7 = vor.u32 %v17734_v0, %v12642_v63  ;;  %v17684_v63 = vld [vmem:[#allocation5 + $0x584] sm:$0xf0]  ;;  %v17519_v0 = vld [vmem:[#allocation5 + $0x64] sm:$0xf] }
  0x75   :  { %1758 = vmatpush.bf16.msra.mxu2 %v12199_v8  ;;  %1772 = vmatpush.bf16.msra.mxu3 %v12519_v12  ;;  %v11962_v8 = vld [vmem:[#allocation5 + $0x1a0] sm:$0xf]  ;;  %v17644_v12 = vld [vmem:[#allocation5 + $0x444] sm:$0xf0] }
  0x76   :  { %v11963_v17 = vor.u32 %v17564_v9, %v11962_v8  ;;  %v12443_v8 = vor.u32 %v17684_v63, %v12442_v62  ;;  %v12082_v9 = vld [vmem:[#allocation5 + $0x290] sm:$0xf]  ;;  %v17555_v62 = vld [vmem:[#allocation5 + $0x17c] sm:$0xf0]  ;;  %v12250_v63 = vld [vmem:[#allocation5 + $0x3d8] sm:$0xf] }
  0x77   :  { %1731 = vmatpush.bf16.msra.mxu0 %v12475_v18  ;;  %v12283_v18 = vor.u32 %v17644_v12, %v12282_v10  ;;  %v17594_v10 = vld [vmem:[#allocation5 + $0x2b4] sm:$0xf0]  ;;  %v11807_v12 = vor.u32 %v17519_v0, %v11804_v1  ;;  %v17635_v0 = vld [vmem:[#allocation5 + $0x3fc] sm:$0xf0] }
  0x78   :  { %1745 = vmatpush.bf16.msra.mxu1 %v11839_v19  ;;  %v12603_v19 = vor.u32 %v17724_v14, %v12602_v13  ;;  %v17674_v13 = vld [vmem:[#allocation5 + $0x534] sm:$0xf0]  ;;  %v17509_v14 = vld [vmem:[#allocation5 + $0x14] sm:$0xf] }
  0x79   :  { %1759 = vmatpush.bf16.msra.mxu2 %v12159_v21  ;;  %1773 = vmatpush.bf16.msra.mxu3 %v12479_v25  ;;  %v11922_v21 = vld [vmem:[#allocation5 + $0x150] sm:$0xf]  ;;  %v17634_v25 = vld [vmem:[#allocation5 + $0x3f4] sm:$0xf0]  ;;  %v11767_v28 = vor.u32 %v17509_v14, %v11764_v15 }
  0x7a   :  { %v11923_v30 = vor.u32 %v17554_v22, %v11922_v21  ;;  %v12684_v21 = vld [vmem:[#allocation5 + $0x768] sm:$0xf0]  ;;  %v12050_v22 = vld [vmem:[#allocation5 + $0x248] sm:$0xf]  ;;  %v17625_v14 = vld [vmem:[#allocation5 + $0x3ac] sm:$0xf0] }
  0x7b   :  { %1732 = vmatpush.bf16.msra.mxu0 %v12435_v31  ;;  %v12243_v31 = vor.u32 %v17634_v25, %v12242_v23  ;;  %v17585_v23 = vld [vmem:[#allocation5 + $0x26c] sm:$0xf0] }
  0x7c   :  { %1746 = vmatpush.bf16.msra.mxu1 %v11799_v34  ;;  %v17544_v34 = vld [vmem:[#allocation5 + $0x124] sm:$0xf0] }
  0x7d   :  { %1760 = vmatpush.bf16.msra.mxu2 %v12119_v35  ;;  %1774 = vmatpush.bf16.msra.mxu3 %v12439_v39  ;;  %v12202_v35 = vld [vmem:[#allocation5 + $0x380] sm:$0xf]  ;;  %v17704_v39 = vld [vmem:[#allocation5 + $0x624] sm:$0xf0]  ;;  %v11883_v42 = vor.u32 %v17544_v34, %v11882_v33  ;;  %v12324_v33 = vld [vmem:[#allocation5 + $0x498] sm:$0xf0] }
  0x7e   :  { %v12203_v43 = vor.u32 %v17624_v37, %v12202_v35  ;;  %v12523_v44 = vor.u32 %v17704_v39, %v12522_v38  ;;  %v17729_v34 = vld [vmem:[#allocation5 + $0x6f4] sm:$0xf]  ;;  %v12371_v35 = vor.u32 %v17665_v27, %v12370_v26  ;;  %v12010_v37 = vld [vmem:[#allocation5 + $0x1f8] sm:$0xf]  ;;  %v17575_v38 = vld [vmem:[#allocation5 + $0x21c] sm:$0xf0] }
  0x7f   :  { %1733 = vmatpush.bf16.msra.mxu0 %v12395_v46  ;;  %v17534_v46 = vld [vmem:[#allocation5 + $0xd4] sm:$0xf0]  ;;  %v17615_v27 = vld [vmem:[#allocation5 + $0x35c] sm:$0xf0] }
  0x80   :  { %1747 = vmatpush.bf16.msra.mxu1 %v11759_v50  ;;  %v12482_v50 = vld [vmem:[#allocation5 + $0x5b0] sm:$0xf]  ;;  %v12330_v39 = vld [vmem:[#allocation5 + $0x478] sm:$0xf] }
  0x81   :  { %1761 = vmatpush.bf16.msra.mxu2 %v12079_v51  ;;  %1775 = vmatpush.bf16.msra.mxu3 %v12399_v54  ;;  %v17694_v51 = vld [vmem:[#allocation5 + $0x5d4] sm:$0xf0]  ;;  %v11843_v54 = vor.u32 %v17534_v46, %v11842_v45  ;;  %v12284_v45 = vld [vmem:[#allocation5 + $0x448] sm:$0xf0]  ;;  %v17719_v46 = vld [vmem:[#allocation5 + $0x6a4] sm:$0xf] }
  0x82   :  { %1734 = vmatmul.bf16.vlgmr.msra.gmra.mxu0 %v19249_v4  ;;  %v12170_v26 = vld [vmem:[#allocation5 + $0x338] sm:$0xf] }
  0x83   :  { %1782 = vmatpush.bf16.msrb.mxu0 %v12043_v55  ;;  %1748 = vmatmul.bf16.vlgmr.msra.gmra.mxu1 %v19251_v5  ;;  %v12163_v55 = vor.u32 %v17614_v49, %v12162_v47  ;;  %v12331_v47 = vor.u32 %v17655_v40, %v12330_v39  ;;  %v11970_v49 = vld [vmem:[#allocation5 + $0x1a8] sm:$0xf]  ;;  %v17605_v39 = vld [vmem:[#allocation5 + $0x30c] sm:$0xf0] }
  0x84   :  { %1796 = vmatpush.bf16.msrb.mxu1 %v12363_v56  ;;  %1762 = vmatmul.bf16.vlgmr.msra.gmra.mxu2 %v19255_v20  ;;  %v12483_v56 = vor.u32 %v17694_v51, %v12482_v50  ;;  %v17565_v50 = vld [vmem:[#allocation5 + $0x1cc] sm:$0xf0]  ;;  %v12290_v51 = vld [vmem:[#allocation5 + $0x428] sm:$0xf] }
  0x85   :  { %1810 = vmatpush.bf16.msrb.mxu2 %v12683_v57  ;;  %1824 = vmatpush.bf16.msrb.mxu3 %v12047_v61  ;;  %v11802_v57 = vld [vmem:[#allocation5 + $0x60] sm:$0xf]  ;;  %v17604_v61 = vld [vmem:[#allocation5 + $0x304] sm:$0xf0] }
  0x86   :  { %1776 = vmatmul.bf16.vlgmr.msra.gmra.mxu3 %v19249_v4  ;;  %v11803_v2 = vor.u32 %v17524_v58, %v11802_v57  ;;  %v12244_v57 = vld [vmem:[#allocation5 + $0x3f8] sm:$0xf0]  ;;  %v17709_v58 = vld [vmem:[#allocation5 + $0x654] sm:$0xf] }
  0x87   :  { %1783 = vmatpush.bf16.msrb.mxu0 %v12003_v3  ;;  %v11762_v3 = vld [vmem:[#allocation5 + $0x10] sm:$0xf] }
  0x88   :  { %1797 = vmatpush.bf16.msrb.mxu1 %v12323_v6  ;;  %v17514_v6 = vld [vmem:[#allocation5 + $0x34] sm:$0xf0] }
  0x89   :  { %1811 = vmatpush.bf16.msrb.mxu2 %v12643_v7  ;;  %1825 = vmatpush.bf16.msrb.mxu3 %v12007_v11  ;;  %v12123_v7 = vor.u32 %v17604_v61, %v12122_v59  ;;  %v12402_v11 = vld [vmem:[#allocation5 + $0x510] sm:$0xf]  ;;  %v12291_v59 = vor.u32 %v17645_v52, %v12290_v51  ;;  %v11930_v61 = vld [vmem:[#allocation5 + $0x158] sm:$0xf]  ;;  %v17595_v51 = vld [vmem:[#allocation5 + $0x2bc] sm:$0xf0] }
  0x8a   :  { %v12403_v25 = vor.u32 %v17674_v13, %v12402_v11  ;;  %v11890_v11 = vld [vmem:[#allocation5 + $0x108] sm:$0xf] }
  0x8b   :  { %1784 = vmatpush.bf16.msrb.mxu0 %v11963_v17  ;;  %v12364_v17 = vld [vmem:[#allocation5 + $0x4e8] sm:$0xf0]  ;;  %v12210_v13 = vld [vmem:[#allocation5 + $0x388] sm:$0xf] }
  0x8c   :  { %1798 = vmatpush.bf16.msrb.mxu1 %v12283_v18  ;;  %v17739_v18 = vld [vmem:[#allocation5 + $0x744] sm:$0xf]  ;;  %v12367_v29 = vor.u32 %v17659_v16, %v12364_v17  ;;  %v12690_v52 = vld [vmem:[#allocation5 + $0x748] sm:$0xf] }
  0x8d   :  { %1812 = vmatpush.bf16.msrb.mxu2 %v12603_v19  ;;  %1826 = vmatpush.bf16.msrb.mxu3 %v11967_v24  ;;  %v11763_v19 = vor.u32 %v17514_v6, %v11762_v3  ;;  %v12083_v24 = vor.u32 %v17594_v10, %v12082_v9  ;;  %v11931_v3 = vor.u32 %v17555_v62, %v11930_v61  ;;  %v17619_v6 = vld [vmem:[#allocation5 + $0x384] sm:$0xf]  ;;  %v12524_v10 = vld [vmem:[#allocation5 + $0x628] sm:$0xf0]  ;;  %v12692_v62 = vld [vmem:[#allocation5 + $0x770] sm:$0xf0] }
  0x8e   :  { %v12251_v9 = vor.u32 %v17635_v0, %v12250_v63  ;;  %v17740_v61 = vld [vmem:[#allocation5 + $0x74c] sm:$0xf] }
  0x8f   :  { %1785 = vmatpush.bf16.msrb.mxu0 %v11923_v30  ;;  %v12687_v30 = vor.u32 %v17739_v18, %v12684_v21  ;;  %v17609_v18 = vld [vmem:[#allocation5 + $0x334] sm:$0xf] }
  0x90   :  { %1799 = vmatpush.bf16.msrb.mxu1 %v12243_v31  ;;  %v12051_v31 = vor.u32 %v17585_v23, %v12050_v22  ;;  %v17689_v21 = vld [vmem:[#allocation5 + $0x5b4] sm:$0xf]  ;;  %v12211_v22 = vor.u32 %v17625_v14, %v12210_v13  ;;  %v12484_v23 = vld [vmem:[#allocation5 + $0x5d8] sm:$0xf0]  ;;  %v12652_v13 = vld [vmem:[#allocation5 + $0x720] sm:$0xf0] }
  0x91   :  { %1813 = vmatpush.bf16.msrb.mxu2 %v12563_v32  ;;  %1827 = vmatpush.bf16.msrb.mxu3 %v11927_v36  ;;  %v17649_v32 = vld [vmem:[#allocation5 + $0x474] sm:$0xf]  ;;  %v12644_v36 = vld [vmem:[#allocation5 + $0x718] sm:$0xf0] }
  0x92   :  { %v12327_v41 = vor.u32 %v17649_v32, %v12324_v33  ;;  %v12124_v32 = vld [vmem:[#allocation5 + $0x308] sm:$0xf0]  ;;  %v17679_v33 = vld [vmem:[#allocation5 + $0x564] sm:$0xf] }
  0x93   :  { %1786 = vmatpush.bf16.msrb.mxu0 %v11883_v42  ;;  %v12647_v42 = vor.u32 %v17729_v34, %v12644_v36  ;;  %v12171_v34 = vor.u32 %v17615_v27, %v12170_v26  ;;  %v11810_v36 = vld [vmem:[#allocation5 + $0x68] sm:$0xf]  ;;  %v12612_v26 = vld [vmem:[#allocation5 + $0x6d0] sm:$0xf0] }
  0x94   :  { %1800 = vmatpush.bf16.msrb.mxu1 %v12203_v43  ;;  %v12011_v43 = vor.u32 %v17575_v38, %v12010_v37  ;;  %v17525_v37 = vld [vmem:[#allocation5 + $0x8c] sm:$0xf0]  ;;  %v12130_v38 = vld [vmem:[#allocation5 + $0x2e8] sm:$0xf] }
  0x95   :  { %1814 = vmatpush.bf16.msrb.mxu2 %v12523_v44  ;;  %1828 = vmatpush.bf16.msrb.mxu3 %v11887_v48  ;;  %v17639_v44 = vld [vmem:[#allocation5 + $0x424] sm:$0xf]  ;;  %v12604_v48 = vld [vmem:[#allocation5 + $0x6c8] sm:$0xf0] }
  0x96   :  { %v12287_v53 = vor.u32 %v17639_v44, %v12284_v45  ;;  %v11811_v44 = vor.u32 %v17525_v37, %v11810_v36  ;;  %v17669_v45 = vld [vmem:[#allocation5 + $0x514] sm:$0xf]  ;;  %v12252_v36 = vld [vmem:[#allocation5 + $0x400] sm:$0xf0]  ;;  %v17710_v37 = vld [vmem:[#allocation5 + $0x65c] sm:$0xf] }
  0x97   :  { %1787 = vmatpush.bf16.msrb.mxu0 %v11843_v54  ;;  %v12607_v54 = vor.u32 %v17719_v46, %v12604_v48  ;;  %v12404_v46 = vld [vmem:[#allocation5 + $0x538] sm:$0xf0]  ;;  %v12131_v48 = vor.u32 %v17605_v39, %v12130_v38  ;;  %v12572_v38 = vld [vmem:[#allocation5 + $0x680] sm:$0xf0] }
  0x98   :  { %1801 = vmatpush.bf16.msrb.mxu1 %v12163_v55  ;;  %v11971_v55 = vor.u32 %v17565_v50, %v11970_v49  ;;  %v17515_v49 = vld [vmem:[#allocation5 + $0x3c] sm:$0xf0]  ;;  %v12090_v50 = vld [vmem:[#allocation5 + $0x298] sm:$0xf] }
  0x99   :  { %1815 = vmatpush.bf16.msrb.mxu2 %v12483_v56  ;;  %1829 = vmatpush.bf16.msrb.mxu3 %v11847_v60  ;;  %v17629_v56 = vld [vmem:[#allocation5 + $0x3d4] sm:$0xf]  ;;  %v12564_v60 = vld [vmem:[#allocation5 + $0x678] sm:$0xf0]  ;;  %v12091_v63 = vor.u32 %v17595_v51, %v12090_v50 }
  0x9a   :  { %v12247_v1 = vor.u32 %v17629_v56, %v12244_v57  ;;  %v12052_v56 = vld [vmem:[#allocation5 + $0x270] sm:$0xf0]  ;;  %v17660_v57 = vld [vmem:[#allocation5 + $0x4cc] sm:$0xf] }
  0x9b   :  { %1788 = vmatpush.bf16.msrb.mxu0 %v11803_v2  ;;  %v12567_v2 = vor.u32 %v17709_v58, %v12564_v60  ;;  %v12372_v58 = vld [vmem:[#allocation5 + $0x4f0] sm:$0xf0] }
  0x9c   :  { %1802 = vmatpush.bf16.msrb.mxu1 %v12123_v7  ;;  %v12204_v7 = vld [vmem:[#allocation5 + $0x3a8] sm:$0xf0]  ;;  %v12532_v50 = vld [vmem:[#allocation5 + $0x630] sm:$0xf0] }
  0x9d   :  { %1816 = vmatpush.bf16.msrb.mxu2 %v12443_v8  ;;  %1830 = vmatpush.bf16.msrb.mxu3 %v11807_v12  ;;  %v17699_v8 = vld [vmem:[#allocation5 + $0x604] sm:$0xf]  ;;  %v17545_v12 = vld [vmem:[#allocation5 + $0x12c] sm:$0xf0]  ;;  %v12207_v15 = vor.u32 %v17619_v6, %v12204_v7  ;;  %v17735_v6 = vld [vmem:[#allocation5 + $0x71c] sm:$0xf0] }
  0x9e   :  { %v12527_v16 = vor.u32 %v17699_v8, %v12524_v10  ;;  %v11891_v17 = vor.u32 %v17545_v12, %v11890_v11  ;;  %v17570_v7 = vld [vmem:[#allocation5 + $0x1fc] sm:$0xf]  ;;  %v12695_v8 = vor.u32 %v17740_v61, %v12692_v62  ;;  %v12332_v11 = vld [vmem:[#allocation5 + $0x4a0] sm:$0xf0] }
  0x9f   :  { %1789 = vmatpush.bf16.msrb.mxu0 %v11763_v19  ;;  %v12164_v19 = vld [vmem:[#allocation5 + $0x358] sm:$0xf0]  ;;  %v12492_v62 = vld [vmem:[#allocation5 + $0x5e0] sm:$0xf0] }
  0xa0   :  { %1803 = vmatpush.bf16.msrb.mxu1 %v12083_v24  ;;  %v11850_v24 = vld [vmem:[#allocation5 + $0xb8] sm:$0xf]  ;;  %v17650_v10 = vld [vmem:[#allocation5 + $0x47c] sm:$0xf] }
  0xa1   :  { %1817 = vmatpush.bf16.msrb.mxu2 %v12403_v25  ;;  %1831 = vmatpush.bf16.msrb.mxu3 %v11767_v28  ;;  %v17535_v25 = vld [vmem:[#allocation5 + $0xdc] sm:$0xf0]  ;;  %v12167_v28 = vor.u32 %v17609_v18, %v12164_v19  ;;  %v17730_v12 = vld [vmem:[#allocation5 + $0x6fc] sm:$0xf]  ;;  %v17725_v18 = vld [vmem:[#allocation5 + $0x6cc] sm:$0xf0] }
  0xa2   :  { %1790 = vmatmul.bf16.vlgmr.msrb.gmra.mxu0 %v19251_v5  ;;  %v17560_v19 = vld [vmem:[#allocation5 + $0x1ac] sm:$0xf]  ;;  %v17690_v61 = vld [vmem:[#allocation5 + $0x5bc] sm:$0xf] }
  0xa3   :  { %1838 = vmatpush.bf16.msra.mxu0 %v12367_v29  ;;  %1804 = vmatmul.bf16.vlgmr.msrb.gmra.mxu1 %v19255_v20  ;;  %v12487_v29 = vor.u32 %v17689_v21, %v12484_v23  ;;  %v12655_v21 = vor.u32 %v17730_v12, %v12652_v13  ;;  %v17640_v23 = vld [vmem:[#allocation5 + $0x42c] sm:$0xf]  ;;  %v12452_v12 = vld [vmem:[#allocation5 + $0x590] sm:$0xf0] }
  0xa4   :  { %1852 = vmatpush.bf16.msra.mxu1 %v12687_v30  ;;  %1818 = vmatmul.bf16.vlgmr.msrb.gmra.mxu2 %v19249_v4  ;;  %v11851_v30 = vor.u32 %v17535_v25, %v11850_v24  ;;  %v12292_v24 = vld [vmem:[#allocation5 + $0x450] sm:$0xf0]  ;;  %v17720_v25 = vld [vmem:[#allocation5 + $0x6ac] sm:$0xf] }
  0xa5   :  { %1866 = vmatpush.bf16.msra.mxu2 %v12051_v31  ;;  %1880 = vmatpush.bf16.msra.mxu3 %v12371_v35  ;;  %v17599_v31 = vld [vmem:[#allocation5 + $0x2e4] sm:$0xf]  ;;  %v12444_v35 = vld [vmem:[#allocation5 + $0x588] sm:$0xf0] }
  0xa6   :  { %1832 = vmatmul.bf16.vlgmr.msrb.gmra.mxu3 %v19251_v5  ;;  %v12127_v40 = vor.u32 %v17599_v31, %v12124_v32  ;;  %v17715_v31 = vld [vmem:[#allocation5 + $0x67c] sm:$0xf0]  ;;  %v17550_v32 = vld [vmem:[#allocation5 + $0x15c] sm:$0xf] }
  0xa7   :  { %1839 = vmatpush.bf16.msra.mxu0 %v12327_v41  ;;  %v17589_v41 = vld [vmem:[#allocation5 + $0x294] sm:$0xf] }
  0xa8   :  { %1853 = vmatpush.bf16.msra.mxu1 %v12647_v42  ;;  %v12084_v42 = vld [vmem:[#allocation5 + $0x2b8] sm:$0xf0] }
  0xa9   :  { %1867 = vmatpush.bf16.msra.mxu2 %v12011_v43  ;;  %1881 = vmatpush.bf16.msra.mxu3 %v12331_v47  ;;  %v12447_v43 = vor.u32 %v17679_v33, %v12444_v35  ;;  %v11770_v47 = vld [vmem:[#allocation5 + $0x18] sm:$0xf]  ;;  %v12615_v33 = vor.u32 %v17720_v25, %v12612_v26  ;;  %v17630_v35 = vld [vmem:[#allocation5 + $0x3dc] sm:$0xf]  ;;  %v12412_v25 = vld [vmem:[#allocation5 + $0x540] sm:$0xf0] }
  0xaa   :  { %v11771_v60 = vor.u32 %v17515_v49, %v11770_v47  ;;  %v17620_v47 = vld [vmem:[#allocation5 + $0x38c] sm:$0xf]  ;;  %v12058_v26 = vld [vmem:[#allocation5 + $0x250] sm:$0xf] }
  0xab   :  { %1840 = vmatpush.bf16.msra.mxu0 %v12287_v53  ;;  %v17745_v53 = vld [vmem:[#allocation5 + $0x76c] sm:$0xf0]  ;;  %v17700_v49 = vld [vmem:[#allocation5 + $0x60c] sm:$0xf] }
  0xac   :  { %1854 = vmatpush.bf16.msra.mxu1 %v12607_v54  ;;  %v17580_v54 = vld [vmem:[#allocation5 + $0x24c] sm:$0xf]  ;;  %v12691_v0 = vor.u32 %v17745_v53, %v12690_v52 }
  0xad   :  { %1868 = vmatpush.bf16.msra.mxu2 %v11971_v55  ;;  %1882 = vmatpush.bf16.msra.mxu3 %v12291_v59  ;;  %v12087_v55 = vor.u32 %v17589_v41, %v12084_v42  ;;  %v12407_v59 = vor.u32 %v17669_v45, %v12404_v46  ;;  %v12255_v41 = vor.u32 %v17630_v35, %v12252_v36  ;;  %v12530_v42 = vld [vmem:[#allocation5 + $0x608] sm:$0xf]  ;;  %v11892_v46 = vld [vmem:[#allocation5 + $0x130] sm:$0xf0]  ;;  %v12060_v36 = vld [vmem:[#allocation5 + $0x278] sm:$0xf0] }
  0xae   :  { %v12575_v45 = vor.u32 %v17710_v37, %v12572_v38  ;;  %v17581_v35 = vld [vmem:[#allocation5 + $0x254] sm:$0xf] }
  0xaf   :  { %1841 = vmatpush.bf16.msra.mxu0 %v12247_v1  ;;  %v12055_v1 = vor.u32 %v17580_v54, %v12052_v56  ;;  %v12490_v54 = vld [vmem:[#allocation5 + $0x5b8] sm:$0xf]  ;;  %v17530_v56 = vld [vmem:[#allocation5 + $0xbc] sm:$0xf] }
  0xb0   :  { %1855 = vmatpush.bf16.msra.mxu1 %v12567_v2  ;;  %v12375_v2 = vor.u32 %v17660_v57, %v12372_v58  ;;  %v12535_v57 = vor.u32 %v17700_v49, %v12532_v50  ;;  %v11852_v58 = vld [vmem:[#allocation5 + $0xe0] sm:$0xf0]  ;;  %v12020_v49 = vld [vmem:[#allocation5 + $0x228] sm:$0xf0] }
  0xb1   :  { %1869 = vmatpush.bf16.msra.mxu2 %v11931_v3  ;;  %1883 = vmatpush.bf16.msra.mxu3 %v12251_v9  ;;  %v12650_v3 = vld [vmem:[#allocation5 + $0x6f8] sm:$0xf]  ;;  %v12012_v9 = vld [vmem:[#allocation5 + $0x220] sm:$0xf0] }
  0xb2   :  { %v12651_v14 = vor.u32 %v17735_v6, %v12650_v3  ;;  %v17685_v3 = vld [vmem:[#allocation5 + $0x58c] sm:$0xf0]  ;;  %v17520_v6 = vld [vmem:[#allocation5 + $0x6c] sm:$0xf] }
  0xb3   :  { %1842 = vmatpush.bf16.msra.mxu0 %v12207_v15  ;;  %v12015_v15 = vor.u32 %v17570_v7, %v12012_v9  ;;  %v12495_v7 = vor.u32 %v17690_v61, %v12492_v62  ;;  %v17600_v9 = vld [vmem:[#allocation5 + $0x2ec] sm:$0xf]  ;;  %v11980_v61 = vld [vmem:[#allocation5 + $0x1d8] sm:$0xf0] }
  0xb4   :  { %1856 = vmatpush.bf16.msra.mxu1 %v12527_v16  ;;  %v12335_v16 = vor.u32 %v17650_v10, %v12332_v11  ;;  %v12132_v10 = vld [vmem:[#allocation5 + $0x310] sm:$0xf0]  ;;  %v17680_v11 = vld [vmem:[#allocation5 + $0x56c] sm:$0xf] }
  0xb5   :  { %1870 = vmatpush.bf16.msra.mxu2 %v11891_v17  ;;  %1884 = vmatpush.bf16.msra.mxu3 %v12211_v22  ;;  %v12610_v17 = vld [vmem:[#allocation5 + $0x6a8] sm:$0xf]  ;;  %v11972_v22 = vld [vmem:[#allocation5 + $0x1d0] sm:$0xf0] }
  0xb6   :  { %v12611_v27 = vor.u32 %v17725_v18, %v12610_v17  ;;  %v12135_v17 = vor.u32 %v17600_v9, %v12132_v10  ;;  %v17510_v18 = vld [vmem:[#allocation5 + $0x1c] sm:$0xf]  ;;  %v17716_v9 = vld [vmem:[#allocation5 + $0x684] sm:$0xf0]  ;;  %v17551_v10 = vld [vmem:[#allocation5 + $0x164] sm:$0xf] }
  0xb7   :  { %1843 = vmatpush.bf16.msra.mxu0 %v12167_v28  ;;  %v11975_v28 = vor.u32 %v17560_v19, %v11972_v22  ;;  %v11772_v19 = vld [vmem:[#allocation5 + $0x40] sm:$0xf0]  ;;  %v12455_v22 = vor.u32 %v17680_v11, %v12452_v12  ;;  %v11940_v11 = vld [vmem:[#allocation5 + $0x188] sm:$0xf0] }
  0xb8   :  { %1857 = vmatpush.bf16.msra.mxu1 %v12487_v29  ;;  %v12295_v29 = vor.u32 %v17640_v23, %v12292_v24  ;;  %v12092_v23 = vld [vmem:[#allocation5 + $0x2c0] sm:$0xf0]  ;;  %v17670_v24 = vld [vmem:[#allocation5 + $0x51c] sm:$0xf] }
  0xb9   :  { %1871 = vmatpush.bf16.msra.mxu2 %v11851_v30  ;;  %1885 = vmatpush.bf16.msra.mxu3 %v12171_v34  ;;  %v12570_v30 = vld [vmem:[#allocation5 + $0x658] sm:$0xf]  ;;  %v11932_v34 = vld [vmem:[#allocation5 + $0x180] sm:$0xf0]  ;;  %v12415_v37 = vor.u32 %v17670_v24, %v12412_v25  ;;  %v11900_v24 = vld [vmem:[#allocation5 + $0x138] sm:$0xf0] }
  0xba   :  { %v12571_v39 = vor.u32 %v17715_v31, %v12570_v30  ;;  %v17666_v30 = vld [vmem:[#allocation5 + $0x4f4] sm:$0xf0]  ;;  %v12698_v31 = vld [vmem:[#allocation5 + $0x750] sm:$0xf] }
  0xbb   :  { %1844 = vmatpush.bf16.msra.mxu0 %v12127_v40  ;;  %v11935_v40 = vor.u32 %v17550_v32, %v11932_v34  ;;  %v17746_v32 = vld [vmem:[#allocation5 + $0x774] sm:$0xf0] }
  0xbc   :  { %1858 = vmatpush.bf16.msra.mxu1 %v12447_v43  ;;  %v17705_v43 = vld [vmem:[#allocation5 + $0x62c] sm:$0xf0] }
  0xbd   :  { %1872 = vmatpush.bf16.msra.mxu2 %v11811_v44  ;;  %1886 = vmatpush.bf16.msra.mxu3 %v12131_v48  ;;  %v17540_v44 = vld [vmem:[#allocation5 + $0x10c] sm:$0xf]  ;;  %v12212_v48 = vld [vmem:[#allocation5 + $0x3b0] sm:$0xf0]  ;;  %v12531_v51 = vor.u32 %v17705_v43, %v12530_v42  ;;  %v17576_v42 = vld [vmem:[#allocation5 + $0x224] sm:$0xf0] }
  0xbe   :  { %v11895_v52 = vor.u32 %v17540_v44, %v11892_v46  ;;  %v12215_v53 = vor.u32 %v17620_v47, %v12212_v48  ;;  %v12338_v43 = vld [vmem:[#allocation5 + $0x480] sm:$0xf]  ;;  %v12063_v44 = vor.u32 %v17581_v35, %v12060_v36  ;;  %v17736_v47 = vld [vmem:[#allocation5 + $0x724] sm:$0xf0]  ;;  %v17571_v48 = vld [vmem:[#allocation5 + $0x204] sm:$0xf] }
  0xbf   :  { %1845 = vmatpush.bf16.msra.mxu0 %v12087_v55  ;;  %v17695_v55 = vld [vmem:[#allocation5 + $0x5dc] sm:$0xf0]  ;;  %v19279_v25 = vpop.f32.mrf.mxu0  ;;  %v17696_v36 = vld [vmem:[#allocation5 + $0x5e4] sm:$0xf0] }
  0xc0   :  { %1859 = vmatpush.bf16.msra.mxu1 %v12407_v59  ;;  %v17610_v59 = vld [vmem:[#allocation5 + $0x33c] sm:$0xf]  ;;  %v12658_v46 = vld [vmem:[#allocation5 + $0x700] sm:$0xf] }
  0xc1   :  { %1873 = vmatpush.bf16.msra.mxu2 %v11771_v60  ;;  %1887 = vmatpush.bf16.msra.mxu3 %v12091_v63  ;;  %v12172_v60 = vld [vmem:[#allocation5 + $0x360] sm:$0xf0]  ;;  %v12491_v63 = vor.u32 %v17695_v55, %v12490_v54  ;;  %v17566_v54 = vld [vmem:[#allocation5 + $0x1d4] sm:$0xf0]  ;;  %v12298_v55 = vld [vmem:[#allocation5 + $0x430] sm:$0xf] }
  0xc2   :  { %1846 = vmatmul.bf16.vlgmr.msra.gmra.mxu0 %v19255_v20  ;;  %v12498_v35 = vld [vmem:[#allocation5 + $0x5c0] sm:$0xf] }
  0xc3   :  { %1894 = vmatpush.bf16.msrb.mxu0 %v12691_v0  ;;  %1860 = vmatmul.bf16.vlgmr.msra.gmra.mxu1 %v19249_v4  ;;  %v11855_v0 = vor.u32 %v17530_v56, %v11852_v58  ;;  %v12023_v56 = vor.u32 %v17571_v48, %v12020_v49  ;;  %v12618_v58 = vld [vmem:[#allocation5 + $0x6b0] sm:$0xf]  ;;  %v17686_v49 = vld [vmem:[#allocation5 + $0x594] sm:$0xf0] }
  0xc4   :  { %1908 = vmatpush.bf16.msrb.mxu1 %v12055_v1  ;;  %1874 = vmatmul.bf16.vlgmr.msra.gmra.mxu2 %v19251_v5  ;;  %v12175_v1 = vor.u32 %v17610_v59, %v12172_v60  ;;  %v17726_v59 = vld [vmem:[#allocation5 + $0x6d4] sm:$0xf0]  ;;  %v17561_v60 = vld [vmem:[#allocation5 + $0x1b4] sm:$0xf]  ;;  %v12458_v48 = vld [vmem:[#allocation5 + $0x570] sm:$0xf] }
  0xc5   :  { %1922 = vmatpush.bf16.msrb.mxu2 %v12375_v2  ;;  %1936 = vmatpush.bf16.msrb.mxu3 %v12695_v8  ;;  %v12450_v2 = vld [vmem:[#allocation5 + $0x568] sm:$0xf]  ;;  %v11812_v8 = vld [vmem:[#allocation5 + $0x90] sm:$0xf0] }
  0xc6   :  { %1888 = vmatmul.bf16.vlgmr.msra.gmra.mxu3 %v19255_v20  ;;  %v12451_v13 = vor.u32 %v17685_v3, %v12450_v2  ;;  %v17556_v2 = vld [vmem:[#allocation5 + $0x184] sm:$0xf0]  ;;  %v12258_v3 = vld [vmem:[#allocation5 + $0x3e0] sm:$0xf] }
  0xc7   :  { %1895 = vmatpush.bf16.msrb.mxu0 %v12651_v14  ;;  %v12410_v14 = vld [vmem:[#allocation5 + $0x518] sm:$0xf] }
  0xc8   :  { %1909 = vmatpush.bf16.msrb.mxu1 %v12015_v15  ;;  %v17675_v15 = vld [vmem:[#allocation5 + $0x53c] sm:$0xf0] }
  0xc9   :  { %1923 = vmatpush.bf16.msrb.mxu2 %v12335_v16  ;;  %1937 = vmatpush.bf16.msrb.mxu3 %v12655_v21  ;;  %v11815_v16 = vor.u32 %v17520_v6, %v11812_v8  ;;  %v17590_v21 = vld [vmem:[#allocation5 + $0x29c] sm:$0xf]  ;;  %v11983_v6 = vor.u32 %v17561_v60, %v11980_v61  ;;  %v12578_v8 = vld [vmem:[#allocation5 + $0x660] sm:$0xf]  ;;  %v19285_v60 = vpop.f32.mrf.mxu0 }
  0xca   :  { %v12095_v34 = vor.u32 %v17590_v21, %v12092_v23  ;;  %v12538_v21 = vld [vmem:[#allocation5 + $0x610] sm:$0xf]  ;;  %v17541_v23 = vld [vmem:[#allocation5 + $0x114] sm:$0xf] }
  0xcb   :  { %1896 = vmatpush.bf16.msrb.mxu0 %v12611_v27  ;;  %v17586_v27 = vld [vmem:[#allocation5 + $0x274] sm:$0xf0] }
  0xcc   :  { %1910 = vmatpush.bf16.msrb.mxu1 %v11975_v28  ;;  %v12378_v28 = vld [vmem:[#allocation5 + $0x4d0] sm:$0xf]  ;;  %v12059_v38 = vor.u32 %v17586_v27, %v12058_v26  ;;  %v19281_v26 = vpop.f32.mrf.mxu1 }
  0xcd   :  { %1924 = vmatpush.bf16.msrb.mxu2 %v12295_v29  ;;  %1938 = vmatpush.bf16.msrb.mxu3 %v12615_v33  ;;  %v12411_v29 = vor.u32 %v17675_v15, %v12410_v14  ;;  %v11775_v33 = vor.u32 %v17510_v18, %v11772_v19  ;;  %v12579_v14 = vor.u32 %v17716_v9, %v12578_v8  ;;  %v11898_v15 = vld [vmem:[#allocation5 + $0x110] sm:$0xf]  ;;  %v17626_v19 = vld [vmem:[#allocation5 + $0x3b4] sm:$0xf0]  ;;  %v12700_v8 = vld [vmem:[#allocation5 + $0x778] sm:$0xf0] }
  0xce   :  { %v11943_v18 = vor.u32 %v17551_v10, %v11940_v11  ;;  %v12986_v9 = vld [vmem:[#allocation8 + $0x230] sm:$0xf]  ;;  %v17822_v10 = vld [vmem:[#allocation8 + $0x254] sm:$0xf0] }
  0xcf   :  { %1897 = vmatpush.bf16.msrb.mxu0 %v12571_v39  ;;  %v12379_v39 = vor.u32 %v17666_v30, %v12378_v28  ;;  %v11858_v30 = vld [vmem:[#allocation5 + $0xc0] sm:$0xf] }
  0xd0   :  { %1911 = vmatpush.bf16.msrb.mxu1 %v11935_v40  ;;  %v12699_v40 = vor.u32 %v17746_v32, %v12698_v31  ;;  %v17536_v31 = vld [vmem:[#allocation5 + $0xe4] sm:$0xf0]  ;;  %v12178_v32 = vld [vmem:[#allocation5 + $0x340] sm:$0xf] }
  0xd1   :  { %1925 = vmatpush.bf16.msrb.mxu2 %v12255_v41  ;;  %1939 = vmatpush.bf16.msrb.mxu3 %v12575_v45  ;;  %v12018_v41 = vld [vmem:[#allocation5 + $0x200] sm:$0xf]  ;;  %v17656_v45 = vld [vmem:[#allocation5 + $0x4a4] sm:$0xf0] }
  0xd2   :  { %v12019_v50 = vor.u32 %v17576_v42, %v12018_v41  ;;  %v12499_v42 = vor.u32 %v17696_v36, %v12498_v35 }
  0xd3   :  { %1898 = vmatpush.bf16.msrb.mxu0 %v12531_v51  ;;  %v12339_v51 = vor.u32 %v17656_v45, %v12338_v43  ;;  %v11818_v43 = vld [vmem:[#allocation5 + $0x70] sm:$0xf] }
  0xd4   :  { %1912 = vmatpush.bf16.msrb.mxu1 %v11895_v52  ;;  %v12659_v52 = vor.u32 %v17736_v47, %v12658_v46  ;;  %v12138_v45 = vld [vmem:[#allocation5 + $0x2f0] sm:$0xf]  ;;  %v17606_v47 = vld [vmem:[#allocation5 + $0x314] sm:$0xf0]  ;;  %v19287_v61 = vpop.f32.mrf.mxu1 }
  0xd5   :  { %1926 = vmatpush.bf16.msrb.mxu2 %v12215_v53  ;;  %1940 = vmatpush.bf16.msrb.mxu3 %v12535_v57  ;;  %v11978_v53 = vld [vmem:[#allocation5 + $0x1b0] sm:$0xf]  ;;  %v17646_v57 = vld [vmem:[#allocation5 + $0x454] sm:$0xf0] }
  0xd6   :  { %v11979_v62 = vor.u32 %v17566_v54, %v11978_v53  ;;  %v11778_v53 = vld [vmem:[#allocation5 + $0x20] sm:$0xf]  ;;  %v17516_v54 = vld [vmem:[#allocation5 + $0x44] sm:$0xf0] }
  0xd7   :  { %1899 = vmatpush.bf16.msrb.mxu0 %v12491_v63  ;;  %v12299_v63 = vor.u32 %v17646_v57, %v12298_v55  ;;  %v12139_v55 = vor.u32 %v17606_v47, %v12138_v45  ;;  %v12098_v57 = vld [vmem:[#allocation5 + $0x2a0] sm:$0xf]  ;;  %v12620_v45 = vld [vmem:[#allocation5 + $0x6d8] sm:$0xf0] }
  0xd8   :  { %1913 = vmatpush.bf16.msrb.mxu1 %v11855_v0  ;;  %v12619_v0 = vor.u32 %v17726_v59, %v12618_v58  ;;  %v17596_v58 = vld [vmem:[#allocation5 + $0x2c4] sm:$0xf0]  ;;  %v12418_v59 = vld [vmem:[#allocation5 + $0x520] sm:$0xf] }
  0xd9   :  { %1927 = vmatpush.bf16.msrb.mxu2 %v12175_v1  ;;  %1941 = vmatpush.bf16.msrb.mxu3 %v12495_v7  ;;  %v11938_v1 = vld [vmem:[#allocation5 + $0x160] sm:$0xf]  ;;  %v17636_v7 = vld [vmem:[#allocation5 + $0x404] sm:$0xf0] }
  0xda   :  { %v11939_v12 = vor.u32 %v17556_v2, %v11938_v1  ;;  %v11780_v1 = vld [vmem:[#allocation5 + $0x48] sm:$0xf0]  ;;  %v17661_v2 = vld [vmem:[#allocation5 + $0x4d4] sm:$0xf]  ;;  %v17802_v47 = vld [vmem:[#allocation8 + $0x1b4] sm:$0xf0] }
  0xdb   :  { %1900 = vmatpush.bf16.msrb.mxu0 %v12451_v13  ;;  %v12259_v13 = vor.u32 %v17636_v7, %v12258_v3  ;;  %v12380_v3 = vld [vmem:[#allocation5 + $0x4f8] sm:$0xf0]  ;;  %v11779_v7 = vor.u32 %v17516_v54, %v11778_v53 }
  0xdc   :  { %1914 = vmatpush.bf16.msrb.mxu1 %v11815_v16  ;;  %v17546_v16 = vld [vmem:[#allocation5 + $0x134] sm:$0xf0] }
  0xdd   :  { %1928 = vmatpush.bf16.msrb.mxu2 %v12135_v17  ;;  %1942 = vmatpush.bf16.msrb.mxu3 %v12455_v22  ;;  %v12218_v17 = vld [vmem:[#allocation5 + $0x390] sm:$0xf]  ;;  %v17706_v22 = vld [vmem:[#allocation5 + $0x634] sm:$0xf0]  ;;  %v11899_v27 = vor.u32 %v17546_v16, %v11898_v15  ;;  %v17902_v15 = vld [vmem:[#allocation8 + $0x4d4] sm:$0xf0] }
  0xde   :  { %v12219_v28 = vor.u32 %v17626_v19, %v12218_v17  ;;  %v19291_v16 = vld [vmem:[#allocation7] sm:$0xff]  ;;  %v1665_v19 = vpop.f32.mrf.mxu3 }
  0xdf   :  { %1901 = vmatpush.bf16.msrb.mxu0 %v12411_v29  ;;  %v12539_v29 = vor.u32 %v17706_v22, %v12538_v21  ;;  %v12987_v22 = vor.u32 %v17822_v10, %v12986_v9  ;;  %v19294_v35 = vpop.f32.mrf.mxu0  ;;  %v17621_v10 = vld [vmem:[#allocation5 + $0x394] sm:$0xf] }
  0xe0   :  { %1915 = vmatpush.bf16.msrb.mxu1 %v11775_v33  ;;  %v11903_v33 = vor.u32 %v17541_v23, %v11900_v24  ;;  %v17651_v23 = vld [vmem:[#allocation5 + $0x484] sm:$0xf]  ;;  %v12340_v24 = vld [vmem:[#allocation5 + $0x4a8] sm:$0xf0]  ;;  %v19296_v36 = vpop.f32.mrf.mxu1 }
  0xe1   :  { %1929 = vmatpush.bf16.msrb.mxu2 %v12095_v34  ;;  %1943 = vmatpush.bf16.msrb.mxu3 %v12415_v37  ;;  %v17616_v34 = vld [vmem:[#allocation5 + $0x364] sm:$0xf0]  ;;  %v19283_v37 = vpop.f32.mrf.mxu2 }
  0xe2   :  { %1902 = vmatmul.bf16.vlgmr.msrb.gmra.mxu0 %v19249_v4  ;;  %v12179_v41 = vor.u32 %v17616_v34, %v12178_v32  ;;  %v13266_v32 = vld [vmem:[#allocation8 + $0x460] sm:$0xf]  ;;  %v378_v34 = vperm.slane %v19291_v16, 0 }
  0xe3   :  { %1950 = vmatpush.bf16.msra.mxu0 %v12059_v38  ;;  %1916 = vmatmul.bf16.vlgmr.msrb.gmra.mxu1 %v19251_v5  ;;  %v17531_v38 = vld [vmem:[#allocation5 + $0xc4] sm:$0xf] }
  0xe4   :  { %1964 = vmatpush.bf16.msra.mxu1 %v12379_v39  ;;  %1930 = vmatmul.bf16.vlgmr.msrb.gmra.mxu2 %v19255_v20  ;;  %v11860_v39 = vld [vmem:[#allocation5 + $0xe8] sm:$0xf0] }
  0xe5   :  { %1978 = vmatpush.bf16.msra.mxu2 %v12699_v40  ;;  %1992 = vmatpush.bf16.msra.mxu3 %v12063_v44  ;;  %v11859_v40 = vor.u32 %v17536_v31, %v11858_v30  ;;  %v17526_v44 = vld [vmem:[#allocation5 + $0x94] sm:$0xf0]  ;;  %v11863_v46 = vor.u32 %v17531_v38, %v11860_v39  ;;  %v12946_v30 = vld [vmem:[#allocation8 + $0x1e0] sm:$0xf]  ;;  %v17812_v31 = vld [vmem:[#allocation8 + $0x204] sm:$0xf0]  ;;  %v12343_v38 = vor.u32 %v17651_v23, %v12340_v24 }
  0xe6   :  { %1944 = vmatmul.bf16.vlgmr.msrb.gmra.mxu3 %v19249_v4 }
  0xe7   :  { %1951 = vmatpush.bf16.msra.mxu0 %v12019_v50  ;;  %v17521_v50 = vld [vmem:[#allocation5 + $0x74] sm:$0xf] }
  0xe8   :  { %1965 = vmatpush.bf16.msra.mxu1 %v12339_v51  ;;  %v11820_v51 = vld [vmem:[#allocation5 + $0x98] sm:$0xf0] }
  0xe9   :  { %1979 = vmatpush.bf16.msra.mxu2 %v12659_v52  ;;  %1993 = vmatpush.bf16.msra.mxu3 %v12023_v56  ;;  %v11819_v52 = vor.u32 %v17526_v44, %v11818_v43  ;;  %v12459_v56 = vor.u32 %v17686_v49, %v12458_v48  ;;  %v19289_v11 = vpop.f32.mrf.mxu2  ;;  %v17721_v43 = vld [vmem:[#allocation5 + $0x6b4] sm:$0xf]  ;;  %v13226_v48 = vld [vmem:[#allocation8 + $0x410] sm:$0xf]  ;;  %v17882_v49 = vld [vmem:[#allocation8 + $0x434] sm:$0xf0] }
  0xea   :  { %v12623_v54 = vor.u32 %v17721_v43, %v12620_v45 }
  0xeb   :  { %1952 = vmatpush.bf16.msra.mxu0 %v11979_v62  ;;  %v11823_v62 = vor.u32 %v17521_v50, %v11820_v51  ;;  %v1624_v51 = vadd.f32 %v19279_v25, %v378_v34  ;;  %v1626_v25 = vadd.f32 %v19285_v60, %v378_v34  ;;  %v12540_v60 = vld [vmem:[#allocation5 + $0x638] sm:$0xf0] }
  0xec   :  { %1966 = vmatpush.bf16.msra.mxu1 %v12299_v63  ;;  %v17676_v63 = vld [vmem:[#allocation5 + $0x544] sm:$0xf0] }
  0xed   :  { %1980 = vmatpush.bf16.msra.mxu2 %v12619_v0  ;;  %1994 = vmatpush.bf16.msra.mxu3 %v11983_v6  ;;  %v17511_v0 = vld [vmem:[#allocation5 + $0x24] sm:$0xf]  ;;  %v17741_v6 = vld [vmem:[#allocation5 + $0x754] sm:$0xf] }
  0xee   :  { %v11783_v17 = vor.u32 %v17511_v0, %v11780_v1  ;;  %v12703_v21 = vor.u32 %v17741_v6, %v12700_v8  ;;  %v17792_v0 = vld [vmem:[#allocation8 + $0x164] sm:$0xf0]  ;;  %v1667_v1 = vpop.f32.mrf.mxu3  ;;  %v1638_v6 = vadd.f32 %v19281_v26, %v1624_v51  ;;  %v13146_v26 = vld [vmem:[#allocation8 + $0x370] sm:$0xf] }
  0xef   :  { %1953 = vmatpush.bf16.msra.mxu0 %v11939_v12  ;;  %v12099_v12 = vor.u32 %v17596_v58, %v12098_v57  ;;  %v12260_v57 = vld [vmem:[#allocation5 + $0x408] sm:$0xf0]  ;;  %v17711_v58 = vld [vmem:[#allocation5 + $0x664] sm:$0xf]  ;;  %v17681_v51 = vld [vmem:[#allocation5 + $0x574] sm:$0xf] }
  0xf0   :  { %1967 = vmatpush.bf16.msra.mxu1 %v12259_v13  ;;  %v12419_v13 = vor.u32 %v17676_v63, %v12418_v59  ;;  %v13227_v59 = vor.u32 %v17882_v49, %v13226_v48  ;;  %v12866_v63 = vld [vmem:[#allocation8 + $0x140] sm:$0xf]  ;;  %v19310_v23 = vadd.f32 %v19283_v37, %v1638_v6  ;;  %v17772_v37 = vld [vmem:[#allocation8 + $0xc4] sm:$0xf0]  ;;  %v17671_v6 = vld [vmem:[#allocation5 + $0x524] sm:$0xf] }
  0xf1   :  { %1981 = vmatpush.bf16.msra.mxu2 %v12579_v14  ;;  %1995 = vmatpush.bf16.msra.mxu3 %v11943_v18  ;;  %v13306_v14 = vld [vmem:[#allocation8 + $0x4b0] sm:$0xf]  ;;  %v12383_v18 = vor.u32 %v17661_v2, %v12380_v3  ;;  %v19301_v50 = vpop.f32.mrf.mxu2  ;;  %v13186_v2 = vld [vmem:[#allocation8 + $0x3c0] sm:$0xf]  ;;  %v17872_v3 = vld [vmem:[#allocation8 + $0x3e4] sm:$0xf0]  ;;  %v12867_v9 = vor.u32 %v17792_v0, %v12866_v63 }
  0xf2   :  { %v19321_v43 = vmul.f32 0.01, %v19310_v23  ;;  %v17601_v49 = vld [vmem:[#allocation5 + $0x2f4] sm:$0xf]  ;;  %vm2034_vm0 = vcmp.gt.f32.partialorder %v19310_v23, 0.0 }
  0xf3   :  { %1954 = vmatpush.bf16.msra.mxu0 %v11899_v27  ;;  %v17731_v27 = vld [vmem:[#allocation5 + $0x704] sm:$0xf] }
  0xf4   :  { %1968 = vmatpush.bf16.msra.mxu1 %v12219_v28  ;;  %v13307_v28 = vor.u32 %v17902_v15, %v13306_v14  ;;  %v1681_v14 = vpop.f32.mrf.mxu0  ;;  %v1695_v15 = vpop.f32.mrf.mxu1 }
  0xf5   :  { %1982 = vmatpush.bf16.msra.mxu2 %v12539_v29  ;;  %1996 = vmatpush.bf16.msra.mxu3 %v11903_v33  ;;  %v12660_v29 = vld [vmem:[#allocation5 + $0x728] sm:$0xf0]  ;;  %v17892_v33 = vld [vmem:[#allocation8 + $0x484] sm:$0xf0] }
  0xf6   :  { %v12663_v39 = vor.u32 %v17731_v27, %v12660_v29  ;;  %v13267_v44 = vor.u32 %v17892_v33, %v13266_v32  ;;  %v12180_v32 = vld [vmem:[#allocation5 + $0x368] sm:$0xf0]  ;;  %v17691_v33 = vld [vmem:[#allocation5 + $0x5c4] sm:$0xf] }
  0xf7   :  { %1955 = vmatpush.bf16.msra.mxu0 %v11859_v40  ;;  %v12947_v40 = vor.u32 %v17812_v31, %v12946_v30  ;;  %v17611_v31 = vld [vmem:[#allocation5 + $0x344] sm:$0xf] }
  0xf8   :  { %1969 = vmatpush.bf16.msra.mxu1 %v12179_v41  ;;  %v17641_v41 = vld [vmem:[#allocation5 + $0x434] sm:$0xf] }
  0xf9   :  { %1983 = vmatpush.bf16.msra.mxu2 %v12499_v42  ;;  %1997 = vmatpush.bf16.msra.mxu3 %v11863_v46  ;;  %v12300_v42 = vld [vmem:[#allocation5 + $0x458] sm:$0xf0]  ;;  %v19313_v34 = vpop.f32.mrf.mxu2 }
  0xfa   :  { %v12906_v46 = vld [vmem:[#allocation8 + $0x190] sm:$0xf]  ;;  %v12303_v53 = vor.u32 %v17641_v41, %v12300_v42  ;;  %v13106_v41 = vld [vmem:[#allocation8 + $0x320] sm:$0xf]  ;;  %v17852_v42 = vld [vmem:[#allocation8 + $0x344] sm:$0xf0] }
  0xfb   :  { %1956 = vmatpush.bf16.msra.mxu0 %v11819_v52  ;;  %v379_v52 = vperm.slane %v19291_v16, 1 }
  0xfc   :  { %1970 = vmatpush.bf16.msra.mxu1 %v12139_v55  ;;  %v12907_v55 = vor.u32 %v17802_v47, %v12906_v46  ;;  %v12183_v46 = vor.u32 %v17611_v31, %v12180_v32  ;;  %v2074_v31 = vsel %vm2034_vm0, %v19310_v23, %v19321_v43 }
  0xfd   :  { %1984 = vmatpush.bf16.msra.mxu2 %v12459_v56  ;;  %1998 = vmatpush.bf16.msra.mxu3 %v11823_v62  ;;  %v17631_v56 = vld [vmem:[#allocation5 + $0x3e4] sm:$0xf]  ;;  %v12580_v62 = vld [vmem:[#allocation5 + $0x688] sm:$0xf0]  ;;  %v1668_v27 = vadd.f32 %v1667_v1, %v379_v52 }
  0xfe   :  { %v12583_v8 = vor.u32 %v17711_v58, %v12580_v62  ;;  %v17842_v58 = vld [vmem:[#allocation8 + $0x2f4] sm:$0xf0] }
  0xff   :  { %1957 = vmatpush.bf16.msra.mxu0 %v11779_v7  ;;  %v12263_v7 = vor.u32 %v17631_v56, %v12260_v57  ;;  %v1682_v45 = vadd.f32 %v1681_v14, %v1668_v27  ;;  %v19326_v56 = vpop.f32.mrf.mxu0  ;;  %v17982_v14 = vld [vmem:[#allocation8 + $0x754] sm:$0xf0] }
 0x100   :  { %1971 = vmatpush.bf16.msra.mxu1 %v12099_v12  ;;  %v12220_v12 = vld [vmem:[#allocation5 + $0x3b8] sm:$0xf0]  ;;  %v19328_v57 = vpop.f32.mrf.mxu1 }
 0x101   :  { %1985 = vmatpush.bf16.msra.mxu2 %v12419_v13  ;;  %1999 = vmatpush.bf16.msra.mxu3 %v11783_v17  ;;  %v17701_v13 = vld [vmem:[#allocation5 + $0x614] sm:$0xf]  ;;  %v13187_v17 = vor.u32 %v17872_v3, %v13186_v2  ;;  %v1696_v63 = vadd.f32 %v1695_v15, %v1682_v45  ;;  %v12100_v3 = vld [vmem:[#allocation5 + $0x2c8] sm:$0xf0] }
 0x102   :  { %1958 = vmatmul.bf16.vlgmr.msra.gmra.mxu0 %v19251_v5  ;;  %v12543_v29 = vor.u32 %v17701_v13, %v12540_v60  ;;  %v13626_v13 = vld [vmem:[#allocation8 + $0x730] sm:$0xf]  ;;  %v13906_v45 = vld [vmem:[#allocation8 + $0x960] sm:$0xf] }
 0x103   :  { %2006 = vmatpush.bf16.msrb.mxu0 %v12383_v18  ;;  %1972 = vmatmul.bf16.vlgmr.msra.gmra.mxu1 %v19255_v20  ;;  %v12826_v18 = vld [vmem:[#allocation8 + $0xf0] sm:$0xf]  ;;  %v2065_v15 = vmul.f32 0.01, %v1696_v63  ;;  %vm2045_vm3 = vcmp.gt.f32.partialorder %v1696_v63, 0.0  ;;  %v13627_v27 = vor.u32 %v17982_v14, %v13626_v13 }
 0x104   :  { %2020 = vmatpush.bf16.msrb.mxu1 %v12703_v21  ;;  %1986 = vmatmul.bf16.vlgmr.msra.gmra.mxu2 %v19249_v4  ;;  %v17782_v21 = vld [vmem:[#allocation8 + $0x114] sm:$0xf0]  ;;  %v18032_v13 = vld [vmem:[#allocation8 + $0x8e4] sm:$0xf0] }
 0x105   :  { %6928 = vmatpush.bf16.msrb.mxu2 %v12987_v22  ;;  %6942 = vmatpush.bf16.msrb.mxu3 %v13307_v28  ;;  %v1640_v22 = vadd.f32 %v19287_v61, %v1626_v25  ;;  %v12223_v28 = vor.u32 %v17621_v10, %v12220_v12  ;;  %v12827_v30 = vor.u32 %v17782_v21, %v12826_v18  ;;  %v17591_v25 = vld [vmem:[#allocation5 + $0x2a4] sm:$0xf]  ;;  %v13026_v10 = vld [vmem:[#allocation8 + $0x280] sm:$0xf]  ;;  %v17832_v12 = vld [vmem:[#allocation8 + $0x2a4] sm:$0xf0] }
 0x106   :  { %2000 = vmatmul.bf16.vlgmr.msra.gmra.mxu3 %v19251_v5  ;;  %v1666_v5 = vadd.f32 %v1665_v19, %v379_v52  ;;  %v17862_v19 = vld [vmem:[#allocation8 + $0x394] sm:$0xf0]  ;;  %v13107_v52 = vor.u32 %v17852_v42, %v13106_v41  ;;  %v12103_v60 = vor.u32 %v17591_v25, %v12100_v3  ;;  %v13946_v18 = vld [vmem:[#allocation8 + $0x9b0] sm:$0xf]  ;;  %v2085_v41 = vsel %vm2045_vm3, %v1696_v63, %v2065_v15 }
 0x107   :  { %2007 = vmatpush.bf16.msrb.mxu0 %v12343_v38  ;;  %v13147_v61 = vor.u32 %v17862_v19, %v13146_v26  ;;  %v12500_v38 = vld [vmem:[#allocation5 + $0x5e8] sm:$0xf0]  ;;  %v18062_v21 = vld [vmem:[#allocation8 + $0x9d4] sm:$0xf0]  ;;  %v380_v42 = vperm.slane %v19291_v16, 2  ;;  %v19351_v23 = vpop.f32.mrf.mxu0  ;;  %v382_v15 = vperm.slane %v19291_v16, 4 }
 0x108   :  { %2021 = vmatpush.bf16.msrb.mxu1 %v12663_v39  ;;  %v1680_v24 = vadd.f32 %v19294_v35, %v1666_v5  ;;  %v12786_v39 = vld [vmem:[#allocation8 + $0xa0] sm:$0xf]  ;;  %v19318_v35 = vpop.f32.mrf.mxu3  ;;  %v12503_v47 = vor.u32 %v17691_v33, %v12500_v38  ;;  %v13947_v33 = vor.u32 %v18062_v21, %v13946_v18  ;;  %v14586_v38 = vld [vmem:[#allocation8 + $0xeb0] sm:$0xf]  ;;  %v19353_v43 = vpop.f32.mrf.mxu1  ;;  %v18042_v63 = vld [vmem:[#allocation8 + $0x934] sm:$0xf0] }
 0x109   :  { %6929 = vmatpush.bf16.msrb.mxu2 %v12947_v40  ;;  %6943 = vmatpush.bf16.msrb.mxu3 %v13267_v44  ;;  %v19316_v40 = vadd.f32 %v19289_v11, %v1640_v22  ;;  %v12787_v48 = vor.u32 %v17772_v37, %v12786_v39  ;;  %v12140_v11 = vld [vmem:[#allocation5 + $0x318] sm:$0xf0]  ;;  %v12420_v5 = vld [vmem:[#allocation5 + $0x548] sm:$0xf0]  ;;  %v18222_v39 = vld [vmem:[#allocation8 + $0xed4] sm:$0xf0] }
 0x10a   :  { %v19324_v44 = vadd.f32 %v19296_v36, %v1680_v24  ;;  %v13066_v36 = vld [vmem:[#allocation8 + $0x2d0] sm:$0xf]  ;;  %v12143_v0 = vor.u32 %v17601_v49, %v12140_v11  ;;  %v12423_v26 = vor.u32 %v17671_v6, %v12420_v5  ;;  %v13027_v24 = vor.u32 %v17832_v12, %v13026_v10  ;;  %v14226_v49 = vld [vmem:[#allocation8 + $0xbe0] sm:$0xf]  ;;  %v18132_v11 = vld [vmem:[#allocation8 + $0xc04] sm:$0xf0] }
 0x10b   :  { %2008 = vmatpush.bf16.msrb.mxu0 %v12303_v53  ;;  %v12460_v53 = vld [vmem:[#allocation5 + $0x598] sm:$0xf0]  ;;  %vm2044_vm1 = vcmp.gt.f32.partialorder %v19316_v40, 0.0  ;;  %v18122_v3 = vld [vmem:[#allocation8 + $0xbb4] sm:$0xf0] }
 0x10c   :  { %2022 = vmatpush.bf16.msrb.mxu1 %v12623_v54  ;;  %v12746_v54 = vld [vmem:[#allocation8 + $0x50] sm:$0xf]  ;;  %v2055_v62 = vmul.f32 0.01, %v19324_v44  ;;  %v12463_v1 = vor.u32 %v17681_v51, %v12460_v53  ;;  %vm2035_vm2 = vcmp.gt.f32.partialorder %v19324_v44, 0.0 }
 0x10d   :  { %6930 = vmatpush.bf16.msrb.mxu2 %v12907_v55  ;;  %6944 = vmatpush.bf16.msrb.mxu3 %v13227_v59  ;;  %v17762_v55 = vld [vmem:[#allocation8 + $0x74] sm:$0xf0]  ;;  %v2064_v59 = vmul.f32 0.01, %v19316_v40  ;;  %v13546_v51 = vld [vmem:[#allocation8 + $0x690] sm:$0xf] }
 0x10e   :  { %v12747_v2 = vor.u32 %v17762_v55, %v12746_v54  ;;  %v2075_v37 = vsel %vm2035_vm2, %v19324_v44, %v2055_v62  ;;  %v17962_v55 = vld [vmem:[#allocation8 + $0x6b4] sm:$0xf0]  ;;  %v13866_v62 = vld [vmem:[#allocation8 + $0x910] sm:$0xf]  ;;  %v13826_v12 = vld [vmem:[#allocation8 + $0x8c0] sm:$0xf] }
 0x10f   :  { %2009 = vmatpush.bf16.msrb.mxu0 %v12263_v7  ;;  %v13067_v7 = vor.u32 %v17842_v58, %v13066_v36  ;;  %v2084_v32 = vsel %vm2044_vm1, %v19316_v40, %v2064_v59  ;;  %v381_v40 = vperm.slane %v19291_v16, 3  ;;  %v19358_v53 = vpack.c.bf16 %v2085_v41, %v2075_v37  ;;  %v14546_v36 = vld [vmem:[#allocation8 + $0xe60] sm:$0xf]  ;;  %v18212_v58 = vld [vmem:[#allocation8 + $0xe84] sm:$0xf0] }
 0x110   :  { %2023 = vmatpush.bf16.msrb.mxu1 %v12583_v8  ;;  %v12706_v8 = vld [vmem:[#allocation8] sm:$0xf]  ;;  %v19337_v22 = vpop.f32.mrf.mxu3  ;;  %v1708_v59 = vadd.f32 %v19301_v50, %v380_v42  ;;  %v14186_v50 = vld [vmem:[#allocation8 + $0xb90] sm:$0xf]  ;;  %v14547_v6 = vor.u32 %v18212_v58, %v14546_v36 }
 0x111   :  { %6931 = vmatpush.bf16.msrb.mxu2 %v12867_v9  ;;  %6945 = vmatpush.bf16.msrb.mxu3 %v13187_v17  ;;  %v17752_v9 = vld [vmem:[#allocation8 + $0x24] sm:$0xf0]  ;;  %v19334_v17 = vpop.f32.mrf.mxu2 }
 0x112   :  { %v12707_v19 = vor.u32 %v17752_v9, %v12706_v8  ;;  %v17952_v8 = vld [vmem:[#allocation8 + $0x664] sm:$0xf0]  ;;  %v14506_v9 = vld [vmem:[#allocation8 + $0xe10] sm:$0xf]  ;;  %v1722_v10 = vadd.f32 %v19318_v35, %v1708_v59  ;;  %v13827_v35 = vor.u32 %v18032_v13, %v13826_v12  ;;  %v14066_v59 = vld [vmem:[#allocation8 + $0xaa0] sm:$0xf] }
 0x113   :  { %2010 = vmatpush.bf16.msrb.mxu0 %v12223_v28  ;;  %v14266_v28 = vld [vmem:[#allocation8 + $0xc30] sm:$0xf] }
 0x114   :  { %2024 = vmatpush.bf16.msrb.mxu1 %v12543_v29  ;;  %v18142_v29 = vld [vmem:[#allocation8 + $0xc54] sm:$0xf0] }
 0x115   :  { %6932 = vmatpush.bf16.msrb.mxu2 %v12827_v30  ;;  %6946 = vmatpush.bf16.msrb.mxu3 %v13147_v61  ;;  %v13586_v30 = vld [vmem:[#allocation8 + $0x6e0] sm:$0xf]  ;;  %v17972_v61 = vld [vmem:[#allocation8 + $0x704] sm:$0xf0] }
 0x116   :  { %v13587_v44 = vor.u32 %v17972_v61, %v13586_v30  ;;  %v14466_v30 = vld [vmem:[#allocation8 + $0xdc0] sm:$0xf] }
 0x117   :  { %2011 = vmatpush.bf16.msrb.mxu0 %v12183_v46  ;;  %v18052_v46 = vld [vmem:[#allocation8 + $0x984] sm:$0xf0] }
 0x118   :  { %2025 = vmatpush.bf16.msrb.mxu1 %v12503_v47  ;;  %v14267_v47 = vor.u32 %v18142_v29, %v14266_v28  ;;  %v13907_v54 = vor.u32 %v18052_v46, %v13906_v45  ;;  %v1777_v5 = vpop.f32.mrf.mxu3  ;;  %v17942_v29 = vld [vmem:[#allocation8 + $0x614] sm:$0xf0] }
 0x119   :  { %6933 = vmatpush.bf16.msrb.mxu2 %v12787_v48  ;;  %6947 = vmatpush.bf16.msrb.mxu3 %v13107_v52  ;;  %v19356_v48 = vpack.c.bf16 %v2084_v32, %v2074_v31  ;;  %v14587_v52 = vor.u32 %v18222_v39, %v14586_v38  ;;  %v1765_v25 = vpop.f32.mrf.mxu2  ;;  %v19374_v31 = vadd.f32 %v19326_v56, %v1722_v10  ;;  %v13786_v32 = vld [vmem:[#allocation8 + $0x870] sm:$0xf]  ;;  %v18102_v45 = vld [vmem:[#allocation8 + $0xb14] sm:$0xf0]  ;;  %v13426_v56 = vld [vmem:[#allocation8 + $0x5a0] sm:$0xf] }
 0x11b   :  { %2012 = vmatpush.bf16.msrb.mxu0 %v12143_v0  ;;  %v1750_v0 = vadd.f32 %v19328_v57, %v381_v40  ;;  %v18202_v57 = vld [vmem:[#allocation8 + $0xe34] sm:$0xf0]  ;;  %vm2036_vm4 = vcmp.gt.f32.partialorder %v19374_v31, 0.0 }
 0x11c   :  { %2026 = vmatpush.bf16.msrb.mxu1 %v12463_v1  ;;  %v1710_v1 = vadd.f32 %v19313_v34, %v380_v42  ;;  %v14187_v34 = vor.u32 %v18122_v3, %v14186_v50  ;;  %v14507_v28 = vor.u32 %v18202_v57, %v14506_v9  ;;  %v14106_v42 = vld [vmem:[#allocation8 + $0xaf0] sm:$0xf]  ;;  %v18002_v9 = vld [vmem:[#allocation8 + $0x7f4] sm:$0xf0] }
 0x11d   :  { %6934 = vmatpush.bf16.msrb.mxu2 %v12747_v2  ;;  %6948 = vmatpush.bf16.msrb.mxu3 %v13067_v7  ;;  %v13547_v2 = vor.u32 %v17962_v55, %v13546_v51  ;;  %v13867_v7 = vor.u32 %v18042_v63, %v13866_v62  ;;  %v1764_v14 = vadd.f32 %v19334_v17, %v1750_v0  ;;  %v18192_v17 = vld [vmem:[#allocation8 + $0xde4] sm:$0xf0]  ;;  %v14026_v57 = vld [vmem:[#allocation8 + $0xa50] sm:$0xf] }
 0x11e   :  { %v14467_v46 = vor.u32 %v18192_v17, %v14466_v30  ;;  %v14107_v58 = vor.u32 %v18102_v45, %v14106_v42  ;;  %v18072_v45 = vld [vmem:[#allocation8 + $0xa24] sm:$0xf0] }
 0x11f   :  { %2013 = vmatpush.bf16.msrb.mxu0 %v12103_v60  ;;  %v1724_v60 = vadd.f32 %v19337_v22, %v1710_v1  ;;  %v1791_v21 = vpop.f32.mrf.mxu0  ;;  %v1752_v22 = vadd.f32 %v19353_v43, %v381_v40  ;;  %v19379_v61 = vadd.f32 %v1777_v5, %v1764_v14  ;;  %v17932_v40 = vld [vmem:[#allocation8 + $0x5c4] sm:$0xf0]  ;;  %v13386_v1 = vld [vmem:[#allocation8 + $0x550] sm:$0xf]  ;;  %v18082_v14 = vld [vmem:[#allocation8 + $0xa74] sm:$0xf0] }
 0x120   :  { %2027 = vmatpush.bf16.msrb.mxu1 %v12423_v26  ;;  %v14146_v26 = vld [vmem:[#allocation8 + $0xb40] sm:$0xf]  ;;  %v1792_v38 = vadd.f32 %v1791_v21, %v382_v15  ;;  %v1779_v55 = vpop.f32.mrf.mxu3  ;;  %v13427_v63 = vor.u32 %v17932_v40, %v13426_v56  ;;  %v18172_v5 = vld [vmem:[#allocation8 + $0xd44] sm:$0xf0] }
 0x121   :  { %6935 = vmatpush.bf16.msrb.mxu2 %v12707_v19  ;;  %6949 = vmatpush.bf16.msrb.mxu3 %v13027_v24  ;;  %v18112_v19 = vld [vmem:[#allocation8 + $0xb64] sm:$0xf0]  ;;  %v1805_v24 = vpop.f32.mrf.mxu1  ;;  %v19382_v37 = vadd.f32 %v19351_v23, %v1724_v60  ;;  %v1766_v51 = vadd.f32 %v1765_v25, %v1752_v22  ;;  %vm2037_vm5 = vcmp.gt.f32.partialorder %v19379_v61, 0.0  ;;  %v13666_v21 = vld [vmem:[#allocation8 + $0x780] sm:$0xf] }
 0x122   :  { %2014 = vmatmul.bf16.vlgmr.msrb.gmra.mxu0 %v19255_v20  ;;  %v14227_v20 = vor.u32 %v18132_v11, %v14226_v49  ;;  %v14147_v39 = vor.u32 %v18112_v19, %v14146_v26  ;;  %v18182_v49 = vld [vmem:[#allocation8 + $0xd94] sm:$0xf0]  ;;  %v19385_v11 = vmul.f32 0.01, %v19374_v31  ;;  %v18012_v23 = vld [vmem:[#allocation8 + $0x844] sm:$0xf0]  ;;  %v1806_v36 = vadd.f32 %v1805_v24, %v1792_v38 }
 0x123   :  { %6956 = vmatpush.bf16.msra.mxu0 %v13627_v27  ;;  %2028 = vmatmul.bf16.vlgmr.msrb.gmra.mxu1 %v19249_v4  ;;  %v13506_v4 = vld [vmem:[#allocation8 + $0x640] sm:$0xf]  ;;  %v13466_v27 = vld [vmem:[#allocation8 + $0x5f0] sm:$0xf]  ;;  %v19393_v62 = vmul.f32 0.01, %v19382_v37 }
 0x124   :  { %6970 = vmatpush.bf16.msra.mxu1 %v13947_v33  ;;  %6936 = vmatmul.bf16.vlgmr.msrb.gmra.mxu2 %v19356_v48  ;;  %v13507_v18 = vor.u32 %v17952_v8, %v13506_v4  ;;  %v18022_v33 = vld [vmem:[#allocation8 + $0x894] sm:$0xf0]  ;;  %v13467_v41 = vor.u32 %v17942_v29, %v13466_v27  ;;  %v13706_v8 = vld [vmem:[#allocation8 + $0x7d0] sm:$0xf]  ;;  %v17912_v60 = vld [vmem:[#allocation8 + $0x524] sm:$0xf0] }
 0x125   :  { %6950 = vmatmul.bf16.vlgmr.msrb.gmra.mxu3 %v19358_v53  ;;  %6984 = vmatpush.bf16.msra.mxu2 %v14267_v47  ;;  %v13787_v47 = vor.u32 %v18022_v33, %v13786_v32  ;;  %v17922_v4 = vld [vmem:[#allocation8 + $0x574] sm:$0xf0]  ;;  %v17992_v26 = vld [vmem:[#allocation8 + $0x7a4] sm:$0xf0]  ;;  %v14906_v19 = vld [vmem:[#allocation8 + $0x1130] sm:$0xf]  ;;  %v13707_v24 = vor.u32 %v18002_v9, %v13706_v8  ;;  %v14027_v33 = vor.u32 %v18082_v14, %v14026_v57 }
 0x126   :  { %6998 = vmatpush.bf16.msra.mxu3 %v14587_v52  ;;  %v13746_v52 = vld [vmem:[#allocation8 + $0x820] sm:$0xf]  ;;  %v18162_v29 = vld [vmem:[#allocation8 + $0xcf4] sm:$0xf0]  ;;  %vm2046_vm6 = vcmp.gt.f32.partialorder %v19382_v37, 0.0 }
 0x127   :  { %6957 = vmatpush.bf16.msra.mxu0 %v13587_v44  ;;  %v1819_v43 = vpop.f32.mrf.mxu2  ;;  %v14426_v44 = vld [vmem:[#allocation8 + $0xd70] sm:$0xf]  ;;  %v1793_v0 = vpop.f32.mrf.mxu0  ;;  %v13747_v50 = vor.u32 %v18012_v23, %v13746_v52  ;;  %v13986_v22 = vld [vmem:[#allocation8 + $0xa00] sm:$0xf]  ;;  %v18292_v23 = vld [vmem:[#allocation8 + $0x1104] sm:$0xf0] }
 0x128   :  { %6971 = vmatpush.bf16.msra.mxu1 %v13907_v54  ;;  %v19390_v54 = vmul.f32 0.01, %v19379_v61  ;;  %v1794_v3 = vadd.f32 %v1793_v0, %v382_v15  ;;  %v1820_v10 = vadd.f32 %v1819_v43, %v1806_v36  ;;  %v14866_v43 = vld [vmem:[#allocation8 + $0x10e0] sm:$0xf]  ;;  %v15546_v36 = vld [vmem:[#allocation8 + $0x1630] sm:$0xf] }
 0x129   :  { %6985 = vmatpush.bf16.msra.mxu2 %v14227_v20  ;;  %v18092_v20 = vld [vmem:[#allocation8 + $0xac4] sm:$0xf0]  ;;  %v1807_v25 = vpop.f32.mrf.mxu1  ;;  %v14306_v40 = vld [vmem:[#allocation8 + $0xc80] sm:$0xf]  ;;  %v18362_v8 = vld [vmem:[#allocation8 + $0x1334] sm:$0xf0] }
 0x12a   :  { %6999 = vmatpush.bf16.msra.mxu3 %v14547_v6  ;;  %v14386_v6 = vld [vmem:[#allocation8 + $0xd20] sm:$0xf]  ;;  %v14067_v12 = vor.u32 %v18092_v20, %v14066_v59  ;;  %v1808_v13 = vadd.f32 %v1807_v25, %v1794_v3  ;;  %v2058_v32 = vmul.f32 0.01, %v1820_v10  ;;  %vm2038_vm8 = vcmp.gt.f32.partialorder %v1820_v10, 0.0  ;;  %v1833_v25 = vpop.f32.mrf.mxu3 }
 0x12b   :  { %6958 = vmatpush.bf16.msra.mxu0 %v13547_v2  ;;  %v14427_v2 = vor.u32 %v18182_v49, %v14426_v44  ;;  %v14387_v15 = vor.u32 %v18172_v5, %v14386_v6  ;;  %v18152_v44 = vld [vmem:[#allocation8 + $0xca4] sm:$0xf0]  ;;  %v2076_v49 = vsel %vm2036_vm4, %v19374_v31, %v19385_v11  ;;  %v2077_v52 = vsel %vm2037_vm5, %v19379_v61, %v19390_v54  ;;  %v15186_v0 = vld [vmem:[#allocation8 + $0x1360] sm:$0xf]  ;;  %v14826_v54 = vld [vmem:[#allocation8 + $0x1090] sm:$0xf] }
 0x12c   :  { %6972 = vmatpush.bf16.msra.mxu1 %v13867_v7  ;;  %v1780_v7 = vadd.f32 %v1779_v55, %v1766_v51  ;;  %v2086_v51 = vsel %vm2046_vm6, %v19382_v37, %v19393_v62  ;;  %v13987_v11 = vor.u32 %v18072_v45, %v13986_v22  ;;  %v18372_v20 = vld [vmem:[#allocation8 + $0x1384] sm:$0xf0]  ;;  %v14307_v37 = vor.u32 %v18152_v44, %v14306_v40  ;;  %v18282_v3 = vld [vmem:[#allocation8 + $0x10b4] sm:$0xf0]  ;;  %v15506_v5 = vld [vmem:[#allocation8 + $0x15e0] sm:$0xf] }
 0x12d   :  { %6986 = vmatpush.bf16.msra.mxu2 %v14187_v34  ;;  %v13346_v34 = vld [vmem:[#allocation8 + $0x500] sm:$0xf]  ;;  %v19411_v62 = vpack.c.bf16 %v2086_v51, %v2076_v49  ;;  %v14867_v61 = vor.u32 %v18292_v23, %v14866_v43  ;;  %v15187_v6 = vor.u32 %v18372_v20, %v15186_v0  ;;  %v18452_v9 = vld [vmem:[#allocation8 + $0x1604] sm:$0xf0]  ;;  %v14827_v57 = vor.u32 %v18282_v3, %v14826_v54  ;;  %v15066_v22 = vld [vmem:[#allocation8 + $0x1270] sm:$0xf] }
 0x12e   :  { %7000 = vmatpush.bf16.msra.mxu3 %v14507_v28  ;;  %v18302_v28 = vld [vmem:[#allocation8 + $0x1154] sm:$0xf0]  ;;  %vm2047_vm7 = vcmp.gt.f32.partialorder %v1780_v7, 0.0  ;;  %v2067_v30 = vmul.f32 0.01, %v1780_v7  ;;  %v13347_v38 = vor.u32 %v17912_v60, %v13346_v34 }
 0x12f   :  { %6959 = vmatpush.bf16.msra.mxu0 %v13507_v18  ;;  %v13387_v18 = vor.u32 %v17922_v4, %v13386_v1  ;;  %v1821_v27 = vpop.f32.mrf.mxu2  ;;  %v383_v4 = vperm.slane %v19291_v16, 5  ;;  %v18272_v14 = vld [vmem:[#allocation8 + $0x1064] sm:$0xf0]  ;;  %v15106_v60 = vld [vmem:[#allocation8 + $0x12c0] sm:$0xf] }
 0x130   :  { %6973 = vmatpush.bf16.msra.mxu1 %v13827_v35  ;;  %v14346_v35 = vld [vmem:[#allocation8 + $0xcd0] sm:$0xf]  ;;  %v1822_v17 = vadd.f32 %v1821_v27, %v1808_v13  ;;  %v2087_v59 = vsel %vm2047_vm7, %v1780_v7, %v2067_v30  ;;  %v14786_v13 = vld [vmem:[#allocation8 + $0x1040] sm:$0xf]  ;;  %v18332_v40 = vld [vmem:[#allocation8 + $0x1244] sm:$0xf0] }
 0x131   :  { %6987 = vmatpush.bf16.msra.mxu2 %v14147_v39  ;;  %v15226_v39 = vld [vmem:[#allocation8 + $0x13b0] sm:$0xf]  ;;  %v14347_v56 = vor.u32 %v18162_v29, %v14346_v35  ;;  %v18262_v29 = vld [vmem:[#allocation8 + $0x1014] sm:$0xf0]  ;;  %v15026_v43 = vld [vmem:[#allocation8 + $0x1220] sm:$0xf] }
 0x132   :  { %7001 = vmatpush.bf16.msra.mxu3 %v14467_v46  ;;  %vm2048_vm9 = vcmp.gt.f32.partialorder %v1822_v17, 0.0  ;;  %v2068_v42 = vmul.f32 0.01, %v1822_v17  ;;  %v13667_v46 = vor.u32 %v17992_v26, %v13666_v21  ;;  %v15146_v7 = vld [vmem:[#allocation8 + $0x1310] sm:$0xf] }
 0x133   :  { %6960 = vmatpush.bf16.msra.mxu0 %v13467_v41  ;;  %v18382_v41 = vld [vmem:[#allocation8 + $0x13d4] sm:$0xf0]  ;;  %v15147_v34 = vor.u32 %v18362_v8, %v15146_v7  ;;  %v15466_v21 = vld [vmem:[#allocation8 + $0x1590] sm:$0xf]  ;;  %v17817_v3 = vld [vmem:[#allocation8 + $0x234] sm:$0xf] }
 0x134   :  { %6974 = vmatpush.bf16.msra.mxu1 %v13787_v47  ;;  %v14907_v47 = vor.u32 %v18302_v28, %v14906_v19  ;;  %v15227_v55 = vor.u32 %v18382_v41, %v15226_v39  ;;  %v2088_v31 = vsel %vm2048_vm9, %v1822_v17, %v2068_v42  ;;  %v18442_v26 = vld [vmem:[#allocation8 + $0x15b4] sm:$0xf0]  ;;  %v14746_v35 = vld [vmem:[#allocation8 + $0xff0] sm:$0xf]  ;;  %v1835_v17 = vpop.f32.mrf.mxu3  ;;  %v12988_v7 = vld [vmem:[#allocation8 + $0x258] sm:$0xf0] }
 0x135   :  { %6988 = vmatpush.bf16.msra.mxu2 %v14107_v58  ;;  %v18462_v58 = vld [vmem:[#allocation8 + $0x1654] sm:$0xf0]  ;;  %v14747_v39 = vor.u32 %v18262_v29, %v14746_v35  ;;  %v1836_v45 = vadd.f32 %v1835_v17, %v383_v4  ;;  %v15386_v44 = vld [vmem:[#allocation8 + $0x14f0] sm:$0xf]  ;;  %v17807_v29 = vld [vmem:[#allocation8 + $0x1e4] sm:$0xf] }
 0x136   :  { %7002 = vmatpush.bf16.msra.mxu3 %v14427_v2  ;;  %v15547_v1 = vor.u32 %v18462_v58, %v15546_v36  ;;  %v19413_v2 = vpack.c.bf16 %v2087_v59, %v2077_v52  ;;  %v18422_v49 = vld [vmem:[#allocation8 + $0x1514] sm:$0xf0]  ;;  %v14666_v59 = vld [vmem:[#allocation8 + $0xf50] sm:$0xf] }
 0x137   :  { %6961 = vmatpush.bf16.msra.mxu0 %v13427_v63  ;;  %v2078_v63 = vsel %vm2038_vm8, %v1820_v10, %v2058_v32  ;;  %v15507_v10 = vor.u32 %v18452_v9, %v15506_v5  ;;  %v18342_v32 = vld [vmem:[#allocation8 + $0x1294] sm:$0xf0]  ;;  %v15387_v23 = vor.u32 %v18422_v49, %v15386_v44  ;;  %v14946_v9 = vld [vmem:[#allocation8 + $0x1180] sm:$0xf]  ;;  %v12908_v44 = vld [vmem:[#allocation8 + $0x1b8] sm:$0xf0] }
 0x138   :  { %6975 = vmatpush.bf16.msra.mxu1 %v13747_v50  ;;  %v19415_v50 = vpack.c.bf16 %v2088_v31, %v2078_v63  ;;  %v18242_v63 = vld [vmem:[#allocation8 + $0xf74] sm:$0xf0]  ;;  %v15027_v31 = vor.u32 %v18332_v40, %v15026_v43  ;;  %v13628_v43 = vld [vmem:[#allocation8 + $0x758] sm:$0xf0]  ;;  %v17797_v40 = vld [vmem:[#allocation8 + $0x194] sm:$0xf] }
 0x139   :  { %6989 = vmatpush.bf16.msra.mxu2 %v14067_v12  ;;  %v1834_v12 = vadd.f32 %v1833_v25, %v383_v4  ;;  %v18322_v0 = vld [vmem:[#allocation8 + $0x11f4] sm:$0xf0]  ;;  %v14667_v54 = vor.u32 %v18242_v63, %v14666_v59  ;;  %v14626_v25 = vld [vmem:[#allocation8 + $0xf00] sm:$0xf]  ;;  %v12911_v63 = vor.u32 %v17797_v40, %v12908_v44 }
 0x13a   :  { %7003 = vmatpush.bf16.msra.mxu3 %v14387_v15  ;;  %v14787_v15 = vor.u32 %v18272_v14, %v14786_v13  ;;  %v13308_v13 = vld [vmem:[#allocation8 + $0x4d8] sm:$0xf0]  ;;  %v15306_v14 = vld [vmem:[#allocation8 + $0x1450] sm:$0xf] }
 0x13b   :  { %6962 = vmatpush.bf16.msra.mxu0 %v13387_v18  ;;  %v18352_v18 = vld [vmem:[#allocation8 + $0x12e4] sm:$0xf0] }
 0x13c   :  { %6976 = vmatpush.bf16.msra.mxu1 %v13707_v24  ;;  %v15467_v24 = vor.u32 %v18442_v26, %v15466_v21  ;;  %v15107_v30 = vor.u32 %v18352_v18, %v15106_v60  ;;  %v15866_v26 = vld [vmem:[#allocation8 + $0x18b0] sm:$0xf] }
 0x13d   :  { %6990 = vmatpush.bf16.msra.mxu2 %v14027_v33  ;;  %v15426_v33 = vld [vmem:[#allocation8 + $0x1540] sm:$0xf] }
 0x13e   :  { %7004 = vmatpush.bf16.msra.mxu3 %v14347_v56  ;;  %v14706_v56 = vld [vmem:[#allocation8 + $0xfa0] sm:$0xf] }
 0x13f   :  { %6963 = vmatpush.bf16.msra.mxu0 %v13347_v38  ;;  %v1847_v19 = vpop.f32.mrf.mxu0  ;;  %v18432_v38 = vld [vmem:[#allocation8 + $0x1564] sm:$0xf0] }
 0x140   :  { %6977 = vmatpush.bf16.msra.mxu1 %v13667_v46  ;;  %v1848_v27 = vadd.f32 %v1847_v19, %v1834_v12  ;;  %v1861_v28 = vpop.f32.mrf.mxu1  ;;  %v15427_v41 = vor.u32 %v18432_v38, %v15426_v33  ;;  %v18252_v46 = vld [vmem:[#allocation8 + $0xfc4] sm:$0xf0]  ;;  %v18542_v19 = vld [vmem:[#allocation8 + $0x18d4] sm:$0xf0]  ;;  %v15266_v33 = vld [vmem:[#allocation8 + $0x1400] sm:$0xf] }
 0x141   :  { %6991 = vmatpush.bf16.msra.mxu2 %v13987_v11  ;;  %v14707_v52 = vor.u32 %v18252_v46, %v14706_v56  ;;  %v14986_v11 = vld [vmem:[#allocation8 + $0x11d0] sm:$0xf]  ;;  %v15867_v35 = vor.u32 %v18542_v19, %v15866_v26  ;;  %v18392_v38 = vld [vmem:[#allocation8 + $0x1424] sm:$0xf0]  ;;  %v384_v56 = vperm.slane %v19291_v16, 6 }
 0x142   :  { %6964 = vmatmul.bf16.vlgmr.msra.gmra.mxu0 %v19411_v62  ;;  %7005 = vmatpush.bf16.msra.mxu3 %v14307_v37  ;;  %v1862_v42 = vadd.f32 %v1861_v28, %v1848_v27  ;;  %v15346_v37 = vld [vmem:[#allocation8 + $0x14a0] sm:$0xf]  ;;  %v14987_v8 = vor.u32 %v18322_v0, %v14986_v11  ;;  %v17787_v11 = vld [vmem:[#allocation8 + $0x144] sm:$0xf]  ;;  %v12868_v0 = vld [vmem:[#allocation8 + $0x168] sm:$0xf0] }
 0x143   :  { %7012 = vmatpush.bf16.msrb.mxu0 %v14907_v47  ;;  %6978 = vmatmul.bf16.vlgmr.msra.gmra.mxu1 %v19413_v2  ;;  %v15067_v47 = vor.u32 %v18342_v32, %v15066_v22  ;;  %v17887_v22 = vld [vmem:[#allocation8 + $0x464] sm:$0xf]  ;;  %v13268_v32 = vld [vmem:[#allocation8 + $0x488] sm:$0xf0]  ;;  %v17857_v26 = vld [vmem:[#allocation8 + $0x374] sm:$0xf] }
 0x144   :  { %7026 = vmatpush.bf16.msrb.mxu1 %v15227_v55  ;;  %6992 = vmatmul.bf16.vlgmr.msra.gmra.mxu2 %v19415_v50  ;;  %v2059_v55 = vmul.f32 0.01, %v1862_v42  ;;  %vm2039_vm10 = vcmp.gt.f32.partialorder %v1862_v42, 0.0  ;;  %v13271_v49 = vor.u32 %v17887_v22, %v13268_v32  ;;  %v13148_v19 = vld [vmem:[#allocation8 + $0x398] sm:$0xf0] }
 0x145   :  { %7040 = vmatpush.bf16.msrb.mxu2 %v15547_v1  ;;  %v18232_v1 = vld [vmem:[#allocation8 + $0xf24] sm:$0xf0]  ;;  %v17767_v32 = vld [vmem:[#allocation8 + $0xa4] sm:$0xf] }
 0x146   :  { %v14627_v18 = vor.u32 %v18232_v1, %v14626_v25  ;;  %7054 = vmatpush.bf16.msrb.mxu3 %v15867_v35  ;;  %v17867_v25 = vld [vmem:[#allocation8 + $0x3c4] sm:$0xf]  ;;  %v13188_v1 = vld [vmem:[#allocation8 + $0x3e8] sm:$0xf0] }
 0x147   :  { %7013 = vmatpush.bf16.msrb.mxu0 %v14867_v61  ;;  %v1849_v51 = vpop.f32.mrf.mxu0  ;;  %v18412_v61 = vld [vmem:[#allocation8 + $0x14c4] sm:$0xf0] }
 0x148   :  { %7027 = vmatpush.bf16.msrb.mxu1 %v15187_v6  ;;  %v1850_v36 = vadd.f32 %v1849_v51, %v1836_v45  ;;  %v1863_v58 = vpop.f32.mrf.mxu1  ;;  %v15347_v4 = vor.u32 %v18412_v61, %v15346_v37  ;;  %v2079_v6 = vsel %vm2039_vm10, %v1862_v42, %v2059_v55  ;;  %v18532_v42 = vld [vmem:[#allocation8 + $0x1884] sm:$0xf0]  ;;  %v17977_v45 = vld [vmem:[#allocation8 + $0x734] sm:$0xf]  ;;  %v15786_v55 = vld [vmem:[#allocation8 + $0x1810] sm:$0xf] }
 0x149   :  { %7041 = vmatpush.bf16.msrb.mxu2 %v15507_v10  ;;  %v17897_v10 = vld [vmem:[#allocation8 + $0x4b4] sm:$0xf]  ;;  %v1889_v27 = vpop.f32.mrf.mxu3  ;;  %v13631_v51 = vor.u32 %v17977_v45, %v13628_v43  ;;  %v17847_v45 = vld [vmem:[#allocation8 + $0x324] sm:$0xf] }
 0x14a   :  { %v1864_v20 = vadd.f32 %v1863_v58, %v1850_v36  ;;  %v13311_v17 = vor.u32 %v17897_v10, %v13308_v13  ;;  %v18522_v36 = vld [vmem:[#allocation8 + $0x1834] sm:$0xf0]  ;;  %v17967_v58 = vld [vmem:[#allocation8 + $0x6e4] sm:$0xf]  ;;  %v17777_v13 = vld [vmem:[#allocation8 + $0xf4] sm:$0xf] }
 0x14b   :  { %7014 = vmatpush.bf16.msrb.mxu0 %v14827_v57  ;;  %v18312_v57 = vld [vmem:[#allocation8 + $0x11a4] sm:$0xf0]  ;;  %v15787_v16 = vor.u32 %v18522_v36, %v15786_v55  ;;  %v19425_v10 = vld [vmem:[#allocation7] sm:$0xff] }
 0x14c   :  { %7028 = vmatpush.bf16.msrb.mxu1 %v15147_v34  ;;  %vm2049_vm11 = vcmp.gt.f32.partialorder %v1864_v20, 0.0  ;;  %v2069_v5 = vmul.f32 0.01, %v1864_v20  ;;  %v18402_v34 = vld [vmem:[#allocation8 + $0x1474] sm:$0xf0]  ;;  %v14947_v28 = vor.u32 %v18312_v57, %v14946_v9 }
 0x14d   :  { %7042 = vmatpush.bf16.msrb.mxu2 %v15467_v24  ;;  %v15307_v21 = vor.u32 %v18402_v34, %v15306_v14  ;;  %v1875_v24 = vpop.f32.mrf.mxu2  ;;  %v13548_v9 = vld [vmem:[#allocation8 + $0x6b8] sm:$0xf0]  ;;  %v13191_v34 = vor.u32 %v17867_v25, %v13188_v1  ;;  %v17937_v43 = vld [vmem:[#allocation8 + $0x5f4] sm:$0xf]  ;;  %v17927_v25 = vld [vmem:[#allocation8 + $0x5a4] sm:$0xf] }
 0x14e   :  { %v2089_v12 = vsel %vm2049_vm11, %v1864_v20, %v2069_v5  ;;  %v1876_v59 = vadd.f32 %v1875_v24, %v384_v56  ;;  %v12828_v14 = vld [vmem:[#allocation8 + $0x118] sm:$0xf0]  ;;  %v15706_v24 = vld [vmem:[#allocation8 + $0x1770] sm:$0xf] }
 0x14f   :  { %7015 = vmatpush.bf16.msrb.mxu0 %v14787_v15  ;;  %v19421_v60 = vpack.c.bf16 %v2089_v12, %v2079_v6  ;;  %v12991_v15 = vor.u32 %v17817_v3, %v12988_v7  ;;  %v15746_v3 = vld [vmem:[#allocation8 + $0x17c0] sm:$0xf]  ;;  %v17957_v6 = vld [vmem:[#allocation8 + $0x694] sm:$0xf]  ;;  %v12871_v7 = vor.u32 %v17787_v11, %v12868_v0  ;;  %v385_v12 = vperm.slane %v19425_v10, 7 }
 0x150   :  { %7029 = vmatpush.bf16.msrb.mxu1 %v15107_v30  ;;  %v12948_v30 = vld [vmem:[#allocation8 + $0x208] sm:$0xf0]  ;;  %v1890_v5 = vadd.f32 %v1889_v27, %v1876_v59  ;;  %v18502_v27 = vld [vmem:[#allocation8 + $0x1794] sm:$0xf0]  ;;  %v13468_v55 = vld [vmem:[#allocation8 + $0x618] sm:$0xf0] }
 0x151   :  { %7043 = vmatpush.bf16.msrb.mxu2 %v15427_v41  ;;  %7006 = vmatmul.bf16.vlgmr.msra.gmra.mxu3 %v19421_v60  ;;  %v15826_v41 = vld [vmem:[#allocation8 + $0x1860] sm:$0xf]  ;;  %v12951_v46 = vor.u32 %v17807_v29, %v12948_v30  ;;  %v12831_v29 = vor.u32 %v17777_v13, %v12828_v14  ;;  %v15707_v30 = vor.u32 %v18502_v27, %v15706_v24  ;;  %v13068_v11 = vld [vmem:[#allocation8 + $0x2f8] sm:$0xf0]  ;;  %v17917_v24 = vld [vmem:[#allocation8 + $0x554] sm:$0xf] }
 0x153   :  { %7016 = vmatpush.bf16.msrb.mxu0 %v14747_v39  ;;  %v15267_v39 = vor.u32 %v18392_v38, %v15266_v33  ;;  %v12788_v33 = vld [vmem:[#allocation8 + $0xc8] sm:$0xf0]  ;;  %v13151_v38 = vor.u32 %v17857_v26, %v13148_v19  ;;  %v15586_v19 = vld [vmem:[#allocation8 + $0x1680] sm:$0xf] }
 0x154   :  { %7030 = vmatpush.bf16.msrb.mxu1 %v15067_v47  ;;  %v15827_v47 = vor.u32 %v18532_v42, %v15826_v41  ;;  %v17757_v42 = vld [vmem:[#allocation8 + $0x54] sm:$0xf] }
 0x155   :  { %7044 = vmatpush.bf16.msrb.mxu2 %v15387_v23  ;;  %v13228_v23 = vld [vmem:[#allocation8 + $0x438] sm:$0xf0]  ;;  %v1877_v61 = vpop.f32.mrf.mxu2 }
 0x156   :  { %7055 = vmatpush.bf16.msrb.mxu3 %v15827_v47  ;;  %v18492_v47 = vld [vmem:[#allocation8 + $0x1744] sm:$0xf0] }
 0x157   :  { %7017 = vmatpush.bf16.msrb.mxu0 %v14707_v52  ;;  %v17877_v52 = vld [vmem:[#allocation8 + $0x414] sm:$0xf] }
 0x158   :  { %7031 = vmatpush.bf16.msrb.mxu1 %v15027_v31  ;;  %v13588_v31 = vld [vmem:[#allocation8 + $0x708] sm:$0xf0]  ;;  %v13231_v20 = vor.u32 %v17877_v52, %v13228_v23  ;;  %v12748_v52 = vld [vmem:[#allocation8 + $0x78] sm:$0xf0] }
 0x159   :  { %7045 = vmatpush.bf16.msrb.mxu2 %v15347_v4  ;;  %v13591_v37 = vor.u32 %v17967_v58, %v13588_v31  ;;  %v18512_v4 = vld [vmem:[#allocation8 + $0x17e4] sm:$0xf0]  ;;  %v17837_v31 = vld [vmem:[#allocation8 + $0x2d4] sm:$0xf] }
 0x15a   :  { %7056 = vmatpush.bf16.msrb.mxu3 %v15787_v16  ;;  %v13071_v13 = vor.u32 %v17837_v31, %v13068_v11  ;;  %v14548_v11 = vld [vmem:[#allocation8 + $0xe88] sm:$0xf0] }
 0x15b   :  { %7018 = vmatpush.bf16.msrb.mxu0 %v14667_v54  ;;  %v1891_v54 = vpop.f32.mrf.mxu3 }
 0x15c   :  { %7032 = vmatpush.bf16.msrb.mxu1 %v14987_v8  ;;  %v15747_v8 = vor.u32 %v18512_v4, %v15746_v3 }
 0x15d   :  { %7046 = vmatpush.bf16.msrb.mxu2 %v15307_v21  ;;  %v1878_v21 = vadd.f32 %v1877_v61, %v384_v56  ;;  %v13108_v56 = vld [vmem:[#allocation8 + $0x348] sm:$0xf0]  ;;  %v15626_v61 = vld [vmem:[#allocation8 + $0x16d0] sm:$0xf] }
 0x15e   :  { %7057 = vmatpush.bf16.msrb.mxu3 %v15747_v8  ;;  %v13111_v59 = vor.u32 %v17847_v45, %v13108_v56  ;;  %v12708_v8 = vld [vmem:[#allocation8 + $0x28] sm:$0xf0]  ;;  %v18217_v56 = vld [vmem:[#allocation8 + $0xeb4] sm:$0xf] }
 0x15f   :  { %7019 = vmatpush.bf16.msrb.mxu0 %v14627_v18  ;;  %v1903_v57 = vpop.f32.mrf.mxu0  ;;  %v13551_v18 = vor.u32 %v17957_v6, %v13548_v9  ;;  %v1892_v41 = vadd.f32 %v1891_v54, %v1878_v21  ;;  %v18482_v54 = vld [vmem:[#allocation8 + $0x16f4] sm:$0xf0]  ;;  %v13428_v6 = vld [vmem:[#allocation8 + $0x5c8] sm:$0xf0]  ;;  %v18137_v9 = vld [vmem:[#allocation8 + $0xc34] sm:$0xf] }
 0x160   :  { %7033 = vmatpush.bf16.msrb.mxu1 %v14947_v28  ;;  %v17947_v28 = vld [vmem:[#allocation8 + $0x644] sm:$0xf]  ;;  %v1904_v35 = vadd.f32 %v1903_v57, %v1890_v5  ;;  %v15627_v4 = vor.u32 %v18482_v54, %v15626_v61  ;;  %v14268_v57 = vld [vmem:[#allocation8 + $0xc58] sm:$0xf0]  ;;  %v13431_v14 = vor.u32 %v17927_v25, %v13428_v6  ;;  %v13028_v21 = vld [vmem:[#allocation8 + $0x2a8] sm:$0xf0] }
 0x161   :  { %7047 = vmatpush.bf16.msrb.mxu2 %v15267_v39  ;;  %v18107_v61 = vld [vmem:[#allocation8 + $0xb44] sm:$0xf]  ;;  %v14148_v54 = vld [vmem:[#allocation8 + $0xb68] sm:$0xf0]  ;;  %v19439_v25 = vld [vmem:[#allocation7 + $0x8] sm:$0x3] }
 0x162   :  { %7058 = vmatpush.bf16.msrb.mxu3 %v15707_v30  ;;  %v2060_v40 = vmul.f32 0.01, %v1904_v35  ;;  %vm2040_vm12 = vcmp.gt.f32.partialorder %v1904_v35, 0.0  ;;  %v14508_v6 = vld [vmem:[#allocation8 + $0xe38] sm:$0xf0] }
 0x163   :  { %7068 = vmatpush.bf16.msra.mxu0 %v12991_v15  ;;  %v1917_v15 = vpop.f32.mrf.mxu1 }
 0x164   :  { %7082 = vmatpush.bf16.msra.mxu1 %v13311_v17  ;;  %v13508_v17 = vld [vmem:[#allocation8 + $0x668] sm:$0xf0]  ;;  %v1918_v22 = vadd.f32 %v1917_v15, %v385_v12  ;;  %v2080_v1 = vsel %vm2040_vm12, %v1904_v35, %v2060_v40  ;;  %v18472_v15 = vld [vmem:[#allocation8 + $0x16a4] sm:$0xf0] }
 0x165   :  { %7096 = vmatpush.bf16.msra.mxu2 %v13631_v51  ;;  %v13511_v39 = vor.u32 %v17947_v28, %v13508_v17  ;;  %v12791_v51 = vor.u32 %v17767_v32, %v12788_v33  ;;  %v15587_v35 = vor.u32 %v18472_v15, %v15586_v19  ;;  %v18057_v33 = vld [vmem:[#allocation8 + $0x9b4] sm:$0xf]  ;;  %v14468_v15 = vld [vmem:[#allocation8 + $0xde8] sm:$0xf0] }
 0x167   :  { %7069 = vmatpush.bf16.msra.mxu0 %v12951_v46  ;;  %v15666_v46 = vld [vmem:[#allocation8 + $0x1720] sm:$0xf]  ;;  %v1931_v44 = vpop.f32.mrf.mxu2  ;;  %v1905_v58 = vpop.f32.mrf.mxu0 }
 0x168   :  { %7083 = vmatpush.bf16.msra.mxu1 %v13271_v49  ;;  %v15667_v23 = vor.u32 %v18492_v47, %v15666_v46  ;;  %v1932_v36 = vadd.f32 %v1931_v44, %v1918_v22  ;;  %v1906_v16 = vadd.f32 %v1905_v58, %v1892_v41  ;;  %v14228_v41 = vld [vmem:[#allocation8 + $0xc08] sm:$0xf0]  ;;  %v17907_v46 = vld [vmem:[#allocation8 + $0x504] sm:$0xf] }
 0x169   :  { %7097 = vmatpush.bf16.msra.mxu2 %v13591_v37  ;;  %v1945_v49 = vpop.f32.mrf.mxu3  ;;  %v17747_v37 = vld [vmem:[#allocation8 + $0x4] sm:$0xf]  ;;  %v13348_v47 = vld [vmem:[#allocation8 + $0x528] sm:$0xf0] }
 0x16a   :  { %7059 = vmatpush.bf16.msrb.mxu3 %v15667_v23  ;;  %vm2050_vm13 = vcmp.gt.f32.partialorder %v1906_v16, 0.0  ;;  %v2070_v3 = vmul.f32 0.01, %v1906_v16  ;;  %v1946_v5 = vadd.f32 %v1945_v49, %v1932_v36  ;;  %v12711_v10 = vor.u32 %v17747_v37, %v12708_v8  ;;  %v18047_v44 = vld [vmem:[#allocation8 + $0x964] sm:$0xf] }
 0x16b   :  { %7070 = vmatpush.bf16.msra.mxu0 %v12911_v63  ;;  %v13471_v63 = vor.u32 %v17937_v43, %v13468_v55  ;;  %v1919_v0 = vpop.f32.mrf.mxu1  ;;  %v14588_v43 = vld [vmem:[#allocation8 + $0xed8] sm:$0xf0]  ;;  %v13351_v40 = vor.u32 %v17907_v46, %v13348_v47  ;;  %v13908_v49 = vld [vmem:[#allocation8 + $0x988] sm:$0xf0]  ;;  %v18117_v55 = vld [vmem:[#allocation8 + $0xb94] sm:$0xf]  ;;  %v14151_v8 = vor.u32 %v18107_v61, %v14148_v54 }
 0x16c   :  { %7084 = vmatpush.bf16.msra.mxu1 %v13231_v20  ;;  %v12751_v20 = vor.u32 %v17757_v42, %v12748_v52  ;;  %v2061_v30 = vmul.f32 0.01, %v1946_v5  ;;  %vm2041_vm14 = vcmp.gt.f32.partialorder %v1946_v5, 0.0  ;;  %v14188_v36 = vld [vmem:[#allocation8 + $0xbb8] sm:$0xf0]  ;;  %v13911_v58 = vor.u32 %v18047_v44, %v13908_v49 }
 0x16d   :  { %7098 = vmatpush.bf16.msra.mxu2 %v13551_v18  ;;  %v17827_v18 = vld [vmem:[#allocation8 + $0x284] sm:$0xf]  ;;  %v14191_v37 = vor.u32 %v18117_v55, %v14188_v36  ;;  %v14388_v49 = vld [vmem:[#allocation8 + $0xd48] sm:$0xf0]  ;;  %v13708_v55 = vld [vmem:[#allocation8 + $0x7f8] sm:$0xf0] }
 0x16e   :  { %7060 = vmatpush.bf16.msrb.mxu3 %v15627_v4  ;;  %v13031_v22 = vor.u32 %v17827_v18, %v13028_v21  ;;  %v18197_v4 = vld [vmem:[#allocation8 + $0xe14] sm:$0xf]  ;;  %v18187_v18 = vld [vmem:[#allocation8 + $0xdc4] sm:$0xf] }
 0x16f   :  { %7071 = vmatpush.bf16.msra.mxu0 %v12871_v7  ;;  %v1920_v7 = vadd.f32 %v1919_v0, %v385_v12  ;;  %v1933_v27 = vpop.f32.mrf.mxu2  ;;  %v14271_v12 = vor.u32 %v18137_v9, %v14268_v57  ;;  %v18037_v0 = vld [vmem:[#allocation8 + $0x914] sm:$0xf]  ;;  %v386_v9 = vperm.slane %v19439_v25, 0  ;;  %v18167_v44 = vld [vmem:[#allocation8 + $0xd24] sm:$0xf] }
 0x170   :  { %7085 = vmatpush.bf16.msra.mxu1 %v13191_v34  ;;  %v2090_v34 = vsel %vm2050_vm13, %v1906_v16, %v2070_v3  ;;  %v18207_v16 = vld [vmem:[#allocation8 + $0xe64] sm:$0xf]  ;;  %v18097_v57 = vld [vmem:[#allocation8 + $0xaf4] sm:$0xf] }
 0x171   :  { %7099 = vmatpush.bf16.msra.mxu2 %v13511_v39  ;;  %v19433_v26 = vpack.c.bf16 %v2090_v34, %v2080_v1  ;;  %v1947_v28 = vpop.f32.mrf.mxu3  ;;  %v1934_v17 = vadd.f32 %v1933_v27, %v1920_v7  ;;  %v18127_v39 = vld [vmem:[#allocation8 + $0xbe4] sm:$0xf]  ;;  %v14551_v3 = vor.u32 %v18207_v16, %v14548_v11  ;;  %v13828_v7 = vld [vmem:[#allocation8 + $0x8e8] sm:$0xf0]  ;;  %v14511_v34 = vor.u32 %v18197_v4, %v14508_v6  ;;  %v13788_v27 = vld [vmem:[#allocation8 + $0x898] sm:$0xf0] }
 0x172   :  { %7061 = vmatpush.bf16.msrb.mxu3 %v15587_v35  ;;  %v14231_v23 = vor.u32 %v18127_v39, %v14228_v41  ;;  %v14068_v35 = vld [vmem:[#allocation8 + $0xac8] sm:$0xf0]  ;;  %v18067_v36 = vld [vmem:[#allocation8 + $0xa04] sm:$0xf]  ;;  %v14391_v11 = vor.u32 %v18167_v44, %v14388_v49  ;;  %v18517_v44 = vld [vmem:[#allocation8 + $0x1814] sm:$0xf] }
 0x173   :  { %7072 = vmatpush.bf16.msra.mxu0 %v12831_v29  ;;  %v13388_v29 = vld [vmem:[#allocation8 + $0x578] sm:$0xf0]  ;;  %v1948_v45 = vadd.f32 %v1947_v28, %v1934_v17  ;;  %v18177_v17 = vld [vmem:[#allocation8 + $0xd74] sm:$0xf]  ;;  %v17987_v54 = vld [vmem:[#allocation8 + $0x784] sm:$0xf] }
 0x174   :  { %7086 = vmatpush.bf16.msra.mxu1 %v13151_v38  ;;  %7020 = vmatmul.bf16.vlgmr.msrb.gmra.mxu0 %v19433_v26  ;;  %v13391_v32 = vor.u32 %v17917_v24, %v13388_v29  ;;  %v13948_v38 = vld [vmem:[#allocation8 + $0x9d8] sm:$0xf0]  ;;  %v18017_v24 = vld [vmem:[#allocation8 + $0x874] sm:$0xf] }
 0x175   :  { %7100 = vmatpush.bf16.msra.mxu2 %v13471_v63  ;;  %v13951_v42 = vor.u32 %v18057_v33, %v13948_v38  ;;  %vm2051_vm15 = vcmp.gt.f32.partialorder %v1948_v45, 0.0  ;;  %v2071_v52 = vmul.f32 0.01, %v1948_v45  ;;  %v14591_v63 = vor.u32 %v18217_v56, %v14588_v43  ;;  %v18007_v33 = vld [vmem:[#allocation8 + $0x824] sm:$0xf] }
 0x176   :  { %v13791_v29 = vor.u32 %v18017_v24, %v13788_v27  ;;  %v13748_v38 = vld [vmem:[#allocation8 + $0x848] sm:$0xf0]  ;;  %v18537_v24 = vld [vmem:[#allocation8 + $0x18b4] sm:$0xf]  ;;  %v15868_v27 = vld [vmem:[#allocation8 + $0x18d8] sm:$0xf0] }
 0x177   :  { %7073 = vmatpush.bf16.msra.mxu0 %v12791_v51  ;;  %v2081_v51 = vsel %vm2041_vm14, %v1946_v5, %v2061_v30  ;;  %7110 = vmatpush.bf16.msra.mxu3 %v13951_v42  ;;  %v18027_v5 = vld [vmem:[#allocation8 + $0x8c4] sm:$0xf]  ;;  %v14471_v30 = vor.u32 %v18187_v18, %v14468_v15  ;;  %v18077_v42 = vld [vmem:[#allocation8 + $0xa54] sm:$0xf]  ;;  %v13751_v56 = vor.u32 %v18007_v33, %v13748_v38  ;;  %v15788_v49 = vld [vmem:[#allocation8 + $0x1838] sm:$0xf0] }
 0x178   :  { %7087 = vmatpush.bf16.msra.mxu1 %v13111_v59  ;;  %v2091_v59 = vsel %vm2051_vm15, %v1948_v45, %v2071_v52  ;;  %v14028_v45 = vld [vmem:[#allocation8 + $0xa78] sm:$0xf0]  ;;  %v15871_v33 = vor.u32 %v18537_v24, %v15868_v27  ;;  %v18527_v38 = vld [vmem:[#allocation8 + $0x1864] sm:$0xf]  ;;  %v18397_v24 = vld [vmem:[#allocation8 + $0x1454] sm:$0xf] }
 0x179   :  { %7101 = vmatpush.bf16.msra.mxu2 %v13431_v14  ;;  %v19436_v31 = vpack.c.bf16 %v2091_v59, %v2081_v51  ;;  %v13831_v14 = vor.u32 %v18027_v5, %v13828_v7  ;;  %v17997_v51 = vld [vmem:[#allocation8 + $0x7d4] sm:$0xf]  ;;  %v15308_v27 = vld [vmem:[#allocation8 + $0x1478] sm:$0xf0] }
 0x17a   :  { %v18457_v59 = vld [vmem:[#allocation8 + $0x1634] sm:$0xf] }
 0x17b   :  { %7074 = vmatpush.bf16.msra.mxu0 %v12751_v20  ;;  %v13868_v20 = vld [vmem:[#allocation8 + $0x938] sm:$0xf0]  ;;  %7034 = vmatmul.bf16.vlgmr.msrb.gmra.mxu1 %v19436_v31  ;;  %v18297_v7 = vld [vmem:[#allocation8 + $0x1134] sm:$0xf] }
 0x17c   :  { %7088 = vmatpush.bf16.msra.mxu1 %v13071_v13  ;;  %7111 = vmatpush.bf16.msra.mxu3 %v13911_v58  ;;  %v13871_v1 = vor.u32 %v18037_v0, %v13868_v20  ;;  %v14108_v13 = vld [vmem:[#allocation8 + $0xb18] sm:$0xf0]  ;;  %v13988_v58 = vld [vmem:[#allocation8 + $0xa28] sm:$0xf0]  ;;  %v18157_v20 = vld [vmem:[#allocation8 + $0xcd4] sm:$0xf] }
 0x17d   :  { %7102 = vmatpush.bf16.msra.mxu2 %v13391_v32  ;;  %v14428_v32 = vld [vmem:[#allocation8 + $0xd98] sm:$0xf0]  ;;  %v13991_v4 = vor.u32 %v18067_v36, %v13988_v58  ;;  %v14788_v36 = vld [vmem:[#allocation8 + $0x1068] sm:$0xf0]  ;;  %v18417_v58 = vld [vmem:[#allocation8 + $0x14f4] sm:$0xf] }
 0x17e   :  { %v14431_v46 = vor.u32 %v18177_v17, %v14428_v32  ;;  %v15548_v0 = vld [vmem:[#allocation8 + $0x1658] sm:$0xf0]  ;;  %v14868_v17 = vld [vmem:[#allocation8 + $0x1108] sm:$0xf0] }
 0x17f   :  { %7075 = vmatpush.bf16.msra.mxu0 %v12711_v10  ;;  %v1959_v21 = vpop.f32.mrf.mxu0  ;;  %v14111_v10 = vor.u32 %v18097_v57, %v14108_v13  ;;  %v15551_v5 = vor.u32 %v18457_v59, %v15548_v0  ;;  %v18447_v13 = vld [vmem:[#allocation8 + $0x15e4] sm:$0xf]  ;;  %v15468_v32 = vld [vmem:[#allocation8 + $0x15b8] sm:$0xf0] }
 0x180   :  { %7089 = vmatpush.bf16.msra.mxu1 %v13031_v22  ;;  %7112 = vmatpush.bf16.msra.mxu3 %v13871_v1  ;;  %v1973_v19 = vpop.f32.mrf.mxu1  ;;  %v1960_v28 = vadd.f32 %v1959_v21, %v386_v9  ;;  %v13668_v1 = vld [vmem:[#allocation8 + $0x7a8] sm:$0xf0]  ;;  %v15388_v59 = vld [vmem:[#allocation8 + $0x1518] sm:$0xf0]  ;;  %v19450_v0 = vld [vmem:[#allocation10] sm:$0xff] }
 0x181   :  { %7103 = vmatpush.bf16.msra.mxu2 %v13351_v40 }
 0x182   :  { %v1974_v22 = vadd.f32 %v1973_v19, %v1960_v28  ;;  %v14308_v19 = vld [vmem:[#allocation8 + $0xca8] sm:$0xf0] }
 0x183   :  { %7124 = vmatpush.bf16.msrb.mxu0 %v14271_v12  ;;  %v18087_v12 = vld [vmem:[#allocation8 + $0xaa4] sm:$0xf] }
 0x184   :  { %7138 = vmatpush.bf16.msrb.mxu1 %v14591_v63  ;;  %7076 = vmatmul.bf16.vlgmr.msra.gmra.mxu0 %v19356_v48  ;;  %v14071_v41 = vor.u32 %v18087_v12, %v14068_v35  ;;  %v13711_v63 = vor.u32 %v17997_v51, %v13708_v55  ;;  %v18287_v35 = vld [vmem:[#allocation8 + $0x10e4] sm:$0xf] }
 0x185   :  { %7113 = vmatpush.bf16.msra.mxu3 %v13831_v14  ;;  %v15508_v14 = vld [vmem:[#allocation8 + $0x1608] sm:$0xf0] }
 0x186   :  { %v15511_v12 = vor.u32 %v18447_v13, %v15508_v14 }
 0x187   :  { %7125 = vmatpush.bf16.msrb.mxu0 %v14231_v23  ;;  %v1987_v39 = vpop.f32.mrf.mxu2  ;;  %v1961_v43 = vpop.f32.mrf.mxu0  ;;  %v14031_v23 = vor.u32 %v18077_v42, %v14028_v45  ;;  %v14871_v42 = vor.u32 %v18287_v35, %v14868_v17  ;;  %v18487_v17 = vld [vmem:[#allocation8 + $0x1724] sm:$0xf] }
 0x188   :  { %7139 = vmatpush.bf16.msrb.mxu1 %v14551_v3  ;;  %v1988_v47 = vadd.f32 %v1987_v39, %v1974_v22  ;;  %v1975_v40 = vpop.f32.mrf.mxu1  ;;  %v1962_v52 = vadd.f32 %v1961_v43, %v386_v9  ;;  %v13671_v9 = vor.u32 %v17987_v54, %v13668_v1  ;;  %v18437_v22 = vld [vmem:[#allocation8 + $0x1594] sm:$0xf]  ;;  %v15828_v39 = vld [vmem:[#allocation8 + $0x1888] sm:$0xf0]  ;;  %v15391_v54 = vor.u32 %v18417_v58, %v15388_v59  ;;  %v18227_v58 = vld [vmem:[#allocation8 + $0xf04] sm:$0xf] }
 0x189   :  { %7114 = vmatpush.bf16.msra.mxu3 %v13791_v29  ;;  %v2001_v15 = vpop.f32.mrf.mxu3  ;;  %v15471_v45 = vor.u32 %v18437_v22, %v15468_v32  ;;  %v15428_v43 = vld [vmem:[#allocation8 + $0x1568] sm:$0xf0]  ;;  %v18257_v1 = vld [vmem:[#allocation8 + $0xff4] sm:$0xf] }
 0x18a   :  { %v1976_v16 = vadd.f32 %v1975_v40, %v1962_v52  ;;  %v2062_v61 = vmul.f32 0.01, %v1988_v47  ;;  %vm2042_vm0 = vcmp.gt.f32.partialorder %v1988_v47, 0.0  ;;  %v15831_v40 = vor.u32 %v18527_v38, %v15828_v39  ;;  %v15668_v22 = vld [vmem:[#allocation8 + $0x1748] sm:$0xf0] }
 0x18b   :  { %7126 = vmatpush.bf16.msrb.mxu0 %v14191_v37  ;;  %7090 = vmatmul.bf16.vlgmr.msra.gmra.mxu1 %v19358_v53  ;;  %v14348_v37 = vld [vmem:[#allocation8 + $0xcf8] sm:$0xf0]  ;;  %v18237_v32 = vld [vmem:[#allocation8 + $0xf54] sm:$0xf] }
 0x18c   :  { %7140 = vmatpush.bf16.msrb.mxu1 %v14511_v34  ;;  %v14351_v57 = vor.u32 %v18157_v20, %v14348_v37  ;;  %v18147_v34 = vld [vmem:[#allocation8 + $0xc84] sm:$0xf]  ;;  %v2082_v18 = vsel %vm2042_vm0, %v1988_v47, %v2062_v61  ;;  %v15748_v37 = vld [vmem:[#allocation8 + $0x17e8] sm:$0xf0] }
 0x18d   :  { %7115 = vmatpush.bf16.msra.mxu3 %v13751_v56  ;;  %v18277_v56 = vld [vmem:[#allocation8 + $0x1094] sm:$0xf]  ;;  %v18427_v47 = vld [vmem:[#allocation8 + $0x1544] sm:$0xf] }
 0x18e   :  { %v15431_v52 = vor.u32 %v18427_v47, %v15428_v43  ;;  %v18507_v20 = vld [vmem:[#allocation8 + $0x17c4] sm:$0xf]  ;;  %v18377_v43 = vld [vmem:[#allocation8 + $0x13b4] sm:$0xf] }
 0x18f   :  { %7127 = vmatpush.bf16.msrb.mxu0 %v14151_v8  ;;  %v1989_v3 = vpop.f32.mrf.mxu2  ;;  %v14908_v8 = vld [vmem:[#allocation8 + $0x1158] sm:$0xf0] }
 0x190   :  { %7141 = vmatpush.bf16.msrb.mxu1 %v14471_v30  ;;  %v1990_v6 = vadd.f32 %v1989_v3, %v1976_v16  ;;  %v14311_v30 = vor.u32 %v18147_v34, %v14308_v19  ;;  %v15791_v16 = vor.u32 %v18517_v44, %v15788_v49  ;;  %v18247_v34 = vld [vmem:[#allocation8 + $0xfa4] sm:$0xf]  ;;  %v13634_v44 = vld [vmem:[#allocation8 + $0x738] sm:$0xf]  ;;  %v15671_v49 = vor.u32 %v18487_v17, %v15668_v22  ;;  %v18053_v17 = vld [vmem:[#allocation8 + $0x98c] sm:$0xf0] }
 0x191   :  { %7116 = vmatpush.bf16.msra.mxu3 %v13711_v63 }
 0x192   :  { %vm2052_vm1 = vcmp.gt.f32.partialorder %v1990_v6, 0.0  ;;  %v2072_v21 = vmul.f32 0.01, %v1990_v6 }
 0x193   :  { %7128 = vmatpush.bf16.msrb.mxu0 %v14111_v10  ;;  %v14911_v10 = vor.u32 %v18297_v7, %v14908_v8  ;;  %v20205_v7 = vperm.slane %v19450_v0, 0  ;;  %v15751_v8 = vor.u32 %v18507_v20, %v15748_v37  ;;  %v18367_v20 = vld [vmem:[#allocation8 + $0x1364] sm:$0xf]  ;;  %v12994_v37 = vld [vmem:[#allocation8 + $0x238] sm:$0xf] }
 0x194   :  { %7142 = vmatpush.bf16.msrb.mxu1 %v14431_v46  ;;  %v2092_v28 = vsel %vm2052_vm1, %v1990_v6, %v2072_v21  ;;  %v14828_v46 = vld [vmem:[#allocation8 + $0x10b8] sm:$0xf0]  ;;  %v18407_v6 = vld [vmem:[#allocation8 + $0x14a4] sm:$0xf] }
 0x195   :  { %7117 = vmatpush.bf16.msra.mxu3 %v13671_v9  ;;  %v19444_v29 = vpack.c.bf16 %v2092_v28, %v2082_v18  ;;  %v14831_v51 = vor.u32 %v18277_v56, %v14828_v46  ;;  %v18497_v9 = vld [vmem:[#allocation8 + $0x1774] sm:$0xf]  ;;  %v15268_v56 = vld [vmem:[#allocation8 + $0x1428] sm:$0xf0] }
 0x197   :  { %7129 = vmatpush.bf16.msrb.mxu0 %v14071_v41  ;;  %7048 = vmatmul.bf16.vlgmr.msrb.gmra.mxu2 %v19444_v29  ;;  %v387_v41 = vperm.slane %v19439_v25, 1  ;;  %v2003_v25 = vpop.f32.mrf.mxu3 }
 0x198   :  { %7143 = vmatpush.bf16.msrb.mxu1 %v14391_v11  ;;  %7152 = vmatpush.bf16.msrb.mxu2 %v14911_v10 }
 0x199   :  { %v2002_v55 = vadd.f32 %v2001_v15, %v387_v41  ;;  %v2004_v18 = vadd.f32 %v2003_v25, %v387_v41  ;;  %v14708_v15 = vld [vmem:[#allocation8 + $0xfc8] sm:$0xf0]  ;;  %v15311_v41 = vor.u32 %v18397_v24, %v15308_v27  ;;  %v12954_v24 = vld [vmem:[#allocation8 + $0x1e8] sm:$0xf]  ;;  %v17813_v27 = vld [vmem:[#allocation8 + $0x20c] sm:$0xf0] }
 0x19a   :  { %v14711_v39 = vor.u32 %v18247_v34, %v14708_v15  ;;  %v18357_v15 = vld [vmem:[#allocation8 + $0x1314] sm:$0xf]  ;;  %v12955_v22 = vor.u32 %v17813_v27, %v12954_v24  ;;  %v12794_v27 = vld [vmem:[#allocation8 + $0xa8] sm:$0xf] }
 0x19b   :  { %7130 = vmatpush.bf16.msrb.mxu0 %v14031_v23  ;;  %v18267_v23 = vld [vmem:[#allocation8 + $0x1044] sm:$0xf]  ;;  %v18317_v24 = vld [vmem:[#allocation8 + $0x11d4] sm:$0xf] }
 0x19c   :  { %7144 = vmatpush.bf16.msrb.mxu1 %v14351_v57  ;;  %7153 = vmatpush.bf16.msrb.mxu2 %v14871_v42  ;;  %v14791_v61 = vor.u32 %v18267_v23, %v14788_v36  ;;  %v15708_v57 = vld [vmem:[#allocation8 + $0x1798] sm:$0xf0] }
 0x19d   :  { %v14668_v42 = vld [vmem:[#allocation8 + $0xf78] sm:$0xf0] }
 0x19e   :  { %v14671_v25 = vor.u32 %v18237_v32, %v14668_v42  ;;  %v17803_v42 = vld [vmem:[#allocation8 + $0x1bc] sm:$0xf0] }
 0x19f   :  { %7131 = vmatpush.bf16.msrb.mxu0 %v13991_v4  ;;  %v2015_v63 = vpop.f32.mrf.mxu0  ;;  %v14748_v4 = vld [vmem:[#allocation8 + $0x1018] sm:$0xf0] }
 0x1a0   :  { %7145 = vmatpush.bf16.msrb.mxu1 %v14311_v30  ;;  %v2029_v11 = vpop.f32.mrf.mxu1  ;;  %7154 = vmatpush.bf16.msrb.mxu2 %v14831_v51  ;;  %v2016_v3 = vadd.f32 %v2015_v63, %v2002_v55  ;;  %v14751_v13 = vor.u32 %v18257_v1, %v14748_v4  ;;  %v17983_v51 = vld [vmem:[#allocation8 + $0x75c] sm:$0xf0]  ;;  %v15628_v55 = vld [vmem:[#allocation8 + $0x16f8] sm:$0xf0]  ;;  %v13594_v4 = vld [vmem:[#allocation8 + $0x6e8] sm:$0xf] }
 0x1a2   :  { %7132 = vmatmul.bf16.vlgmr.msrb.gmra.mxu0 %v19415_v50  ;;  %v2030_v21 = vadd.f32 %v2029_v11, %v2016_v3  ;;  %v14628_v11 = vld [vmem:[#allocation8 + $0xf28] sm:$0xf0]  ;;  %v17823_v3 = vld [vmem:[#allocation8 + $0x25c] sm:$0xf0] }
 0x1a3   :  { %7180 = vmatpush.bf16.msra.mxu0 %v15551_v5  ;;  %7146 = vmatmul.bf16.vlgmr.msrb.gmra.mxu1 %v19421_v60  ;;  %v15348_v5 = vld [vmem:[#allocation8 + $0x14c8] sm:$0xf0]  ;;  %v12995_v34 = vor.u32 %v17823_v3, %v12994_v37 }
 0x1a4   :  { %7194 = vmatpush.bf16.msra.mxu1 %v15871_v33  ;;  %7155 = vmatpush.bf16.msrb.mxu2 %v14791_v61  ;;  %v15351_v14 = vor.u32 %v18407_v6, %v15348_v5  ;;  %v2063_v46 = vmul.f32 0.01, %v2030_v21  ;;  %vm2043_vm2 = vcmp.gt.f32.partialorder %v2030_v21, 0.0  ;;  %v17973_v6 = vld [vmem:[#allocation8 + $0x70c] sm:$0xf0] }
 0x1a5   :  { %v15188_v5 = vld [vmem:[#allocation8 + $0x1388] sm:$0xf0] }
 0x1a6   :  { %v2083_v59 = vsel %vm2043_vm2, %v2030_v21, %v2063_v46  ;;  %v15191_v21 = vor.u32 %v18367_v20, %v15188_v5  ;;  %v13514_v46 = vld [vmem:[#allocation8 + $0x648] sm:$0xf]  ;;  %v12834_v5 = vld [vmem:[#allocation8 + $0xf8] sm:$0xf] }
 0x1a7   :  { %7181 = vmatpush.bf16.msra.mxu0 %v15511_v12  ;;  %v6937_v19 = vpop.f32.mrf.mxu2  ;;  %v2017_v10 = vpop.f32.mrf.mxu0  ;;  %v15711_v12 = vor.u32 %v18497_v9, %v15708_v57  ;;  %7104 = vmatmul.bf16.vlgmr.msra.gmra.mxu2 %v19411_v62  ;;  %v15588_v9 = vld [vmem:[#allocation8 + $0x16a8] sm:$0xf0]  ;;  %v14631_v57 = vor.u32 %v18227_v58, %v14628_v11  ;;  %v13474_v58 = vld [vmem:[#allocation8 + $0x5f8] sm:$0xf]  ;;  %v18033_v11 = vld [vmem:[#allocation8 + $0x8ec] sm:$0xf0] }
 0x1a8   :  { %7195 = vmatpush.bf16.msra.mxu1 %v15831_v40  ;;  %v6938_v28 = vadd.f32 %v6937_v19, %v20205_v7  ;;  %v6951_v35 = vpop.f32.mrf.mxu3  ;;  %v2018_v30 = vadd.f32 %v2017_v10, %v2004_v18  ;;  %v2031_v38 = vpop.f32.mrf.mxu1  ;;  %7156 = vmatpush.bf16.msrb.mxu2 %v14751_v13  ;;  %v15228_v40 = vld [vmem:[#allocation8 + $0x13d8] sm:$0xf0]  ;;  %v13954_v13 = vld [vmem:[#allocation8 + $0x9b8] sm:$0xf]  ;;  %v13595_v18 = vor.u32 %v17973_v6, %v13594_v4  ;;  %v18327_v6 = vld [vmem:[#allocation8 + $0x1224] sm:$0xf] }
 0x1a9   :  { %v15148_v10 = vld [vmem:[#allocation8 + $0x1338] sm:$0xf0]  ;;  %v14722_v7 = vld [vmem:[#allocation8 + $0xfb0] sm:$0xf] }
 0x1aa   :  { %v19456_v33 = vadd.f32 %v6951_v35, %v6938_v28  ;;  %v2032_v47 = vadd.f32 %v2031_v38, %v2018_v30  ;;  %v17963_v35 = vld [vmem:[#allocation8 + $0x6bc] sm:$0xf0]  ;;  %v13914_v30 = vld [vmem:[#allocation8 + $0x968] sm:$0xf]  ;;  %v15151_v32 = vor.u32 %v18357_v15, %v15148_v10 }
 0x1ab   :  { %7182 = vmatpush.bf16.msra.mxu0 %v15471_v45  ;;  %v18387_v45 = vld [vmem:[#allocation8 + $0x1404] sm:$0xf] }
 0x1ac   :  { %7196 = vmatpush.bf16.msra.mxu1 %v15791_v16  ;;  %vm2053_vm3 = vcmp.gt.f32.partialorder %v2032_v47, 0.0  ;;  %v2073_v23 = vmul.f32 0.01, %v2032_v47  ;;  %7157 = vmatpush.bf16.msrb.mxu2 %v14711_v39  ;;  %v15271_v36 = vor.u32 %v18387_v45, %v15268_v56  ;;  %v13635_v16 = vor.u32 %v17983_v51, %v13634_v44  ;;  %v18347_v39 = vld [vmem:[#allocation8 + $0x12c4] sm:$0xf] }
 0x1ad   :  { %v13915_v45 = vor.u32 %v18053_v17, %v13914_v30  ;;  %v15108_v56 = vld [vmem:[#allocation8 + $0x12e8] sm:$0xf0]  ;;  %v17923_v30 = vld [vmem:[#allocation8 + $0x57c] sm:$0xf0]  ;;  %v13754_v17 = vld [vmem:[#allocation8 + $0x828] sm:$0xf] }
 0x1ae   :  { %v2093_v63 = vsel %vm2053_vm3, %v2032_v47, %v2073_v23  ;;  %v17953_v47 = vld [vmem:[#allocation8 + $0x66c] sm:$0xf0]  ;;  %v12874_v23 = vld [vmem:[#allocation8 + $0x148] sm:$0xf] }
 0x1af   :  { %7183 = vmatpush.bf16.msra.mxu0 %v15431_v52  ;;  %v18477_v52 = vld [vmem:[#allocation8 + $0x16d4] sm:$0xf]  ;;  %v19458_v61 = vpack.c.bf16 %v2093_v63, %v2083_v59  ;;  %v13515_v51 = vor.u32 %v17953_v47, %v13514_v46  ;;  %v17943_v59 = vld [vmem:[#allocation8 + $0x61c] sm:$0xf0]  ;;  %v19464_v20 = vpop.f32.mrf.mxu2  ;;  %v12754_v46 = vld [vmem:[#allocation8 + $0x58] sm:$0xf] }
 0x1b0   :  { %7197 = vmatpush.bf16.msra.mxu1 %v15751_v8  ;;  %v15631_v1 = vor.u32 %v18477_v52, %v15628_v55  ;;  %v18467_v8 = vld [vmem:[#allocation8 + $0x1684] sm:$0xf]  ;;  %7158 = vmatpush.bf16.msrb.mxu2 %v14671_v25  ;;  %v18337_v52 = vld [vmem:[#allocation8 + $0x1274] sm:$0xf]  ;;  %v17793_v55 = vld [vmem:[#allocation8 + $0x16c] sm:$0xf0]  ;;  %v13475_v4 = vor.u32 %v17943_v59, %v13474_v58 }
 0x1b1   :  { %7062 = vmatmul.bf16.vlgmr.msrb.gmra.mxu3 %v19458_v61  ;;  %v15591_v19 = vor.u32 %v18467_v8, %v15588_v9  ;;  %v17783_v8 = vld [vmem:[#allocation8 + $0x11c] sm:$0xf0] }
 0x1b2   :  { %v17763_v47 = vld [vmem:[#allocation8 + $0x7c] sm:$0xf0] }
 0x1b3   :  { %7184 = vmatpush.bf16.msra.mxu0 %v15391_v54  ;;  %v15231_v54 = vor.u32 %v18377_v43, %v15228_v40  ;;  %v13874_v43 = vld [vmem:[#allocation8 + $0x918] sm:$0xf]  ;;  %v18043_v40 = vld [vmem:[#allocation8 + $0x93c] sm:$0xf0] }
 0x1b4   :  { %7198 = vmatpush.bf16.msra.mxu1 %v15711_v12  ;;  %v13554_v12 = vld [vmem:[#allocation8 + $0x698] sm:$0xf]  ;;  %7159 = vmatpush.bf16.msrb.mxu2 %v14631_v57  ;;  %v13875_v25 = vor.u32 %v18043_v40, %v13874_v43  ;;  %v13354_v40 = vld [vmem:[#allocation8 + $0x508] sm:$0xf] }
 0x1b5   :  { %7166 = vmatpush.bf16.msrb.mxu3 %v15231_v54  ;;  %v13555_v38 = vor.u32 %v17963_v35, %v13554_v12  ;;  %v12875_v54 = vor.u32 %v17793_v55, %v12874_v23  ;;  %v14988_v12 = vld [vmem:[#allocation8 + $0x11f8] sm:$0xf0]  ;;  %v13394_v35 = vld [vmem:[#allocation8 + $0x558] sm:$0xf]  ;;  %v18303_v23 = vld [vmem:[#allocation8 + $0x115c] sm:$0xf0]  ;;  %v12755_v55 = vor.u32 %v17763_v47, %v12754_v46 }
 0x1b6   :  { %v18123_v47 = vld [vmem:[#allocation8 + $0xbbc] sm:$0xf0] }
 0x1b7   :  { %7185 = vmatpush.bf16.msra.mxu0 %v15351_v14  ;;  %v18063_v14 = vld [vmem:[#allocation8 + $0x9dc] sm:$0xf0]  ;;  %7160 = vmatmul.bf16.vlgmr.msrb.gmra.mxu2 %v19433_v26 }
 0x1b8   :  { %7199 = vmatpush.bf16.msra.mxu1 %v15671_v49  ;;  %v13955_v28 = vor.u32 %v18063_v14, %v13954_v13  ;;  %7208 = vmatpush.bf16.msra.mxu2 %v12995_v34  ;;  %v15111_v49 = vor.u32 %v18347_v39, %v15108_v56  ;;  %v15028_v13 = vld [vmem:[#allocation8 + $0x1248] sm:$0xf0]  ;;  %v13434_v14 = vld [vmem:[#allocation8 + $0x5a8] sm:$0xf]  ;;  %v17933_v34 = vld [vmem:[#allocation8 + $0x5cc] sm:$0xf0] }
 0x1b9   :  { %7167 = vmatpush.bf16.msrb.mxu3 %v15191_v21  ;;  %v18023_v21 = vld [vmem:[#allocation8 + $0x89c] sm:$0xf0]  ;;  %v13435_v15 = vor.u32 %v17933_v34, %v13434_v14  ;;  %v18307_v39 = vld [vmem:[#allocation8 + $0x1184] sm:$0xf]  ;;  %v14948_v56 = vld [vmem:[#allocation8 + $0x11a8] sm:$0xf0] }
 0x1ba   :  { %v14951_v58 = vor.u32 %v18307_v39, %v14948_v56  ;;  %v15234_v14 = vld [vmem:[#allocation8 + $0x13b8] sm:$0xf]  ;;  %v18383_v34 = vld [vmem:[#allocation8 + $0x13dc] sm:$0xf0] }
 0x1bb   :  { %7186 = vmatpush.bf16.msra.mxu0 %v15311_v41  ;;  %v12914_v41 = vld [vmem:[#allocation8 + $0x198] sm:$0xf] }
 0x1bc   :  { %7200 = vmatpush.bf16.msra.mxu1 %v15631_v1  ;;  %7209 = vmatpush.bf16.msra.mxu2 %v12955_v22  ;;  %v12915_v44 = vor.u32 %v17803_v42, %v12914_v41  ;;  %v18013_v22 = vld [vmem:[#allocation8 + $0x84c] sm:$0xf0]  ;;  %v14991_v42 = vor.u32 %v18317_v24, %v14988_v12  ;;  %v17883_v24 = vld [vmem:[#allocation8 + $0x43c] sm:$0xf0]  ;;  %v14834_v12 = vld [vmem:[#allocation8 + $0x1098] sm:$0xf] }
 0x1bd   :  { %7168 = vmatpush.bf16.msrb.mxu3 %v15151_v32  ;;  %v13755_v43 = vor.u32 %v18013_v22, %v13754_v17  ;;  %v15194_v17 = vld [vmem:[#allocation8 + $0x1368] sm:$0xf]  ;;  %v18373_v22 = vld [vmem:[#allocation8 + $0x138c] sm:$0xf0]  ;;  %v14194_v56 = vld [vmem:[#allocation8 + $0xb98] sm:$0xf] }
 0x1be   :  { %v15195_v46 = vor.u32 %v18373_v22, %v15194_v17  ;;  %v15034_v17 = vld [vmem:[#allocation8 + $0x1228] sm:$0xf]  ;;  %v18333_v22 = vld [vmem:[#allocation8 + $0x124c] sm:$0xf0] }
 0x1bf   :  { %7187 = vmatpush.bf16.msra.mxu0 %v15271_v36  ;;  %v15068_v36 = vld [vmem:[#allocation8 + $0x1298] sm:$0xf0]  ;;  %v6965_v63 = vpop.f32.mrf.mxu0 }
 0x1c0   :  { %7201 = vmatpush.bf16.msra.mxu1 %v15591_v19  ;;  %v6966_v37 = vadd.f32 %v6965_v63, %v19456_v33  ;;  %7210 = vmatpush.bf16.msra.mxu2 %v12915_v44  ;;  %v6979_v1 = vpop.f32.mrf.mxu1  ;;  %v15071_v3 = vor.u32 %v18337_v52, %v15068_v36  ;;  %v12835_v33 = vor.u32 %v17783_v8, %v12834_v5  ;;  %v17913_v44 = vld [vmem:[#allocation8 + $0x52c] sm:$0xf0]  ;;  %v14914_v52 = vld [vmem:[#allocation8 + $0x1138] sm:$0xf]  ;;  %v18003_v36 = vld [vmem:[#allocation8 + $0x7fc] sm:$0xf0] }
 0x1c1   :  { %7169 = vmatpush.bf16.msrb.mxu3 %v15111_v49  ;;  %v15031_v19 = vor.u32 %v18327_v6, %v15028_v13  ;;  %v13314_v49 = vld [vmem:[#allocation8 + $0x4b8] sm:$0xf]  ;;  %v13355_v59 = vor.u32 %v17913_v44, %v13354_v40  ;;  %v12714_v63 = vld [vmem:[#allocation8 + $0x8] sm:$0xf]  ;;  %v18143_v6 = vld [vmem:[#allocation8 + $0xc5c] sm:$0xf0] }
 0x1c2   :  { %7188 = vmatmul.bf16.vlgmr.msra.gmra.mxu0 %v19444_v29  ;;  %v6980_v9 = vadd.f32 %v6979_v1, %v6966_v37  ;;  %7118 = vmatmul.bf16.vlgmr.msra.gmra.mxu3 %v19413_v2  ;;  %v17753_v37 = vld [vmem:[#allocation8 + $0x2c] sm:$0xf0]  ;;  %v14874_v5 = vld [vmem:[#allocation8 + $0x10e8] sm:$0xf]  ;;  %v15154_v44 = vld [vmem:[#allocation8 + $0x1318] sm:$0xf] }
 0x1c3   :  { %7236 = vmatpush.bf16.msrb.mxu0 %v13635_v16  ;;  %7202 = vmatmul.bf16.vlgmr.msra.gmra.mxu1 %v19458_v61  ;;  %v13834_v16 = vld [vmem:[#allocation8 + $0x8c8] sm:$0xf]  ;;  %v17893_v1 = vld [vmem:[#allocation8 + $0x48c] sm:$0xf0]  ;;  %v12715_v13 = vor.u32 %v17753_v37, %v12714_v63  ;;  %v14754_v63 = vld [vmem:[#allocation8 + $0xff8] sm:$0xf] }
 0x1c4   :  { %7250 = vmatpush.bf16.msrb.mxu1 %v13955_v28  ;;  %v13835_v57 = vor.u32 %v18033_v11, %v13834_v16  ;;  %7211 = vmatpush.bf16.msra.mxu2 %v12875_v54  ;;  %v17773_v28 = vld [vmem:[#allocation8 + $0xcc] sm:$0xf0]  ;;  %v14915_v11 = vor.u32 %v18303_v23, %v14914_v52  ;;  %v13274_v54 = vld [vmem:[#allocation8 + $0x468] sm:$0xf]  ;;  %v14195_v52 = vor.u32 %v18123_v47, %v14194_v56  ;;  %v14034_v56 = vld [vmem:[#allocation8 + $0xa58] sm:$0xf] }
 0x1c5   :  { %7170 = vmatpush.bf16.msrb.mxu3 %v15071_v3  ;;  %v18293_v8 = vld [vmem:[#allocation8 + $0x110c] sm:$0xf0]  ;;  %v15114_v37 = vld [vmem:[#allocation8 + $0x12c8] sm:$0xf]  ;;  %v15035_v47 = vor.u32 %v18333_v22, %v15034_v17  ;;  %v17888_v22 = vld [vmem:[#allocation8 + $0x46c] sm:$0xf] }
 0x1c6   :  { %v18273_v40 = vld [vmem:[#allocation8 + $0x106c] sm:$0xf0] }
 0x1c7   :  { %7237 = vmatpush.bf16.msrb.mxu0 %v13595_v18  ;;  %v13794_v18 = vld [vmem:[#allocation8 + $0x878] sm:$0xf]  ;;  %v6993_v32 = vpop.f32.mrf.mxu2 }
 0x1c8   :  { %7251 = vmatpush.bf16.msrb.mxu1 %v13915_v45  ;;  %v13795_v10 = vor.u32 %v18023_v21, %v13794_v18  ;;  %7212 = vmatpush.bf16.msra.mxu2 %v12835_v33  ;;  %v19468_v41 = vadd.f32 %v6993_v32, %v6980_v9  ;;  %v13395_v45 = vor.u32 %v17923_v30, %v13394_v35  ;;  %v13674_v9 = vld [vmem:[#allocation8 + $0x788] sm:$0xf]  ;;  %v18283_v35 = vld [vmem:[#allocation8 + $0x10bc] sm:$0xf0]  ;;  %v19472_v30 = vpop.f32.mrf.mxu3 }
 0x1c9   :  { %7171 = vmatpush.bf16.msrb.mxu3 %v15031_v19  ;;  %v13275_v18 = vor.u32 %v17893_v1, %v13274_v54  ;;  %v14875_v33 = vor.u32 %v18293_v8, %v14874_v5  ;;  %v14835_v39 = vor.u32 %v18283_v35, %v14834_v12  ;;  %v18353_v54 = vld [vmem:[#allocation8 + $0x12ec] sm:$0xf0]  ;;  %v13114_v5 = vld [vmem:[#allocation8 + $0x328] sm:$0xf]  ;;  %v14674_v12 = vld [vmem:[#allocation8 + $0xf58] sm:$0xf] }
 0x1ca   :  { %v17853_v8 = vld [vmem:[#allocation8 + $0x34c] sm:$0xf0]  ;;  %v18243_v35 = vld [vmem:[#allocation8 + $0xf7c] sm:$0xf0] }
 0x1cb   :  { %7238 = vmatpush.bf16.msrb.mxu0 %v13555_v38  ;;  %v12795_v38 = vor.u32 %v17773_v28, %v12794_v27  ;;  %v14234_v27 = vld [vmem:[#allocation8 + $0xbe8] sm:$0xf]  ;;  %v15235_v28 = vor.u32 %v18383_v34, %v15234_v14  ;;  %v18253_v34 = vld [vmem:[#allocation8 + $0xfcc] sm:$0xf0] }
 0x1cc   :  { %7252 = vmatpush.bf16.msrb.mxu1 %v13875_v25  ;;  %v13714_v25 = vld [vmem:[#allocation8 + $0x7d8] sm:$0xf]  ;;  %v14714_v14 = vld [vmem:[#allocation8 + $0xfa8] sm:$0xf] }
 0x1cd   :  { %7213 = vmatpush.bf16.msra.mxu2 %v12795_v38  ;;  %7172 = vmatpush.bf16.msrb.mxu3 %v14991_v42  ;;  %v13715_v3 = vor.u32 %v18003_v36, %v13714_v25  ;;  %v13194_v42 = vld [vmem:[#allocation8 + $0x3c8] sm:$0xf]  ;;  %v17863_v25 = vld [vmem:[#allocation8 + $0x39c] sm:$0xf0] }
 0x1ce   :  { %v14154_v36 = vld [vmem:[#allocation8 + $0xb48] sm:$0xf] }
 0x1cf   :  { %7239 = vmatpush.bf16.msrb.mxu0 %v13515_v51  ;;  %v17903_v51 = vld [vmem:[#allocation8 + $0x4dc] sm:$0xf0] }
 0x1d0   :  { %7253 = vmatpush.bf16.msrb.mxu1 %v13835_v57  ;;  %v13315_v16 = vor.u32 %v17903_v51, %v13314_v49  ;;  %v17993_v57 = vld [vmem:[#allocation8 + $0x7ac] sm:$0xf0]  ;;  %v18363_v49 = vld [vmem:[#allocation8 + $0x133c] sm:$0xf0] }
 0x1d1   :  { %7214 = vmatpush.bf16.msra.mxu2 %v12755_v55  ;;  %7173 = vmatpush.bf16.msrb.mxu3 %v14951_v58  ;;  %v13675_v19 = vor.u32 %v17993_v57, %v13674_v9  ;;  %v13154_v55 = vld [vmem:[#allocation8 + $0x378] sm:$0xf]  ;;  %v15155_v58 = vor.u32 %v18363_v49, %v15154_v44  ;;  %v15115_v57 = vor.u32 %v18353_v54, %v15114_v37  ;;  %v18223_v49 = vld [vmem:[#allocation8 + $0xedc] sm:$0xf0]  ;;  %v18073_v37 = vld [vmem:[#allocation8 + $0xa2c] sm:$0xf0] }
 0x1d2   :  { %v14114_v9 = vld [vmem:[#allocation8 + $0xaf8] sm:$0xf]  ;;  %v14554_v54 = vld [vmem:[#allocation8 + $0xe68] sm:$0xf] }
 0x1d3   :  { %7240 = vmatpush.bf16.msrb.mxu0 %v13475_v4  ;;  %v14274_v4 = vld [vmem:[#allocation8 + $0xc38] sm:$0xf] }
 0x1d4   :  { %7254 = vmatpush.bf16.msrb.mxu1 %v13795_v10  ;;  %v14275_v21 = vor.u32 %v18143_v6, %v14274_v4  ;;  %7174 = vmatmul.bf16.vlgmr.msrb.gmra.mxu3 %v19436_v31  ;;  %v18133_v10 = vld [vmem:[#allocation8 + $0xc0c] sm:$0xf0]  ;;  %v14594_v44 = vld [vmem:[#allocation8 + $0xeb8] sm:$0xf] }
 0x1d5   :  { %7222 = vmatpush.bf16.msra.mxu3 %v13315_v16  ;;  %7215 = vmatpush.bf16.msra.mxu2 %v12715_v13  ;;  %v14235_v38 = vor.u32 %v18133_v10, %v14234_v27  ;;  %v18263_v16 = vld [vmem:[#allocation8 + $0x101c] sm:$0xf0]  ;;  %v14074_v27 = vld [vmem:[#allocation8 + $0xaa8] sm:$0xf]  ;;  %v18093_v10 = vld [vmem:[#allocation8 + $0xacc] sm:$0xf0] }
 0x1d6   :  { %v14755_v6 = vor.u32 %v18263_v16, %v14754_v63  ;;  %v18103_v13 = vld [vmem:[#allocation8 + $0xb1c] sm:$0xf0]  ;;  %v13994_v63 = vld [vmem:[#allocation8 + $0xa08] sm:$0xf]  ;;  %v14595_v16 = vor.u32 %v18223_v49, %v14594_v44  ;;  %v17788_v49 = vld [vmem:[#allocation8 + $0x14c] sm:$0xf] }
 0x1d7   :  { %7241 = vmatpush.bf16.msrb.mxu0 %v13435_v15  ;;  %v13234_v15 = vld [vmem:[#allocation8 + $0x418] sm:$0xf]  ;;  %v18443_v44 = vld [vmem:[#allocation8 + $0x15bc] sm:$0xf0] }
 0x1d8   :  { %7255 = vmatpush.bf16.msrb.mxu1 %v13755_v43  ;;  %v13235_v32 = vor.u32 %v17883_v24, %v13234_v15  ;;  %7216 = vmatmul.bf16.vlgmr.msra.gmra.mxu2 %v19356_v48  ;;  %v14794_v43 = vld [vmem:[#allocation8 + $0x1048] sm:$0xf]  ;;  %v13074_v15 = vld [vmem:[#allocation8 + $0x2d8] sm:$0xf]  ;;  %v17843_v24 = vld [vmem:[#allocation8 + $0x2fc] sm:$0xf0] }
 0x1d9   :  { %7223 = vmatpush.bf16.msra.mxu3 %v13275_v18  ;;  %7264 = vmatpush.bf16.msrb.mxu2 %v14275_v21  ;;  %v14795_v23 = vor.u32 %v18273_v40, %v14794_v43  ;;  %v15074_v18 = vld [vmem:[#allocation8 + $0x1278] sm:$0xf]  ;;  %v18343_v21 = vld [vmem:[#allocation8 + $0x129c] sm:$0xf0]  ;;  %v14634_v43 = vld [vmem:[#allocation8 + $0xf08] sm:$0xf] }
 0x1da   :  { %v18233_v40 = vld [vmem:[#allocation8 + $0xf2c] sm:$0xf0] }
 0x1db   :  { %7242 = vmatpush.bf16.msrb.mxu0 %v13395_v45  ;;  %v17873_v45 = vld [vmem:[#allocation8 + $0x3ec] sm:$0xf0] }
 0x1dc   :  { %7256 = vmatpush.bf16.msrb.mxu1 %v13715_v3  ;;  %v13195_v51 = vor.u32 %v17873_v45, %v13194_v42  ;;  %v13155_v3 = vor.u32 %v17863_v25, %v13154_v55  ;;  %v14675_v42 = vor.u32 %v18243_v35, %v14674_v12  ;;  %v17833_v45 = vld [vmem:[#allocation8 + $0x2ac] sm:$0xf0]  ;;  %v14994_v55 = vld [vmem:[#allocation8 + $0x11d8] sm:$0xf]  ;;  %v18323_v25 = vld [vmem:[#allocation8 + $0x11fc] sm:$0xf0] }
 0x1dd   :  { %7224 = vmatpush.bf16.msra.mxu3 %v13235_v32  ;;  %7265 = vmatpush.bf16.msrb.mxu2 %v14235_v38  ;;  %v13075_v32 = vor.u32 %v17843_v24, %v13074_v15  ;;  %v13034_v38 = vld [vmem:[#allocation8 + $0x288] sm:$0xf]  ;;  %v14514_v15 = vld [vmem:[#allocation8 + $0xe18] sm:$0xf]  ;;  %v18203_v24 = vld [vmem:[#allocation8 + $0xe3c] sm:$0xf0] }
 0x1de   :  { %v17798_v12 = vld [vmem:[#allocation8 + $0x19c] sm:$0xf]  ;;  %v12916_v35 = vld [vmem:[#allocation8 + $0x1c0] sm:$0xf0] }
 0x1df   :  { %7243 = vmatpush.bf16.msrb.mxu0 %v13355_v59  ;;  %v18113_v59 = vld [vmem:[#allocation8 + $0xb6c] sm:$0xf0] }
 0x1e0   :  { %7257 = vmatpush.bf16.msrb.mxu1 %v13675_v19  ;;  %v14155_v4 = vor.u32 %v18113_v59, %v14154_v36  ;;  %v14715_v19 = vor.u32 %v18253_v34, %v14714_v14  ;;  %v19479_v36 = vpop.f32.mrf.mxu0  ;;  %v14635_v59 = vor.u32 %v18233_v40, %v14634_v43  ;;  %v13995_v14 = vor.u32 %v18073_v37, %v13994_v63  ;;  %v17898_v34 = vld [vmem:[#allocation8 + $0x4bc] sm:$0xf]  ;;  %v15474_v43 = vld [vmem:[#allocation8 + $0x1598] sm:$0xf]  ;;  %v15434_v63 = vld [vmem:[#allocation8 + $0x1548] sm:$0xf] }
 0x1e1   :  { %7225 = vmatpush.bf16.msra.mxu3 %v13195_v51  ;;  %7266 = vmatpush.bf16.msrb.mxu2 %v14195_v52  ;;  %v17818_v51 = vld [vmem:[#allocation8 + $0x23c] sm:$0xf]  ;;  %v12996_v52 = vld [vmem:[#allocation8 + $0x260] sm:$0xf0] }
 0x1e2   :  { %7244 = vmatmul.bf16.vlgmr.msrb.gmra.mxu0 %v19411_v62  ;;  %v17778_v37 = vld [vmem:[#allocation8 + $0xfc] sm:$0xf] }
 0x1e3   :  { %7292 = vmatpush.bf16.msra.mxu0 %v14915_v11  ;;  %7258 = vmatmul.bf16.vlgmr.msrb.gmra.mxu1 %v19413_v2  ;;  %v7007_v11 = vpop.f32.mrf.mxu3 }
 0x1e4   :  { %7306 = vmatpush.bf16.msra.mxu1 %v15235_v28  ;;  %v19477_v1 = vadd.f32 %v7007_v11, %v19468_v41  ;;  %v14115_v41 = vor.u32 %v18103_v13, %v14114_v9  ;;  %v15075_v28 = vor.u32 %v18343_v21, %v15074_v18  ;;  %v12999_v11 = vor.u32 %v17818_v51, %v12996_v52  ;;  %v12956_v9 = vld [vmem:[#allocation8 + $0x210] sm:$0xf0]  ;;  %v18313_v13 = vld [vmem:[#allocation8 + $0x11ac] sm:$0xf0]  ;;  %v13316_v18 = vld [vmem:[#allocation8 + $0x4e0] sm:$0xf0] }
 0x1e5   :  { %7226 = vmatpush.bf16.msra.mxu3 %v13155_v3  ;;  %7267 = vmatpush.bf16.msrb.mxu2 %v14155_v4  ;;  %v18213_v3 = vld [vmem:[#allocation8 + $0xe8c] sm:$0xf0]  ;;  %v14995_v4 = vor.u32 %v18323_v25, %v14994_v55  ;;  %v12876_v51 = vld [vmem:[#allocation8 + $0x170] sm:$0xf0]  ;;  %v17878_v52 = vld [vmem:[#allocation8 + $0x41c] sm:$0xf]  ;;  %v15475_v55 = vor.u32 %v18443_v44, %v15474_v43 }
 0x1e6   :  { %v14555_v21 = vor.u32 %v18213_v3, %v14554_v54  ;;  %v12879_v25 = vor.u32 %v17788_v49, %v12876_v51  ;;  %v12836_v54 = vld [vmem:[#allocation8 + $0x120] sm:$0xf0]  ;;  %v17868_v3 = vld [vmem:[#allocation8 + $0x3cc] sm:$0xf]  ;;  %v18153_v51 = vld [vmem:[#allocation8 + $0xcac] sm:$0xf0] }
 0x1e7   :  { %7293 = vmatpush.bf16.msra.mxu0 %v14875_v33  ;;  %v13115_v33 = vor.u32 %v17853_v8, %v13114_v5  ;;  %v18463_v5 = vld [vmem:[#allocation8 + $0x165c] sm:$0xf0]  ;;  %v17808_v8 = vld [vmem:[#allocation8 + $0x1ec] sm:$0xf] }
 0x1e8   :  { %7307 = vmatpush.bf16.msra.mxu1 %v15195_v46  ;;  %v18083_v46 = vld [vmem:[#allocation8 + $0xa7c] sm:$0xf0] }
 0x1e9   :  { %7227 = vmatpush.bf16.msra.mxu3 %v13115_v33  ;;  %7268 = vmatpush.bf16.msrb.mxu2 %v14115_v41  ;;  %v12959_v41 = vor.u32 %v17808_v8, %v12956_v9 }
 0x1eb   :  { %7294 = vmatpush.bf16.msra.mxu0 %v14835_v39  ;;  %v14075_v39 = vor.u32 %v18093_v10, %v14074_v27  ;;  %v15514_v27 = vld [vmem:[#allocation8 + $0x15e8] sm:$0xf]  ;;  %v18453_v10 = vld [vmem:[#allocation8 + $0x160c] sm:$0xf0] }
 0x1ec   :  { %7308 = vmatpush.bf16.msra.mxu1 %v15155_v58  ;;  %v14035_v58 = vor.u32 %v18083_v46, %v14034_v56  ;;  %v12919_v56 = vor.u32 %v17798_v12, %v12916_v35  ;;  %v14474_v46 = vld [vmem:[#allocation8 + $0xdc8] sm:$0xf]  ;;  %v14354_v12 = vld [vmem:[#allocation8 + $0xcd8] sm:$0xf]  ;;  %v18163_v35 = vld [vmem:[#allocation8 + $0xcfc] sm:$0xf0] }
 0x1ed   :  { %7228 = vmatpush.bf16.msra.mxu3 %v13075_v32  ;;  %7269 = vmatpush.bf16.msrb.mxu2 %v14075_v39  ;;  %v13276_v32 = vld [vmem:[#allocation8 + $0x490] sm:$0xf0]  ;;  %v14355_v43 = vor.u32 %v18163_v35, %v14354_v12 }
 0x1ee   :  { %v13279_v40 = vor.u32 %v17888_v22, %v13276_v32  ;;  %v18413_v32 = vld [vmem:[#allocation8 + $0x14cc] sm:$0xf0] }
 0x1ef   :  { %7295 = vmatpush.bf16.msra.mxu0 %v14795_v23  ;;  %v13035_v23 = vor.u32 %v17833_v45, %v13034_v38  ;;  %v19483_v38 = vpop.f32.mrf.mxu1  ;;  %v15515_v45 = vor.u32 %v18453_v10, %v15514_v27 }
 0x1f0   :  { %7309 = vmatpush.bf16.msra.mxu1 %v15115_v57  ;;  %v14954_v57 = vld [vmem:[#allocation8 + $0x1188] sm:$0xf] }
 0x1f1   :  { %7229 = vmatpush.bf16.msra.mxu3 %v13035_v23  ;;  %7270 = vmatpush.bf16.msrb.mxu2 %v14035_v58  ;;  %v7021_v17 = vpop.f32.mrf.mxu0  ;;  %v13236_v23 = vld [vmem:[#allocation8 + $0x440] sm:$0xf0]  ;;  %v14434_v58 = vld [vmem:[#allocation8 + $0xd78] sm:$0xf] }
 0x1f2   :  { %v7022_v39 = vadd.f32 %v7021_v17, %v19477_v1  ;;  %v15354_v17 = vld [vmem:[#allocation8 + $0x14a8] sm:$0xf] }
 0x1f3   :  { %7296 = vmatpush.bf16.msra.mxu0 %v14755_v6  ;;  %v15554_v6 = vld [vmem:[#allocation8 + $0x1638] sm:$0xf]  ;;  %v15355_v44 = vor.u32 %v18413_v32, %v15354_v17  ;;  %v18218_v17 = vld [vmem:[#allocation8 + $0xebc] sm:$0xf] }
 0x1f4   :  { %7310 = vmatpush.bf16.msra.mxu1 %v15075_v28  ;;  %v15555_v33 = vor.u32 %v18463_v5, %v15554_v6  ;;  %7230 = vmatmul.bf16.vlgmr.msra.gmra.mxu3 %v19358_v53  ;;  %v13319_v28 = vor.u32 %v17898_v34, %v13316_v18  ;;  %v15394_v34 = vld [vmem:[#allocation8 + $0x14f8] sm:$0xf] }
 0x1f5   :  { %7278 = vmatpush.bf16.msrb.mxu3 %v14595_v16  ;;  %7271 = vmatpush.bf16.msrb.mxu2 %v13995_v14  ;;  %v13239_v16 = vor.u32 %v17878_v52, %v13236_v23  ;;  %v18173_v14 = vld [vmem:[#allocation8 + $0xd4c] sm:$0xf0]  ;;  %v15314_v52 = vld [vmem:[#allocation8 + $0x1458] sm:$0xf]  ;;  %v18403_v23 = vld [vmem:[#allocation8 + $0x147c] sm:$0xf0] }
 0x1f7   :  { %7297 = vmatpush.bf16.msra.mxu0 %v14715_v19  ;;  %v14955_v19 = vor.u32 %v18313_v13, %v14954_v57  ;;  %v12839_v57 = vor.u32 %v17778_v37, %v12836_v54  ;;  %v14394_v13 = vld [vmem:[#allocation8 + $0xd28] sm:$0xf]  ;;  %v17838_v54 = vld [vmem:[#allocation8 + $0x2dc] sm:$0xf] }
 0x1f8   :  { %7311 = vmatpush.bf16.msra.mxu1 %v15035_v47  ;;  %v18193_v47 = vld [vmem:[#allocation8 + $0xdec] sm:$0xf0]  ;;  %7272 = vmatmul.bf16.vlgmr.msrb.gmra.mxu2 %v19415_v50  ;;  %v7035_v6 = vpop.f32.mrf.mxu1  ;;  %v14395_v27 = vor.u32 %v18173_v14, %v14394_v13  ;;  %v15834_v14 = vld [vmem:[#allocation8 + $0x1868] sm:$0xf] }
 0x1f9   :  { %7279 = vmatpush.bf16.msrb.mxu3 %v14555_v21  ;;  %7320 = vmatpush.bf16.msra.mxu2 %v15555_v33  ;;  %v14475_v1 = vor.u32 %v18193_v47, %v14474_v46  ;;  %v19488_v8 = vadd.f32 %v7035_v6, %v7022_v39  ;;  %v19490_v18 = vpop.f32.mrf.mxu0  ;;  %v18423_v33 = vld [vmem:[#allocation8 + $0x151c] sm:$0xf0]  ;;  %v17758_v39 = vld [vmem:[#allocation8 + $0x5c] sm:$0xf]  ;;  %v20204_v47 = vperm.slane %v19450_v0, 1 }
 0x1fa   :  { %v18393_v13 = vld [vmem:[#allocation8 + $0x142c] sm:$0xf0] }
 0x1fb   :  { %7298 = vmatpush.bf16.msra.mxu0 %v14675_v42  ;;  %v14515_v42 = vor.u32 %v18203_v24, %v14514_v15  ;;  %v17858_v15 = vld [vmem:[#allocation8 + $0x37c] sm:$0xf]  ;;  %v13156_v24 = vld [vmem:[#allocation8 + $0x3a0] sm:$0xf0] }
 0x1fc   :  { %7312 = vmatpush.bf16.msra.mxu1 %v14995_v4  ;;  %v13196_v4 = vld [vmem:[#allocation8 + $0x3f0] sm:$0xf0]  ;;  %v13159_v22 = vor.u32 %v17858_v15, %v13156_v24  ;;  %v18128_v15 = vld [vmem:[#allocation8 + $0xbec] sm:$0xf] }
 0x1fd   :  { %7280 = vmatpush.bf16.msrb.mxu3 %v14515_v42  ;;  %7321 = vmatpush.bf16.msra.mxu2 %v15515_v45  ;;  %v13199_v21 = vor.u32 %v17868_v3, %v13196_v4  ;;  %v12756_v42 = vld [vmem:[#allocation8 + $0x80] sm:$0xf0]  ;;  %v17848_v45 = vld [vmem:[#allocation8 + $0x32c] sm:$0xf]  ;;  %v15315_v4 = vor.u32 %v18403_v23, %v15314_v52 }
 0x1fe   :  { %v12759_v49 = vor.u32 %v17758_v39, %v12756_v42  ;;  %v13076_v3 = vld [vmem:[#allocation8 + $0x300] sm:$0xf0]  ;;  %v18208_v23 = vld [vmem:[#allocation8 + $0xe6c] sm:$0xf] }
 0x1ff   :  { %7299 = vmatpush.bf16.msra.mxu0 %v14635_v59  ;;  %v18183_v59 = vld [vmem:[#allocation8 + $0xd9c] sm:$0xf0]  ;;  %v14196_v52 = vld [vmem:[#allocation8 + $0xbc0] sm:$0xf0] }
 0x200   :  { %7313 = vmatpush.bf16.msra.mxu1 %v14955_v19  ;;  %v14435_v5 = vor.u32 %v18183_v59, %v14434_v58  ;;  %v12796_v19 = vld [vmem:[#allocation8 + $0xd0] sm:$0xf0]  ;;  %v19492_v46 = vpop.f32.mrf.mxu1  ;;  %v15874_v58 = vld [vmem:[#allocation8 + $0x18b8] sm:$0xf]  ;;  %v18543_v59 = vld [vmem:[#allocation8 + $0x18dc] sm:$0xf0] }
 0x201   :  { %7281 = vmatpush.bf16.msrb.mxu3 %v14475_v1  ;;  %7322 = vmatpush.bf16.msra.mxu2 %v15475_v55  ;;  %v17748_v55 = vld [vmem:[#allocation8 + $0xc] sm:$0xf] }
 0x202   :  { %7300 = vmatmul.bf16.vlgmr.msra.gmra.mxu0 %v19433_v26 }
 0x203   :  { %7348 = vmatpush.bf16.msrb.mxu0 %v12999_v11  ;;  %7314 = vmatmul.bf16.vlgmr.msra.gmra.mxu1 %v19436_v31  ;;  %v18433_v11 = vld [vmem:[#allocation8 + $0x156c] sm:$0xf0] }
 0x204   :  { %7362 = vmatpush.bf16.msrb.mxu1 %v13319_v28  ;;  %v15435_v9 = vor.u32 %v18433_v11, %v15434_v63  ;;  %v15395_v28 = vor.u32 %v18423_v33, %v15394_v34  ;;  %v18138_v63 = vld [vmem:[#allocation8 + $0xc3c] sm:$0xf]  ;;  %v7077_v11 = vpop.f32.mrf.mxu0  ;;  %v18533_v34 = vld [vmem:[#allocation8 + $0x188c] sm:$0xf0]  ;;  %v13079_v33 = vor.u32 %v17838_v54, %v13076_v3  ;;  %v18108_v54 = vld [vmem:[#allocation8 + $0xb4c] sm:$0xf] }
 0x205   :  { %7282 = vmatpush.bf16.msrb.mxu3 %v14435_v5  ;;  %v15274_v5 = vld [vmem:[#allocation8 + $0x1408] sm:$0xf]  ;;  %v15835_v32 = vor.u32 %v18533_v34, %v15834_v14  ;;  %v14156_v3 = vld [vmem:[#allocation8 + $0xb70] sm:$0xf0]  ;;  %v15714_v14 = vld [vmem:[#allocation8 + $0x1778] sm:$0xf] }
 0x206   :  { %7323 = vmatpush.bf16.msra.mxu2 %v15435_v9  ;;  %v15875_v9 = vor.u32 %v18543_v59, %v15874_v58  ;;  %v15275_v35 = vor.u32 %v18393_v13, %v15274_v5  ;;  %v15754_v59 = vld [vmem:[#allocation8 + $0x17c8] sm:$0xf]  ;;  %v14516_v5 = vld [vmem:[#allocation8 + $0xe40] sm:$0xf0]  ;;  %v14159_v13 = vor.u32 %v18108_v54, %v14156_v3  ;;  %v18503_v34 = vld [vmem:[#allocation8 + $0x179c] sm:$0xf0] }
 0x207   :  { %7349 = vmatpush.bf16.msrb.mxu0 %v12959_v41  ;;  %v17768_v41 = vld [vmem:[#allocation8 + $0xac] sm:$0xf]  ;;  %v15594_v3 = vld [vmem:[#allocation8 + $0x1688] sm:$0xf] }
 0x208   :  { %7363 = vmatpush.bf16.msrb.mxu1 %v13279_v40  ;;  %v12799_v10 = vor.u32 %v17768_v41, %v12796_v19  ;;  %v14314_v40 = vld [vmem:[#allocation8 + $0xc88] sm:$0xf]  ;;  %v17978_v41 = vld [vmem:[#allocation8 + $0x73c] sm:$0xf]  ;;  %v13636_v19 = vld [vmem:[#allocation8 + $0x760] sm:$0xf0]  ;;  %v7091_v24 = vpop.f32.mrf.mxu1 }
 0x209   :  { %7283 = vmatpush.bf16.msrb.mxu3 %v14395_v27  ;;  %v14315_v37 = vor.u32 %v18153_v51, %v14314_v40  ;;  %v14236_v27 = vld [vmem:[#allocation8 + $0xc10] sm:$0xf0]  ;;  %v13639_v39 = vor.u32 %v17978_v41, %v13636_v19  ;;  %v17968_v40 = vld [vmem:[#allocation8 + $0x6ec] sm:$0xf]  ;;  %v18118_v51 = vld [vmem:[#allocation8 + $0xb9c] sm:$0xf] }
 0x20a   :  { %7324 = vmatpush.bf16.msra.mxu2 %v15395_v28  ;;  %v17828_v28 = vld [vmem:[#allocation8 + $0x28c] sm:$0xf]  ;;  %v14239_v42 = vor.u32 %v18128_v15, %v14236_v27  ;;  %v14199_v58 = vor.u32 %v18118_v51, %v14196_v52  ;;  %v13516_v41 = vld [vmem:[#allocation8 + $0x670] sm:$0xf0]  ;;  %v18098_v19 = vld [vmem:[#allocation8 + $0xafc] sm:$0xf] }
 0x20b   :  { %7350 = vmatpush.bf16.msrb.mxu0 %v12919_v56  ;;  %v13116_v56 = vld [vmem:[#allocation8 + $0x350] sm:$0xf0]  ;;  %v14116_v15 = vld [vmem:[#allocation8 + $0xb20] sm:$0xf0] }
 0x20c   :  { %7364 = vmatpush.bf16.msrb.mxu1 %v13239_v16  ;;  %v13119_v1 = vor.u32 %v17848_v45, %v13116_v56  ;;  %v14276_v16 = vld [vmem:[#allocation8 + $0xc60] sm:$0xf0]  ;;  %v15794_v56 = vld [vmem:[#allocation8 + $0x1818] sm:$0xf]  ;;  %v14476_v27 = vld [vmem:[#allocation8 + $0xdf0] sm:$0xf0] }
 0x20d   :  { %7284 = vmatpush.bf16.msrb.mxu3 %v14355_v43  ;;  %v18523_v43 = vld [vmem:[#allocation8 + $0x183c] sm:$0xf0] }
 0x20e   :  { %7325 = vmatpush.bf16.msra.mxu2 %v15355_v44 }
 0x20f   :  { %7351 = vmatpush.bf16.msrb.mxu0 %v12879_v25  ;;  %v12716_v25 = vld [vmem:[#allocation8 + $0x30] sm:$0xf0] }
 0x210   :  { %7365 = vmatpush.bf16.msrb.mxu1 %v13199_v21  ;;  %v12719_v6 = vor.u32 %v17748_v55, %v12716_v25  ;;  %v7078_v21 = vadd.f32 %v7077_v11, %v20204_v47  ;;  %v15795_v55 = vor.u32 %v18523_v43, %v15794_v56  ;;  %v14076_v56 = vld [vmem:[#allocation8 + $0xad0] sm:$0xf0]  ;;  %v18354_v47 = vld [vmem:[#allocation8 + $0x12f4] sm:$0xf0] }
 0x211   :  { %7285 = vmatpush.bf16.msrb.mxu3 %v14315_v37  ;;  %v13556_v37 = vld [vmem:[#allocation8 + $0x6c0] sm:$0xf0] }
 0x212   :  { %7326 = vmatpush.bf16.msra.mxu2 %v15315_v4  ;;  %v19497_v12 = vadd.f32 %v7091_v24, %v7078_v21  ;;  %v19502_v4 = vpop.f32.mrf.mxu2  ;;  %v17948_v21 = vld [vmem:[#allocation8 + $0x64c] sm:$0xf] }
 0x213   :  { %7352 = vmatpush.bf16.msrb.mxu0 %v12839_v57  ;;  %v14279_v57 = vor.u32 %v18138_v63, %v14276_v16  ;;  %v18513_v63 = vld [vmem:[#allocation8 + $0x17ec] sm:$0xf0]  ;;  %v17958_v16 = vld [vmem:[#allocation8 + $0x69c] sm:$0xf]  ;;  %v18188_v24 = vld [vmem:[#allocation8 + $0xdcc] sm:$0xf] }
 0x214   :  { %7366 = vmatpush.bf16.msrb.mxu1 %v13159_v22  ;;  %v14596_v22 = vld [vmem:[#allocation8 + $0xee0] sm:$0xf0]  ;;  %7286 = vmatmul.bf16.vlgmr.msrb.gmra.mxu3 %v19421_v60 }
 0x215   :  { %7334 = vmatpush.bf16.msra.mxu3 %v15875_v9  ;;  %v14599_v44 = vor.u32 %v18218_v17, %v14596_v22  ;;  %v15755_v9 = vor.u32 %v18513_v63, %v15754_v59  ;;  %v15674_v17 = vld [vmem:[#allocation8 + $0x1728] sm:$0xf]  ;;  %v18493_v22 = vld [vmem:[#allocation8 + $0x174c] sm:$0xf0]  ;;  %v13436_v59 = vld [vmem:[#allocation8 + $0x5d0] sm:$0xf0] }
 0x216   :  { %7327 = vmatpush.bf16.msra.mxu2 %v15275_v35  ;;  %v14119_v35 = vor.u32 %v18098_v19, %v14116_v15  ;;  %v15675_v51 = vor.u32 %v18493_v22, %v15674_v17  ;;  %v18078_v63 = vld [vmem:[#allocation8 + $0xa5c] sm:$0xf]  ;;  %v15556_v15 = vld [vmem:[#allocation8 + $0x1660] sm:$0xf0]  ;;  %v17908_v17 = vld [vmem:[#allocation8 + $0x50c] sm:$0xf] }
 0x217   :  { %7353 = vmatpush.bf16.msrb.mxu0 %v12799_v10  ;;  %v13036_v10 = vld [vmem:[#allocation8 + $0x2b0] sm:$0xf0]  ;;  %v18458_v19 = vld [vmem:[#allocation8 + $0x163c] sm:$0xf] }
 0x218   :  { %7367 = vmatpush.bf16.msrb.mxu1 %v13119_v1  ;;  %v13039_v45 = vor.u32 %v17828_v28, %v13036_v10  ;;  %v14556_v1 = vld [vmem:[#allocation8 + $0xe90] sm:$0xf0]  ;;  %v15715_v28 = vor.u32 %v18503_v34, %v15714_v14  ;;  %v13519_v10 = vor.u32 %v17948_v21, %v13516_v41  ;;  %v18068_v14 = vld [vmem:[#allocation8 + $0xa0c] sm:$0xf]  ;;  %v18058_v21 = vld [vmem:[#allocation8 + $0x9bc] sm:$0xf] }
 0x219   :  { %7335 = vmatpush.bf16.msra.mxu3 %v15835_v32  ;;  %7328 = vmatmul.bf16.vlgmr.msra.gmra.mxu2 %v19444_v29  ;;  %v14559_v11 = vor.u32 %v18208_v23, %v14556_v1  ;;  %v17938_v32 = vld [vmem:[#allocation8 + $0x5fc] sm:$0xf]  ;;  %v15634_v1 = vld [vmem:[#allocation8 + $0x16d8] sm:$0xf]  ;;  %v13996_v34 = vld [vmem:[#allocation8 + $0xa30] sm:$0xf0] }
 0x21a   :  { %7376 = vmatpush.bf16.msrb.mxu2 %v13639_v39  ;;  %v14479_v39 = vor.u32 %v18188_v24, %v14476_v27  ;;  %v7049_v43 = vpop.f32.mrf.mxu2  ;;  %v13956_v41 = vld [vmem:[#allocation8 + $0x9e0] sm:$0xf0]  ;;  %v18158_v27 = vld [vmem:[#allocation8 + $0xcdc] sm:$0xf] }
 0x21b   :  { %7354 = vmatpush.bf16.msrb.mxu0 %v12759_v49  ;;  %v13596_v49 = vld [vmem:[#allocation8 + $0x710] sm:$0xf0]  ;;  %v13959_v22 = vor.u32 %v18058_v21, %v13956_v41 }
 0x21c   :  { %7368 = vmatpush.bf16.msrb.mxu1 %v13079_v33  ;;  %v13599_v25 = vor.u32 %v17968_v40, %v13596_v49  ;;  %v18178_v40 = vld [vmem:[#allocation8 + $0xd7c] sm:$0xf]  ;;  %v19506_v49 = vadd.f32 %v7049_v43, %v19488_v8 }
 0x21d   :  { %7336 = vmatpush.bf16.msra.mxu3 %v15795_v55  ;;  %v18483_v55 = vld [vmem:[#allocation8 + $0x16fc] sm:$0xf0]  ;;  %v18298_v43 = vld [vmem:[#allocation8 + $0x113c] sm:$0xf] }
 0x21e   :  { %7377 = vmatpush.bf16.msrb.mxu2 %v13599_v25  ;;  %v17928_v25 = vld [vmem:[#allocation8 + $0x5ac] sm:$0xf]  ;;  %v15635_v54 = vor.u32 %v18483_v55, %v15634_v1  ;;  %v18538_v55 = vld [vmem:[#allocation8 + $0x18bc] sm:$0xf] }
 0x21f   :  { %7355 = vmatpush.bf16.msrb.mxu0 %v12719_v6  ;;  %v18198_v6 = vld [vmem:[#allocation8 + $0xe1c] sm:$0xf]  ;;  %v13439_v8 = vor.u32 %v17928_v25, %v13436_v59  ;;  %v15876_v25 = vld [vmem:[#allocation8 + $0x18e0] sm:$0xf0] }
 0x220   :  { %7369 = vmatpush.bf16.msrb.mxu1 %v13039_v45  ;;  %v14519_v33 = vor.u32 %v18198_v6, %v14516_v5  ;;  %v18088_v45 = vld [vmem:[#allocation8 + $0xaac] sm:$0xf]  ;;  %v18473_v5 = vld [vmem:[#allocation8 + $0x16ac] sm:$0xf0] }
 0x221   :  { %7337 = vmatpush.bf16.msra.mxu3 %v15755_v9  ;;  %v14079_v23 = vor.u32 %v18088_v45, %v14076_v56  ;;  %v17918_v9 = vld [vmem:[#allocation8 + $0x55c] sm:$0xf]  ;;  %v15595_v24 = vor.u32 %v18473_v5, %v15594_v3  ;;  %v13916_v45 = vld [vmem:[#allocation8 + $0x990] sm:$0xf0]  ;;  %v18288_v3 = vld [vmem:[#allocation8 + $0x10ec] sm:$0xf] }
 0x222   :  { %7356 = vmatmul.bf16.vlgmr.msrb.gmra.mxu0 %v19356_v48  ;;  %v14876_v5 = vld [vmem:[#allocation8 + $0x1110] sm:$0xf0] }
 0x223   :  { %7404 = vmatpush.bf16.msra.mxu0 %v14279_v57  ;;  %7370 = vmatmul.bf16.vlgmr.msrb.gmra.mxu1 %v19358_v53  ;;  %v13559_v57 = vor.u32 %v17958_v16, %v13556_v37  ;;  %v14036_v16 = vld [vmem:[#allocation8 + $0xa80] sm:$0xf0]  ;;  %v14396_v37 = vld [vmem:[#allocation8 + $0xd50] sm:$0xf0]  ;;  %v14879_v41 = vor.u32 %v18288_v3, %v14876_v5 }
 0x224   :  { %7418 = vmatpush.bf16.msra.mxu1 %v14599_v44  ;;  %v14436_v44 = vld [vmem:[#allocation8 + $0xda0] sm:$0xf0]  ;;  %v14039_v6 = vor.u32 %v18078_v63, %v14036_v16  ;;  %v15356_v5 = vld [vmem:[#allocation8 + $0x14d0] sm:$0xf0] }
 0x225   :  { %7378 = vmatpush.bf16.msrb.mxu2 %v13559_v57  ;;  %7338 = vmatpush.bf16.msra.mxu3 %v15715_v28  ;;  %v13396_v57 = vld [vmem:[#allocation8 + $0x580] sm:$0xf0] }
 0x226   :  { %v14356_v28 = vld [vmem:[#allocation8 + $0xd00] sm:$0xf0] }
 0x227   :  { %7405 = vmatpush.bf16.msra.mxu0 %v14239_v42  ;;  %v13476_v42 = vld [vmem:[#allocation8 + $0x620] sm:$0xf0]  ;;  %v14359_v56 = vor.u32 %v18158_v27, %v14356_v28 }
 0x228   :  { %7419 = vmatpush.bf16.msra.mxu1 %v14559_v11  ;;  %v13479_v52 = vor.u32 %v17938_v32, %v13476_v42  ;;  %v18168_v11 = vld [vmem:[#allocation8 + $0xd2c] sm:$0xf]  ;;  %v15559_v32 = vor.u32 %v18458_v19, %v15556_v15  ;;  %v14836_v28 = vld [vmem:[#allocation8 + $0x10c0] sm:$0xf0] }
 0x229   :  { %7379 = vmatpush.bf16.msrb.mxu2 %v13519_v10  ;;  %7339 = vmatpush.bf16.msra.mxu3 %v15675_v51  ;;  %v13399_v10 = vor.u32 %v17918_v9, %v13396_v57  ;;  %v18048_v42 = vld [vmem:[#allocation8 + $0x96c] sm:$0xf]  ;;  %v15516_v51 = vld [vmem:[#allocation8 + $0x1610] sm:$0xf0]  ;;  %v18438_v9 = vld [vmem:[#allocation8 + $0x159c] sm:$0xf] }
 0x22a   :  { %v15476_v57 = vld [vmem:[#allocation8 + $0x15c0] sm:$0xf0]  ;;  %v18028_v15 = vld [vmem:[#allocation8 + $0x8cc] sm:$0xf] }
 0x22b   :  { %7406 = vmatpush.bf16.msra.mxu0 %v14199_v58  ;;  %v14439_v58 = vor.u32 %v18178_v40, %v14436_v44  ;;  %v14916_v40 = vld [vmem:[#allocation8 + $0x1160] sm:$0xf0]  ;;  %v18448_v44 = vld [vmem:[#allocation8 + $0x15ec] sm:$0xf]  ;;  %v15479_v19 = vor.u32 %v18438_v9, %v15476_v57  ;;  %v18498_v9 = vld [vmem:[#allocation8 + $0x177c] sm:$0xf] }
 0x22c   :  { %7420 = vmatpush.bf16.msra.mxu1 %v14519_v33  ;;  %v19508_v33 = vpop.f32.mrf.mxu2  ;;  %v14919_v59 = vor.u32 %v18298_v43, %v14916_v40  ;;  %v15519_v63 = vor.u32 %v18448_v44, %v15516_v51  ;;  %v18268_v43 = vld [vmem:[#allocation8 + $0x104c] sm:$0xf]  ;;  %v14796_v44 = vld [vmem:[#allocation8 + $0x1070] sm:$0xf0]  ;;  %v18418_v51 = vld [vmem:[#allocation8 + $0x14fc] sm:$0xf] }
 0x22d   :  { %7380 = vmatpush.bf16.msrb.mxu2 %v13479_v52  ;;  %20216 = vst [vmem:[#allocation20_spill] sm:$0xff] %v19508_v33  ;;  %7340 = vmatpush.bf16.msra.mxu3 %v15635_v54  ;;  %v18148_v52 = vld [vmem:[#allocation8 + $0xc8c] sm:$0xf]  ;;  %v13876_v54 = vld [vmem:[#allocation8 + $0x940] sm:$0xf0] }
 0x22e   :  { %v14756_v3 = vld [vmem:[#allocation8 + $0x1020] sm:$0xf0]  ;;  %v17995_v33 = vld [vmem:[#allocation8 + $0x7bc] sm:$0xf0] }
 0x22f   :  { %7407 = vmatpush.bf16.msra.mxu0 %v14159_v13  ;;  %v14399_v13 = vor.u32 %v18168_v11, %v14396_v37  ;;  %v18038_v37 = vld [vmem:[#allocation8 + $0x91c] sm:$0xf]  ;;  %v15716_v57 = vld [vmem:[#allocation8 + $0x17a0] sm:$0xf0] }
 0x230   :  { %7421 = vmatpush.bf16.msra.mxu1 %v14479_v39  ;;  %v13356_v39 = vld [vmem:[#allocation8 + $0x530] sm:$0xf0]  ;;  %v13879_v21 = vor.u32 %v18038_v37, %v13876_v54  ;;  %v18258_v37 = vld [vmem:[#allocation8 + $0xffc] sm:$0xf] }
 0x231   :  { %7381 = vmatpush.bf16.msrb.mxu2 %v13439_v8  ;;  %7341 = vmatpush.bf16.msra.mxu3 %v15595_v24  ;;  %v13359_v1 = vor.u32 %v17908_v17, %v13356_v39  ;;  %v13836_v24 = vld [vmem:[#allocation8 + $0x8f0] sm:$0xf0]  ;;  %v18518_v17 = vld [vmem:[#allocation8 + $0x181c] sm:$0xf] }
 0x233   :  { %7408 = vmatpush.bf16.msra.mxu0 %v14119_v35  ;;  %v13999_v35 = vor.u32 %v18068_v14, %v13996_v34  ;;  %v18528_v14 = vld [vmem:[#allocation8 + $0x186c] sm:$0xf]  ;;  %v15836_v34 = vld [vmem:[#allocation8 + $0x1890] sm:$0xf0] }
 0x234   :  { %7422 = vmatpush.bf16.msra.mxu1 %v14439_v58  ;;  %v13919_v58 = vor.u32 %v18048_v42, %v13916_v45  ;;  %7342 = vmatmul.bf16.vlgmr.msra.gmra.mxu3 %v19458_v61  ;;  %v7105_v11 = vpop.f32.mrf.mxu2  ;;  %v15839_v27 = vor.u32 %v18528_v14, %v15836_v34  ;;  %v18018_v45 = vld [vmem:[#allocation8 + $0x87c] sm:$0xf]  ;;  %v19522_v34 = vpop.f32.mrf.mxu0 }
 0x235   :  { %7382 = vmatpush.bf16.msrb.mxu2 %v13399_v10  ;;  %7390 = vmatpush.bf16.msrb.mxu3 %v13959_v22  ;;  %v19513_v8 = vadd.f32 %v7105_v11, %v19497_v12  ;;  %v18278_v12 = vld [vmem:[#allocation8 + $0x109c] sm:$0xf]  ;;  %v18428_v10 = vld [vmem:[#allocation8 + $0x154c] sm:$0xf]  ;;  %v15796_v22 = vld [vmem:[#allocation8 + $0x1840] sm:$0xf0] }
 0x236   :  { %v14839_v39 = vor.u32 %v18278_v12, %v14836_v28  ;;  %v15799_v40 = vor.u32 %v18518_v17, %v15796_v22  ;;  %v13756_v11 = vld [vmem:[#allocation8 + $0x850] sm:$0xf0]  ;;  %20218 = vst [vmem:[#allocation22_spill] sm:$0xff] %v19522_v34  ;;  %v15316_v28 = vld [vmem:[#allocation8 + $0x1480] sm:$0xf0] }
 0x237   :  { %7409 = vmatpush.bf16.msra.mxu0 %v14079_v23  ;;  %v14316_v23 = vld [vmem:[#allocation8 + $0xcb0] sm:$0xf0]  ;;  %v18488_v17 = vld [vmem:[#allocation8 + $0x172c] sm:$0xf]  ;;  %v18315_v34 = vld [vmem:[#allocation8 + $0x11bc] sm:$0xf0] }
 0x238   :  { %7423 = vmatpush.bf16.msra.mxu1 %v14399_v13  ;;  %v14319_v16 = vor.u32 %v18148_v52, %v14316_v23  ;;  %v19515_v13 = vpop.f32.mrf.mxu3  ;;  %v15396_v52 = vld [vmem:[#allocation8 + $0x1520] sm:$0xf0]  ;;  %v14716_v12 = vld [vmem:[#allocation8 + $0xfd0] sm:$0xf0] }
 0x239   :  { %7383 = vmatpush.bf16.msrb.mxu2 %v13359_v1  ;;  %7391 = vmatpush.bf16.msrb.mxu3 %v13919_v58  ;;  %v18508_v1 = vld [vmem:[#allocation8 + $0x17cc] sm:$0xf]  ;;  %v15676_v22 = vld [vmem:[#allocation8 + $0x1750] sm:$0xf0] }
 0x23b   :  { %7410 = vmatpush.bf16.msra.mxu0 %v14039_v6  ;;  %v15879_v6 = vor.u32 %v18538_v55, %v15876_v25  ;;  %v15756_v55 = vld [vmem:[#allocation8 + $0x17f0] sm:$0xf0] }
 0x23c   :  { %7424 = vmatpush.bf16.msra.mxu1 %v14359_v56  ;;  %7384 = vmatmul.bf16.vlgmr.msrb.gmra.mxu2 %v19411_v62  ;;  %v13796_v56 = vld [vmem:[#allocation8 + $0x8a0] sm:$0xf0]  ;;  %v15759_v54 = vor.u32 %v18508_v1, %v15756_v55  ;;  %v19528_v1 = vpop.f32.mrf.mxu2 }
 0x23d   :  { %7432 = vmatpush.bf16.msra.mxu2 %v14919_v59  ;;  %7392 = vmatpush.bf16.msrb.mxu3 %v13879_v21  ;;  %v13799_v58 = vor.u32 %v18018_v45, %v13796_v56  ;;  %v14799_v59 = vor.u32 %v18268_v43, %v14796_v44  ;;  %v13676_v56 = vld [vmem:[#allocation8 + $0x7b0] sm:$0xf0]  ;;  %v18238_v43 = vld [vmem:[#allocation8 + $0xf5c] sm:$0xf]  ;;  %v15679_v44 = vor.u32 %v18488_v17, %v15676_v22  ;;  %v15236_v55 = vld [vmem:[#allocation8 + $0x13e0] sm:$0xf0] }
 0x23e   :  { %20221 = vst [vmem:[#allocation25_spill] sm:$0xff] %v19528_v1  ;;  %v15596_v17 = vld [vmem:[#allocation8 + $0x16b0] sm:$0xf0]  ;;  %v13810_v1 = vld [vmem:[#allocation8 + $0x888] sm:$0xf] }
 0x23f   :  { %7411 = vmatpush.bf16.msra.mxu0 %v13999_v35  ;;  %v15436_v35 = vld [vmem:[#allocation8 + $0x1570] sm:$0xf0] }
 0x240   :  { %7425 = vmatpush.bf16.msra.mxu1 %v14319_v16  ;;  %v15439_v42 = vor.u32 %v18428_v10, %v15436_v35  ;;  %v7063_v23 = vpop.f32.mrf.mxu3  ;;  %v18008_v16 = vld [vmem:[#allocation8 + $0x82c] sm:$0xf]  ;;  %v19524_v10 = vpop.f32.mrf.mxu1 }
 0x241   :  { %7433 = vmatpush.bf16.msra.mxu2 %v14879_v41  ;;  %v19520_v25 = vadd.f32 %v7063_v23, %v19506_v49  ;;  %v13759_v14 = vor.u32 %v18008_v16, %v13756_v11  ;;  %v14759_v49 = vor.u32 %v18258_v37, %v14756_v3  ;;  %v17998_v41 = vld [vmem:[#allocation8 + $0x7dc] sm:$0xf]  ;;  %20219 = vst [vmem:[#allocation23_spill] sm:$0xff] %v19524_v10  ;;  %v15636_v11 = vld [vmem:[#allocation8 + $0x1700] sm:$0xf0] }
 0x242   :  { %7412 = vmatmul.bf16.vlgmr.msra.gmra.mxu0 %v19415_v50  ;;  %v18378_v23 = vld [vmem:[#allocation8 + $0x13bc] sm:$0xf]  ;;  %v18228_v3 = vld [vmem:[#allocation8 + $0xf0c] sm:$0xf]  ;;  %v15090_v10 = vld [vmem:[#allocation8 + $0x1288] sm:$0xf] }
 0x243   :  { %7460 = vmatpush.bf16.msrb.mxu0 %v15559_v32  ;;  %7426 = vmatmul.bf16.vlgmr.msra.gmra.mxu1 %v19421_v60  ;;  %v13839_v32 = vor.u32 %v18028_v15, %v13836_v24  ;;  %20217 = vst [vmem:[#allocation21_spill] sm:$0xff] %v19520_v25  ;;  %v18248_v15 = vld [vmem:[#allocation8 + $0xfac] sm:$0xf]  ;;  %v15719_v24 = vor.u32 %v18498_v9, %v15716_v57  ;;  %v18478_v16 = vld [vmem:[#allocation8 + $0x16dc] sm:$0xf] }
 0x244   :  { %7474 = vmatpush.bf16.msrb.mxu1 %v15879_v6  ;;  %v18408_v6 = vld [vmem:[#allocation8 + $0x14ac] sm:$0xf]  ;;  %v14636_v9 = vld [vmem:[#allocation8 + $0xf30] sm:$0xf0]  ;;  %v18499_v25 = vld [vmem:[#allocation8 + $0x1784] sm:$0xf] }
 0x245   :  { %7393 = vmatpush.bf16.msrb.mxu3 %v13839_v32  ;;  %7434 = vmatpush.bf16.msra.mxu2 %v14839_v39  ;;  %v15359_v21 = vor.u32 %v18408_v6, %v15356_v5  ;;  %v17988_v39 = vld [vmem:[#allocation8 + $0x78c] sm:$0xf]  ;;  %v15239_v6 = vor.u32 %v18378_v23, %v15236_v55  ;;  %v17814_v55 = vld [vmem:[#allocation8 + $0x214] sm:$0xf0] }
 0x246   :  { %v18368_v57 = vld [vmem:[#allocation8 + $0x136c] sm:$0xf] }
 0x247   :  { %7461 = vmatpush.bf16.msrb.mxu0 %v15519_v63  ;;  %v15399_v63 = vor.u32 %v18418_v51, %v15396_v52  ;;  %v18388_v51 = vld [vmem:[#allocation8 + $0x140c] sm:$0xf]  ;;  %v15276_v52 = vld [vmem:[#allocation8 + $0x1430] sm:$0xf0] }
 0x248   :  { %7475 = vmatpush.bf16.msrb.mxu1 %v15839_v27  ;;  %v18398_v27 = vld [vmem:[#allocation8 + $0x145c] sm:$0xf]  ;;  %v19526_v35 = vpop.f32.mrf.mxu3  ;;  %v7147_v22 = vpop.f32.mrf.mxu1 }
 0x249   :  { %7394 = vmatpush.bf16.msrb.mxu3 %v13799_v58  ;;  %7435 = vmatpush.bf16.msra.mxu2 %v14799_v59  ;;  %20220 = vst [vmem:[#allocation24_spill] sm:$0xff] %v19526_v35  ;;  %v15319_v45 = vor.u32 %v18398_v27, %v15316_v28  ;;  %v13642_v58 = vld [vmem:[#allocation8 + $0x740] sm:$0xf]  ;;  %v17984_v59 = vld [vmem:[#allocation8 + $0x764] sm:$0xf0] }
 0x24a   :  { %v13643_v5 = vor.u32 %v17984_v59, %v13642_v58  ;;  %v17974_v27 = vld [vmem:[#allocation8 + $0x714] sm:$0xf0]  ;;  %v18468_v28 = vld [vmem:[#allocation8 + $0x168c] sm:$0xf]  ;;  %v13562_v58 = vld [vmem:[#allocation8 + $0x6a0] sm:$0xf] }
 0x24b   :  { %7462 = vmatpush.bf16.msrb.mxu0 %v15479_v19  ;;  %v13716_v19 = vld [vmem:[#allocation8 + $0x800] sm:$0xf0]  ;;  %v17964_v59 = vld [vmem:[#allocation8 + $0x6c4] sm:$0xf0]  ;;  %v13610_v35 = vld [vmem:[#allocation8 + $0x6f8] sm:$0xf] }
 0x24c   :  { %7476 = vmatpush.bf16.msrb.mxu1 %v15799_v40  ;;  %v13719_v32 = vor.u32 %v17998_v41, %v13716_v19  ;;  %v14676_v40 = vld [vmem:[#allocation8 + $0xf80] sm:$0xf0]  ;;  %v13002_v19 = vld [vmem:[#allocation8 + $0x240] sm:$0xf] }
 0x24d   :  { %7395 = vmatpush.bf16.msrb.mxu3 %v13759_v14  ;;  %7436 = vmatpush.bf16.msra.mxu2 %v14759_v49  ;;  %v14679_v37 = vor.u32 %v18238_v43, %v14676_v40  ;;  %v15196_v14 = vld [vmem:[#allocation8 + $0x1390] sm:$0xf0]  ;;  %v7133_v49 = vpop.f32.mrf.mxu0 }
 0x24f   :  { %7463 = vmatpush.bf16.msrb.mxu0 %v15439_v42  ;;  %v14719_v42 = vor.u32 %v18248_v15, %v14716_v12  ;;  %v17824_v15 = vld [vmem:[#allocation8 + $0x264] sm:$0xf0] }
 0x250   :  { %7477 = vmatpush.bf16.msrb.mxu1 %v15759_v54  ;;  %v15279_v54 = vor.u32 %v18388_v51, %v15276_v52  ;;  %v7119_v41 = vpop.f32.mrf.mxu3  ;;  %v13003_v43 = vor.u32 %v17824_v15, %v13002_v19  ;;  %v15156_v51 = vld [vmem:[#allocation8 + $0x1340] sm:$0xf0]  ;;  %v12962_v52 = vld [vmem:[#allocation8 + $0x1f0] sm:$0xf]  ;;  %v17954_v15 = vld [vmem:[#allocation8 + $0x674] sm:$0xf0] }
 0x251   :  { %7396 = vmatpush.bf16.msrb.mxu3 %v13719_v32  ;;  %7437 = vmatpush.bf16.msra.mxu2 %v14719_v42  ;;  %v7120_v12 = vadd.f32 %v7119_v41, %v19513_v8  ;;  %v14639_v32 = vor.u32 %v18228_v3, %v14636_v9  ;;  %v18064_v42 = vld [vmem:[#allocation8 + $0x9e4] sm:$0xf0]  ;;  %v18358_v8 = vld [vmem:[#allocation8 + $0x131c] sm:$0xf]  ;;  %v13522_v19 = vld [vmem:[#allocation8 + $0x650] sm:$0xf] }
 0x252   :  { %v17804_v41 = vld [vmem:[#allocation8 + $0x1c4] sm:$0xf0] }
 0x253   :  { %7464 = vmatpush.bf16.msrb.mxu0 %v15399_v63  ;;  %v13679_v63 = vor.u32 %v17988_v39, %v13676_v56  ;;  %v13962_v39 = vld [vmem:[#allocation8 + $0x9c0] sm:$0xf]  ;;  %v15199_v56 = vor.u32 %v18368_v57, %v15196_v14  ;;  %v18348_v57 = vld [vmem:[#allocation8 + $0x12cc] sm:$0xf]  ;;  %v15116_v14 = vld [vmem:[#allocation8 + $0x12f0] sm:$0xf0] }
 0x254   :  { %7478 = vmatpush.bf16.msrb.mxu1 %v15719_v24  ;;  %v13602_v24 = vld [vmem:[#allocation8 + $0x6f0] sm:$0xf]  ;;  %v13963_v23 = vor.u32 %v18064_v42, %v13962_v39  ;;  %v18338_v39 = vld [vmem:[#allocation8 + $0x127c] sm:$0xf]  ;;  %v15076_v42 = vld [vmem:[#allocation8 + $0x12a0] sm:$0xf0] }
 0x255   :  { %7397 = vmatpush.bf16.msrb.mxu3 %v13679_v63  ;;  %7438 = vmatpush.bf16.msra.mxu2 %v14679_v37  ;;  %v13603_v40 = vor.u32 %v17974_v27, %v13602_v24  ;;  %v18054_v37 = vld [vmem:[#allocation8 + $0x994] sm:$0xf0]  ;;  %v19536_v24 = vpop.f32.mrf.mxu0  ;;  %v18044_v27 = vld [vmem:[#allocation8 + $0x944] sm:$0xf0] }
 0x256   :  { %20223 = vst [vmem:[#allocation27_spill] sm:$0xff] %v19536_v24  ;;  %v18424_v24 = vld [vmem:[#allocation8 + $0x1524] sm:$0xf0] }
 0x257   :  { %7465 = vmatpush.bf16.msrb.mxu0 %v15359_v21  ;;  %v15639_v21 = vor.u32 %v18478_v16, %v15636_v11  ;;  %v7161_v16 = vpop.f32.mrf.mxu2  ;;  %v13922_v11 = vld [vmem:[#allocation8 + $0x970] sm:$0xf] }
 0x258   :  { %7479 = vmatpush.bf16.msrb.mxu1 %v15679_v44  ;;  %7398 = vmatmul.bf16.vlgmr.msrb.gmra.mxu3 %v19413_v2  ;;  %v15599_v44 = vor.u32 %v18468_v28, %v15596_v17  ;;  %v19533_v9 = vpop.f32.mrf.mxu3  ;;  %v15119_v28 = vor.u32 %v18348_v57, %v15116_v14  ;;  %v19539_v17 = vpop.f32.mrf.mxu1  ;;  %v13802_v14 = vld [vmem:[#allocation8 + $0x880] sm:$0xf] }
 0x259   :  { %7446 = vmatpush.bf16.msra.mxu3 %v15239_v6  ;;  %7439 = vmatpush.bf16.msra.mxu2 %v14639_v32  ;;  %v12963_v6 = vor.u32 %v17814_v55, %v12962_v52  ;;  %20222 = vst [vmem:[#allocation26_spill] sm:$0xff] %v19533_v9  ;;  %v13523_v32 = vor.u32 %v17954_v15, %v13522_v19  ;;  %v17769_v9 = vld [vmem:[#allocation8 + $0xb4] sm:$0xf] }
 0x25a   :  { %20224 = vst [vmem:[#allocation28_spill] sm:$0xff] %v19539_v17  ;;  %v15079_v52 = vor.u32 %v18338_v39, %v15076_v42  ;;  %v17774_v39 = vld [vmem:[#allocation8 + $0xd4] sm:$0xf0]  ;;  %v13402_v42 = vld [vmem:[#allocation8 + $0x560] sm:$0xf] }
 0x25b   :  { %7466 = vmatpush.bf16.msrb.mxu0 %v15319_v45  ;;  %v7134_v45 = vadd.f32 %v7133_v49, %v7120_v12  ;;  %v12922_v49 = vld [vmem:[#allocation8 + $0x1a0] sm:$0xf] }
 0x25c   :  { %7480 = vmatpush.bf16.msrb.mxu1 %v15639_v21  ;;  %7440 = vmatmul.bf16.vlgmr.msra.gmra.mxu2 %v19433_v26  ;;  %v13923_v21 = vor.u32 %v18054_v37, %v13922_v11  ;;  %v13882_v12 = vld [vmem:[#allocation8 + $0x920] sm:$0xf] }
 0x25d   :  { %v7148_v63 = vadd.f32 %v7147_v22, %v7134_v45  ;;  %7447 = vmatpush.bf16.msra.mxu3 %v15199_v56  ;;  %7488 = vmatpush.bf16.msrb.mxu2 %v13003_v43  ;;  %v12923_v22 = vor.u32 %v17804_v41, %v12922_v49  ;;  %v12882_v45 = vld [vmem:[#allocation8 + $0x150] sm:$0xf]  ;;  %v13883_v56 = vor.u32 %v18044_v27, %v13882_v12  ;;  %v17794_v43 = vld [vmem:[#allocation8 + $0x174] sm:$0xf0]  ;;  %v7189_v57 = vpop.f32.mrf.mxu0  ;;  %v18024_v49 = vld [vmem:[#allocation8 + $0x8a4] sm:$0xf0] }
 0x25e   :  { %v18318_v27 = vld [vmem:[#allocation8 + $0x11dc] sm:$0xf] }
 0x25f   :  { %7467 = vmatpush.bf16.msrb.mxu0 %v15279_v54  ;;  %v15159_v54 = vor.u32 %v18358_v8, %v15156_v51  ;;  %v7162_v3 = vadd.f32 %v7161_v16, %v7148_v63  ;;  %v13842_v8 = vld [vmem:[#allocation8 + $0x8d0] sm:$0xf]  ;;  %v18034_v51 = vld [vmem:[#allocation8 + $0x8f4] sm:$0xf0]  ;;  %v15036_v63 = vld [vmem:[#allocation8 + $0x1250] sm:$0xf0] }
 0x260   :  { %7481 = vmatpush.bf16.msrb.mxu1 %v15599_v44  ;;  %v17944_v44 = vld [vmem:[#allocation8 + $0x624] sm:$0xf0]  ;;  %v12842_v16 = vld [vmem:[#allocation8 + $0x100] sm:$0xf]  ;;  %v13843_v37 = vor.u32 %v18034_v51, %v13842_v8  ;;  %v7203_v19 = vpop.f32.mrf.mxu1 }
 0x261   :  { %7448 = vmatpush.bf16.msra.mxu3 %v15159_v54  ;;  %7489 = vmatpush.bf16.msrb.mxu2 %v12963_v6  ;;  %v17784_v54 = vld [vmem:[#allocation8 + $0x124] sm:$0xf0]  ;;  %v13442_v6 = vld [vmem:[#allocation8 + $0x5b0] sm:$0xf] }
 0x262   :  { %7468 = vmatmul.bf16.vlgmr.msrb.gmra.mxu0 %v19444_v29  ;;  %v12843_v15 = vor.u32 %v17784_v54, %v12842_v16  ;;  %v17914_v16 = vld [vmem:[#allocation8 + $0x534] sm:$0xf0]  ;;  %v14922_v54 = vld [vmem:[#allocation8 + $0x1140] sm:$0xf] }
 0x263   :  { %7516 = vmatpush.bf16.msra.mxu0 %v13643_v5  ;;  %v13563_v5 = vor.u32 %v17964_v59, %v13562_v58  ;;  %7482 = vmatmul.bf16.vlgmr.msrb.gmra.mxu1 %v19458_v61  ;;  %v7175_v58 = vpop.f32.mrf.mxu3  ;;  %v18328_v59 = vld [vmem:[#allocation8 + $0x122c] sm:$0xf] }
 0x264   :  { %7530 = vmatpush.bf16.msra.mxu1 %v13963_v23  ;;  %v12883_v23 = vor.u32 %v17794_v43, %v12882_v45  ;;  %v7176_v11 = vadd.f32 %v7175_v58, %v7162_v3  ;;  %v15039_v41 = vor.u32 %v18328_v59, %v15036_v63  ;;  %v13803_v3 = vor.u32 %v18024_v49, %v13802_v14  ;;  %v17924_v45 = vld [vmem:[#allocation8 + $0x584] sm:$0xf0]  ;;  %v18014_v43 = vld [vmem:[#allocation8 + $0x854] sm:$0xf0]  ;;  %v19543_v58 = vpop.f32.mrf.mxu2  ;;  %v13362_v63 = vld [vmem:[#allocation8 + $0x510] sm:$0xf] }
 0x265   :  { %7449 = vmatpush.bf16.msra.mxu3 %v15119_v28  ;;  %7490 = vmatpush.bf16.msrb.mxu2 %v12923_v22  ;;  %v14996_v28 = vld [vmem:[#allocation8 + $0x1200] sm:$0xf0]  ;;  %v12802_v22 = vld [vmem:[#allocation8 + $0xb0] sm:$0xf]  ;;  %v13403_v51 = vor.u32 %v17924_v45, %v13402_v42  ;;  %20226 = vst [vmem:[#allocation30_spill] sm:$0xff] %v19543_v58  ;;  %v19545_v49 = vpop.f32.mrf.mxu0 }
 0x266   :  { %v12803_v8 = vor.u32 %v17774_v39, %v12802_v22  ;;  %v18004_v14 = vld [vmem:[#allocation8 + $0x804] sm:$0xf0]  ;;  %20227 = vst [vmem:[#allocation31_spill] sm:$0xff] %v19545_v49  ;;  %v17894_v22 = vld [vmem:[#allocation8 + $0x494] sm:$0xf0] }
 0x267   :  { %7517 = vmatpush.bf16.msra.mxu0 %v13603_v40  ;;  %v13482_v40 = vld [vmem:[#allocation8 + $0x600] sm:$0xf]  ;;  %v18144_v42 = vld [vmem:[#allocation8 + $0xc64] sm:$0xf0]  ;;  %v14882_v45 = vld [vmem:[#allocation8 + $0x10f0] sm:$0xf] }
 0x268   :  { %7531 = vmatpush.bf16.msra.mxu1 %v13923_v21  ;;  %v13483_v55 = vor.u32 %v17944_v44, %v13482_v40  ;;  %v7190_v21 = vadd.f32 %v7189_v57, %v7176_v11  ;;  %v14999_v40 = vor.u32 %v18318_v27, %v14996_v28  ;;  %v18308_v44 = vld [vmem:[#allocation8 + $0x118c] sm:$0xf]  ;;  %v13322_v11 = vld [vmem:[#allocation8 + $0x4c0] sm:$0xf]  ;;  %v17754_v27 = vld [vmem:[#allocation8 + $0x34] sm:$0xf0] }
 0x269   :  { %7450 = vmatpush.bf16.msra.mxu3 %v15079_v52  ;;  %7491 = vmatpush.bf16.msrb.mxu2 %v12883_v23  ;;  %v14956_v52 = vld [vmem:[#allocation8 + $0x11b0] sm:$0xf0]  ;;  %v12762_v23 = vld [vmem:[#allocation8 + $0x60] sm:$0xf]  ;;  %v13282_v28 = vld [vmem:[#allocation8 + $0x470] sm:$0xf] }
 0x26a   :  { %v13722_v57 = vld [vmem:[#allocation8 + $0x7e0] sm:$0xf]  ;;  %v18314_v58 = vld [vmem:[#allocation8 + $0x11b4] sm:$0xf0] }
 0x26b   :  { %7518 = vmatpush.bf16.msra.mxu0 %v13563_v5  ;;  %v17934_v5 = vld [vmem:[#allocation8 + $0x5d4] sm:$0xf0]  ;;  %v14282_v39 = vld [vmem:[#allocation8 + $0xc40] sm:$0xf] }
 0x26c   :  { %7532 = vmatpush.bf16.msra.mxu1 %v13883_v56  ;;  %v13443_v12 = vor.u32 %v17934_v5, %v13442_v6  ;;  %v13762_v56 = vld [vmem:[#allocation8 + $0x830] sm:$0xf]  ;;  %v18304_v6 = vld [vmem:[#allocation8 + $0x1164] sm:$0xf0]  ;;  %v14959_v5 = vor.u32 %v18308_v44, %v14956_v52  ;;  %v19547_v44 = vpop.f32.mrf.mxu1  ;;  %v15562_v49 = vld [vmem:[#allocation8 + $0x1640] sm:$0xf] }
 0x26d   :  { %7451 = vmatpush.bf16.msra.mxu3 %v15039_v41  ;;  %7492 = vmatpush.bf16.msrb.mxu2 %v12843_v15  ;;  %v13763_v59 = vor.u32 %v18014_v43, %v13762_v56  ;;  %v13363_v41 = vor.u32 %v17914_v16, %v13362_v63  ;;  %v18294_v56 = vld [vmem:[#allocation8 + $0x1114] sm:$0xf0]  ;;  %v13682_v43 = vld [vmem:[#allocation8 + $0x790] sm:$0xf]  ;;  %20228 = vst [vmem:[#allocation32_spill] sm:$0xff] %v19547_v44 }
 0x26e   :  { %v18384_v52 = vld [vmem:[#allocation8 + $0x13e4] sm:$0xf0]  ;;  %v14883_v63 = vor.u32 %v18294_v56, %v14882_v45  ;;  %v14802_v56 = vld [vmem:[#allocation8 + $0x1050] sm:$0xf] }
 0x26f   :  { %7519 = vmatpush.bf16.msra.mxu0 %v13523_v32  ;;  %v19541_v32 = vadd.f32 %v7203_v19, %v7190_v21  ;;  %v12722_v19 = vld [vmem:[#allocation8 + $0x10] sm:$0xf]  ;;  %v18124_v45 = vld [vmem:[#allocation8 + $0xbc4] sm:$0xf0] }
 0x270   :  { %7533 = vmatpush.bf16.msra.mxu1 %v13843_v37  ;;  %v17904_v37 = vld [vmem:[#allocation8 + $0x4e4] sm:$0xf0] }
 0x271   :  { %20225 = vst [vmem:[#allocation29_spill] sm:$0xff] %v19541_v32  ;;  %7452 = vmatpush.bf16.msra.mxu3 %v14999_v40  ;;  %7493 = vmatpush.bf16.msrb.mxu2 %v12803_v8  ;;  %v13323_v15 = vor.u32 %v17904_v37, %v13322_v11  ;;  %v17994_v40 = vld [vmem:[#allocation8 + $0x7b4] sm:$0xf0]  ;;  %v12723_v8 = vor.u32 %v17754_v27, %v12722_v19  ;;  %v13242_v11 = vld [vmem:[#allocation8 + $0x420] sm:$0xf] }
 0x272   :  { %v13683_v16 = vor.u32 %v17994_v40, %v13682_v43  ;;  %v17884_v37 = vld [vmem:[#allocation8 + $0x444] sm:$0xf0]  ;;  %v18374_v19 = vld [vmem:[#allocation8 + $0x1394] sm:$0xf0]  ;;  %v15082_v32 = vld [vmem:[#allocation8 + $0x1280] sm:$0xf] }
 0x273   :  { %7520 = vmatpush.bf16.msra.mxu0 %v13483_v55  ;;  %v17764_v55 = vld [vmem:[#allocation8 + $0x84] sm:$0xf0]  ;;  %v18274_v43 = vld [vmem:[#allocation8 + $0x1074] sm:$0xf0] }
 0x274   :  { %7534 = vmatpush.bf16.msra.mxu1 %v13803_v3  ;;  %v12763_v21 = vor.u32 %v17764_v55, %v12762_v23  ;;  %v13723_v3 = vor.u32 %v18004_v14, %v13722_v57  ;;  %v7217_v23 = vpop.f32.mrf.mxu2  ;;  %v13283_v55 = vor.u32 %v17894_v22, %v13282_v28  ;;  %v14842_v57 = vld [vmem:[#allocation8 + $0x10a0] sm:$0xf]  ;;  %v18284_v14 = vld [vmem:[#allocation8 + $0x10c4] sm:$0xf0]  ;;  %v13202_v22 = vld [vmem:[#allocation8 + $0x3d0] sm:$0xf]  ;;  %v7259_v40 = vpop.f32.mrf.mxu1 }
 0x275   :  { %7453 = vmatpush.bf16.msra.mxu3 %v14959_v5  ;;  %v18134_v5 = vld [vmem:[#allocation8 + $0xc14] sm:$0xf0]  ;;  %v14843_v28 = vor.u32 %v18284_v14, %v14842_v57  ;;  %v14762_v14 = vld [vmem:[#allocation8 + $0x1000] sm:$0xf] }
 0x276   :  { %7494 = vmatpush.bf16.msrb.mxu2 %v12763_v21  ;;  %v7245_v21 = vpop.f32.mrf.mxu0  ;;  %v18114_v57 = vld [vmem:[#allocation8 + $0xb74] sm:$0xf0] }
 0x277   :  { %7521 = vmatpush.bf16.msra.mxu0 %v13443_v12  ;;  %v14923_v12 = vor.u32 %v18304_v6, %v14922_v54  ;;  %v14242_v54 = vld [vmem:[#allocation8 + $0xbf0] sm:$0xf] }
 0x278   :  { %7535 = vmatpush.bf16.msra.mxu1 %v13763_v59  ;;  %v14283_v59 = vor.u32 %v18144_v42, %v14282_v39  ;;  %7454 = vmatmul.bf16.vlgmr.msra.gmra.mxu3 %v19436_v31  ;;  %v14243_v27 = vor.u32 %v18134_v5, %v14242_v54  ;;  %v14202_v39 = vld [vmem:[#allocation8 + $0xba0] sm:$0xf]  ;;  %v14162_v54 = vld [vmem:[#allocation8 + $0xb50] sm:$0xf] }
 0x279   :  { %7502 = vmatpush.bf16.msrb.mxu3 %v13323_v15  ;;  %v19551_v15 = vpop.f32.mrf.mxu3 }
 0x27a   :  { %7495 = vmatpush.bf16.msrb.mxu2 %v12723_v8  ;;  %20229 = vst [vmem:[#allocation33_spill] sm:$0xff] %v19551_v15  ;;  %v19554_v8 = vld [vmem:[#allocation10] sm:$0xff]  ;;  %v18464_v15 = vld [vmem:[#allocation8 + $0x1664] sm:$0xf0] }
 0x27b   :  { %7522 = vmatpush.bf16.msra.mxu0 %v13403_v51  ;;  %v15242_v51 = vld [vmem:[#allocation8 + $0x13c0] sm:$0xf] }
 0x27c   :  { %7536 = vmatpush.bf16.msra.mxu1 %v13723_v3  ;;  %v15243_v6 = vor.u32 %v18384_v52, %v15242_v51  ;;  %v17874_v3 = vld [vmem:[#allocation8 + $0x3f4] sm:$0xf0]  ;;  %v20206_v51 = vperm.slane %v19554_v8, 2  ;;  %v15162_v52 = vld [vmem:[#allocation8 + $0x1320] sm:$0xf] }
 0x27d   :  { %7503 = vmatpush.bf16.msrb.mxu3 %v13283_v55  ;;  %7496 = vmatmul.bf16.vlgmr.msrb.gmra.mxu2 %v19356_v48  ;;  %v18364_v55 = vld [vmem:[#allocation8 + $0x1344] sm:$0xf0] }
 0x27e   :  { %7544 = vmatpush.bf16.msra.mxu2 %v14283_v59  ;;  %v13203_v59 = vor.u32 %v17874_v3, %v13202_v22  ;;  %v15163_v5 = vor.u32 %v18364_v55, %v15162_v52  ;;  %v19562_v22 = vpop.f32.mrf.mxu0  ;;  %v14163_v3 = vor.u32 %v18114_v57, %v14162_v54  ;;  %v18104_v55 = vld [vmem:[#allocation8 + $0xb24] sm:$0xf0]  ;;  %v13082_v57 = vld [vmem:[#allocation8 + $0x2e0] sm:$0xf] }
 0x27f   :  { %7523 = vmatpush.bf16.msra.mxu0 %v13363_v41  ;;  %v15202_v41 = vld [vmem:[#allocation8 + $0x1370] sm:$0xf] }
 0x280   :  { %7537 = vmatpush.bf16.msra.mxu1 %v13683_v16  ;;  %v15203_v42 = vor.u32 %v18374_v19, %v15202_v41  ;;  %v14803_v16 = vor.u32 %v18274_v43, %v14802_v56  ;;  %v18264_v41 = vld [vmem:[#allocation8 + $0x1024] sm:$0xf0]  ;;  %v7218_v19 = vadd.f32 %v7217_v23, %v20206_v51  ;;  %v17854_v56 = vld [vmem:[#allocation8 + $0x354] sm:$0xf0]  ;;  %v14122_v43 = vld [vmem:[#allocation8 + $0xb00] sm:$0xf] }
 0x281   :  { %v18254_v23 = vld [vmem:[#allocation8 + $0xfd4] sm:$0xf0] }
 0x282   :  { %7524 = vmatmul.bf16.vlgmr.msra.gmra.mxu0 %v19411_v62  ;;  %7545 = vmatpush.bf16.msra.mxu2 %v14243_v27 }
 0x283   :  { %7572 = vmatpush.bf16.msrb.mxu0 %v14923_v12  ;;  %v13243_v12 = vor.u32 %v17884_v37, %v13242_v11  ;;  %7538 = vmatmul.bf16.vlgmr.msra.gmra.mxu1 %v19413_v2  ;;  %v13162_v11 = vld [vmem:[#allocation8 + $0x380] sm:$0xf]  ;;  %v17864_v37 = vld [vmem:[#allocation8 + $0x3a4] sm:$0xf0] }
 0x284   :  { %7586 = vmatpush.bf16.msrb.mxu1 %v15243_v6  ;;  %v19558_v6 = vpop.f32.mrf.mxu2  ;;  %v13163_v27 = vor.u32 %v17864_v37, %v13162_v11  ;;  %v19564_v37 = vpop.f32.mrf.mxu1 }
 0x285   :  { %7504 = vmatpush.bf16.msrb.mxu3 %v13243_v12  ;;  %v15122_v12 = vld [vmem:[#allocation8 + $0x12d0] sm:$0xf] }
 0x286   :  { %v15123_v52 = vor.u32 %v18354_v47, %v15122_v12  ;;  %v14682_v12 = vld [vmem:[#allocation8 + $0xf60] sm:$0xf] }
 0x287   :  { %7573 = vmatpush.bf16.msrb.mxu0 %v14883_v63  ;;  %v14203_v63 = vor.u32 %v18124_v45, %v14202_v39  ;;  %v14763_v39 = vor.u32 %v18264_v41, %v14762_v14  ;;  %v17844_v14 = vld [vmem:[#allocation8 + $0x304] sm:$0xf0]  ;;  %v14082_v41 = vld [vmem:[#allocation8 + $0xab0] sm:$0xf] }
 0x288   :  { %7587 = vmatpush.bf16.msrb.mxu1 %v15203_v42  ;;  %v13122_v42 = vld [vmem:[#allocation8 + $0x330] sm:$0xf] }
 0x289   :  { %7505 = vmatpush.bf16.msrb.mxu3 %v13203_v59  ;;  %7546 = vmatpush.bf16.msra.mxu2 %v14203_v63  ;;  %v18344_v59 = vld [vmem:[#allocation8 + $0x12a4] sm:$0xf0]  ;;  %v13123_v11 = vor.u32 %v17854_v56, %v13122_v42  ;;  %v14123_v63 = vor.u32 %v18104_v55, %v14122_v43  ;;  %v13083_v42 = vor.u32 %v17844_v14, %v13082_v57  ;;  %v14042_v56 = vld [vmem:[#allocation8 + $0xa60] sm:$0xf]  ;;  %v18234_v55 = vld [vmem:[#allocation8 + $0xf34] sm:$0xf0] }
 0x28a   :  { %v18084_v43 = vld [vmem:[#allocation8 + $0xa84] sm:$0xf0]  ;;  %v15002_v57 = vld [vmem:[#allocation8 + $0x11e0] sm:$0xf] }
 0x28b   :  { %7574 = vmatpush.bf16.msrb.mxu0 %v14843_v28  ;;  %v7231_v28 = vpop.f32.mrf.mxu3  ;;  %v18324_v14 = vld [vmem:[#allocation8 + $0x1204] sm:$0xf0] }
 0x28c   :  { %v7232_v45 = vadd.f32 %v7231_v28, %v7218_v19  ;;  %7588 = vmatpush.bf16.msrb.mxu1 %v15163_v5  ;;  %v7273_v47 = vpop.f32.mrf.mxu2  ;;  %v15083_v5 = vor.u32 %v18344_v59, %v15082_v32  ;;  %v18094_v19 = vld [vmem:[#allocation8 + $0xad4] sm:$0xf0]  ;;  %v18224_v59 = vld [vmem:[#allocation8 + $0xee4] sm:$0xf0]  ;;  %v19570_v44 = vpop.f32.mrf.mxu1 }
 0x28d   :  { %7506 = vmatpush.bf16.msrb.mxu3 %v13163_v27  ;;  %7547 = vmatpush.bf16.msra.mxu2 %v14163_v3  ;;  %v15042_v27 = vld [vmem:[#allocation8 + $0x1230] sm:$0xf] }
 0x28e   :  { %v7246_v51 = vadd.f32 %v7245_v21, %v7232_v45  ;;  %v18244_v21 = vld [vmem:[#allocation8 + $0xf84] sm:$0xf0]  ;;  %v18334_v45 = vld [vmem:[#allocation8 + $0x1254] sm:$0xf0]  ;;  %v13042_v3 = vld [vmem:[#allocation8 + $0x290] sm:$0xf] }
 0x28f   :  { %7575 = vmatpush.bf16.msrb.mxu0 %v14803_v16  ;;  %v14723_v16 = vor.u32 %v18254_v23, %v14722_v7  ;;  %v14083_v7 = vor.u32 %v18094_v19, %v14082_v41  ;;  %v15043_v32 = vor.u32 %v18334_v45, %v15042_v27  ;;  %v14602_v23 = vld [vmem:[#allocation8 + $0xec0] sm:$0xf]  ;;  %v14002_v41 = vld [vmem:[#allocation8 + $0xa10] sm:$0xf]  ;;  %v18214_v27 = vld [vmem:[#allocation8 + $0xe94] sm:$0xf0]  ;;  %v15003_v45 = vor.u32 %v18324_v14, %v15002_v57 }
 0x290   :  { %v7260_v54 = vadd.f32 %v7259_v40, %v7246_v51  ;;  %7589 = vmatpush.bf16.msrb.mxu1 %v15123_v52  ;;  %v14683_v40 = vor.u32 %v18244_v21, %v14682_v12  ;;  %v17834_v51 = vld [vmem:[#allocation8 + $0x2b4] sm:$0xf0]  ;;  %v14642_v52 = vld [vmem:[#allocation8 + $0xf10] sm:$0xf]  ;;  %v17799_v14 = vld [vmem:[#allocation8 + $0x1a4] sm:$0xf] }
 0x291   :  { %7507 = vmatpush.bf16.msrb.mxu3 %v13123_v11  ;;  %7548 = vmatpush.bf16.msra.mxu2 %v14123_v63  ;;  %v13043_v11 = vor.u32 %v17834_v51, %v13042_v3  ;;  %v14043_v63 = vor.u32 %v18084_v43, %v14042_v56  ;;  %v18074_v12 = vld [vmem:[#allocation8 + $0xa34] sm:$0xf0]  ;;  %v14562_v21 = vld [vmem:[#allocation8 + $0xe70] sm:$0xf]  ;;  %v12964_v3 = vld [vmem:[#allocation8 + $0x218] sm:$0xf0] }
 0x292   :  { %v19566_v28 = vadd.f32 %v7273_v47, %v7260_v54  ;;  %v17819_v54 = vld [vmem:[#allocation8 + $0x244] sm:$0xf]  ;;  %v13004_v47 = vld [vmem:[#allocation8 + $0x268] sm:$0xf0]  ;;  %v14962_v51 = vld [vmem:[#allocation8 + $0x1190] sm:$0xf]  ;;  %v14563_v43 = vor.u32 %v18214_v27, %v14562_v21 }
 0x293   :  { %7576 = vmatpush.bf16.msrb.mxu0 %v14763_v39  ;;  %v19568_v39 = vpop.f32.mrf.mxu0  ;;  %v13007_v19 = vor.u32 %v17819_v54, %v13004_v47  ;;  %v13324_v56 = vld [vmem:[#allocation8 + $0x4e8] sm:$0xf0]  ;;  %v18204_v54 = vld [vmem:[#allocation8 + $0xe44] sm:$0xf0]  ;;  %v15522_v47 = vld [vmem:[#allocation8 + $0x15f0] sm:$0xf] }
 0x294   :  { %7590 = vmatpush.bf16.msrb.mxu1 %v15083_v5  ;;  %v14603_v5 = vor.u32 %v18224_v59, %v14602_v23  ;;  %v14963_v23 = vor.u32 %v18314_v58, %v14962_v51  ;;  %v14522_v59 = vld [vmem:[#allocation8 + $0xe20] sm:$0xf]  ;;  %v18454_v57 = vld [vmem:[#allocation8 + $0x1614] sm:$0xf0]  ;;  %v12884_v51 = vld [vmem:[#allocation8 + $0x178] sm:$0xf0] }
 0x295   :  { %7508 = vmatpush.bf16.msrb.mxu3 %v13083_v42  ;;  %7549 = vmatpush.bf16.msra.mxu2 %v14083_v7  ;;  %v17809_v42 = vld [vmem:[#allocation8 + $0x1f4] sm:$0xf]  ;;  %v14003_v7 = vor.u32 %v18074_v12, %v14002_v41  ;;  %v13284_v41 = vld [vmem:[#allocation8 + $0x498] sm:$0xf0]  ;;  %v15523_v58 = vor.u32 %v18454_v57, %v15522_v47  ;;  %v14482_v12 = vld [vmem:[#allocation8 + $0xdd0] sm:$0xf] }
 0x296   :  { %v18194_v21 = vld [vmem:[#allocation8 + $0xdf4] sm:$0xf0]  ;;  %v15482_v27 = vld [vmem:[#allocation8 + $0x15a0] sm:$0xf]  ;;  %v15442_v47 = vld [vmem:[#allocation8 + $0x1550] sm:$0xf] }
 0x297   :  { %7577 = vmatpush.bf16.msrb.mxu0 %v14723_v16  ;;  %v14643_v16 = vor.u32 %v18234_v55, %v14642_v52  ;;  %v12967_v55 = vor.u32 %v17809_v42, %v12964_v3  ;;  %v18444_v42 = vld [vmem:[#allocation8 + $0x15c4] sm:$0xf0]  ;;  %v17789_v3 = vld [vmem:[#allocation8 + $0x154] sm:$0xf] }
 0x298   :  { %7591 = vmatpush.bf16.msrb.mxu1 %v15043_v32  ;;  %v15563_v32 = vor.u32 %v18464_v15, %v15562_v49  ;;  %v19576_v49 = vpop.f32.mrf.mxu3  ;;  %v14523_v15 = vor.u32 %v18204_v54, %v14522_v59  ;;  %v14442_v59 = vld [vmem:[#allocation8 + $0xd80] sm:$0xf]  ;;  %v18184_v54 = vld [vmem:[#allocation8 + $0xda4] sm:$0xf0] }
 0x299   :  { %7509 = vmatpush.bf16.msrb.mxu3 %v13043_v11  ;;  %7550 = vmatpush.bf16.msra.mxu2 %v14043_v63  ;;  %v12924_v63 = vld [vmem:[#allocation8 + $0x1c8] sm:$0xf0] }
 0x29b   :  { %7578 = vmatpush.bf16.msrb.mxu0 %v14683_v40  ;;  %v17899_v40 = vld [vmem:[#allocation8 + $0x4c4] sm:$0xf]  ;;  %v19572_v52 = vpop.f32.mrf.mxu0 }
 0x29c   :  { %20230 = vst [vmem:[#allocation34_spill] sm:$0xff] %v19572_v52  ;;  %7592 = vmatpush.bf16.msrb.mxu1 %v15003_v45  ;;  %7510 = vmatmul.bf16.vlgmr.msrb.gmra.mxu3 %v19358_v53  ;;  %v13327_v11 = vor.u32 %v17899_v40, %v13324_v56  ;;  %v13244_v40 = vld [vmem:[#allocation8 + $0x448] sm:$0xf0]  ;;  %v20208_v56 = vperm.slane %v19554_v8, 3  ;;  %v18145_v52 = vld [vmem:[#allocation8 + $0xc6c] sm:$0xf0] }
 0x29d   :  { %7558 = vmatpush.bf16.msra.mxu3 %v14603_v5  ;;  %7551 = vmatpush.bf16.msra.mxu2 %v14003_v7  ;;  %v19578_v5 = vpop.f32.mrf.mxu1  ;;  %v17879_v7 = vld [vmem:[#allocation8 + $0x424] sm:$0xf] }
 0x29e   :  { %20231 = vst [vmem:[#allocation35_spill] sm:$0xff] %v19578_v5  ;;  %v13247_v57 = vor.u32 %v17879_v7, %v13244_v40  ;;  %v15402_v7 = vld [vmem:[#allocation8 + $0x1500] sm:$0xf]  ;;  %v15684_v5 = vld [vmem:[#allocation8 + $0x1758] sm:$0xf0] }
 0x29f   :  { %7579 = vmatpush.bf16.msrb.mxu0 %v14643_v16  ;;  %v17889_v16 = vld [vmem:[#allocation8 + $0x474] sm:$0xf] }
 0x2a0   :  { %7593 = vmatpush.bf16.msrb.mxu1 %v14963_v23  ;;  %7552 = vmatmul.bf16.vlgmr.msra.gmra.mxu2 %v19415_v50  ;;  %v13287_v45 = vor.u32 %v17889_v16, %v13284_v41  ;;  %v12887_v23 = vor.u32 %v17789_v3, %v12884_v51  ;;  %v12844_v16 = vld [vmem:[#allocation8 + $0x128] sm:$0xf0]  ;;  %v17869_v41 = vld [vmem:[#allocation8 + $0x3d4] sm:$0xf]  ;;  %v18174_v51 = vld [vmem:[#allocation8 + $0xd54] sm:$0xf0] }
 0x2a1   :  { %7559 = vmatpush.bf16.msra.mxu3 %v14563_v43  ;;  %7600 = vmatpush.bf16.msrb.mxu2 %v15563_v32  ;;  %v14483_v43 = vor.u32 %v18194_v21, %v14482_v12 }
 0x2a2   :  { %7580 = vmatmul.bf16.vlgmr.msrb.gmra.mxu0 %v19433_v26 }
 0x2a3   :  { %7628 = vmatpush.bf16.msra.mxu0 %v13007_v19  ;;  %v12927_v19 = vor.u32 %v17799_v14, %v12924_v63  ;;  %7594 = vmatmul.bf16.vlgmr.msrb.gmra.mxu1 %v19436_v31  ;;  %v7357_v32 = vpop.f32.mrf.mxu0  ;;  %v18434_v14 = vld [vmem:[#allocation8 + $0x1574] sm:$0xf0]  ;;  %v17779_v63 = vld [vmem:[#allocation8 + $0x104] sm:$0xf] }
 0x2a4   :  { %7642 = vmatpush.bf16.msra.mxu1 %v13327_v11  ;;  %v19583_v11 = vpop.f32.mrf.mxu2  ;;  %v7358_v12 = vadd.f32 %v7357_v32, %v20208_v56  ;;  %v15443_v21 = vor.u32 %v18434_v14, %v15442_v47  ;;  %v12804_v32 = vld [vmem:[#allocation8 + $0xd8] sm:$0xf0]  ;;  %v14362_v14 = vld [vmem:[#allocation8 + $0xce0] sm:$0xf]  ;;  %v18129_v56 = vld [vmem:[#allocation8 + $0xbf4] sm:$0xf] }
 0x2a5   :  { %7560 = vmatpush.bf16.msra.mxu3 %v14523_v15  ;;  %7601 = vmatpush.bf16.msrb.mxu2 %v15523_v58  ;;  %v13204_v15 = vld [vmem:[#allocation8 + $0x3f8] sm:$0xf0]  ;;  %v14443_v58 = vor.u32 %v18184_v54, %v14442_v59  ;;  %v7371_v3 = vpop.f32.mrf.mxu1  ;;  %v17859_v59 = vld [vmem:[#allocation8 + $0x384] sm:$0xf]  ;;  %v12807_v54 = vor.u32 %v17769_v9, %v12804_v32  ;;  %v15882_v32 = vld [vmem:[#allocation8 + $0x18c0] sm:$0xf] }
 0x2a6   :  { %v19588_v40 = vadd.f32 %v7371_v3, %v7358_v12  ;;  %v13207_v17 = vor.u32 %v17869_v41, %v13204_v15  ;;  %v18414_v15 = vld [vmem:[#allocation8 + $0x14d4] sm:$0xf0]  ;;  %v17759_v12 = vld [vmem:[#allocation8 + $0x64] sm:$0xf]  ;;  %v15322_v3 = vld [vmem:[#allocation8 + $0x1460] sm:$0xf] }
 0x2a7   :  { %7629 = vmatpush.bf16.msra.mxu0 %v12967_v55  ;;  %v15483_v55 = vor.u32 %v18444_v42, %v15482_v27  ;;  %v12847_v27 = vor.u32 %v17779_v63, %v12844_v16  ;;  %v15362_v63 = vld [vmem:[#allocation8 + $0x14b0] sm:$0xf] }
 0x2a8   :  { %7643 = vmatpush.bf16.msra.mxu1 %v13287_v45  ;;  %v14402_v45 = vld [vmem:[#allocation8 + $0xd30] sm:$0xf]  ;;  %v15363_v9 = vor.u32 %v18414_v15, %v15362_v63 }
 0x2a9   :  { %7561 = vmatpush.bf16.msra.mxu3 %v14483_v43  ;;  %7602 = vmatpush.bf16.msrb.mxu2 %v15483_v55  ;;  %v13164_v55 = vld [vmem:[#allocation8 + $0x3a8] sm:$0xf0]  ;;  %v15842_v15 = vld [vmem:[#allocation8 + $0x1870] sm:$0xf] }
 0x2aa   :  { %v13167_v41 = vor.u32 %v17859_v59, %v13164_v55  ;;  %v18139_v59 = vld [vmem:[#allocation8 + $0xc44] sm:$0xf]  ;;  %v14284_v55 = vld [vmem:[#allocation8 + $0xc68] sm:$0xf0] }
 0x2ab   :  { %7630 = vmatpush.bf16.msra.mxu0 %v12927_v19  ;;  %v7287_v19 = vpop.f32.mrf.mxu3 }
 0x2ac   :  { %v7288_v42 = vadd.f32 %v7287_v19, %v19566_v28  ;;  %7644 = vmatpush.bf16.msra.mxu1 %v13247_v57  ;;  %v15403_v28 = vor.u32 %v18424_v24, %v15402_v7  ;;  %v18164_v57 = vld [vmem:[#allocation8 + $0xd04] sm:$0xf0]  ;;  %v7329_v16 = vpop.f32.mrf.mxu2  ;;  %v12764_v19 = vld [vmem:[#allocation8 + $0x88] sm:$0xf0]  ;;  %v12724_v7 = vld [vmem:[#allocation8 + $0x38] sm:$0xf0] }
 0x2ad   :  { %7562 = vmatpush.bf16.msra.mxu3 %v14443_v58  ;;  %7603 = vmatpush.bf16.msrb.mxu2 %v15443_v21  ;;  %v13124_v58 = vld [vmem:[#allocation8 + $0x358] sm:$0xf0]  ;;  %v14363_v21 = vor.u32 %v18164_v57, %v14362_v14  ;;  %v12767_v24 = vor.u32 %v17759_v12, %v12764_v19  ;;  %v13084_v14 = vld [vmem:[#allocation8 + $0x308] sm:$0xf0]  ;;  %v15282_v57 = vld [vmem:[#allocation8 + $0x1410] sm:$0xf] }
 0x2ae   :  { %v7302_v43 = vadd.f32 %v19568_v39, %v7288_v42  ;;  %v17849_v42 = vld [vmem:[#allocation8 + $0x334] sm:$0xf]  ;;  %v18534_v12 = vld [vmem:[#allocation8 + $0x1894] sm:$0xf0] }
 0x2af   :  { %7631 = vmatpush.bf16.msra.mxu0 %v12887_v23  ;;  %v14403_v23 = vor.u32 %v18174_v51, %v14402_v45  ;;  %v18404_v45 = vld [vmem:[#allocation8 + $0x1484] sm:$0xf0]  ;;  %v17749_v51 = vld [vmem:[#allocation8 + $0x14] sm:$0xf] }
 0x2b0   :  { %v7316_v47 = vadd.f32 %v19570_v44, %v7302_v43  ;;  %7645 = vmatpush.bf16.msra.mxu1 %v13207_v17  ;;  %v18154_v44 = vld [vmem:[#allocation8 + $0xcb4] sm:$0xf0]  ;;  %v13127_v17 = vor.u32 %v17849_v42, %v13124_v58  ;;  %v18544_v43 = vld [vmem:[#allocation8 + $0x18e4] sm:$0xf0]  ;;  %v17979_v42 = vld [vmem:[#allocation8 + $0x744] sm:$0xf] }
 0x2b1   :  { %7563 = vmatpush.bf16.msra.mxu3 %v14403_v23  ;;  %7604 = vmatpush.bf16.msrb.mxu2 %v15403_v28  ;;  %v17839_v23 = vld [vmem:[#allocation8 + $0x2e4] sm:$0xf]  ;;  %v15323_v28 = vor.u32 %v18404_v45, %v15322_v3  ;;  %v15883_v63 = vor.u32 %v18544_v43, %v15882_v32  ;;  %v13644_v58 = vld [vmem:[#allocation8 + $0x768] sm:$0xf0]  ;;  %v15843_v45 = vor.u32 %v18534_v12, %v15842_v15  ;;  %v15802_v32 = vld [vmem:[#allocation8 + $0x1820] sm:$0xf] }
 0x2b2   :  { %v19592_v39 = vadd.f32 %v7329_v16, %v7316_v47  ;;  %v14287_v16 = vor.u32 %v18139_v59, %v14284_v55  ;;  %v13087_v19 = vor.u32 %v17839_v23, %v13084_v14  ;;  %v14604_v3 = vld [vmem:[#allocation8 + $0xee8] sm:$0xf0]  ;;  %v18524_v43 = vld [vmem:[#allocation8 + $0x1844] sm:$0xf0]  ;;  %v17969_v59 = vld [vmem:[#allocation8 + $0x6f4] sm:$0xf] }
 0x2b3   :  { %7632 = vmatpush.bf16.msra.mxu0 %v12847_v27  ;;  %v14322_v27 = vld [vmem:[#allocation8 + $0xc90] sm:$0xf]  ;;  %v18119_v23 = vld [vmem:[#allocation8 + $0xba4] sm:$0xf]  ;;  %v14204_v14 = vld [vmem:[#allocation8 + $0xbc8] sm:$0xf0] }
 0x2b4   :  { %7646 = vmatpush.bf16.msra.mxu1 %v13167_v41  ;;  %v14323_v47 = vor.u32 %v18154_v44, %v14322_v27  ;;  %v18394_v41 = vld [vmem:[#allocation8 + $0x1434] sm:$0xf0]  ;;  %v17829_v27 = vld [vmem:[#allocation8 + $0x294] sm:$0xf]  ;;  %v13044_v44 = vld [vmem:[#allocation8 + $0x2b8] sm:$0xf0] }
 0x2b5   :  { %7564 = vmatpush.bf16.msra.mxu3 %v14363_v21  ;;  %7605 = vmatpush.bf16.msrb.mxu2 %v15363_v9  ;;  %v14244_v21 = vld [vmem:[#allocation8 + $0xc18] sm:$0xf0]  ;;  %v15283_v9 = vor.u32 %v18394_v41, %v15282_v57  ;;  %v19596_v57 = vpop.f32.mrf.mxu3  ;;  %v15762_v41 = vld [vmem:[#allocation8 + $0x17d0] sm:$0xf]  ;;  %v18514_v15 = vld [vmem:[#allocation8 + $0x17f4] sm:$0xf0] }
 0x2b6   :  { %v17959_v12 = vld [vmem:[#allocation8 + $0x6a4] sm:$0xf] }
 0x2b7   :  { %7633 = vmatpush.bf16.msra.mxu0 %v12807_v54  ;;  %v12727_v54 = vor.u32 %v17749_v51, %v12724_v7  ;;  %v14247_v51 = vor.u32 %v18129_v56, %v14244_v21  ;;  %v13047_v7 = vor.u32 %v17829_v27, %v13044_v44  ;;  %v14164_v21 = vld [vmem:[#allocation8 + $0xb78] sm:$0xf0]  ;;  %v18199_v27 = vld [vmem:[#allocation8 + $0xe24] sm:$0xf]  ;;  %v14524_v44 = vld [vmem:[#allocation8 + $0xe48] sm:$0xf0] }
 0x2b8   :  { %7647 = vmatpush.bf16.msra.mxu1 %v13127_v17  ;;  %v13647_v17 = vor.u32 %v17979_v42, %v13644_v58  ;;  %v13564_v42 = vld [vmem:[#allocation8 + $0x6c8] sm:$0xf0]  ;;  %v18109_v58 = vld [vmem:[#allocation8 + $0xb54] sm:$0xf] }
 0x2b9   :  { %7565 = vmatpush.bf16.msra.mxu3 %v14323_v47  ;;  %7606 = vmatpush.bf16.msrb.mxu2 %v15323_v28  ;;  %v13604_v47 = vld [vmem:[#allocation8 + $0x718] sm:$0xf0]  ;;  %v18209_v28 = vld [vmem:[#allocation8 + $0xe74] sm:$0xf] }
 0x2ba   :  { %v13607_v56 = vor.u32 %v17969_v59, %v13604_v47  ;;  %v18099_v59 = vld [vmem:[#allocation8 + $0xb04] sm:$0xf]  ;;  %v18189_v47 = vld [vmem:[#allocation8 + $0xdd4] sm:$0xf] }
 0x2bb   :  { %7634 = vmatpush.bf16.msra.mxu0 %v12767_v24  ;;  %v18219_v24 = vld [vmem:[#allocation8 + $0xec4] sm:$0xf] }
 0x2bc   :  { %7648 = vmatpush.bf16.msra.mxu1 %v13087_v19  ;;  %7566 = vmatmul.bf16.vlgmr.msra.gmra.mxu3 %v19421_v60  ;;  %v14607_v55 = vor.u32 %v18219_v24, %v14604_v3  ;;  %v19600_v24 = vpop.f32.mrf.mxu2  ;;  %v13567_v3 = vor.u32 %v17959_v12, %v13564_v42  ;;  %v18089_v42 = vld [vmem:[#allocation8 + $0xab4] sm:$0xf] }
 0x2bd   :  { %7614 = vmatpush.bf16.msrb.mxu3 %v15883_v63  ;;  %7607 = vmatpush.bf16.msrb.mxu2 %v15283_v9  ;;  %v15803_v63 = vor.u32 %v18524_v43, %v15802_v32  ;;  %v15763_v9 = vor.u32 %v18514_v15, %v15762_v41  ;;  %20232 = vst [vmem:[#allocation36_spill] sm:$0xff] %v19600_v24  ;;  %v13524_v43 = vld [vmem:[#allocation8 + $0x678] sm:$0xf0]  ;;  %v18494_v41 = vld [vmem:[#allocation8 + $0x1754] sm:$0xf0] }
 0x2be   :  { %v14527_v32 = vor.u32 %v18199_v27, %v14524_v44  ;;  %v17939_v15 = vld [vmem:[#allocation8 + $0x604] sm:$0xf]  ;;  %v14444_v27 = vld [vmem:[#allocation8 + $0xda8] sm:$0xf0]  ;;  %v18449_v24 = vld [vmem:[#allocation8 + $0x15f4] sm:$0xf] }
 0x2bf   :  { %7635 = vmatpush.bf16.msra.mxu0 %v12727_v54  ;;  %v14564_v54 = vld [vmem:[#allocation8 + $0xe98] sm:$0xf0] }
 0x2c0   :  { %7649 = vmatpush.bf16.msra.mxu1 %v13047_v7  ;;  %7608 = vmatmul.bf16.vlgmr.msrb.gmra.mxu2 %v19444_v29  ;;  %v14567_v19 = vor.u32 %v18209_v28, %v14564_v54  ;;  %v17949_v7 = vld [vmem:[#allocation8 + $0x654] sm:$0xf]  ;;  %v7343_v28 = vpop.f32.mrf.mxu3 }
 0x2c1   :  { %7615 = vmatpush.bf16.msrb.mxu3 %v15843_v45  ;;  %7656 = vmatpush.bf16.msra.mxu2 %v13647_v17  ;;  %v14167_v45 = vor.u32 %v18109_v58, %v14164_v21  ;;  %v15722_v17 = vld [vmem:[#allocation8 + $0x1780] sm:$0xf]  ;;  %v13527_v54 = vor.u32 %v17949_v7, %v13524_v43  ;;  %v14084_v58 = vld [vmem:[#allocation8 + $0xad8] sm:$0xf0]  ;;  %v18179_v21 = vld [vmem:[#allocation8 + $0xd84] sm:$0xf] }
 0x2c2   :  { %7636 = vmatmul.bf16.vlgmr.msra.gmra.mxu0 %v19356_v48  ;;  %v13444_v43 = vld [vmem:[#allocation8 + $0x5d8] sm:$0xf0] }
 0x2c3   :  { %7684 = vmatpush.bf16.msrb.mxu0 %v14287_v16  ;;  %v14207_v16 = vor.u32 %v18119_v23, %v14204_v14  ;;  %7650 = vmatmul.bf16.vlgmr.msra.gmra.mxu1 %v19358_v53  ;;  %v14484_v23 = vld [vmem:[#allocation8 + $0xdf8] sm:$0xf0] }
 0x2c4   :  { %7698 = vmatpush.bf16.msrb.mxu1 %v14607_v55  ;;  %v14124_v55 = vld [vmem:[#allocation8 + $0xb28] sm:$0xf0]  ;;  %v14487_v12 = vor.u32 %v18189_v47, %v14484_v23  ;;  %v18169_v47 = vld [vmem:[#allocation8 + $0xd34] sm:$0xf]  ;;  %v14404_v23 = vld [vmem:[#allocation8 + $0xd58] sm:$0xf0] }
 0x2c5   :  { %7616 = vmatpush.bf16.msrb.mxu3 %v15803_v63  ;;  %7657 = vmatpush.bf16.msra.mxu2 %v13607_v56  ;;  %v14127_v63 = vor.u32 %v18099_v59, %v14124_v55  ;;  %v19603_v56 = vadd.f32 %v7343_v28, %v19592_v39  ;;  %v18484_v39 = vld [vmem:[#allocation8 + $0x1704] sm:$0xf0]  ;;  %v18079_v59 = vld [vmem:[#allocation8 + $0xa64] sm:$0xf]  ;;  %v14044_v55 = vld [vmem:[#allocation8 + $0xa88] sm:$0xf0] }
 0x2c6   :  { %v15602_v28 = vld [vmem:[#allocation8 + $0x1690] sm:$0xf] }
 0x2c7   :  { %7685 = vmatpush.bf16.msrb.mxu0 %v14247_v51  ;;  %v18504_v51 = vld [vmem:[#allocation8 + $0x17a4] sm:$0xf0]  ;;  %20233 = vst [vmem:[#allocation37_spill] sm:$0xff] %v19603_v56  ;;  %v14924_v56 = vld [vmem:[#allocation8 + $0x1168] sm:$0xf0] }
 0x2c8   :  { %7699 = vmatpush.bf16.msrb.mxu1 %v14567_v19  ;;  %v15723_v14 = vor.u32 %v18504_v51, %v15722_v17  ;;  %v13484_v19 = vld [vmem:[#allocation8 + $0x628] sm:$0xf0]  ;;  %v15642_v17 = vld [vmem:[#allocation8 + $0x16e0] sm:$0xf]  ;;  %v17929_v51 = vld [vmem:[#allocation8 + $0x5b4] sm:$0xf] }
 0x2c9   :  { %7617 = vmatpush.bf16.msrb.mxu3 %v15763_v9  ;;  %7658 = vmatpush.bf16.msra.mxu2 %v13567_v3  ;;  %v13487_v9 = vor.u32 %v17939_v15, %v13484_v19  ;;  %v14087_v3 = vor.u32 %v18089_v42, %v14084_v58  ;;  %v13404_v15 = vld [vmem:[#allocation8 + $0x588] sm:$0xf0]  ;;  %v14004_v19 = vld [vmem:[#allocation8 + $0xa38] sm:$0xf0]  ;;  %v18059_v42 = vld [vmem:[#allocation8 + $0x9c4] sm:$0xf] }
 0x2ca   :  { %v13964_v58 = vld [vmem:[#allocation8 + $0x9e8] sm:$0xf0] }
 0x2cb   :  { %7686 = vmatpush.bf16.msrb.mxu0 %v14207_v16  ;;  %v15682_v16 = vld [vmem:[#allocation8 + $0x1730] sm:$0xf] }
 0x2cc   :  { %7700 = vmatpush.bf16.msrb.mxu1 %v14527_v32  ;;  %v15683_v44 = vor.u32 %v18494_v41, %v15682_v16  ;;  %v14447_v32 = vor.u32 %v18179_v21, %v14444_v27  ;;  %v18474_v16 = vld [vmem:[#allocation8 + $0x16b4] sm:$0xf0]  ;;  %v17919_v41 = vld [vmem:[#allocation8 + $0x564] sm:$0xf]  ;;  %v15564_v27 = vld [vmem:[#allocation8 + $0x1668] sm:$0xf0] }
 0x2cd   :  { %7618 = vmatpush.bf16.msrb.mxu3 %v15723_v14  ;;  %7659 = vmatpush.bf16.msra.mxu2 %v13527_v54  ;;  %v15643_v14 = vor.u32 %v18484_v39, %v15642_v17  ;;  %v13447_v54 = vor.u32 %v17929_v51, %v13444_v43  ;;  %v18459_v21 = vld [vmem:[#allocation8 + $0x1644] sm:$0xf]  ;;  %v14364_v17 = vld [vmem:[#allocation8 + $0xd08] sm:$0xf0]  ;;  %v17909_v39 = vld [vmem:[#allocation8 + $0x514] sm:$0xf]  ;;  %v13967_v51 = vor.u32 %v18059_v42, %v13964_v58 }
 0x2ce   :  { %v15567_v43 = vor.u32 %v18459_v21, %v15564_v27  ;;  %v18039_v42 = vld [vmem:[#allocation8 + $0x924] sm:$0xf]  ;;  %v13884_v58 = vld [vmem:[#allocation8 + $0x948] sm:$0xf0]  ;;  %v18289_v21 = vld [vmem:[#allocation8 + $0x10f4] sm:$0xf] }
 0x2cf   :  { %7687 = vmatpush.bf16.msrb.mxu0 %v14167_v45  ;;  %v7385_v45 = vpop.f32.mrf.mxu2 }
 0x2d0   :  { %7701 = vmatpush.bf16.msrb.mxu1 %v14487_v12  ;;  %v19606_v7 = vadd.f32 %v7385_v45, %v19588_v40  ;;  %v14407_v12 = vor.u32 %v18169_v47, %v14404_v23  ;;  %v18069_v40 = vld [vmem:[#allocation8 + $0xa14] sm:$0xf]  ;;  %v15603_v45 = vor.u32 %v18474_v16, %v15602_v28  ;;  %v18299_v23 = vld [vmem:[#allocation8 + $0x1144] sm:$0xf]  ;;  %v14324_v16 = vld [vmem:[#allocation8 + $0xcb8] sm:$0xf0] }
 0x2d1   :  { %7619 = vmatpush.bf16.msrb.mxu3 %v15683_v44  ;;  %7660 = vmatpush.bf16.msra.mxu2 %v13487_v9  ;;  %v18159_v44 = vld [vmem:[#allocation8 + $0xce4] sm:$0xf]  ;;  %v13407_v9 = vor.u32 %v17919_v41, %v13404_v15  ;;  %v18149_v28 = vld [vmem:[#allocation8 + $0xc94] sm:$0xf]  ;;  %v15884_v41 = vld [vmem:[#allocation8 + $0x18e8] sm:$0xf0] }
 0x2d2   :  { %v14367_v47 = vor.u32 %v18159_v44, %v14364_v17  ;;  %v18439_v44 = vld [vmem:[#allocation8 + $0x15a4] sm:$0xf]  ;;  %v15484_v17 = vld [vmem:[#allocation8 + $0x15c8] sm:$0xf0] }
 0x2d3   :  { %7688 = vmatpush.bf16.msrb.mxu0 %v14127_v63  ;;  %v14047_v63 = vor.u32 %v18079_v59, %v14044_v55  ;;  %v18049_v59 = vld [vmem:[#allocation8 + $0x974] sm:$0xf]  ;;  %v13924_v55 = vld [vmem:[#allocation8 + $0x998] sm:$0xf0] }
 0x2d4   :  { %7702 = vmatpush.bf16.msrb.mxu1 %v14447_v32  ;;  %v13364_v32 = vld [vmem:[#allocation8 + $0x538] sm:$0xf0]  ;;  %v13927_v15 = vor.u32 %v18049_v59, %v13924_v55  ;;  %v18279_v59 = vld [vmem:[#allocation8 + $0x10a4] sm:$0xf]  ;;  %v19612_v55 = vpop.f32.mrf.mxu0 }
 0x2d5   :  { %7620 = vmatpush.bf16.msrb.mxu3 %v15643_v14  ;;  %7661 = vmatpush.bf16.msra.mxu2 %v13447_v54  ;;  %v15524_v14 = vld [vmem:[#allocation8 + $0x1618] sm:$0xf0]  ;;  %v13367_v54 = vor.u32 %v17909_v39, %v13364_v32  ;;  %v19610_v39 = vpop.f32.mrf.mxu3 }
 0x2d6   :  { %20234 = vst [vmem:[#allocation38_spill] sm:$0xff] %v19610_v39  ;;  %v13844_v32 = vld [vmem:[#allocation8 + $0x8f8] sm:$0xf0] }
 0x2d7   :  { %7689 = vmatpush.bf16.msrb.mxu0 %v14087_v3  ;;  %v14007_v3 = vor.u32 %v18069_v40, %v14004_v19  ;;  %v15527_v40 = vor.u32 %v18449_v24, %v15524_v14  ;;  %v14327_v19 = vor.u32 %v18149_v28, %v14324_v16  ;;  %v18429_v14 = vld [vmem:[#allocation8 + $0x1554] sm:$0xf]  ;;  %v15444_v28 = vld [vmem:[#allocation8 + $0x1578] sm:$0xf0]  ;;  %v18519_v16 = vld [vmem:[#allocation8 + $0x1824] sm:$0xf] }
 0x2d8   :  { %7703 = vmatpush.bf16.msrb.mxu1 %v14407_v12  ;;  %v14927_v12 = vor.u32 %v18299_v23, %v14924_v56  ;;  %v13887_v56 = vor.u32 %v18039_v42, %v13884_v58  ;;  %v14844_v23 = vld [vmem:[#allocation8 + $0x10c8] sm:$0xf0]  ;;  %v18269_v42 = vld [vmem:[#allocation8 + $0x1054] sm:$0xf]  ;;  %v19618_v58 = vpop.f32.mrf.mxu2 }
 0x2d9   :  { %7621 = vmatpush.bf16.msrb.mxu3 %v15603_v45  ;;  %7662 = vmatpush.bf16.msra.mxu2 %v13407_v9  ;;  %v14884_v45 = vld [vmem:[#allocation8 + $0x1118] sm:$0xf0]  ;;  %v18529_v9 = vld [vmem:[#allocation8 + $0x1874] sm:$0xf] }
 0x2da   :  { %v14887_v24 = vor.u32 %v18289_v21, %v14884_v45  ;;  %v18419_v45 = vld [vmem:[#allocation8 + $0x1504] sm:$0xf] }
 0x2db   :  { %7690 = vmatpush.bf16.msrb.mxu0 %v14047_v63  ;;  %v18539_v63 = vld [vmem:[#allocation8 + $0x18c4] sm:$0xf] }
 0x2dc   :  { %7704 = vmatpush.bf16.msrb.mxu1 %v14367_v47  ;;  %7622 = vmatmul.bf16.vlgmr.msrb.gmra.mxu3 %v19458_v61  ;;  %v15887_v27 = vor.u32 %v18539_v63, %v15884_v41  ;;  %v19615_v63 = vpop.f32.mrf.mxu1 }
 0x2dd   :  { %7670 = vmatpush.bf16.msra.mxu3 %v13967_v51  ;;  %7663 = vmatpush.bf16.msra.mxu2 %v13367_v54  ;;  %v15487_v51 = vor.u32 %v18439_v44, %v15484_v17  ;;  %v15804_v54 = vld [vmem:[#allocation8 + $0x1848] sm:$0xf0]  ;;  %v18509_v17 = vld [vmem:[#allocation8 + $0x17d4] sm:$0xf] }
 0x2de   :  { %v15807_v21 = vor.u32 %v18519_v16, %v15804_v54  ;;  %v15404_v44 = vld [vmem:[#allocation8 + $0x1528] sm:$0xf0]  ;;  %v18409_v16 = vld [vmem:[#allocation8 + $0x14b4] sm:$0xf]  ;;  %v15364_v54 = vld [vmem:[#allocation8 + $0x14d8] sm:$0xf0] }
 0x2df   :  { %7691 = vmatpush.bf16.msrb.mxu0 %v14007_v3  ;;  %v15844_v3 = vld [vmem:[#allocation8 + $0x1898] sm:$0xf0] }
 0x2e0   :  { %7705 = vmatpush.bf16.msrb.mxu1 %v14327_v19  ;;  %7664 = vmatmul.bf16.vlgmr.msra.gmra.mxu2 %v19411_v62  ;;  %v15847_v47 = vor.u32 %v18529_v9, %v15844_v3  ;;  %v13804_v19 = vld [vmem:[#allocation8 + $0x8a8] sm:$0xf0]  ;;  %v15764_v9 = vld [vmem:[#allocation8 + $0x17f8] sm:$0xf0] }
 0x2e1   :  { %7671 = vmatpush.bf16.msra.mxu3 %v13927_v15  ;;  %7712 = vmatpush.bf16.msrb.mxu2 %v14927_v12  ;;  %v14847_v15 = vor.u32 %v18279_v59, %v14844_v23  ;;  %v15447_v12 = vor.u32 %v18429_v14, %v15444_v28  ;;  %v13764_v59 = vld [vmem:[#allocation8 + $0x858] sm:$0xf0]  ;;  %v18259_v23 = vld [vmem:[#allocation8 + $0x1004] sm:$0xf]  ;;  %v7413_v14 = vpop.f32.mrf.mxu0  ;;  %v14764_v28 = vld [vmem:[#allocation8 + $0x1028] sm:$0xf0] }
 0x2e2   :  { %7692 = vmatmul.bf16.vlgmr.msrb.gmra.mxu0 %v19415_v50 }
 0x2e3   :  { %7740 = vmatpush.bf16.msra.mxu0 %v15567_v43  ;;  %v18029_v43 = vld [vmem:[#allocation8 + $0x8d4] sm:$0xf]  ;;  %7706 = vmatmul.bf16.vlgmr.msrb.gmra.mxu1 %v19421_v60 }
 0x2e4   :  { %7754 = vmatpush.bf16.msra.mxu1 %v15887_v27  ;;  %v13847_v41 = vor.u32 %v18029_v43, %v13844_v32  ;;  %v14804_v27 = vld [vmem:[#allocation8 + $0x1078] sm:$0xf0]  ;;  %v18009_v32 = vld [vmem:[#allocation8 + $0x834] sm:$0xf] }
 0x2e5   :  { %7672 = vmatpush.bf16.msra.mxu3 %v13887_v56  ;;  %7713 = vmatpush.bf16.msrb.mxu2 %v14887_v24  ;;  %v7399_v56 = vpop.f32.mrf.mxu3  ;;  %v14807_v24 = vor.u32 %v18269_v42, %v14804_v27  ;;  %v17999_v42 = vld [vmem:[#allocation8 + $0x7e4] sm:$0xf]  ;;  %v13724_v27 = vld [vmem:[#allocation8 + $0x808] sm:$0xf0] }
 0x2e6   :  { %v7400_v43 = vadd.f32 %v7399_v56, %v19606_v7  ;;  %v15324_v56 = vld [vmem:[#allocation8 + $0x1488] sm:$0xf0] }
 0x2e7   :  { %7741 = vmatpush.bf16.msra.mxu0 %v15527_v40  ;;  %v18019_v40 = vld [vmem:[#allocation8 + $0x884] sm:$0xf] }
 0x2e8   :  { %7755 = vmatpush.bf16.msra.mxu1 %v15847_v47  ;;  %v13807_v3 = vor.u32 %v18019_v40, %v13804_v19  ;;  %v15767_v47 = vor.u32 %v18509_v17, %v15764_v9  ;;  %v7414_v39 = vadd.f32 %v7413_v14, %v7400_v43  ;;  %v7427_v40 = vpop.f32.mrf.mxu1  ;;  %v15367_v19 = vor.u32 %v18409_v16, %v15364_v54  ;;  %v14724_v17 = vld [vmem:[#allocation8 + $0xfd8] sm:$0xf0]  ;;  %v18399_v9 = vld [vmem:[#allocation8 + $0x1464] sm:$0xf]  ;;  %v18489_v14 = vld [vmem:[#allocation8 + $0x1734] sm:$0xf] }
 0x2e9   :  { %7673 = vmatpush.bf16.msra.mxu3 %v13847_v41  ;;  %7714 = vmatpush.bf16.msrb.mxu2 %v14847_v15  ;;  %v15724_v41 = vld [vmem:[#allocation8 + $0x17a8] sm:$0xf0]  ;;  %v13767_v15 = vor.u32 %v18009_v32, %v13764_v59  ;;  %v13684_v32 = vld [vmem:[#allocation8 + $0x7b8] sm:$0xf0]  ;;  %v18239_v59 = vld [vmem:[#allocation8 + $0xf64] sm:$0xf] }
 0x2ea   :  { %v7428_v7 = vadd.f32 %v7427_v40, %v7414_v39  ;;  %v15327_v39 = vor.u32 %v18399_v9, %v15324_v56  ;;  %v18379_v16 = vld [vmem:[#allocation8 + $0x13c4] sm:$0xf]  ;;  %v15244_v54 = vld [vmem:[#allocation8 + $0x13e8] sm:$0xf0]  ;;  %v17985_v40 = vld [vmem:[#allocation8 + $0x76c] sm:$0xf0] }
 0x2eb   :  { %7742 = vmatpush.bf16.msra.mxu0 %v15487_v51  ;;  %v15407_v51 = vor.u32 %v18419_v45, %v15404_v44  ;;  %v18249_v45 = vld [vmem:[#allocation8 + $0xfb4] sm:$0xf]  ;;  %v15727_v44 = vor.u32 %v18499_v25, %v15724_v41  ;;  %v13650_v41 = vld [vmem:[#allocation8 + $0x748] sm:$0xf] }
 0x2ec   :  { %7756 = vmatpush.bf16.msra.mxu1 %v15807_v21  ;;  %v7441_v21 = vpop.f32.mrf.mxu2  ;;  %v18389_v25 = vld [vmem:[#allocation8 + $0x1414] sm:$0xf]  ;;  %v13010_v56 = vld [vmem:[#allocation8 + $0x248] sm:$0xf] }
 0x2ed   :  { %7674 = vmatpush.bf16.msra.mxu3 %v13807_v3  ;;  %7715 = vmatpush.bf16.msrb.mxu2 %v14807_v24  ;;  %v19621_v43 = vadd.f32 %v7441_v21, %v7428_v7  ;;  %v13727_v3 = vor.u32 %v17999_v42, %v13724_v27  ;;  %v17989_v24 = vld [vmem:[#allocation8 + $0x794] sm:$0xf]  ;;  %v15644_v42 = vld [vmem:[#allocation8 + $0x1708] sm:$0xf0]  ;;  %v13651_v21 = vor.u32 %v17985_v40, %v13650_v41  ;;  %v12970_v41 = vld [vmem:[#allocation8 + $0x1f8] sm:$0xf] }
 0x2ee   :  { %v13687_v7 = vor.u32 %v17989_v24, %v13684_v32  ;;  %v18229_v27 = vld [vmem:[#allocation8 + $0xf14] sm:$0xf]  ;;  %v15604_v32 = vld [vmem:[#allocation8 + $0x16b8] sm:$0xf0] }
 0x2ef   :  { %7743 = vmatpush.bf16.msra.mxu0 %v15447_v12  ;;  %v14767_v12 = vor.u32 %v18259_v23, %v14764_v28  ;;  %v14684_v23 = vld [vmem:[#allocation8 + $0xf88] sm:$0xf0]  ;;  %v15284_v28 = vld [vmem:[#allocation8 + $0x1438] sm:$0xf0]  ;;  %v18469_v24 = vld [vmem:[#allocation8 + $0x1694] sm:$0xf] }
 0x2f0   :  { %7757 = vmatpush.bf16.msra.mxu1 %v15767_v47  ;;  %v15687_v47 = vor.u32 %v18489_v14, %v15684_v5  ;;  %v18369_v5 = vld [vmem:[#allocation8 + $0x1374] sm:$0xf]  ;;  %v17825_v14 = vld [vmem:[#allocation8 + $0x26c] sm:$0xf0] }
 0x2f1   :  { %7675 = vmatpush.bf16.msra.mxu3 %v13767_v15  ;;  %7716 = vmatpush.bf16.msrb.mxu2 %v14767_v12  ;;  %v18479_v15 = vld [vmem:[#allocation8 + $0x16e4] sm:$0xf]  ;;  %v14687_v12 = vor.u32 %v18239_v59, %v14684_v23  ;;  %v18065_v59 = vld [vmem:[#allocation8 + $0x9ec] sm:$0xf0] }
 0x2f2   :  { %v15647_v9 = vor.u32 %v18479_v15, %v15644_v42  ;;  %v13570_v15 = vld [vmem:[#allocation8 + $0x6a8] sm:$0xf]  ;;  %v17965_v42 = vld [vmem:[#allocation8 + $0x6cc] sm:$0xf0] }
 0x2f3   :  { %7744 = vmatpush.bf16.msra.mxu0 %v15407_v51  ;;  %v14727_v51 = vor.u32 %v18249_v45, %v14724_v17  ;;  %v15247_v45 = vor.u32 %v18379_v16, %v15244_v54  ;;  %v15204_v17 = vld [vmem:[#allocation8 + $0x1398] sm:$0xf0]  ;;  %v18359_v16 = vld [vmem:[#allocation8 + $0x1324] sm:$0xf]  ;;  %v15164_v54 = vld [vmem:[#allocation8 + $0x1348] sm:$0xf0] }
 0x2f4   :  { %7758 = vmatpush.bf16.msra.mxu1 %v15727_v44  ;;  %v14644_v44 = vld [vmem:[#allocation8 + $0xf38] sm:$0xf0]  ;;  %v15207_v23 = vor.u32 %v18369_v5, %v15204_v17  ;;  %v12930_v17 = vld [vmem:[#allocation8 + $0x1a8] sm:$0xf] }
 0x2f5   :  { %7676 = vmatpush.bf16.msra.mxu3 %v13727_v3  ;;  %7717 = vmatpush.bf16.msrb.mxu2 %v14727_v51  ;;  %v17975_v3 = vld [vmem:[#allocation8 + $0x71c] sm:$0xf0]  ;;  %v14647_v51 = vor.u32 %v18229_v27, %v14644_v44  ;;  %v19625_v27 = vpop.f32.mrf.mxu3  ;;  %v18349_v44 = vld [vmem:[#allocation8 + $0x12d4] sm:$0xf]  ;;  %v15124_v5 = vld [vmem:[#allocation8 + $0x12f8] sm:$0xf0] }
 0x2f7   :  { %7745 = vmatpush.bf16.msra.mxu0 %v15367_v19  ;;  %v15287_v19 = vor.u32 %v18389_v25, %v15284_v28  ;;  %v13611_v25 = vor.u32 %v17975_v3, %v13610_v35  ;;  %v15607_v28 = vor.u32 %v18469_v24, %v15604_v32  ;;  %v13530_v3 = vld [vmem:[#allocation8 + $0x658] sm:$0xf]  ;;  %v17955_v24 = vld [vmem:[#allocation8 + $0x67c] sm:$0xf0]  ;;  %v13890_v32 = vld [vmem:[#allocation8 + $0x928] sm:$0xf] }
 0x2f8   :  { %7759 = vmatpush.bf16.msra.mxu1 %v15687_v47  ;;  %v13011_v47 = vor.u32 %v17825_v14, %v13010_v56  ;;  %v17805_v14 = vld [vmem:[#allocation8 + $0x1cc] sm:$0xf0] }
 0x2f9   :  { %7677 = vmatpush.bf16.msra.mxu3 %v13687_v7  ;;  %7718 = vmatpush.bf16.msrb.mxu2 %v14687_v12  ;;  %v17815_v7 = vld [vmem:[#allocation8 + $0x21c] sm:$0xf0]  ;;  %v13930_v12 = vld [vmem:[#allocation8 + $0x978] sm:$0xf] }
 0x2fa   :  { %v12971_v35 = vor.u32 %v17815_v7, %v12970_v41  ;;  %v17795_v41 = vld [vmem:[#allocation8 + $0x17c] sm:$0xf0]  ;;  %v17945_v7 = vld [vmem:[#allocation8 + $0x62c] sm:$0xf0] }
 0x2fb   :  { %7746 = vmatpush.bf16.msra.mxu0 %v15327_v39  ;;  %v13970_v39 = vld [vmem:[#allocation8 + $0x9c8] sm:$0xf] }
 0x2fc   :  { %7760 = vmatpush.bf16.msra.mxu1 %v15647_v9  ;;  %7678 = vmatmul.bf16.vlgmr.msra.gmra.mxu3 %v19413_v2  ;;  %v13971_v40 = vor.u32 %v18065_v59, %v13970_v39  ;;  %v19627_v9 = vpop.f32.mrf.mxu0  ;;  %v19630_v39 = vpop.f32.mrf.mxu1  ;;  %v15127_v59 = vor.u32 %v18349_v44, %v15124_v5  ;;  %v18329_v44 = vld [vmem:[#allocation8 + $0x1234] sm:$0xf]  ;;  %v15044_v5 = vld [vmem:[#allocation8 + $0x1258] sm:$0xf0] }
 0x2fd   :  { %7726 = vmatpush.bf16.msrb.mxu3 %v15247_v45  ;;  %7719 = vmatpush.bf16.msrb.mxu2 %v14647_v51  ;;  %v15167_v45 = vor.u32 %v18359_v16, %v15164_v54  ;;  %v18045_v51 = vld [vmem:[#allocation8 + $0x94c] sm:$0xf0]  ;;  %20235 = vst [vmem:[#allocation39_spill] sm:$0xff] %v19630_v39  ;;  %v12890_v16 = vld [vmem:[#allocation8 + $0x158] sm:$0xf] }
 0x2fe   :  { %v13891_v54 = vor.u32 %v18045_v51, %v13890_v32  ;;  %v17935_v32 = vld [vmem:[#allocation8 + $0x5dc] sm:$0xf0]  ;;  %v18465_v39 = vld [vmem:[#allocation8 + $0x166c] sm:$0xf0] }
 0x2ff   :  { %7747 = vmatpush.bf16.msra.mxu0 %v15287_v19  ;;  %v18055_v19 = vld [vmem:[#allocation8 + $0x99c] sm:$0xf0] }
 0x300   :  { %7761 = vmatpush.bf16.msra.mxu1 %v15607_v28  ;;  %7720 = vmatmul.bf16.vlgmr.msrb.gmra.mxu2 %v19433_v26  ;;  %v13931_v56 = vor.u32 %v18055_v19, %v13930_v12  ;;  %v15084_v28 = vld [vmem:[#allocation8 + $0x12a8] sm:$0xf0]  ;;  %v7455_v19 = vpop.f32.mrf.mxu3 }
 0x301   :  { %7727 = vmatpush.bf16.msrb.mxu3 %v15207_v23  ;;  %7768 = vmatpush.bf16.msra.mxu2 %v13011_v47  ;;  %v12931_v23 = vor.u32 %v17805_v14, %v12930_v17  ;;  %v13531_v47 = vor.u32 %v17955_v24, %v13530_v3  ;;  %v12850_v17 = vld [vmem:[#allocation8 + $0x108] sm:$0xf]  ;;  %v17785_v3 = vld [vmem:[#allocation8 + $0x12c] sm:$0xf0]  ;;  %v13450_v24 = vld [vmem:[#allocation8 + $0x5b8] sm:$0xf] }
 0x302   :  { %7748 = vmatmul.bf16.vlgmr.msra.gmra.mxu0 %v19444_v29 }
 0x303   :  { %7796 = vmatpush.bf16.msrb.mxu0 %v13651_v21  ;;  %v13571_v21 = vor.u32 %v17965_v42, %v13570_v15  ;;  %7762 = vmatmul.bf16.vlgmr.msra.gmra.mxu1 %v19458_v61  ;;  %v13850_v15 = vld [vmem:[#allocation8 + $0x8d8] sm:$0xf]  ;;  %v18035_v42 = vld [vmem:[#allocation8 + $0x8fc] sm:$0xf0] }
 0x304   :  { %7810 = vmatpush.bf16.msrb.mxu1 %v13971_v40  ;;  %v13490_v40 = vld [vmem:[#allocation8 + $0x608] sm:$0xf]  ;;  %v7469_v14 = vpop.f32.mrf.mxu0 }
 0x305   :  { %7728 = vmatpush.bf16.msrb.mxu3 %v15167_v45  ;;  %7769 = vmatpush.bf16.msra.mxu2 %v12971_v35  ;;  %v12891_v45 = vor.u32 %v17795_v41, %v12890_v16  ;;  %v13491_v35 = vor.u32 %v17945_v7, %v13490_v40  ;;  %v18319_v16 = vld [vmem:[#allocation8 + $0x11e4] sm:$0xf]  ;;  %v15004_v41 = vld [vmem:[#allocation8 + $0x1208] sm:$0xf0]  ;;  %v12810_v40 = vld [vmem:[#allocation8 + $0xb8] sm:$0xf] }
 0x306   :  { %v17775_v7 = vld [vmem:[#allocation8 + $0xdc] sm:$0xf0] }
 0x307   :  { %7797 = vmatpush.bf16.msrb.mxu0 %v13611_v25  ;;  %v18339_v25 = vld [vmem:[#allocation8 + $0x1284] sm:$0xf] }
 0x308   :  { %7811 = vmatpush.bf16.msrb.mxu1 %v13931_v56  ;;  %v15087_v12 = vor.u32 %v18339_v25, %v15084_v28  ;;  %v13851_v56 = vor.u32 %v18035_v42, %v13850_v15  ;;  %v7483_v25 = vpop.f32.mrf.mxu1  ;;  %v13451_v28 = vor.u32 %v17935_v32, %v13450_v24  ;;  %v13410_v15 = vld [vmem:[#allocation8 + $0x568] sm:$0xf]  ;;  %v17925_v42 = vld [vmem:[#allocation8 + $0x58c] sm:$0xf0]  ;;  %v17915_v24 = vld [vmem:[#allocation8 + $0x53c] sm:$0xf0] }
 0x309   :  { %7729 = vmatpush.bf16.msrb.mxu3 %v15127_v59  ;;  %7770 = vmatpush.bf16.msra.mxu2 %v12931_v23  ;;  %v18025_v59 = vld [vmem:[#allocation8 + $0x8ac] sm:$0xf0]  ;;  %v15047_v23 = vor.u32 %v18329_v44, %v15044_v5  ;;  %v14964_v44 = vld [vmem:[#allocation8 + $0x11b8] sm:$0xf0]  ;;  %v12770_v5 = vld [vmem:[#allocation8 + $0x68] sm:$0xf] }
 0x30a   :  { %v13330_v32 = vld [vmem:[#allocation8 + $0x4c8] sm:$0xf] }
 0x30b   :  { %7798 = vmatpush.bf16.msrb.mxu0 %v13571_v21  ;;  %v7456_v21 = vadd.f32 %v7455_v19, %v19621_v43  ;;  %v12851_v43 = vor.u32 %v17785_v3, %v12850_v17  ;;  %v13770_v19 = vld [vmem:[#allocation8 + $0x838] sm:$0xf]  ;;  %v17765_v17 = vld [vmem:[#allocation8 + $0x8c] sm:$0xf0]  ;;  %v19636_v3 = vpop.f32.mrf.mxu2 }
 0x30c   :  { %7812 = vmatpush.bf16.msrb.mxu1 %v13891_v54  ;;  %v13811_v54 = vor.u32 %v18025_v59, %v13810_v1  ;;  %20237 = vst [vmem:[#allocation41_spill] sm:$0xff] %v19636_v3  ;;  %v13370_v1 = vld [vmem:[#allocation8 + $0x518] sm:$0xf]  ;;  %v14930_v59 = vld [vmem:[#allocation8 + $0x1148] sm:$0xf] }
 0x30d   :  { %v7470_v51 = vadd.f32 %v7469_v14, %v7456_v21  ;;  %7730 = vmatpush.bf16.msrb.mxu3 %v15087_v12  ;;  %7771 = vmatpush.bf16.msra.mxu2 %v12891_v45  ;;  %v18015_v21 = vld [vmem:[#allocation8 + $0x85c] sm:$0xf0]  ;;  %v15007_v14 = vor.u32 %v18319_v16, %v15004_v41  ;;  %v18309_v12 = vld [vmem:[#allocation8 + $0x1194] sm:$0xf]  ;;  %v12811_v45 = vor.u32 %v17775_v7, %v12810_v40  ;;  %v13730_v16 = vld [vmem:[#allocation8 + $0x7e8] sm:$0xf] }
 0x30e   :  { %v12771_v41 = vor.u32 %v17765_v17, %v12770_v5  ;;  %v13371_v40 = vor.u32 %v17915_v24, %v13370_v1  ;;  %v12730_v7 = vld [vmem:[#allocation8 + $0x18] sm:$0xf]  ;;  %v14290_v3 = vld [vmem:[#allocation8 + $0xc48] sm:$0xf]  ;;  %v18385_v5 = vld [vmem:[#allocation8 + $0x13ec] sm:$0xf0] }
 0x30f   :  { %7799 = vmatpush.bf16.msrb.mxu0 %v13531_v47  ;;  %v19634_v47 = vadd.f32 %v7483_v25, %v7470_v51  ;;  %v17905_v51 = vld [vmem:[#allocation8 + $0x4ec] sm:$0xf0]  ;;  %v14291_v1 = vor.u32 %v18145_v52, %v14290_v3  ;;  %v13210_v3 = vld [vmem:[#allocation8 + $0x3d8] sm:$0xf] }
 0x310   :  { %7813 = vmatpush.bf16.msrb.mxu1 %v13851_v56  ;;  %v13771_v56 = vor.u32 %v18015_v21, %v13770_v19  ;;  %v18305_v25 = vld [vmem:[#allocation8 + $0x116c] sm:$0xf0]  ;;  %v13290_v19 = vld [vmem:[#allocation8 + $0x478] sm:$0xf]  ;;  %v17895_v21 = vld [vmem:[#allocation8 + $0x49c] sm:$0xf0] }
 0x311   :  { %20236 = vst [vmem:[#allocation40_spill] sm:$0xff] %v19634_v47  ;;  %7731 = vmatpush.bf16.msrb.mxu3 %v15047_v23  ;;  %7772 = vmatpush.bf16.msra.mxu2 %v12851_v43  ;;  %v14967_v23 = vor.u32 %v18309_v12, %v14964_v44  ;;  %v18005_v43 = vld [vmem:[#allocation8 + $0x80c] sm:$0xf0]  ;;  %v18295_v12 = vld [vmem:[#allocation8 + $0x111c] sm:$0xf0] }
 0x312   :  { %v13731_v47 = vor.u32 %v18005_v43, %v13730_v16  ;;  %v13690_v44 = vld [vmem:[#allocation8 + $0x798] sm:$0xf]  ;;  %v18135_v16 = vld [vmem:[#allocation8 + $0xc1c] sm:$0xf0]  ;;  %v14850_v43 = vld [vmem:[#allocation8 + $0x10a8] sm:$0xf] }
 0x313   :  { %7800 = vmatpush.bf16.msrb.mxu0 %v13491_v35  ;;  %v13411_v35 = vor.u32 %v17925_v42, %v13410_v15  ;;  %v14931_v15 = vor.u32 %v18305_v25, %v14930_v59  ;;  %v17755_v42 = vld [vmem:[#allocation8 + $0x3c] sm:$0xf0]  ;;  %v7497_v17 = vpop.f32.mrf.mxu2  ;;  %v17885_v59 = vld [vmem:[#allocation8 + $0x44c] sm:$0xf0]  ;;  %v14250_v25 = vld [vmem:[#allocation8 + $0xbf8] sm:$0xf] }
 0x314   :  { %7814 = vmatpush.bf16.msrb.mxu1 %v13811_v54  ;;  %v13331_v54 = vor.u32 %v17905_v51, %v13330_v32  ;;  %v13691_v32 = vor.u32 %v17995_v33, %v13690_v44  ;;  %v13250_v51 = vld [vmem:[#allocation8 + $0x428] sm:$0xf]  ;;  %v14251_v33 = vor.u32 %v18135_v16, %v14250_v25  ;;  %v18275_v44 = vld [vmem:[#allocation8 + $0x107c] sm:$0xf0]  ;;  %v17865_v25 = vld [vmem:[#allocation8 + $0x3ac] sm:$0xf0] }
 0x315   :  { %7732 = vmatpush.bf16.msrb.mxu3 %v15007_v14  ;;  %7773 = vmatpush.bf16.msra.mxu2 %v12811_v45  ;;  %v14890_v14 = vld [vmem:[#allocation8 + $0x10f8] sm:$0xf]  ;;  %v12731_v45 = vor.u32 %v17755_v42, %v12730_v7  ;;  %v13251_v52 = vor.u32 %v17885_v59, %v13250_v51  ;;  %v17875_v42 = vld [vmem:[#allocation8 + $0x3fc] sm:$0xf0]  ;;  %v13170_v59 = vld [vmem:[#allocation8 + $0x388] sm:$0xf] }
 0x316   :  { %v14891_v24 = vor.u32 %v18295_v12, %v14890_v14  ;;  %v15210_v7 = vld [vmem:[#allocation8 + $0x1378] sm:$0xf]  ;;  %v18125_v14 = vld [vmem:[#allocation8 + $0xbcc] sm:$0xf0] }
 0x317   :  { %7801 = vmatpush.bf16.msrb.mxu0 %v13451_v28  ;;  %v19638_v28 = vpop.f32.mrf.mxu0  ;;  %v14810_v12 = vld [vmem:[#allocation8 + $0x1058] sm:$0xf] }
 0x318   :  { %20238 = vst [vmem:[#allocation42_spill] sm:$0xff] %v19638_v28  ;;  %7815 = vmatpush.bf16.msrb.mxu1 %v13771_v56  ;;  %v19640_v28 = vpop.f32.mrf.mxu1  ;;  %v13291_v56 = vor.u32 %v17895_v21, %v13290_v19  ;;  %v14210_v19 = vld [vmem:[#allocation8 + $0xba8] sm:$0xf]  ;;  %v14811_v51 = vor.u32 %v18275_v44, %v14810_v12  ;;  %v17855_v12 = vld [vmem:[#allocation8 + $0x35c] sm:$0xf0] }
 0x319   :  { %7733 = vmatpush.bf16.msrb.mxu3 %v14967_v23  ;;  %20239 = vst [vmem:[#allocation43_spill] sm:$0xff] %v19640_v28  ;;  %7774 = vmatpush.bf16.msra.mxu2 %v12771_v41  ;;  %v18285_v41 = vld [vmem:[#allocation8 + $0x10cc] sm:$0xf0]  ;;  %v15130_v28 = vld [vmem:[#allocation8 + $0x12d8] sm:$0xf] }
 0x31a   :  { %v14130_v44 = vld [vmem:[#allocation8 + $0xb08] sm:$0xf] }
 0x31b   :  { %7802 = vmatpush.bf16.msrb.mxu0 %v13411_v35  ;;  %v15250_v35 = vld [vmem:[#allocation8 + $0x13c8] sm:$0xf]  ;;  %v19651_v16 = vpop.f32.mrf.mxu2 }
 0x31c   :  { %7816 = vmatpush.bf16.msrb.mxu1 %v13731_v47  ;;  %7734 = vmatmul.bf16.vlgmr.msrb.gmra.mxu3 %v19436_v31  ;;  %v15251_v23 = vor.u32 %v18385_v5, %v15250_v35  ;;  %v14851_v47 = vor.u32 %v18285_v41, %v14850_v43  ;;  %v19647_v35 = vld [vmem:[#allocation10] sm:$0xff]  ;;  %20241 = vst [vmem:[#allocation45_spill] sm:$0xff] %v19651_v16  ;;  %v14730_v16 = vld [vmem:[#allocation8 + $0xfb8] sm:$0xf] }
 0x31d   :  { %7782 = vmatpush.bf16.msra.mxu3 %v13331_v54  ;;  %7775 = vmatpush.bf16.msra.mxu2 %v12731_v45  ;;  %v18375_v54 = vld [vmem:[#allocation8 + $0x139c] sm:$0xf0]  ;;  %v20212_v5 = vperm.slane %v19647_v35, 4 }
 0x31e   :  { %v15211_v21 = vor.u32 %v18375_v54, %v15210_v7  ;;  %v18115_v41 = vld [vmem:[#allocation8 + $0xb7c] sm:$0xf0]  ;;  %v14770_v7 = vld [vmem:[#allocation8 + $0x1008] sm:$0xf]  ;;  %v18265_v54 = vld [vmem:[#allocation8 + $0x102c] sm:$0xf0] }
 0x31f   :  { %7803 = vmatpush.bf16.msrb.mxu0 %v13371_v40  ;;  %v7525_v40 = vpop.f32.mrf.mxu0 }
 0x320   :  { %7817 = vmatpush.bf16.msrb.mxu1 %v13691_v32  ;;  %7776 = vmatmul.bf16.vlgmr.msra.gmra.mxu2 %v19356_v48  ;;  %v7539_v45 = vpop.f32.mrf.mxu1  ;;  %v14211_v32 = vor.u32 %v18125_v14, %v14210_v19  ;;  %v14771_v19 = vor.u32 %v18265_v54, %v14770_v7  ;;  %v17845_v7 = vld [vmem:[#allocation8 + $0x30c] sm:$0xf0]  ;;  %v14090_v54 = vld [vmem:[#allocation8 + $0xab8] sm:$0xf] }
 0x321   :  { %7783 = vmatpush.bf16.msra.mxu3 %v13291_v56  ;;  %7824 = vmatpush.bf16.msrb.mxu2 %v14291_v1  ;;  %v15170_v56 = vld [vmem:[#allocation8 + $0x1328] sm:$0xf]  ;;  %v18365_v1 = vld [vmem:[#allocation8 + $0x134c] sm:$0xf0] }
 0x322   :  { %7804 = vmatmul.bf16.vlgmr.msrb.gmra.mxu0 %v19411_v62  ;;  %v15171_v43 = vor.u32 %v18365_v1, %v15170_v56  ;;  %v18105_v1 = vld [vmem:[#allocation8 + $0xb2c] sm:$0xf0] }
 0x323   :  { %7852 = vmatpush.bf16.msra.mxu0 %v14931_v15  ;;  %v19644_v15 = vpop.f32.mrf.mxu3  ;;  %7818 = vmatmul.bf16.vlgmr.msrb.gmra.mxu1 %v19413_v2 }
 0x324   :  { %20240 = vst [vmem:[#allocation44_spill] sm:$0xff] %v19644_v15  ;;  %7866 = vmatpush.bf16.msra.mxu1 %v15251_v23  ;;  %v14170_v23 = vld [vmem:[#allocation8 + $0xb58] sm:$0xf]  ;;  %v18355_v15 = vld [vmem:[#allocation8 + $0x12fc] sm:$0xf0] }
 0x325   :  { %7784 = vmatpush.bf16.msra.mxu3 %v13251_v52  ;;  %7825 = vmatpush.bf16.msrb.mxu2 %v14251_v33  ;;  %v7498_v52 = vadd.f32 %v7497_v17, %v20212_v5  ;;  %v13171_v33 = vor.u32 %v17865_v25, %v13170_v59  ;;  %v15131_v56 = vor.u32 %v18355_v15, %v15130_v28  ;;  %v18255_v17 = vld [vmem:[#allocation8 + $0xfdc] sm:$0xf0]  ;;  %v7553_v28 = vpop.f32.mrf.mxu2 }
 0x327   :  { %7853 = vmatpush.bf16.msra.mxu0 %v14891_v24  ;;  %v13211_v24 = vor.u32 %v17875_v42, %v13210_v3  ;;  %v19655_v3 = vpop.f32.mrf.mxu0  ;;  %v14171_v42 = vor.u32 %v18115_v41, %v14170_v23  ;;  %v13090_v41 = vld [vmem:[#allocation8 + $0x2e8] sm:$0xf] }
 0x328   :  { %7867 = vmatpush.bf16.msra.mxu1 %v15211_v21  ;;  %20242 = vst [vmem:[#allocation46_spill] sm:$0xff] %v19655_v3  ;;  %v13130_v21 = vld [vmem:[#allocation8 + $0x338] sm:$0xf]  ;;  %v19657_v25 = vpop.f32.mrf.mxu1  ;;  %v15570_v3 = vld [vmem:[#allocation8 + $0x1648] sm:$0xf] }
 0x329   :  { %7785 = vmatpush.bf16.msra.mxu3 %v13211_v24  ;;  %7826 = vmatpush.bf16.msrb.mxu2 %v14211_v32  ;;  %v18345_v24 = vld [vmem:[#allocation8 + $0x12ac] sm:$0xf0]  ;;  %v13131_v59 = vor.u32 %v17855_v12, %v13130_v21  ;;  %20243 = vst [vmem:[#allocation47_spill] sm:$0xff] %v19657_v25  ;;  %v14131_v32 = vor.u32 %v18105_v1, %v14130_v44  ;;  %v14050_v12 = vld [vmem:[#allocation8 + $0xa68] sm:$0xf] }
 0x32a   :  { %v15091_v15 = vor.u32 %v18345_v24, %v15090_v10  ;;  %v13091_v21 = vor.u32 %v17845_v7, %v13090_v41  ;;  %v18085_v44 = vld [vmem:[#allocation8 + $0xa8c] sm:$0xf0]  ;;  %v18235_v1 = vld [vmem:[#allocation8 + $0xf3c] sm:$0xf0]  ;;  %v15010_v41 = vld [vmem:[#allocation8 + $0x11e8] sm:$0xf] }
 0x32b   :  { %7854 = vmatpush.bf16.msra.mxu0 %v14851_v47  ;;  %v7511_v47 = vpop.f32.mrf.mxu3  ;;  %v18225_v24 = vld [vmem:[#allocation8 + $0xeec] sm:$0xf0] }
 0x32c   :  { %v7512_v14 = vadd.f32 %v7511_v47, %v7498_v52  ;;  %7868 = vmatpush.bf16.msra.mxu1 %v15171_v43  ;;  %v18095_v43 = vld [vmem:[#allocation8 + $0xadc] sm:$0xf0]  ;;  %v14690_v52 = vld [vmem:[#allocation8 + $0xf68] sm:$0xf]  ;;  %v18325_v7 = vld [vmem:[#allocation8 + $0x120c] sm:$0xf0] }
 0x32d   :  { %7786 = vmatpush.bf16.msra.mxu3 %v13171_v33  ;;  %7827 = vmatpush.bf16.msrb.mxu2 %v14171_v42  ;;  %v15050_v33 = vld [vmem:[#allocation8 + $0x1238] sm:$0xf] }
 0x32e   :  { %v7526_v5 = vadd.f32 %v7525_v40, %v7512_v14  ;;  %v18245_v40 = vld [vmem:[#allocation8 + $0xf8c] sm:$0xf0]  ;;  %v18335_v14 = vld [vmem:[#allocation8 + $0x125c] sm:$0xf0]  ;;  %v13050_v42 = vld [vmem:[#allocation8 + $0x298] sm:$0xf] }
 0x32f   :  { %7855 = vmatpush.bf16.msra.mxu0 %v14811_v51  ;;  %v14731_v51 = vor.u32 %v18255_v17, %v14730_v16  ;;  %v17835_v16 = vld [vmem:[#allocation8 + $0x2bc] sm:$0xf0]  ;;  %v15051_v10 = vor.u32 %v18335_v14, %v15050_v33  ;;  %v14610_v17 = vld [vmem:[#allocation8 + $0xec8] sm:$0xf]  ;;  %v15011_v14 = vor.u32 %v18325_v7, %v15010_v41  ;;  %v17800_v7 = vld [vmem:[#allocation8 + $0x1ac] sm:$0xf] }
 0x330   :  { %v7540_v23 = vadd.f32 %v7539_v45, %v7526_v5  ;;  %7869 = vmatpush.bf16.msra.mxu1 %v15131_v56  ;;  %v14091_v45 = vor.u32 %v18095_v43, %v14090_v54  ;;  %v14691_v5 = vor.u32 %v18245_v40, %v14690_v52  ;;  %v14650_v56 = vld [vmem:[#allocation8 + $0xf18] sm:$0xf]  ;;  %v19663_v25 = vpop.f32.mrf.mxu1  ;;  %v18075_v52 = vld [vmem:[#allocation8 + $0xa3c] sm:$0xf0] }
 0x331   :  { %7787 = vmatpush.bf16.msra.mxu3 %v13131_v59  ;;  %7828 = vmatpush.bf16.msrb.mxu2 %v14131_v32  ;;  %v13051_v59 = vor.u32 %v17835_v16, %v13050_v42  ;;  %v14051_v32 = vor.u32 %v18085_v44, %v14050_v12  ;;  %v14010_v54 = vld [vmem:[#allocation8 + $0xa18] sm:$0xf]  ;;  %v18215_v33 = vld [vmem:[#allocation8 + $0xe9c] sm:$0xf0]  ;;  %v12972_v42 = vld [vmem:[#allocation8 + $0x220] sm:$0xf0] }
 0x332   :  { %v19659_v47 = vadd.f32 %v7553_v28, %v7540_v23  ;;  %v17820_v23 = vld [vmem:[#allocation8 + $0x24c] sm:$0xf]  ;;  %v13012_v28 = vld [vmem:[#allocation8 + $0x270] sm:$0xf0]  ;;  %v14570_v40 = vld [vmem:[#allocation8 + $0xe78] sm:$0xf] }
 0x333   :  { %7856 = vmatpush.bf16.msra.mxu0 %v14771_v19  ;;  %v19661_v19 = vpop.f32.mrf.mxu0  ;;  %v13015_v43 = vor.u32 %v17820_v23, %v13012_v28  ;;  %v14970_v16 = vld [vmem:[#allocation8 + $0x1198] sm:$0xf]  ;;  %v13332_v12 = vld [vmem:[#allocation8 + $0x4f0] sm:$0xf0]  ;;  %v14571_v44 = vor.u32 %v18215_v33, %v14570_v40  ;;  %v18205_v23 = vld [vmem:[#allocation8 + $0xe4c] sm:$0xf0] }
 0x334   :  { %7870 = vmatpush.bf16.msra.mxu1 %v15091_v15  ;;  %v14611_v15 = vor.u32 %v18225_v24, %v14610_v17  ;;  %v14971_v17 = vor.u32 %v18315_v34, %v14970_v16  ;;  %v14530_v24 = vld [vmem:[#allocation8 + $0xe28] sm:$0xf]  ;;  %v15530_v28 = vld [vmem:[#allocation8 + $0x15f8] sm:$0xf]  ;;  %v18455_v41 = vld [vmem:[#allocation8 + $0x161c] sm:$0xf0] }
 0x335   :  { %7788 = vmatpush.bf16.msra.mxu3 %v13091_v21  ;;  %7829 = vmatpush.bf16.msrb.mxu2 %v14091_v45  ;;  %v17810_v21 = vld [vmem:[#allocation8 + $0x1fc] sm:$0xf]  ;;  %v14011_v45 = vor.u32 %v18075_v52, %v14010_v54  ;;  %v13292_v54 = vld [vmem:[#allocation8 + $0x4a0] sm:$0xf0]  ;;  %v15531_v34 = vor.u32 %v18455_v41, %v15530_v28  ;;  %v14490_v52 = vld [vmem:[#allocation8 + $0xdd8] sm:$0xf] }
 0x336   :  { %v18195_v40 = vld [vmem:[#allocation8 + $0xdfc] sm:$0xf0]  ;;  %v15490_v33 = vld [vmem:[#allocation8 + $0x15a8] sm:$0xf]  ;;  %v12892_v16 = vld [vmem:[#allocation8 + $0x180] sm:$0xf0] }
 0x337   :  { %7857 = vmatpush.bf16.msra.mxu0 %v14731_v51  ;;  %v14651_v51 = vor.u32 %v18235_v1, %v14650_v56  ;;  %v12975_v1 = vor.u32 %v17810_v21, %v12972_v42  ;;  %v18445_v21 = vld [vmem:[#allocation8 + $0x15cc] sm:$0xf0]  ;;  %v17790_v42 = vld [vmem:[#allocation8 + $0x15c] sm:$0xf]  ;;  %v15450_v28 = vld [vmem:[#allocation8 + $0x1558] sm:$0xf] }
 0x338   :  { %7871 = vmatpush.bf16.msra.mxu1 %v15051_v10  ;;  %v15571_v10 = vor.u32 %v18465_v39, %v15570_v3  ;;  %v19669_v39 = vpop.f32.mrf.mxu3  ;;  %v14531_v3 = vor.u32 %v18205_v23, %v14530_v24  ;;  %v14450_v24 = vld [vmem:[#allocation8 + $0xd88] sm:$0xf]  ;;  %v18185_v23 = vld [vmem:[#allocation8 + $0xdac] sm:$0xf0] }
 0x339   :  { %7789 = vmatpush.bf16.msra.mxu3 %v13051_v59  ;;  %7830 = vmatpush.bf16.msrb.mxu2 %v14051_v32  ;;  %v12932_v32 = vld [vmem:[#allocation8 + $0x1d0] sm:$0xf0] }
 0x33b   :  { %7858 = vmatpush.bf16.msra.mxu0 %v14691_v5  ;;  %v17900_v5 = vld [vmem:[#allocation8 + $0x4cc] sm:$0xf]  ;;  %v19665_v56 = vpop.f32.mrf.mxu0 }
 0x33c   :  { %20244 = vst [vmem:[#allocation48_spill] sm:$0xff] %v19665_v56  ;;  %7872 = vmatpush.bf16.msra.mxu1 %v15011_v14  ;;  %7790 = vmatmul.bf16.vlgmr.msra.gmra.mxu3 %v19358_v53  ;;  %v13335_v59 = vor.u32 %v17900_v5, %v13332_v12  ;;  %v13252_v5 = vld [vmem:[#allocation8 + $0x450] sm:$0xf0]  ;;  %v20213_v12 = vperm.slane %v19647_v35, 5  ;;  %v18425_v56 = vld [vmem:[#allocation8 + $0x152c] sm:$0xf0] }
 0x33d   :  { %7838 = vmatpush.bf16.msrb.mxu3 %v14611_v15  ;;  %7831 = vmatpush.bf16.msrb.mxu2 %v14011_v45  ;;  %v19671_v15 = vpop.f32.mrf.mxu1  ;;  %v17880_v45 = vld [vmem:[#allocation8 + $0x42c] sm:$0xf] }
 0x33e   :  { %20245 = vst [vmem:[#allocation49_spill] sm:$0xff] %v19671_v15  ;;  %v13255_v41 = vor.u32 %v17880_v45, %v13252_v5  ;;  %v15410_v45 = vld [vmem:[#allocation8 + $0x1508] sm:$0xf] }
 0x33f   :  { %7859 = vmatpush.bf16.msra.mxu0 %v14651_v51  ;;  %v17890_v51 = vld [vmem:[#allocation8 + $0x47c] sm:$0xf] }
 0x340   :  { %7873 = vmatpush.bf16.msra.mxu1 %v14971_v17  ;;  %7832 = vmatmul.bf16.vlgmr.msrb.gmra.mxu2 %v19415_v50  ;;  %v13295_v14 = vor.u32 %v17890_v51, %v13292_v54  ;;  %v12895_v17 = vor.u32 %v17790_v42, %v12892_v16  ;;  %v12852_v51 = vld [vmem:[#allocation8 + $0x130] sm:$0xf0]  ;;  %v17870_v54 = vld [vmem:[#allocation8 + $0x3dc] sm:$0xf]  ;;  %v18175_v16 = vld [vmem:[#allocation8 + $0xd5c] sm:$0xf0] }
 0x341   :  { %7839 = vmatpush.bf16.msrb.mxu3 %v14571_v44  ;;  %7880 = vmatpush.bf16.msra.mxu2 %v15571_v10  ;;  %v14491_v44 = vor.u32 %v18195_v40, %v14490_v52 }
 0x342   :  { %7860 = vmatmul.bf16.vlgmr.msra.gmra.mxu0 %v19433_v26 }
 0x343   :  { %7908 = vmatpush.bf16.msrb.mxu0 %v13015_v43  ;;  %v12935_v43 = vor.u32 %v17800_v7, %v12932_v32  ;;  %7874 = vmatmul.bf16.vlgmr.msra.gmra.mxu1 %v19436_v31  ;;  %v7637_v10 = vpop.f32.mrf.mxu0  ;;  %v18435_v7 = vld [vmem:[#allocation8 + $0x157c] sm:$0xf0]  ;;  %v17780_v32 = vld [vmem:[#allocation8 + $0x10c] sm:$0xf] }
 0x344   :  { %7922 = vmatpush.bf16.msrb.mxu1 %v13335_v59  ;;  %v19676_v59 = vpop.f32.mrf.mxu2  ;;  %v7638_v52 = vadd.f32 %v7637_v10, %v20213_v12  ;;  %v15451_v40 = vor.u32 %v18435_v7, %v15450_v28  ;;  %v12812_v10 = vld [vmem:[#allocation8 + $0xe0] sm:$0xf0]  ;;  %v14370_v7 = vld [vmem:[#allocation8 + $0xce8] sm:$0xf]  ;;  %v18130_v12 = vld [vmem:[#allocation8 + $0xbfc] sm:$0xf] }
 0x345   :  { %7840 = vmatpush.bf16.msrb.mxu3 %v14531_v3  ;;  %7881 = vmatpush.bf16.msra.mxu2 %v15531_v34  ;;  %20246 = vst [vmem:[#allocation50_spill] sm:$0xff] %v19676_v59  ;;  %v13212_v3 = vld [vmem:[#allocation8 + $0x400] sm:$0xf0]  ;;  %v14451_v34 = vor.u32 %v18185_v23, %v14450_v24  ;;  %v7651_v42 = vpop.f32.mrf.mxu1  ;;  %v17770_v59 = vld [vmem:[#allocation8 + $0xbc] sm:$0xf] }
 0x346   :  { %v19681_v5 = vadd.f32 %v7651_v42, %v7638_v52  ;;  %v13215_v15 = vor.u32 %v17870_v54, %v13212_v3  ;;  %v17860_v24 = vld [vmem:[#allocation8 + $0x38c] sm:$0xf]  ;;  %v12815_v23 = vor.u32 %v17770_v59, %v12812_v10  ;;  %v18415_v3 = vld [vmem:[#allocation8 + $0x14dc] sm:$0xf0]  ;;  %v15330_v42 = vld [vmem:[#allocation8 + $0x1468] sm:$0xf] }
 0x347   :  { %7909 = vmatpush.bf16.msrb.mxu0 %v12975_v1  ;;  %v15491_v1 = vor.u32 %v18445_v21, %v15490_v33  ;;  %v12855_v33 = vor.u32 %v17780_v32, %v12852_v51  ;;  %v15370_v32 = vld [vmem:[#allocation8 + $0x14b8] sm:$0xf]  ;;  %v17760_v52 = vld [vmem:[#allocation8 + $0x6c] sm:$0xf]  ;;  %v18155_v59 = vld [vmem:[#allocation8 + $0xcbc] sm:$0xf0] }
 0x348   :  { %7923 = vmatpush.bf16.msrb.mxu1 %v13295_v14  ;;  %v14410_v14 = vld [vmem:[#allocation8 + $0xd38] sm:$0xf]  ;;  %v15890_v10 = vld [vmem:[#allocation8 + $0x18c8] sm:$0xf] }
 0x349   :  { %7841 = vmatpush.bf16.msrb.mxu3 %v14491_v44  ;;  %7882 = vmatpush.bf16.msra.mxu2 %v15491_v1  ;;  %v13172_v1 = vld [vmem:[#allocation8 + $0x3b0] sm:$0xf0] }
 0x34a   :  { %v13175_v54 = vor.u32 %v17860_v24, %v13172_v1  ;;  %v18140_v24 = vld [vmem:[#allocation8 + $0xc4c] sm:$0xf]  ;;  %v14292_v1 = vld [vmem:[#allocation8 + $0xc70] sm:$0xf0] }
 0x34b   :  { %7910 = vmatpush.bf16.msrb.mxu0 %v12935_v43  ;;  %v7567_v43 = vpop.f32.mrf.mxu3 }
 0x34c   :  { %v7568_v21 = vadd.f32 %v7567_v43, %v19659_v47  ;;  %7924 = vmatpush.bf16.msrb.mxu1 %v13255_v41  ;;  %v15411_v47 = vor.u32 %v18425_v56, %v15410_v45  ;;  %v18165_v41 = vld [vmem:[#allocation8 + $0xd0c] sm:$0xf0]  ;;  %v7609_v51 = vpop.f32.mrf.mxu2  ;;  %v12772_v43 = vld [vmem:[#allocation8 + $0x90] sm:$0xf0]  ;;  %v15371_v56 = vor.u32 %v18415_v3, %v15370_v32  ;;  %v12732_v45 = vld [vmem:[#allocation8 + $0x40] sm:$0xf0] }
 0x34d   :  { %7842 = vmatpush.bf16.msrb.mxu3 %v14451_v34  ;;  %7883 = vmatpush.bf16.msra.mxu2 %v15451_v40  ;;  %v13132_v34 = vld [vmem:[#allocation8 + $0x360] sm:$0xf0]  ;;  %v14371_v40 = vor.u32 %v18165_v41, %v14370_v7  ;;  %v13092_v7 = vld [vmem:[#allocation8 + $0x310] sm:$0xf0]  ;;  %v15290_v41 = vld [vmem:[#allocation8 + $0x1418] sm:$0xf] }
 0x34e   :  { %v7582_v44 = vadd.f32 %v19661_v19, %v7568_v21  ;;  %v17850_v21 = vld [vmem:[#allocation8 + $0x33c] sm:$0xf]  ;;  %v15850_v3 = vld [vmem:[#allocation8 + $0x1878] sm:$0xf] }
 0x34f   :  { %7911 = vmatpush.bf16.msrb.mxu0 %v12895_v17  ;;  %v14411_v17 = vor.u32 %v18175_v16, %v14410_v14  ;;  %v18405_v14 = vld [vmem:[#allocation8 + $0x148c] sm:$0xf0]  ;;  %v17750_v16 = vld [vmem:[#allocation8 + $0x1c] sm:$0xf] }
 0x350   :  { %v7596_v28 = vadd.f32 %v19663_v25, %v7582_v44  ;;  %7925 = vmatpush.bf16.msrb.mxu1 %v13215_v15  ;;  %v12775_v25 = vor.u32 %v17760_v52, %v12772_v43  ;;  %v13135_v15 = vor.u32 %v17850_v21, %v13132_v34  ;;  %v18545_v44 = vld [vmem:[#allocation8 + $0x18ec] sm:$0xf0]  ;;  %v18535_v52 = vld [vmem:[#allocation8 + $0x189c] sm:$0xf0]  ;;  %v17980_v21 = vld [vmem:[#allocation8 + $0x74c] sm:$0xf] }
 0x351   :  { %7843 = vmatpush.bf16.msrb.mxu3 %v14411_v17  ;;  %7884 = vmatpush.bf16.msra.mxu2 %v15411_v47  ;;  %v17840_v17 = vld [vmem:[#allocation8 + $0x2ec] sm:$0xf]  ;;  %v15331_v47 = vor.u32 %v18405_v14, %v15330_v42  ;;  %v15891_v32 = vor.u32 %v18545_v44, %v15890_v10  ;;  %v13652_v34 = vld [vmem:[#allocation8 + $0x770] sm:$0xf0]  ;;  %v15851_v14 = vor.u32 %v18535_v52, %v15850_v3  ;;  %v15810_v10 = vld [vmem:[#allocation8 + $0x1828] sm:$0xf] }
 0x352   :  { %v19685_v19 = vadd.f32 %v7609_v51, %v7596_v28  ;;  %v14295_v51 = vor.u32 %v18140_v24, %v14292_v1  ;;  %v13095_v43 = vor.u32 %v17840_v17, %v13092_v7  ;;  %v14612_v42 = vld [vmem:[#allocation8 + $0xef0] sm:$0xf0]  ;;  %v18525_v44 = vld [vmem:[#allocation8 + $0x184c] sm:$0xf0]  ;;  %v17970_v24 = vld [vmem:[#allocation8 + $0x6fc] sm:$0xf] }
 0x353   :  { %7912 = vmatpush.bf16.msrb.mxu0 %v12855_v33  ;;  %v14330_v33 = vld [vmem:[#allocation8 + $0xc98] sm:$0xf]  ;;  %v18120_v17 = vld [vmem:[#allocation8 + $0xbac] sm:$0xf]  ;;  %v14212_v7 = vld [vmem:[#allocation8 + $0xbd0] sm:$0xf0] }
 0x354   :  { %7926 = vmatpush.bf16.msrb.mxu1 %v13175_v54  ;;  %v14331_v28 = vor.u32 %v18155_v59, %v14330_v33  ;;  %v18395_v54 = vld [vmem:[#allocation8 + $0x143c] sm:$0xf0]  ;;  %v17830_v33 = vld [vmem:[#allocation8 + $0x29c] sm:$0xf]  ;;  %v13052_v59 = vld [vmem:[#allocation8 + $0x2c0] sm:$0xf0] }
 0x355   :  { %7844 = vmatpush.bf16.msrb.mxu3 %v14371_v40  ;;  %7885 = vmatpush.bf16.msra.mxu2 %v15371_v56  ;;  %v14252_v40 = vld [vmem:[#allocation8 + $0xc20] sm:$0xf0]  ;;  %v15291_v56 = vor.u32 %v18395_v54, %v15290_v41  ;;  %v19689_v41 = vpop.f32.mrf.mxu3  ;;  %v15770_v54 = vld [vmem:[#allocation8 + $0x17d8] sm:$0xf]  ;;  %v18515_v3 = vld [vmem:[#allocation8 + $0x17fc] sm:$0xf0] }
 0x356   :  { %v17960_v52 = vld [vmem:[#allocation8 + $0x6ac] sm:$0xf] }
 0x357   :  { %7913 = vmatpush.bf16.msrb.mxu0 %v12815_v23  ;;  %v12735_v23 = vor.u32 %v17750_v16, %v12732_v45  ;;  %v14255_v16 = vor.u32 %v18130_v12, %v14252_v40  ;;  %v13055_v45 = vor.u32 %v17830_v33, %v13052_v59  ;;  %v14172_v40 = vld [vmem:[#allocation8 + $0xb80] sm:$0xf0]  ;;  %v18200_v33 = vld [vmem:[#allocation8 + $0xe2c] sm:$0xf]  ;;  %v14532_v59 = vld [vmem:[#allocation8 + $0xe50] sm:$0xf0] }
 0x358   :  { %7927 = vmatpush.bf16.msrb.mxu1 %v13135_v15  ;;  %v13655_v15 = vor.u32 %v17980_v21, %v13652_v34  ;;  %v13572_v21 = vld [vmem:[#allocation8 + $0x6d0] sm:$0xf0]  ;;  %v18110_v34 = vld [vmem:[#allocation8 + $0xb5c] sm:$0xf] }
 0x359   :  { %7845 = vmatpush.bf16.msrb.mxu3 %v14331_v28  ;;  %7886 = vmatpush.bf16.msra.mxu2 %v15331_v47  ;;  %v13612_v28 = vld [vmem:[#allocation8 + $0x720] sm:$0xf0]  ;;  %v18210_v47 = vld [vmem:[#allocation8 + $0xe7c] sm:$0xf] }
 0x35a   :  { %v13615_v12 = vor.u32 %v17970_v24, %v13612_v28  ;;  %v18100_v24 = vld [vmem:[#allocation8 + $0xb0c] sm:$0xf]  ;;  %v18190_v28 = vld [vmem:[#allocation8 + $0xddc] sm:$0xf] }
 0x35b   :  { %7914 = vmatpush.bf16.msrb.mxu0 %v12775_v25  ;;  %v18220_v25 = vld [vmem:[#allocation8 + $0xecc] sm:$0xf] }
 0x35c   :  { %7928 = vmatpush.bf16.msrb.mxu1 %v13095_v43  ;;  %7846 = vmatmul.bf16.vlgmr.msrb.gmra.mxu3 %v19421_v60  ;;  %v14615_v1 = vor.u32 %v18220_v25, %v14612_v42  ;;  %v19693_v25 = vpop.f32.mrf.mxu2  ;;  %v13575_v42 = vor.u32 %v17960_v52, %v13572_v21  ;;  %v18090_v21 = vld [vmem:[#allocation8 + $0xabc] sm:$0xf] }
 0x35d   :  { %7894 = vmatpush.bf16.msra.mxu3 %v15891_v32  ;;  %7887 = vmatpush.bf16.msra.mxu2 %v15291_v56  ;;  %v15811_v32 = vor.u32 %v18525_v44, %v15810_v10  ;;  %v15771_v56 = vor.u32 %v18515_v3, %v15770_v54  ;;  %20247 = vst [vmem:[#allocation51_spill] sm:$0xff] %v19693_v25  ;;  %v13532_v44 = vld [vmem:[#allocation8 + $0x680] sm:$0xf0]  ;;  %v18495_v54 = vld [vmem:[#allocation8 + $0x175c] sm:$0xf0] }
 0x35e   :  { %v14535_v10 = vor.u32 %v18200_v33, %v14532_v59  ;;  %v17940_v3 = vld [vmem:[#allocation8 + $0x60c] sm:$0xf]  ;;  %v14452_v33 = vld [vmem:[#allocation8 + $0xdb0] sm:$0xf0]  ;;  %v18450_v25 = vld [vmem:[#allocation8 + $0x15fc] sm:$0xf] }
 0x35f   :  { %7915 = vmatpush.bf16.msrb.mxu0 %v12735_v23  ;;  %v14572_v23 = vld [vmem:[#allocation8 + $0xea0] sm:$0xf0] }
 0x360   :  { %7929 = vmatpush.bf16.msrb.mxu1 %v13055_v45  ;;  %7888 = vmatmul.bf16.vlgmr.msra.gmra.mxu2 %v19444_v29  ;;  %v14575_v43 = vor.u32 %v18210_v47, %v14572_v23  ;;  %v17950_v45 = vld [vmem:[#allocation8 + $0x65c] sm:$0xf]  ;;  %v7623_v47 = vpop.f32.mrf.mxu3 }
 0x361   :  { %7895 = vmatpush.bf16.msra.mxu3 %v15851_v14  ;;  %7936 = vmatpush.bf16.msrb.mxu2 %v13655_v15  ;;  %v14175_v14 = vor.u32 %v18110_v34, %v14172_v40  ;;  %v15730_v15 = vld [vmem:[#allocation8 + $0x1788] sm:$0xf]  ;;  %v13535_v23 = vor.u32 %v17950_v45, %v13532_v44  ;;  %v14092_v34 = vld [vmem:[#allocation8 + $0xae0] sm:$0xf0]  ;;  %v18180_v40 = vld [vmem:[#allocation8 + $0xd8c] sm:$0xf] }
 0x362   :  { %7916 = vmatmul.bf16.vlgmr.msrb.gmra.mxu0 %v19356_v48  ;;  %v13452_v44 = vld [vmem:[#allocation8 + $0x5e0] sm:$0xf0] }
 0x363   :  { %7964 = vmatpush.bf16.msra.mxu0 %v14295_v51  ;;  %v14215_v51 = vor.u32 %v18120_v17, %v14212_v7  ;;  %7930 = vmatmul.bf16.vlgmr.msrb.gmra.mxu1 %v19358_v53  ;;  %v14492_v17 = vld [vmem:[#allocation8 + $0xe00] sm:$0xf0] }
 0x364   :  { %7978 = vmatpush.bf16.msra.mxu1 %v14615_v1  ;;  %v14132_v1 = vld [vmem:[#allocation8 + $0xb30] sm:$0xf0]  ;;  %v14495_v52 = vor.u32 %v18190_v28, %v14492_v17  ;;  %v18170_v28 = vld [vmem:[#allocation8 + $0xd3c] sm:$0xf]  ;;  %v14412_v17 = vld [vmem:[#allocation8 + $0xd60] sm:$0xf0] }
 0x365   :  { %7896 = vmatpush.bf16.msra.mxu3 %v15811_v32  ;;  %7937 = vmatpush.bf16.msrb.mxu2 %v13615_v12  ;;  %v14135_v32 = vor.u32 %v18100_v24, %v14132_v1  ;;  %v19696_v12 = vadd.f32 %v7623_v47, %v19685_v19  ;;  %v18485_v19 = vld [vmem:[#allocation8 + $0x170c] sm:$0xf0]  ;;  %v18080_v24 = vld [vmem:[#allocation8 + $0xa6c] sm:$0xf]  ;;  %v14052_v1 = vld [vmem:[#allocation8 + $0xa90] sm:$0xf0] }
 0x366   :  { %v15610_v47 = vld [vmem:[#allocation8 + $0x1698] sm:$0xf] }
 0x367   :  { %7965 = vmatpush.bf16.msra.mxu0 %v14255_v16  ;;  %v18505_v16 = vld [vmem:[#allocation8 + $0x17ac] sm:$0xf0]  ;;  %20248 = vst [vmem:[#allocation52_spill] sm:$0xff] %v19696_v12  ;;  %v14932_v12 = vld [vmem:[#allocation8 + $0x1170] sm:$0xf0] }
 0x368   :  { %7979 = vmatpush.bf16.msra.mxu1 %v14575_v43  ;;  %v15731_v7 = vor.u32 %v18505_v16, %v15730_v15  ;;  %v13492_v43 = vld [vmem:[#allocation8 + $0x630] sm:$0xf0]  ;;  %v15650_v15 = vld [vmem:[#allocation8 + $0x16e8] sm:$0xf]  ;;  %v17930_v16 = vld [vmem:[#allocation8 + $0x5bc] sm:$0xf] }
 0x369   :  { %7897 = vmatpush.bf16.msra.mxu3 %v15771_v56  ;;  %7938 = vmatpush.bf16.msrb.mxu2 %v13575_v42  ;;  %v13495_v56 = vor.u32 %v17940_v3, %v13492_v43  ;;  %v14095_v42 = vor.u32 %v18090_v21, %v14092_v34  ;;  %v13412_v3 = vld [vmem:[#allocation8 + $0x590] sm:$0xf0]  ;;  %v14012_v43 = vld [vmem:[#allocation8 + $0xa40] sm:$0xf0]  ;;  %v18060_v21 = vld [vmem:[#allocation8 + $0x9cc] sm:$0xf] }
 0x36a   :  { %v13972_v34 = vld [vmem:[#allocation8 + $0x9f0] sm:$0xf0] }
 0x36b   :  { %7966 = vmatpush.bf16.msra.mxu0 %v14215_v51  ;;  %v15690_v51 = vld [vmem:[#allocation8 + $0x1738] sm:$0xf] }
 0x36c   :  { %7980 = vmatpush.bf16.msra.mxu1 %v14535_v10  ;;  %v15691_v59 = vor.u32 %v18495_v54, %v15690_v51  ;;  %v14455_v10 = vor.u32 %v18180_v40, %v14452_v33  ;;  %v18475_v51 = vld [vmem:[#allocation8 + $0x16bc] sm:$0xf0]  ;;  %v17920_v54 = vld [vmem:[#allocation8 + $0x56c] sm:$0xf]  ;;  %v15572_v33 = vld [vmem:[#allocation8 + $0x1670] sm:$0xf0] }
 0x36d   :  { %7898 = vmatpush.bf16.msra.mxu3 %v15731_v7  ;;  %7939 = vmatpush.bf16.msrb.mxu2 %v13535_v23  ;;  %v15651_v7 = vor.u32 %v18485_v19, %v15650_v15  ;;  %v13455_v23 = vor.u32 %v17930_v16, %v13452_v44  ;;  %v18460_v40 = vld [vmem:[#allocation8 + $0x164c] sm:$0xf]  ;;  %v14372_v15 = vld [vmem:[#allocation8 + $0xd10] sm:$0xf0]  ;;  %v17910_v19 = vld [vmem:[#allocation8 + $0x51c] sm:$0xf]  ;;  %v13975_v16 = vor.u32 %v18060_v21, %v13972_v34 }
 0x36e   :  { %v15575_v44 = vor.u32 %v18460_v40, %v15572_v33  ;;  %v18040_v21 = vld [vmem:[#allocation8 + $0x92c] sm:$0xf]  ;;  %v13892_v34 = vld [vmem:[#allocation8 + $0x950] sm:$0xf0]  ;;  %v18290_v40 = vld [vmem:[#allocation8 + $0x10fc] sm:$0xf] }
 0x36f   :  { %7967 = vmatpush.bf16.msra.mxu0 %v14175_v14  ;;  %v7665_v14 = vpop.f32.mrf.mxu2 }
 0x370   :  { %7981 = vmatpush.bf16.msra.mxu1 %v14495_v52  ;;  %v19699_v45 = vadd.f32 %v7665_v14, %v19681_v5  ;;  %v14415_v52 = vor.u32 %v18170_v28, %v14412_v17  ;;  %v18070_v5 = vld [vmem:[#allocation8 + $0xa1c] sm:$0xf]  ;;  %v15611_v14 = vor.u32 %v18475_v51, %v15610_v47  ;;  %v18300_v17 = vld [vmem:[#allocation8 + $0x114c] sm:$0xf]  ;;  %v14332_v51 = vld [vmem:[#allocation8 + $0xcc0] sm:$0xf0] }
 0x371   :  { %7899 = vmatpush.bf16.msra.mxu3 %v15691_v59  ;;  %7940 = vmatpush.bf16.msrb.mxu2 %v13495_v56  ;;  %v18160_v59 = vld [vmem:[#allocation8 + $0xcec] sm:$0xf]  ;;  %v13415_v56 = vor.u32 %v17920_v54, %v13412_v3  ;;  %v18150_v47 = vld [vmem:[#allocation8 + $0xc9c] sm:$0xf]  ;;  %v15892_v54 = vld [vmem:[#allocation8 + $0x18f0] sm:$0xf0] }
 0x372   :  { %v14375_v28 = vor.u32 %v18160_v59, %v14372_v15  ;;  %v18440_v59 = vld [vmem:[#allocation8 + $0x15ac] sm:$0xf]  ;;  %v15492_v15 = vld [vmem:[#allocation8 + $0x15d0] sm:$0xf0] }
 0x373   :  { %7968 = vmatpush.bf16.msra.mxu0 %v14135_v32  ;;  %v14055_v32 = vor.u32 %v18080_v24, %v14052_v1  ;;  %v18050_v24 = vld [vmem:[#allocation8 + $0x97c] sm:$0xf]  ;;  %v13932_v1 = vld [vmem:[#allocation8 + $0x9a0] sm:$0xf0] }
 0x374   :  { %7982 = vmatpush.bf16.msra.mxu1 %v14455_v10  ;;  %v13372_v10 = vld [vmem:[#allocation8 + $0x540] sm:$0xf0]  ;;  %v13935_v3 = vor.u32 %v18050_v24, %v13932_v1  ;;  %v18280_v24 = vld [vmem:[#allocation8 + $0x10ac] sm:$0xf]  ;;  %v19705_v1 = vpop.f32.mrf.mxu0 }
 0x375   :  { %7900 = vmatpush.bf16.msra.mxu3 %v15651_v7  ;;  %7941 = vmatpush.bf16.msrb.mxu2 %v13455_v23  ;;  %v15532_v7 = vld [vmem:[#allocation8 + $0x1620] sm:$0xf0]  ;;  %v13375_v23 = vor.u32 %v17910_v19, %v13372_v10  ;;  %v19703_v19 = vpop.f32.mrf.mxu3  ;;  %20250 = vst [vmem:[#allocation54_spill] sm:$0xff] %v19705_v1 }
 0x376   :  { %20249 = vst [vmem:[#allocation53_spill] sm:$0xff] %v19703_v19  ;;  %v13852_v10 = vld [vmem:[#allocation8 + $0x900] sm:$0xf0]  ;;  %v13618_v19 = vld [vmem:[#allocation8 + $0x700] sm:$0xf] }
 0x377   :  { %7969 = vmatpush.bf16.msra.mxu0 %v14095_v42  ;;  %v14015_v42 = vor.u32 %v18070_v5, %v14012_v43  ;;  %v15535_v5 = vor.u32 %v18450_v25, %v15532_v7  ;;  %v14335_v43 = vor.u32 %v18150_v47, %v14332_v51  ;;  %v18430_v7 = vld [vmem:[#allocation8 + $0x155c] sm:$0xf]  ;;  %v15452_v47 = vld [vmem:[#allocation8 + $0x1580] sm:$0xf0]  ;;  %v18520_v51 = vld [vmem:[#allocation8 + $0x182c] sm:$0xf] }
 0x378   :  { %7983 = vmatpush.bf16.msra.mxu1 %v14415_v52  ;;  %v14935_v52 = vor.u32 %v18300_v17, %v14932_v12  ;;  %v13895_v12 = vor.u32 %v18040_v21, %v13892_v34  ;;  %v14852_v17 = vld [vmem:[#allocation8 + $0x10d0] sm:$0xf0]  ;;  %v18270_v21 = vld [vmem:[#allocation8 + $0x105c] sm:$0xf]  ;;  %v19711_v34 = vpop.f32.mrf.mxu2  ;;  %v15692_v1 = vld [vmem:[#allocation8 + $0x1760] sm:$0xf0] }
 0x379   :  { %7901 = vmatpush.bf16.msra.mxu3 %v15611_v14  ;;  %7942 = vmatpush.bf16.msrb.mxu2 %v13415_v56  ;;  %v14892_v14 = vld [vmem:[#allocation8 + $0x1120] sm:$0xf0]  ;;  %v18530_v56 = vld [vmem:[#allocation8 + $0x187c] sm:$0xf]  ;;  %20252 = vst [vmem:[#allocation56_spill] sm:$0xff] %v19711_v34 }
 0x37a   :  { %v14895_v25 = vor.u32 %v18290_v40, %v14892_v14  ;;  %v18420_v14 = vld [vmem:[#allocation8 + $0x150c] sm:$0xf] }
 0x37b   :  { %7970 = vmatpush.bf16.msra.mxu0 %v14055_v32  ;;  %v18540_v32 = vld [vmem:[#allocation8 + $0x18cc] sm:$0xf] }
 0x37c   :  { %7984 = vmatpush.bf16.msra.mxu1 %v14375_v28  ;;  %7902 = vmatmul.bf16.vlgmr.msra.gmra.mxu3 %v19458_v61  ;;  %v15895_v33 = vor.u32 %v18540_v32, %v15892_v54  ;;  %v19708_v32 = vpop.f32.mrf.mxu1 }
 0x37d   :  { %7950 = vmatpush.bf16.msrb.mxu3 %v13975_v16  ;;  %7943 = vmatpush.bf16.msrb.mxu2 %v13375_v23  ;;  %v15495_v16 = vor.u32 %v18440_v59, %v15492_v15  ;;  %v15812_v23 = vld [vmem:[#allocation8 + $0x1850] sm:$0xf0]  ;;  %20251 = vst [vmem:[#allocation55_spill] sm:$0xff] %v19708_v32  ;;  %v18510_v15 = vld [vmem:[#allocation8 + $0x17dc] sm:$0xf] }
 0x37e   :  { %v15815_v40 = vor.u32 %v18520_v51, %v15812_v23  ;;  %v15412_v59 = vld [vmem:[#allocation8 + $0x1530] sm:$0xf0]  ;;  %v18410_v51 = vld [vmem:[#allocation8 + $0x14bc] sm:$0xf]  ;;  %v15372_v23 = vld [vmem:[#allocation8 + $0x14e0] sm:$0xf0] }
 0x37f   :  { %7971 = vmatpush.bf16.msra.mxu0 %v14015_v42  ;;  %v15852_v42 = vld [vmem:[#allocation8 + $0x18a0] sm:$0xf0]  ;;  %v18500_v32 = vld [vmem:[#allocation8 + $0x178c] sm:$0xf] }
 0x380   :  { %7985 = vmatpush.bf16.msra.mxu1 %v14335_v43  ;;  %7944 = vmatmul.bf16.vlgmr.msrb.gmra.mxu2 %v19411_v62  ;;  %v15855_v28 = vor.u32 %v18530_v56, %v15852_v42  ;;  %v13812_v43 = vld [vmem:[#allocation8 + $0x8b0] sm:$0xf0]  ;;  %v15772_v56 = vld [vmem:[#allocation8 + $0x1800] sm:$0xf0] }
 0x381   :  { %7951 = vmatpush.bf16.msrb.mxu3 %v13935_v3  ;;  %7992 = vmatpush.bf16.msra.mxu2 %v14935_v52  ;;  %v14855_v3 = vor.u32 %v18280_v24, %v14852_v17  ;;  %v15455_v52 = vor.u32 %v18430_v7, %v15452_v47  ;;  %v13772_v24 = vld [vmem:[#allocation8 + $0x860] sm:$0xf0]  ;;  %v18260_v17 = vld [vmem:[#allocation8 + $0x100c] sm:$0xf]  ;;  %v7693_v7 = vpop.f32.mrf.mxu0  ;;  %v14772_v47 = vld [vmem:[#allocation8 + $0x1030] sm:$0xf0] }
 0x382   :  { %7972 = vmatmul.bf16.vlgmr.msra.gmra.mxu0 %v19415_v50 }
 0x383   :  { %8020 = vmatpush.bf16.msrb.mxu0 %v15575_v44  ;;  %v18030_v44 = vld [vmem:[#allocation8 + $0x8dc] sm:$0xf]  ;;  %7986 = vmatmul.bf16.vlgmr.msra.gmra.mxu1 %v19421_v60 }
 0x384   :  { %8034 = vmatpush.bf16.msrb.mxu1 %v15895_v33  ;;  %v13855_v54 = vor.u32 %v18030_v44, %v13852_v10  ;;  %v14812_v33 = vld [vmem:[#allocation8 + $0x1080] sm:$0xf0]  ;;  %v18010_v10 = vld [vmem:[#allocation8 + $0x83c] sm:$0xf] }
 0x385   :  { %7952 = vmatpush.bf16.msrb.mxu3 %v13895_v12  ;;  %7993 = vmatpush.bf16.msra.mxu2 %v14895_v25  ;;  %v7679_v12 = vpop.f32.mrf.mxu3  ;;  %v14815_v25 = vor.u32 %v18270_v21, %v14812_v33  ;;  %v18000_v21 = vld [vmem:[#allocation8 + $0x7ec] sm:$0xf]  ;;  %v13732_v33 = vld [vmem:[#allocation8 + $0x810] sm:$0xf0] }
 0x386   :  { %v7680_v44 = vadd.f32 %v7679_v12, %v19699_v45  ;;  %v15332_v12 = vld [vmem:[#allocation8 + $0x1490] sm:$0xf0] }
 0x387   :  { %8021 = vmatpush.bf16.msrb.mxu0 %v15535_v5  ;;  %v18020_v5 = vld [vmem:[#allocation8 + $0x88c] sm:$0xf] }
 0x388   :  { %8035 = vmatpush.bf16.msrb.mxu1 %v15855_v28  ;;  %v13815_v42 = vor.u32 %v18020_v5, %v13812_v43  ;;  %v15775_v28 = vor.u32 %v18510_v15, %v15772_v56  ;;  %v7694_v34 = vadd.f32 %v7693_v7, %v7680_v44  ;;  %v7707_v5 = vpop.f32.mrf.mxu1  ;;  %v15375_v43 = vor.u32 %v18410_v51, %v15372_v23  ;;  %v14732_v15 = vld [vmem:[#allocation8 + $0xfe0] sm:$0xf0]  ;;  %v18400_v56 = vld [vmem:[#allocation8 + $0x146c] sm:$0xf]  ;;  %v18490_v7 = vld [vmem:[#allocation8 + $0x173c] sm:$0xf] }
 0x389   :  { %7953 = vmatpush.bf16.msrb.mxu3 %v13855_v54  ;;  %7994 = vmatpush.bf16.msra.mxu2 %v14855_v3  ;;  %v15732_v54 = vld [vmem:[#allocation8 + $0x17b0] sm:$0xf0]  ;;  %v13775_v3 = vor.u32 %v18010_v10, %v13772_v24  ;;  %v13692_v10 = vld [vmem:[#allocation8 + $0x7c0] sm:$0xf0]  ;;  %v18240_v24 = vld [vmem:[#allocation8 + $0xf6c] sm:$0xf] }
 0x38a   :  { %v7708_v45 = vadd.f32 %v7707_v5, %v7694_v34  ;;  %v15335_v34 = vor.u32 %v18400_v56, %v15332_v12  ;;  %v18380_v51 = vld [vmem:[#allocation8 + $0x13cc] sm:$0xf]  ;;  %v15252_v23 = vld [vmem:[#allocation8 + $0x13f0] sm:$0xf0]  ;;  %v17986_v5 = vld [vmem:[#allocation8 + $0x774] sm:$0xf0] }
 0x38b   :  { %8022 = vmatpush.bf16.msrb.mxu0 %v15495_v16  ;;  %v15415_v16 = vor.u32 %v18420_v14, %v15412_v59  ;;  %v18250_v14 = vld [vmem:[#allocation8 + $0xfbc] sm:$0xf]  ;;  %v15735_v59 = vor.u32 %v18500_v32, %v15732_v54  ;;  %v13658_v54 = vld [vmem:[#allocation8 + $0x750] sm:$0xf] }
 0x38c   :  { %8036 = vmatpush.bf16.msrb.mxu1 %v15815_v40  ;;  %v7721_v40 = vpop.f32.mrf.mxu2  ;;  %v18390_v32 = vld [vmem:[#allocation8 + $0x141c] sm:$0xf]  ;;  %v13018_v12 = vld [vmem:[#allocation8 + $0x250] sm:$0xf] }
 0x38d   :  { %7954 = vmatpush.bf16.msrb.mxu3 %v13815_v42  ;;  %7995 = vmatpush.bf16.msra.mxu2 %v14815_v25  ;;  %v19714_v44 = vadd.f32 %v7721_v40, %v7708_v45  ;;  %v13735_v42 = vor.u32 %v18000_v21, %v13732_v33  ;;  %v17990_v25 = vld [vmem:[#allocation8 + $0x79c] sm:$0xf]  ;;  %v15652_v21 = vld [vmem:[#allocation8 + $0x1710] sm:$0xf0]  ;;  %v13659_v40 = vor.u32 %v17986_v5, %v13658_v54  ;;  %v12978_v54 = vld [vmem:[#allocation8 + $0x200] sm:$0xf] }
 0x38e   :  { %v13695_v45 = vor.u32 %v17990_v25, %v13692_v10  ;;  %v18230_v33 = vld [vmem:[#allocation8 + $0xf1c] sm:$0xf]  ;;  %v15612_v10 = vld [vmem:[#allocation8 + $0x16c0] sm:$0xf0] }
 0x38f   :  { %8023 = vmatpush.bf16.msrb.mxu0 %v15455_v52  ;;  %v14775_v52 = vor.u32 %v18260_v17, %v14772_v47  ;;  %v14692_v17 = vld [vmem:[#allocation8 + $0xf90] sm:$0xf0]  ;;  %v15292_v47 = vld [vmem:[#allocation8 + $0x1440] sm:$0xf0]  ;;  %v18470_v25 = vld [vmem:[#allocation8 + $0x169c] sm:$0xf] }
 0x390   :  { %8037 = vmatpush.bf16.msrb.mxu1 %v15775_v28  ;;  %v15695_v28 = vor.u32 %v18490_v7, %v15692_v1  ;;  %v18370_v1 = vld [vmem:[#allocation8 + $0x137c] sm:$0xf]  ;;  %v17826_v7 = vld [vmem:[#allocation8 + $0x274] sm:$0xf0] }
 0x391   :  { %7955 = vmatpush.bf16.msrb.mxu3 %v13775_v3  ;;  %7996 = vmatpush.bf16.msra.mxu2 %v14775_v52  ;;  %v18480_v3 = vld [vmem:[#allocation8 + $0x16ec] sm:$0xf]  ;;  %v14695_v52 = vor.u32 %v18240_v24, %v14692_v17  ;;  %v18066_v24 = vld [vmem:[#allocation8 + $0x9f4] sm:$0xf0] }
 0x392   :  { %v15655_v56 = vor.u32 %v18480_v3, %v15652_v21  ;;  %v13578_v3 = vld [vmem:[#allocation8 + $0x6b0] sm:$0xf]  ;;  %v17966_v21 = vld [vmem:[#allocation8 + $0x6d4] sm:$0xf0] }
 0x393   :  { %8024 = vmatpush.bf16.msrb.mxu0 %v15415_v16  ;;  %v14735_v16 = vor.u32 %v18250_v14, %v14732_v15  ;;  %v15255_v14 = vor.u32 %v18380_v51, %v15252_v23  ;;  %v15212_v15 = vld [vmem:[#allocation8 + $0x13a0] sm:$0xf0]  ;;  %v18360_v51 = vld [vmem:[#allocation8 + $0x132c] sm:$0xf]  ;;  %v15172_v23 = vld [vmem:[#allocation8 + $0x1350] sm:$0xf0] }
 0x394   :  { %8038 = vmatpush.bf16.msrb.mxu1 %v15735_v59  ;;  %v14652_v59 = vld [vmem:[#allocation8 + $0xf40] sm:$0xf0]  ;;  %v15215_v17 = vor.u32 %v18370_v1, %v15212_v15  ;;  %v12938_v15 = vld [vmem:[#allocation8 + $0x1b0] sm:$0xf] }
 0x395   :  { %7956 = vmatpush.bf16.msrb.mxu3 %v13735_v42  ;;  %7997 = vmatpush.bf16.msra.mxu2 %v14735_v16  ;;  %v17976_v42 = vld [vmem:[#allocation8 + $0x724] sm:$0xf0]  ;;  %v14655_v16 = vor.u32 %v18230_v33, %v14652_v59  ;;  %v19718_v33 = vpop.f32.mrf.mxu3  ;;  %v18350_v59 = vld [vmem:[#allocation8 + $0x12dc] sm:$0xf]  ;;  %v15132_v1 = vld [vmem:[#allocation8 + $0x1300] sm:$0xf0] }
 0x396   :  { %20253 = vst [vmem:[#allocation57_spill] sm:$0xff] %v19718_v33 }
 0x397   :  { %8025 = vmatpush.bf16.msrb.mxu0 %v15375_v43  ;;  %v15295_v43 = vor.u32 %v18390_v32, %v15292_v47  ;;  %v13619_v32 = vor.u32 %v17976_v42, %v13618_v19  ;;  %v15615_v47 = vor.u32 %v18470_v25, %v15612_v10  ;;  %v13538_v42 = vld [vmem:[#allocation8 + $0x660] sm:$0xf]  ;;  %v17956_v25 = vld [vmem:[#allocation8 + $0x684] sm:$0xf0]  ;;  %v13898_v10 = vld [vmem:[#allocation8 + $0x930] sm:$0xf] }
 0x398   :  { %8039 = vmatpush.bf16.msrb.mxu1 %v15695_v28  ;;  %v13019_v28 = vor.u32 %v17826_v7, %v13018_v12  ;;  %v17806_v7 = vld [vmem:[#allocation8 + $0x1d4] sm:$0xf0] }
 0x399   :  { %7957 = vmatpush.bf16.msrb.mxu3 %v13695_v45  ;;  %7998 = vmatpush.bf16.msra.mxu2 %v14695_v52  ;;  %v17816_v45 = vld [vmem:[#allocation8 + $0x224] sm:$0xf0]  ;;  %v13938_v52 = vld [vmem:[#allocation8 + $0x980] sm:$0xf] }
 0x39a   :  { %v12979_v19 = vor.u32 %v17816_v45, %v12978_v54  ;;  %v17796_v54 = vld [vmem:[#allocation8 + $0x184] sm:$0xf0]  ;;  %v17946_v45 = vld [vmem:[#allocation8 + $0x634] sm:$0xf0] }
 0x39b   :  { %8026 = vmatpush.bf16.msrb.mxu0 %v15335_v34  ;;  %v13978_v34 = vld [vmem:[#allocation8 + $0x9d0] sm:$0xf] }
 0x39c   :  { %8040 = vmatpush.bf16.msrb.mxu1 %v15655_v56  ;;  %7958 = vmatmul.bf16.vlgmr.msrb.gmra.mxu3 %v19413_v2  ;;  %v13979_v5 = vor.u32 %v18066_v24, %v13978_v34  ;;  %v19720_v56 = vpop.f32.mrf.mxu0  ;;  %v19723_v34 = vpop.f32.mrf.mxu1  ;;  %v15135_v24 = vor.u32 %v18350_v59, %v15132_v1  ;;  %v18330_v59 = vld [vmem:[#allocation8 + $0x123c] sm:$0xf]  ;;  %v15052_v1 = vld [vmem:[#allocation8 + $0x1260] sm:$0xf0] }
 0x39d   :  { %8006 = vmatpush.bf16.msra.mxu3 %v15255_v14  ;;  %7999 = vmatpush.bf16.msra.mxu2 %v14655_v16  ;;  %v15175_v14 = vor.u32 %v18360_v51, %v15172_v23  ;;  %20254 = vst [vmem:[#allocation58_spill] sm:$0xff] %v19720_v56  ;;  %v18046_v16 = vld [vmem:[#allocation8 + $0x954] sm:$0xf0]  ;;  %v12898_v51 = vld [vmem:[#allocation8 + $0x160] sm:$0xf] }
 0x39e   :  { %20255 = vst [vmem:[#allocation59_spill] sm:$0xff] %v19723_v34  ;;  %v13899_v23 = vor.u32 %v18046_v16, %v13898_v10  ;;  %v17936_v10 = vld [vmem:[#allocation8 + $0x5e4] sm:$0xf0]  ;;  %v13818_v34 = vld [vmem:[#allocation8 + $0x890] sm:$0xf] }
 0x39f   :  { %8027 = vmatpush.bf16.msrb.mxu0 %v15295_v43  ;;  %v18056_v43 = vld [vmem:[#allocation8 + $0x9a4] sm:$0xf0]  ;;  %v14898_v56 = vld [vmem:[#allocation8 + $0x1100] sm:$0xf] }
 0x3a0   :  { %8041 = vmatpush.bf16.msrb.mxu1 %v15615_v47  ;;  %8000 = vmatmul.bf16.vlgmr.msra.gmra.mxu2 %v19433_v26  ;;  %v13939_v12 = vor.u32 %v18056_v43, %v13938_v52  ;;  %v15092_v47 = vld [vmem:[#allocation8 + $0x12b0] sm:$0xf0]  ;;  %v7735_v43 = vpop.f32.mrf.mxu3 }
 0x3a1   :  { %8007 = vmatpush.bf16.msra.mxu3 %v15215_v17  ;;  %8048 = vmatpush.bf16.msrb.mxu2 %v13019_v28  ;;  %v12939_v17 = vor.u32 %v17806_v7, %v12938_v15  ;;  %v13539_v28 = vor.u32 %v17956_v25, %v13538_v42  ;;  %v12858_v15 = vld [vmem:[#allocation8 + $0x110] sm:$0xf]  ;;  %v17786_v42 = vld [vmem:[#allocation8 + $0x134] sm:$0xf0]  ;;  %v13458_v25 = vld [vmem:[#allocation8 + $0x5c0] sm:$0xf] }
 0x3a2   :  { %8028 = vmatmul.bf16.vlgmr.msrb.gmra.mxu0 %v19444_v29 }
 0x3a3   :  { %8076 = vmatpush.bf16.msra.mxu0 %v13659_v40  ;;  %v13579_v40 = vor.u32 %v17966_v21, %v13578_v3  ;;  %8042 = vmatmul.bf16.vlgmr.msrb.gmra.mxu1 %v19458_v61  ;;  %v13858_v3 = vld [vmem:[#allocation8 + $0x8e0] sm:$0xf]  ;;  %v18036_v21 = vld [vmem:[#allocation8 + $0x904] sm:$0xf0] }
 0x3a4   :  { %8090 = vmatpush.bf16.msra.mxu1 %v13979_v5  ;;  %v13498_v5 = vld [vmem:[#allocation8 + $0x610] sm:$0xf]  ;;  %v7749_v7 = vpop.f32.mrf.mxu0 }
 0x3a5   :  { %8008 = vmatpush.bf16.msra.mxu3 %v15175_v14  ;;  %8049 = vmatpush.bf16.msrb.mxu2 %v12979_v19  ;;  %v12899_v14 = vor.u32 %v17796_v54, %v12898_v51  ;;  %v13499_v19 = vor.u32 %v17946_v45, %v13498_v5  ;;  %v18320_v51 = vld [vmem:[#allocation8 + $0x11ec] sm:$0xf]  ;;  %v15012_v54 = vld [vmem:[#allocation8 + $0x1210] sm:$0xf0]  ;;  %v12818_v5 = vld [vmem:[#allocation8 + $0xc0] sm:$0xf] }
 0x3a6   :  { %v17776_v45 = vld [vmem:[#allocation8 + $0xe4] sm:$0xf0] }
 0x3a7   :  { %8077 = vmatpush.bf16.msra.mxu0 %v13619_v32  ;;  %v18340_v32 = vld [vmem:[#allocation8 + $0x128c] sm:$0xf] }
 0x3a8   :  { %8091 = vmatpush.bf16.msra.mxu1 %v13939_v12  ;;  %v15095_v52 = vor.u32 %v18340_v32, %v15092_v47  ;;  %v13859_v12 = vor.u32 %v18036_v21, %v13858_v3  ;;  %v7763_v32 = vpop.f32.mrf.mxu1  ;;  %v13459_v47 = vor.u32 %v17936_v10, %v13458_v25  ;;  %v13418_v3 = vld [vmem:[#allocation8 + $0x570] sm:$0xf]  ;;  %v17926_v21 = vld [vmem:[#allocation8 + $0x594] sm:$0xf0]  ;;  %v13378_v25 = vld [vmem:[#allocation8 + $0x520] sm:$0xf] }
 0x3a9   :  { %8009 = vmatpush.bf16.msra.mxu3 %v15135_v24  ;;  %8050 = vmatpush.bf16.msrb.mxu2 %v12939_v17  ;;  %v18026_v24 = vld [vmem:[#allocation8 + $0x8b4] sm:$0xf0]  ;;  %v15055_v17 = vor.u32 %v18330_v59, %v15052_v1  ;;  %v14972_v59 = vld [vmem:[#allocation8 + $0x11c0] sm:$0xf0]  ;;  %v12778_v1 = vld [vmem:[#allocation8 + $0x70] sm:$0xf] }
 0x3aa   :  { %v17906_v10 = vld [vmem:[#allocation8 + $0x4f4] sm:$0xf0] }
 0x3ab   :  { %8078 = vmatpush.bf16.msra.mxu0 %v13579_v40  ;;  %v7736_v40 = vadd.f32 %v7735_v43, %v19714_v44  ;;  %v12859_v44 = vor.u32 %v17786_v42, %v12858_v15  ;;  %v13778_v43 = vld [vmem:[#allocation8 + $0x840] sm:$0xf]  ;;  %v17766_v15 = vld [vmem:[#allocation8 + $0x94] sm:$0xf0] }
 0x3ac   :  { %8092 = vmatpush.bf16.msra.mxu1 %v13899_v23  ;;  %v13819_v23 = vor.u32 %v18026_v24, %v13818_v34  ;;  %v13338_v34 = vld [vmem:[#allocation8 + $0x4d0] sm:$0xf]  ;;  %v18306_v24 = vld [vmem:[#allocation8 + $0x1174] sm:$0xf0] }
 0x3ad   :  { %v7750_v16 = vadd.f32 %v7749_v7, %v7736_v40  ;;  %8010 = vmatpush.bf16.msra.mxu3 %v15095_v52  ;;  %8051 = vmatpush.bf16.msrb.mxu2 %v12899_v14  ;;  %v18016_v40 = vld [vmem:[#allocation8 + $0x864] sm:$0xf0]  ;;  %v15015_v7 = vor.u32 %v18320_v51, %v15012_v54  ;;  %v18310_v52 = vld [vmem:[#allocation8 + $0x119c] sm:$0xf]  ;;  %v12819_v14 = vor.u32 %v17776_v45, %v12818_v5  ;;  %v18006_v51 = vld [vmem:[#allocation8 + $0x814] sm:$0xf0] }
 0x3ae   :  { %v13779_v42 = vor.u32 %v18016_v40, %v13778_v43  ;;  %v12738_v54 = vld [vmem:[#allocation8 + $0x20] sm:$0xf]  ;;  %v13339_v5 = vor.u32 %v17906_v10, %v13338_v34  ;;  %v14298_v40 = vld [vmem:[#allocation8 + $0xc50] sm:$0xf]  ;;  %v17886_v10 = vld [vmem:[#allocation8 + $0x454] sm:$0xf0] }
 0x3af   :  { %8079 = vmatpush.bf16.msra.mxu0 %v13539_v28  ;;  %v19727_v28 = vadd.f32 %v7763_v32, %v7750_v16  ;;  %v14938_v16 = vld [vmem:[#allocation8 + $0x1150] sm:$0xf]  ;;  %v14975_v32 = vor.u32 %v18310_v52, %v14972_v59  ;;  %v13698_v52 = vld [vmem:[#allocation8 + $0x7a0] sm:$0xf]  ;;  %v17996_v59 = vld [vmem:[#allocation8 + $0x7c4] sm:$0xf0] }
 0x3b0   :  { %8093 = vmatpush.bf16.msra.mxu1 %v13859_v12  ;;  %v17916_v12 = vld [vmem:[#allocation8 + $0x544] sm:$0xf0]  ;;  %v14939_v45 = vor.u32 %v18306_v24, %v14938_v16  ;;  %v13258_v34 = vld [vmem:[#allocation8 + $0x430] sm:$0xf]  ;;  %v14258_v16 = vld [vmem:[#allocation8 + $0xc00] sm:$0xf] }
 0x3b1   :  { %20256 = vst [vmem:[#allocation60_spill] sm:$0xff] %v19727_v28  ;;  %8011 = vmatpush.bf16.msra.mxu3 %v15055_v17  ;;  %8052 = vmatpush.bf16.msrb.mxu2 %v12859_v44  ;;  %v13738_v17 = vld [vmem:[#allocation8 + $0x7f0] sm:$0xf]  ;;  %v12779_v44 = vor.u32 %v17766_v15, %v12778_v1  ;;  %v18146_v28 = vld [vmem:[#allocation8 + $0xc74] sm:$0xf0] }
 0x3b2   :  { %v13739_v43 = vor.u32 %v18006_v51, %v13738_v17  ;;  %v18386_v1 = vld [vmem:[#allocation8 + $0x13f4] sm:$0xf0]  ;;  %v14858_v17 = vld [vmem:[#allocation8 + $0x10b0] sm:$0xf] }
 0x3b3   :  { %8080 = vmatpush.bf16.msra.mxu0 %v13499_v19  ;;  %v13419_v19 = vor.u32 %v17926_v21, %v13418_v3  ;;  %v13298_v3 = vld [vmem:[#allocation8 + $0x480] sm:$0xf]  ;;  %v17896_v21 = vld [vmem:[#allocation8 + $0x4a4] sm:$0xf0]  ;;  %v18286_v51 = vld [vmem:[#allocation8 + $0x10d4] sm:$0xf0] }
 0x3b4   :  { %8094 = vmatpush.bf16.msra.mxu1 %v13819_v23  ;;  %v17756_v23 = vld [vmem:[#allocation8 + $0x44] sm:$0xf0]  ;;  %v13299_v15 = vor.u32 %v17896_v21, %v13298_v3  ;;  %v18126_v21 = vld [vmem:[#allocation8 + $0xbd4] sm:$0xf0] }
 0x3b5   :  { %8012 = vmatpush.bf16.msra.mxu3 %v15015_v7  ;;  %8053 = vmatpush.bf16.msrb.mxu2 %v12819_v14  ;;  %v18296_v7 = vld [vmem:[#allocation8 + $0x1124] sm:$0xf0]  ;;  %v12739_v14 = vor.u32 %v17756_v23, %v12738_v54  ;;  %v14218_v23 = vld [vmem:[#allocation8 + $0xbb0] sm:$0xf] }
 0x3b7   :  { %8081 = vmatpush.bf16.msra.mxu0 %v13459_v47  ;;  %v13379_v47 = vor.u32 %v17916_v12, %v13378_v25  ;;  %v14899_v25 = vor.u32 %v18296_v7, %v14898_v56  ;;  %v13699_v12 = vor.u32 %v17996_v59, %v13698_v52  ;;  %v14859_v56 = vor.u32 %v18286_v51, %v14858_v17  ;;  %v15178_v7 = vld [vmem:[#allocation8 + $0x1330] sm:$0xf]  ;;  %v18366_v52 = vld [vmem:[#allocation8 + $0x1354] sm:$0xf0] }
 0x3b8   :  { %8095 = vmatpush.bf16.msra.mxu1 %v13779_v42  ;;  %v14299_v42 = vor.u32 %v18146_v28, %v14298_v40  ;;  %v13259_v28 = vor.u32 %v17886_v10, %v13258_v34  ;;  %v18276_v40 = vld [vmem:[#allocation8 + $0x1084] sm:$0xf0]  ;;  %v14778_v34 = vld [vmem:[#allocation8 + $0x1010] sm:$0xf]  ;;  %v18266_v10 = vld [vmem:[#allocation8 + $0x1034] sm:$0xf0] }
 0x3b9   :  { %8013 = vmatpush.bf16.msra.mxu3 %v14975_v32  ;;  %8054 = vmatpush.bf16.msrb.mxu2 %v12779_v44  ;;  %v18136_v32 = vld [vmem:[#allocation8 + $0xc24] sm:$0xf0]  ;;  %v15218_v44 = vld [vmem:[#allocation8 + $0x1380] sm:$0xf]  ;;  %v14779_v51 = vor.u32 %v18266_v10, %v14778_v34 }
 0x3ba   :  { %v14259_v54 = vor.u32 %v18136_v32, %v14258_v16  ;;  %v15138_v16 = vld [vmem:[#allocation8 + $0x12e0] sm:$0xf] }
 0x3bb   :  { %8082 = vmatpush.bf16.msra.mxu0 %v13419_v19  ;;  %v15258_v19 = vld [vmem:[#allocation8 + $0x13d0] sm:$0xf]  ;;  %v13058_v34 = vld [vmem:[#allocation8 + $0x2a0] sm:$0xf] }
 0x3bc   :  { %8096 = vmatpush.bf16.msra.mxu1 %v13739_v43  ;;  %8014 = vmatmul.bf16.vlgmr.msra.gmra.mxu3 %v19436_v31  ;;  %v15259_v24 = vor.u32 %v18386_v1, %v15258_v19  ;;  %v14818_v43 = vld [vmem:[#allocation8 + $0x1060] sm:$0xf]  ;;  %v13178_v1 = vld [vmem:[#allocation8 + $0x390] sm:$0xf] }
 0x3bd   :  { %8062 = vmatpush.bf16.msrb.mxu3 %v13339_v5  ;;  %8055 = vmatpush.bf16.msrb.mxu2 %v12739_v14  ;;  %v13218_v5 = vld [vmem:[#allocation8 + $0x3e0] sm:$0xf]  ;;  %v14219_v14 = vor.u32 %v18126_v21, %v14218_v23  ;;  %v14819_v19 = vor.u32 %v18276_v40, %v14818_v43  ;;  %v15098_v23 = vld [vmem:[#allocation8 + $0x1290] sm:$0xf] }
 0x3bf   :  { %8083 = vmatpush.bf16.msra.mxu0 %v13379_v47  ;;  %v18376_v47 = vld [vmem:[#allocation8 + $0x13a4] sm:$0xf0] }
 0x3c0   :  { %8097 = vmatpush.bf16.msra.mxu1 %v13699_v12  ;;  %8056 = vmatmul.bf16.vlgmr.msrb.gmra.mxu2 %v19356_v48  ;;  %v15219_v3 = vor.u32 %v18376_v47, %v15218_v44  ;;  %v18116_v12 = vld [vmem:[#allocation8 + $0xb84] sm:$0xf0]  ;;  %v13138_v44 = vld [vmem:[#allocation8 + $0x340] sm:$0xf] }
 0x3c1   :  { %8063 = vmatpush.bf16.msrb.mxu3 %v13299_v15  ;;  %8104 = vmatpush.bf16.msra.mxu2 %v14299_v42  ;;  %v17866_v15 = vld [vmem:[#allocation8 + $0x3b4] sm:$0xf0]  ;;  %v14178_v42 = vld [vmem:[#allocation8 + $0xb60] sm:$0xf]  ;;  %v17856_v47 = vld [vmem:[#allocation8 + $0x364] sm:$0xf0] }
 0x3c2   :  { %8084 = vmatmul.bf16.vlgmr.msra.gmra.mxu0 %v19411_v62  ;;  %v13179_v32 = vor.u32 %v17866_v15, %v13178_v1  ;;  %v14179_v17 = vor.u32 %v18116_v12, %v14178_v42  ;;  %v13139_v21 = vor.u32 %v17856_v47, %v13138_v44  ;;  %v14698_v1 = vld [vmem:[#allocation8 + $0xf70] sm:$0xf]  ;;  %v18246_v15 = vld [vmem:[#allocation8 + $0xf94] sm:$0xf0]  ;;  %v15058_v42 = vld [vmem:[#allocation8 + $0x1240] sm:$0xf] }
 0x3c3   :  { %8132 = vmatpush.bf16.msrb.mxu0 %v14939_v45  ;;  %v17876_v45 = vld [vmem:[#allocation8 + $0x404] sm:$0xf0]  ;;  %8098 = vmatmul.bf16.vlgmr.msra.gmra.mxu1 %v19413_v2  ;;  %v14658_v44 = vld [vmem:[#allocation8 + $0xf20] sm:$0xf] }
 0x3c4   :  { %8146 = vmatpush.bf16.msrb.mxu1 %v15259_v24  ;;  %v13219_v59 = vor.u32 %v17876_v45, %v13218_v5  ;;  %v18356_v24 = vld [vmem:[#allocation8 + $0x1304] sm:$0xf0]  ;;  %v14738_v5 = vld [vmem:[#allocation8 + $0xfc0] sm:$0xf] }
 0x3c5   :  { %8064 = vmatpush.bf16.msrb.mxu3 %v13259_v28  ;;  %8105 = vmatpush.bf16.msra.mxu2 %v14259_v54  ;;  %v14138_v28 = vld [vmem:[#allocation8 + $0xb10] sm:$0xf]  ;;  %v15139_v54 = vor.u32 %v18356_v24, %v15138_v16  ;;  %v18256_v45 = vld [vmem:[#allocation8 + $0xfe4] sm:$0xf0]  ;;  %v14699_v16 = vor.u32 %v18246_v15, %v14698_v1 }
 0x3c6   :  { %v14739_v40 = vor.u32 %v18256_v45, %v14738_v5  ;;  %v17836_v24 = vld [vmem:[#allocation8 + $0x2c4] sm:$0xf0]  ;;  %v13020_v5 = vld [vmem:[#allocation8 + $0x278] sm:$0xf0]  ;;  %v15578_v15 = vld [vmem:[#allocation8 + $0x1650] sm:$0xf] }
 0x3c7   :  { %8133 = vmatpush.bf16.msrb.mxu0 %v14899_v25  ;;  %v15179_v25 = vor.u32 %v18366_v52, %v15178_v7  ;;  %v13098_v7 = vld [vmem:[#allocation8 + $0x2f0] sm:$0xf]  ;;  %v17846_v52 = vld [vmem:[#allocation8 + $0x314] sm:$0xf0]  ;;  %v18236_v47 = vld [vmem:[#allocation8 + $0xf44] sm:$0xf0]  ;;  %v13059_v45 = vor.u32 %v17836_v24, %v13058_v34 }
 0x3c8   :  { %8147 = vmatpush.bf16.msrb.mxu1 %v15219_v3  ;;  %v18346_v3 = vld [vmem:[#allocation8 + $0x12b4] sm:$0xf0]  ;;  %v13099_v12 = vor.u32 %v17846_v52, %v13098_v7  ;;  %v14978_v34 = vld [vmem:[#allocation8 + $0x11a0] sm:$0xf]  ;;  %v18316_v24 = vld [vmem:[#allocation8 + $0x11c4] sm:$0xf0] }
 0x3c9   :  { %8065 = vmatpush.bf16.msrb.mxu3 %v13219_v59  ;;  %8106 = vmatpush.bf16.msra.mxu2 %v14219_v14  ;;  %v14098_v59 = vld [vmem:[#allocation8 + $0xac0] sm:$0xf]  ;;  %v15099_v14 = vor.u32 %v18346_v3, %v15098_v23  ;;  %v15018_v23 = vld [vmem:[#allocation8 + $0x11f0] sm:$0xf]  ;;  %v18326_v3 = vld [vmem:[#allocation8 + $0x1214] sm:$0xf0] }
 0x3ca   :  { %v15019_v1 = vor.u32 %v18326_v3, %v15018_v23  ;;  %v17801_v23 = vld [vmem:[#allocation8 + $0x1b4] sm:$0xf]  ;;  %v12940_v3 = vld [vmem:[#allocation8 + $0x1d8] sm:$0xf0] }
 0x3cb   :  { %8134 = vmatpush.bf16.msrb.mxu0 %v14859_v56  ;;  %v18106_v56 = vld [vmem:[#allocation8 + $0xb34] sm:$0xf0] }
 0x3cc   :  { %8148 = vmatpush.bf16.msrb.mxu1 %v15179_v25  ;;  %v14139_v43 = vor.u32 %v18106_v56, %v14138_v28  ;;  %v18336_v25 = vld [vmem:[#allocation8 + $0x1264] sm:$0xf0]  ;;  %v14618_v28 = vld [vmem:[#allocation8 + $0xed0] sm:$0xf]  ;;  %v17821_v56 = vld [vmem:[#allocation8 + $0x254] sm:$0xf] }
 0x3cd   :  { %8066 = vmatpush.bf16.msrb.mxu3 %v13179_v32  ;;  %8107 = vmatpush.bf16.msra.mxu2 %v14179_v17  ;;  %v14058_v32 = vld [vmem:[#allocation8 + $0xa70] sm:$0xf]  ;;  %v18086_v17 = vld [vmem:[#allocation8 + $0xa94] sm:$0xf0]  ;;  %v13023_v52 = vor.u32 %v17821_v56, %v13020_v5  ;;  %v15538_v56 = vld [vmem:[#allocation8 + $0x1600] sm:$0xf] }
 0x3cf   :  { %8135 = vmatpush.bf16.msrb.mxu0 %v14819_v19  ;;  %v18096_v19 = vld [vmem:[#allocation8 + $0xae4] sm:$0xf0] }
 0x3d0   :  { %8149 = vmatpush.bf16.msrb.mxu1 %v15139_v54  ;;  %v14099_v10 = vor.u32 %v18096_v19, %v14098_v59  ;;  %v18226_v54 = vld [vmem:[#allocation8 + $0xef4] sm:$0xf0]  ;;  %v18076_v59 = vld [vmem:[#allocation8 + $0xa44] sm:$0xf0] }
 0x3d1   :  { %8067 = vmatpush.bf16.msrb.mxu3 %v13139_v21  ;;  %8108 = vmatpush.bf16.msra.mxu2 %v14139_v43  ;;  %v14059_v21 = vor.u32 %v18086_v17, %v14058_v32  ;;  %v14659_v43 = vor.u32 %v18236_v47, %v14658_v44  ;;  %v14619_v7 = vor.u32 %v18226_v54, %v14618_v28  ;;  %v18216_v19 = vld [vmem:[#allocation8 + $0xea4] sm:$0xf0]  ;;  %v13340_v32 = vld [vmem:[#allocation8 + $0x4f8] sm:$0xf0]  ;;  %v14538_v28 = vld [vmem:[#allocation8 + $0xe30] sm:$0xf] }
 0x3d2   :  { %v14979_v47 = vor.u32 %v18316_v24, %v14978_v34  ;;  %v18206_v54 = vld [vmem:[#allocation8 + $0xe54] sm:$0xf0]  ;;  %v13260_v34 = vld [vmem:[#allocation8 + $0x458] sm:$0xf0] }
 0x3d3   :  { %8136 = vmatpush.bf16.msrb.mxu0 %v14779_v51  ;;  %v15059_v51 = vor.u32 %v18336_v25, %v15058_v42  ;;  %v18466_v42 = vld [vmem:[#allocation8 + $0x1674] sm:$0xf0]  ;;  %v17811_v25 = vld [vmem:[#allocation8 + $0x204] sm:$0xf] }
 0x3d4   :  { %8150 = vmatpush.bf16.msrb.mxu1 %v15099_v14  ;;  %v14578_v14 = vld [vmem:[#allocation8 + $0xe80] sm:$0xf] }
 0x3d5   :  { %8068 = vmatpush.bf16.msrb.mxu3 %v13099_v12  ;;  %8109 = vmatpush.bf16.msra.mxu2 %v14099_v10  ;;  %v12980_v12 = vld [vmem:[#allocation8 + $0x228] sm:$0xf0]  ;;  %v14579_v17 = vor.u32 %v18216_v19, %v14578_v14  ;;  %v18196_v14 = vld [vmem:[#allocation8 + $0xe04] sm:$0xf0]  ;;  %v15498_v19 = vld [vmem:[#allocation8 + $0x15b0] sm:$0xf] }
 0x3d6   :  { %v12983_v44 = vor.u32 %v17811_v25, %v12980_v12  ;;  %v12900_v25 = vld [vmem:[#allocation8 + $0x188] sm:$0xf0]  ;;  %v17881_v12 = vld [vmem:[#allocation8 + $0x434] sm:$0xf] }
 0x3d7   :  { %8137 = vmatpush.bf16.msrb.mxu0 %v14739_v40  ;;  %v14018_v40 = vld [vmem:[#allocation8 + $0xa20] sm:$0xf] }
 0x3d8   :  { %8151 = vmatpush.bf16.msrb.mxu1 %v15059_v51  ;;  %v14019_v10 = vor.u32 %v18076_v59, %v14018_v40  ;;  %v15579_v51 = vor.u32 %v18466_v42, %v15578_v15  ;;  %v14539_v40 = vor.u32 %v18206_v54, %v14538_v28  ;;  %v14498_v59 = vld [vmem:[#allocation8 + $0xde0] sm:$0xf]  ;;  %v18446_v15 = vld [vmem:[#allocation8 + $0x15d4] sm:$0xf0]  ;;  %v17791_v42 = vld [vmem:[#allocation8 + $0x164] sm:$0xf] }
 0x3d9   :  { %8069 = vmatpush.bf16.msrb.mxu3 %v13059_v45  ;;  %8110 = vmatpush.bf16.msra.mxu2 %v14059_v21  ;;  %v18456_v45 = vld [vmem:[#allocation8 + $0x1624] sm:$0xf0]  ;;  %v17891_v21 = vld [vmem:[#allocation8 + $0x484] sm:$0xf]  ;;  %v14499_v24 = vor.u32 %v18196_v14, %v14498_v59  ;;  %v17781_v28 = vld [vmem:[#allocation8 + $0x114] sm:$0xf] }
 0x3da   :  { %v12860_v54 = vld [vmem:[#allocation8 + $0x138] sm:$0xf0]  ;;  %v17771_v59 = vld [vmem:[#allocation8 + $0xc4] sm:$0xf]  ;;  %v12820_v14 = vld [vmem:[#allocation8 + $0xe8] sm:$0xf0] }
 0x3db   :  { %8138 = vmatpush.bf16.msrb.mxu0 %v14699_v16  ;;  %v17901_v16 = vld [vmem:[#allocation8 + $0x4d4] sm:$0xf] }
 0x3dc   :  { %8152 = vmatpush.bf16.msrb.mxu1 %v15019_v1  ;;  %8070 = vmatmul.bf16.vlgmr.msrb.gmra.mxu3 %v19358_v53  ;;  %v13343_v5 = vor.u32 %v17901_v16, %v13340_v32  ;;  %v12903_v16 = vor.u32 %v17791_v42, %v12900_v25  ;;  %v14458_v32 = vld [vmem:[#allocation8 + $0xd90] sm:$0xf]  ;;  %v12823_v25 = vor.u32 %v17771_v59, %v12820_v14  ;;  %v14300_v59 = vld [vmem:[#allocation8 + $0xc78] sm:$0xf0] }
 0x3dd   :  { %8118 = vmatpush.bf16.msra.mxu3 %v14619_v7  ;;  %8111 = vmatpush.bf16.msra.mxu2 %v14019_v10  ;;  %v15539_v7 = vor.u32 %v18456_v45, %v15538_v56  ;;  %v15499_v10 = vor.u32 %v18446_v15, %v15498_v19  ;;  %v17871_v56 = vld [vmem:[#allocation8 + $0x3e4] sm:$0xf]  ;;  %v17861_v19 = vld [vmem:[#allocation8 + $0x394] sm:$0xf] }
 0x3df   :  { %8139 = vmatpush.bf16.msrb.mxu0 %v14659_v43  ;;  %v13300_v43 = vld [vmem:[#allocation8 + $0x4a8] sm:$0xf0] }
 0x3e0   :  { %8153 = vmatpush.bf16.msrb.mxu1 %v14979_v47  ;;  %8112 = vmatmul.bf16.vlgmr.msra.gmra.mxu2 %v19415_v50  ;;  %v13303_v1 = vor.u32 %v17891_v21, %v13300_v43  ;;  %v18436_v47 = vld [vmem:[#allocation8 + $0x1584] sm:$0xf0]  ;;  %v14418_v21 = vld [vmem:[#allocation8 + $0xd40] sm:$0xf] }
 0x3e1   :  { %8119 = vmatpush.bf16.msra.mxu3 %v14579_v17  ;;  %8160 = vmatpush.bf16.msrb.mxu2 %v15579_v51  ;;  %v18186_v17 = vld [vmem:[#allocation8 + $0xdb4] sm:$0xf0]  ;;  %v15458_v51 = vld [vmem:[#allocation8 + $0x1560] sm:$0xf]  ;;  %v18176_v43 = vld [vmem:[#allocation8 + $0xd64] sm:$0xf0] }
 0x3e2   :  { %8140 = vmatmul.bf16.vlgmr.msrb.gmra.mxu0 %v19433_v26  ;;  %v14459_v45 = vor.u32 %v18186_v17, %v14458_v32  ;;  %v14419_v15 = vor.u32 %v18176_v43, %v14418_v21  ;;  %v17761_v32 = vld [vmem:[#allocation8 + $0x74] sm:$0xf]  ;;  %v12780_v17 = vld [vmem:[#allocation8 + $0x98] sm:$0xf0]  ;;  %v17751_v21 = vld [vmem:[#allocation8 + $0x24] sm:$0xf] }
 0x3e3   :  { %8188 = vmatpush.bf16.msra.mxu0 %v13023_v52  ;;  %v12943_v52 = vor.u32 %v17801_v23, %v12940_v3  ;;  %8154 = vmatmul.bf16.vlgmr.msrb.gmra.mxu1 %v19436_v31  ;;  %v15459_v23 = vor.u32 %v18436_v47, %v15458_v51  ;;  %v12863_v3 = vor.u32 %v17781_v28, %v12860_v54  ;;  %v17851_v51 = vld [vmem:[#allocation8 + $0x344] sm:$0xf]  ;;  %v14338_v28 = vld [vmem:[#allocation8 + $0xca0] sm:$0xf]  ;;  %v12740_v43 = vld [vmem:[#allocation8 + $0x48] sm:$0xf0] }
 0x3e4   :  { %8202 = vmatpush.bf16.msra.mxu1 %v13343_v5  ;;  %v13220_v5 = vld [vmem:[#allocation8 + $0x408] sm:$0xf0] }
 0x3e5   :  { %8120 = vmatpush.bf16.msra.mxu3 %v14539_v40  ;;  %8161 = vmatpush.bf16.msrb.mxu2 %v15539_v7  ;;  %v15418_v40 = vld [vmem:[#allocation8 + $0x1510] sm:$0xf]  ;;  %v13223_v7 = vor.u32 %v17871_v56, %v13220_v5  ;;  %v12783_v56 = vor.u32 %v17761_v32, %v12780_v17  ;;  %v18156_v5 = vld [vmem:[#allocation8 + $0xcc4] sm:$0xf0]  ;;  %v17981_v17 = vld [vmem:[#allocation8 + $0x754] sm:$0xf] }
 0x3e6   :  { %v14339_v14 = vor.u32 %v18156_v5, %v14338_v28  ;;  %v17831_v28 = vld [vmem:[#allocation8 + $0x2a4] sm:$0xf]  ;;  %v13060_v5 = vld [vmem:[#allocation8 + $0x2c8] sm:$0xf0] }
 0x3e7   :  { %8189 = vmatpush.bf16.msra.mxu0 %v12983_v44  ;;  %v13263_v44 = vor.u32 %v17881_v12, %v13260_v34  ;;  %v14378_v12 = vld [vmem:[#allocation8 + $0xcf0] sm:$0xf]  ;;  %v18166_v34 = vld [vmem:[#allocation8 + $0xd14] sm:$0xf0] }
 0x3e8   :  { %8203 = vmatpush.bf16.msra.mxu1 %v13303_v1  ;;  %v13180_v1 = vld [vmem:[#allocation8 + $0x3b8] sm:$0xf0]  ;;  %v14379_v47 = vor.u32 %v18166_v34, %v14378_v12 }
 0x3e9   :  { %8121 = vmatpush.bf16.msra.mxu3 %v14499_v24  ;;  %8162 = vmatpush.bf16.msrb.mxu2 %v15499_v10  ;;  %v15378_v24 = vld [vmem:[#allocation8 + $0x14c0] sm:$0xf]  ;;  %v13183_v10 = vor.u32 %v17861_v19, %v13180_v1  ;;  %v17841_v19 = vld [vmem:[#allocation8 + $0x2f4] sm:$0xf]  ;;  %v13100_v1 = vld [vmem:[#allocation8 + $0x318] sm:$0xf0] }
 0x3ea   :  { %v13103_v32 = vor.u32 %v17841_v19, %v13100_v1  ;;  %v18121_v19 = vld [vmem:[#allocation8 + $0xbb4] sm:$0xf]  ;;  %v14220_v1 = vld [vmem:[#allocation8 + $0xbd8] sm:$0xf0] }
 0x3eb   :  { %8190 = vmatpush.bf16.msra.mxu0 %v12943_v52  ;;  %v18426_v52 = vld [vmem:[#allocation8 + $0x1534] sm:$0xf0] }
 0x3ec   :  { %8204 = vmatpush.bf16.msra.mxu1 %v13263_v44  ;;  %v15419_v42 = vor.u32 %v18426_v52, %v15418_v40  ;;  %v13140_v44 = vld [vmem:[#allocation8 + $0x368] sm:$0xf0]  ;;  %v15898_v40 = vld [vmem:[#allocation8 + $0x18d0] sm:$0xf]  ;;  %v18141_v52 = vld [vmem:[#allocation8 + $0xc54] sm:$0xf] }
 0x3ed   :  { %8122 = vmatpush.bf16.msra.mxu3 %v14459_v45  ;;  %8163 = vmatpush.bf16.msrb.mxu2 %v15459_v23  ;;  %v15338_v45 = vld [vmem:[#allocation8 + $0x1470] sm:$0xf]  ;;  %v18406_v23 = vld [vmem:[#allocation8 + $0x1494] sm:$0xf0]  ;;  %v14303_v34 = vor.u32 %v18141_v52, %v14300_v59  ;;  %v17971_v52 = vld [vmem:[#allocation8 + $0x704] sm:$0xf] }
 0x3ef   :  { %8191 = vmatpush.bf16.msra.mxu0 %v12903_v16  ;;  %v18416_v16 = vld [vmem:[#allocation8 + $0x14e4] sm:$0xf0] }
 0x3f0   :  { %8205 = vmatpush.bf16.msra.mxu1 %v13223_v7  ;;  %v15379_v54 = vor.u32 %v18416_v16, %v15378_v24  ;;  %v18546_v7 = vld [vmem:[#allocation8 + $0x18f4] sm:$0xf0]  ;;  %v18396_v24 = vld [vmem:[#allocation8 + $0x1444] sm:$0xf0] }
 0x3f1   :  { %8123 = vmatpush.bf16.msra.mxu3 %v14419_v15  ;;  %8164 = vmatpush.bf16.msrb.mxu2 %v15419_v42  ;;  %v15339_v15 = vor.u32 %v18406_v23, %v15338_v45  ;;  %v12743_v42 = vor.u32 %v17751_v21, %v12740_v43  ;;  %v15899_v12 = vor.u32 %v18546_v7, %v15898_v40  ;;  %v18536_v16 = vld [vmem:[#allocation8 + $0x18a4] sm:$0xf0]  ;;  %v14620_v45 = vld [vmem:[#allocation8 + $0xef8] sm:$0xf0]  ;;  %v15818_v40 = vld [vmem:[#allocation8 + $0x1830] sm:$0xf] }
 0x3f2   :  { %v13063_v43 = vor.u32 %v17831_v28, %v13060_v5  ;;  %v18526_v7 = vld [vmem:[#allocation8 + $0x1854] sm:$0xf0] }
 0x3f3   :  { %8192 = vmatpush.bf16.msra.mxu0 %v12863_v3  ;;  %v13143_v3 = vor.u32 %v17851_v51, %v13140_v44  ;;  %v13660_v51 = vld [vmem:[#allocation8 + $0x778] sm:$0xf0]  ;;  %v18131_v44 = vld [vmem:[#allocation8 + $0xc04] sm:$0xf] }
 0x3f4   :  { %8206 = vmatpush.bf16.msra.mxu1 %v13183_v10  ;;  %v15858_v10 = vld [vmem:[#allocation8 + $0x1880] sm:$0xf] }
 0x3f5   :  { %8124 = vmatpush.bf16.msra.mxu3 %v14379_v47  ;;  %8165 = vmatpush.bf16.msrb.mxu2 %v15379_v54  ;;  %v14260_v47 = vld [vmem:[#allocation8 + $0xc28] sm:$0xf0]  ;;  %v15859_v23 = vor.u32 %v18536_v16, %v15858_v10  ;;  %v18516_v10 = vld [vmem:[#allocation8 + $0x1804] sm:$0xf0]  ;;  %v17961_v16 = vld [vmem:[#allocation8 + $0x6b4] sm:$0xf] }
 0x3f6   :  { %v14263_v21 = vor.u32 %v18131_v44, %v14260_v47  ;;  %v18201_v44 = vld [vmem:[#allocation8 + $0xe34] sm:$0xf]  ;;  %v14540_v47 = vld [vmem:[#allocation8 + $0xe58] sm:$0xf0] }
 0x3f7   :  { %8193 = vmatpush.bf16.msra.mxu0 %v12823_v25  ;;  %v15298_v25 = vld [vmem:[#allocation8 + $0x1420] sm:$0xf] }
 0x3f8   :  { %8207 = vmatpush.bf16.msra.mxu1 %v13143_v3  ;;  %v15299_v54 = vor.u32 %v18396_v24, %v15298_v25  ;;  %v13663_v3 = vor.u32 %v17981_v17, %v13660_v51  ;;  %v15819_v25 = vor.u32 %v18526_v7, %v15818_v40  ;;  %v15778_v24 = vld [vmem:[#allocation8 + $0x17e0] sm:$0xf]  ;;  %v18111_v17 = vld [vmem:[#allocation8 + $0xb64] sm:$0xf]  ;;  %v14180_v51 = vld [vmem:[#allocation8 + $0xb88] sm:$0xf0] }
 0x3f9   :  { %8125 = vmatpush.bf16.msra.mxu3 %v14339_v14  ;;  %8166 = vmatpush.bf16.msrb.mxu2 %v15339_v15  ;;  %v13620_v14 = vld [vmem:[#allocation8 + $0x728] sm:$0xf0]  ;;  %v18211_v15 = vld [vmem:[#allocation8 + $0xe84] sm:$0xf]  ;;  %v15779_v28 = vor.u32 %v18516_v10, %v15778_v24  ;;  %v14140_v40 = vld [vmem:[#allocation8 + $0xb38] sm:$0xf0] }
 0x3fa   :  { %v18191_v7 = vld [vmem:[#allocation8 + $0xde4] sm:$0xf]  ;;  %v14100_v10 = vld [vmem:[#allocation8 + $0xae8] sm:$0xf0] }
 0x3fb   :  { %8194 = vmatpush.bf16.msra.mxu0 %v12783_v56  ;;  %v18221_v56 = vld [vmem:[#allocation8 + $0xed4] sm:$0xf]  ;;  %v18091_v24 = vld [vmem:[#allocation8 + $0xac4] sm:$0xf] }
 0x3fc   :  { %8208 = vmatpush.bf16.msra.mxu1 %v13103_v32  ;;  %8126 = vmatmul.bf16.vlgmr.msra.gmra.mxu3 %v19421_v60  ;;  %v14623_v59 = vor.u32 %v18221_v56, %v14620_v45  ;;  %v13580_v32 = vld [vmem:[#allocation8 + $0x6d8] sm:$0xf0]  ;;  %v15738_v56 = vld [vmem:[#allocation8 + $0x1790] sm:$0xf]  ;;  %v18506_v45 = vld [vmem:[#allocation8 + $0x17b4] sm:$0xf0] }
 0x3fd   :  { %8174 = vmatpush.bf16.msrb.mxu3 %v15899_v12  ;;  %8167 = vmatpush.bf16.msrb.mxu2 %v15299_v54  ;;  %v13623_v12 = vor.u32 %v17971_v52, %v13620_v14  ;;  %v13583_v5 = vor.u32 %v17961_v16, %v13580_v32  ;;  %v14183_v54 = vor.u32 %v18111_v17, %v14180_v51  ;;  %v14500_v52 = vld [vmem:[#allocation8 + $0xe08] sm:$0xf0]  ;;  %v18181_v16 = vld [vmem:[#allocation8 + $0xd94] sm:$0xf] }
 0x3fe   :  { %v14103_v51 = vor.u32 %v18091_v24, %v14100_v10  ;;  %v18061_v24 = vld [vmem:[#allocation8 + $0x9d4] sm:$0xf]  ;;  %v19751_v10 = vpop.f32.mrf.mxu1 }
 0x3ff   :  { %8195 = vmatpush.bf16.msra.mxu0 %v12743_v42  ;;  %v14580_v42 = vld [vmem:[#allocation8 + $0xea8] sm:$0xf0]  ;;  %20260 = vst [vmem:[#allocation64_spill] sm:$0xff] %v19751_v10  ;;  %v18301_v10 = vld [vmem:[#allocation8 + $0x1154] sm:$0xf] }
 0x400   :  { %8209 = vmatpush.bf16.msra.mxu1 %v13063_v43  ;;  %8168 = vmatmul.bf16.vlgmr.msrb.gmra.mxu2 %v19444_v29  ;;  %v18101_v43 = vld [vmem:[#allocation8 + $0xb14] sm:$0xf] }
 0x401   :  { %8175 = vmatpush.bf16.msrb.mxu3 %v15859_v23  ;;  %8216 = vmatpush.bf16.msra.mxu2 %v13663_v3  ;;  %v17951_v23 = vld [vmem:[#allocation8 + $0x664] sm:$0xf]  ;;  %v14543_v3 = vor.u32 %v18201_v44, %v14540_v47  ;;  %v14143_v14 = vor.u32 %v18101_v43, %v14140_v40  ;;  %v15658_v44 = vld [vmem:[#allocation8 + $0x16f0] sm:$0xf]  ;;  %v18486_v47 = vld [vmem:[#allocation8 + $0x1714] sm:$0xf0] }
 0x402   :  { %8196 = vmatmul.bf16.vlgmr.msra.gmra.mxu0 %v19356_v48  ;;  %v14583_v48 = vor.u32 %v18211_v15, %v14580_v42  ;;  %v17941_v15 = vld [vmem:[#allocation8 + $0x614] sm:$0xf]  ;;  %v19741_v42 = vpop.f32.mrf.mxu2  ;;  %v15659_v43 = vor.u32 %v18486_v47, %v15658_v44  ;;  %v15618_v40 = vld [vmem:[#allocation8 + $0x16a0] sm:$0xf]  ;;  %v14380_v44 = vld [vmem:[#allocation8 + $0xd18] sm:$0xf0] }
 0x403   :  { %8244 = vmatpush.bf16.msrb.mxu0 %v14303_v34  ;;  %v14223_v34 = vor.u32 %v18121_v19, %v14220_v1  ;;  %8210 = vmatmul.bf16.vlgmr.msra.gmra.mxu1 %v19358_v53  ;;  %v15698_v19 = vld [vmem:[#allocation8 + $0x1740] sm:$0xf]  ;;  %v18496_v1 = vld [vmem:[#allocation8 + $0x1764] sm:$0xf0]  ;;  %20257 = vst [vmem:[#allocation61_spill] sm:$0xff] %v19741_v42 }
 0x404   :  { %8258 = vmatpush.bf16.msrb.mxu1 %v14623_v59  ;;  %v15739_v59 = vor.u32 %v18506_v45, %v15738_v56  ;;  %v15699_v32 = vor.u32 %v18496_v1, %v15698_v19  ;;  %v18081_v56 = vld [vmem:[#allocation8 + $0xa74] sm:$0xf]  ;;  %v14060_v45 = vld [vmem:[#allocation8 + $0xa98] sm:$0xf0]  ;;  %v18451_v42 = vld [vmem:[#allocation8 + $0x1604] sm:$0xf] }
 0x405   :  { %8176 = vmatpush.bf16.msrb.mxu3 %v15819_v25  ;;  %8217 = vmatpush.bf16.msra.mxu2 %v13623_v12  ;;  %v19743_v25 = vpop.f32.mrf.mxu3  ;;  %v14503_v12 = vor.u32 %v18191_v7, %v14500_v52  ;;  %v14063_v52 = vor.u32 %v18081_v56, %v14060_v45  ;;  %v13380_v45 = vld [vmem:[#allocation8 + $0x548] sm:$0xf0] }
 0x406   :  { %20258 = vst [vmem:[#allocation62_spill] sm:$0xff] %v19743_v25  ;;  %v14940_v25 = vld [vmem:[#allocation8 + $0x1178] sm:$0xf0] }
 0x407   :  { %8245 = vmatpush.bf16.msrb.mxu0 %v14263_v21  ;;  %v13540_v21 = vld [vmem:[#allocation8 + $0x688] sm:$0xf0] }
 0x408   :  { %8259 = vmatpush.bf16.msrb.mxu1 %v14583_v48  ;;  %v13543_v53 = vor.u32 %v17951_v23, %v13540_v21  ;;  %v14460_v48 = vld [vmem:[#allocation8 + $0xdb8] sm:$0xf0]  ;;  %v18171_v23 = vld [vmem:[#allocation8 + $0xd44] sm:$0xf]  ;;  %v19745_v21 = vpop.f32.mrf.mxu0 }
 0x409   :  { %8177 = vmatpush.bf16.msrb.mxu3 %v15779_v28  ;;  %8218 = vmatpush.bf16.msra.mxu2 %v13583_v5  ;;  %v17931_v28 = vld [vmem:[#allocation8 + $0x5c4] sm:$0xf]  ;;  %v14463_v5 = vor.u32 %v18181_v16, %v14460_v48  ;;  %20259 = vst [vmem:[#allocation63_spill] sm:$0xff] %v19745_v21  ;;  %v13980_v16 = vld [vmem:[#allocation8 + $0x9f8] sm:$0xf0] }
 0x40a   :  { %v19747_v19 = vpop.f32.mrf.mxu2  ;;  %v18461_v48 = vld [vmem:[#allocation8 + $0x1654] sm:$0xf] }
 0x40b   :  { %8246 = vmatpush.bf16.msrb.mxu0 %v14223_v34  ;;  %v13500_v34 = vld [vmem:[#allocation8 + $0x638] sm:$0xf0] }
 0x40c   :  { %8260 = vmatpush.bf16.msrb.mxu1 %v14543_v3  ;;  %v13503_v17 = vor.u32 %v17941_v15, %v13500_v34  ;;  %v14420_v3 = vld [vmem:[#allocation8 + $0xd68] sm:$0xf0] }
 0x40d   :  { %8178 = vmatpush.bf16.msrb.mxu3 %v15739_v59  ;;  %8219 = vmatpush.bf16.msra.mxu2 %v13543_v53  ;;  %v18476_v59 = vld [vmem:[#allocation8 + $0x16c4] sm:$0xf0]  ;;  %v17921_v53 = vld [vmem:[#allocation8 + $0x574] sm:$0xf]  ;;  %v19749_v1 = vpop.f32.mrf.mxu3  ;;  %v14423_v15 = vor.u32 %v18171_v23, %v14420_v3  ;;  %v14020_v34 = vld [vmem:[#allocation8 + $0xa48] sm:$0xf0] }
 0x40e   :  { %v18051_v23 = vld [vmem:[#allocation8 + $0x984] sm:$0xf]  ;;  %v13940_v3 = vld [vmem:[#allocation8 + $0x9a8] sm:$0xf0] }
 0x40f   :  { %8247 = vmatpush.bf16.msrb.mxu0 %v14183_v54  ;;  %v13460_v54 = vld [vmem:[#allocation8 + $0x5e8] sm:$0xf0] }
 0x410   :  { %8261 = vmatpush.bf16.msrb.mxu1 %v14503_v12  ;;  %v13463_v7 = vor.u32 %v17931_v28, %v13460_v54  ;;  %v18071_v12 = vld [vmem:[#allocation8 + $0xa24] sm:$0xf]  ;;  %v19753_v33 = vpop.f32.mrf.mxu0 }
 0x411   :  { %8179 = vmatpush.bf16.msrb.mxu3 %v15699_v32  ;;  %8220 = vmatpush.bf16.msra.mxu2 %v13503_v17  ;;  %v15580_v32 = vld [vmem:[#allocation8 + $0x1678] sm:$0xf0]  ;;  %v15619_v17 = vor.u32 %v18476_v59, %v15618_v40  ;;  %v14023_v28 = vor.u32 %v18071_v12, %v14020_v34  ;;  %v17911_v54 = vld [vmem:[#allocation8 + $0x524] sm:$0xf]  ;;  %v18541_v59 = vld [vmem:[#allocation8 + $0x18d4] sm:$0xf]  ;;  %v19755_v12 = vpop.f32.mrf.mxu1 }
 0x412   :  { %v15583_v56 = vor.u32 %v18461_v48, %v15580_v32  ;;  %v18151_v40 = vld [vmem:[#allocation8 + $0xca4] sm:$0xf]  ;;  %v13900_v48 = vld [vmem:[#allocation8 + $0x958] sm:$0xf0] }
 0x413   :  { %8248 = vmatpush.bf16.msrb.mxu0 %v14143_v14  ;;  %v13420_v14 = vld [vmem:[#allocation8 + $0x598] sm:$0xf0]  ;;  %v18291_v32 = vld [vmem:[#allocation8 + $0x1104] sm:$0xf] }
 0x414   :  { %8262 = vmatpush.bf16.msrb.mxu1 %v14463_v5  ;;  %v13423_v47 = vor.u32 %v17921_v53, %v13420_v14  ;;  %v13983_v5 = vor.u32 %v18061_v24, %v13980_v16  ;;  %v15900_v53 = vld [vmem:[#allocation8 + $0x18f8] sm:$0xf0]  ;;  %v13943_v14 = vor.u32 %v18051_v23, %v13940_v3  ;;  %v18041_v16 = vld [vmem:[#allocation8 + $0x934] sm:$0xf] }
 0x415   :  { %8180 = vmatpush.bf16.msrb.mxu3 %v15659_v43  ;;  %8221 = vmatpush.bf16.msra.mxu2 %v13463_v7  ;;  %v15540_v43 = vld [vmem:[#allocation8 + $0x1628] sm:$0xf0]  ;;  %v18281_v23 = vld [vmem:[#allocation8 + $0x10b4] sm:$0xf]  ;;  %v14860_v3 = vld [vmem:[#allocation8 + $0x10d8] sm:$0xf0] }
 0x416   :  { %v14340_v7 = vld [vmem:[#allocation8 + $0xcc8] sm:$0xf0]  ;;  %v15543_v34 = vor.u32 %v18451_v42, %v15540_v43  ;;  %v13903_v42 = vor.u32 %v18041_v16, %v13900_v48  ;;  %v18431_v43 = vld [vmem:[#allocation8 + $0x1564] sm:$0xf] }
 0x417   :  { %8249 = vmatpush.bf16.msrb.mxu0 %v14103_v51  ;;  %v18161_v51 = vld [vmem:[#allocation8 + $0xcf4] sm:$0xf]  ;;  %v14343_v24 = vor.u32 %v18151_v40, %v14340_v7  ;;  %v15460_v40 = vld [vmem:[#allocation8 + $0x1588] sm:$0xf0] }
 0x418   :  { %8263 = vmatpush.bf16.msrb.mxu1 %v14423_v15  ;;  %v14383_v21 = vor.u32 %v18161_v51, %v14380_v44  ;;  %v14943_v15 = vor.u32 %v18301_v10, %v14940_v25  ;;  %v19760_v51 = vpop.f32.mrf.mxu3  ;;  %v15903_v44 = vor.u32 %v18541_v59, %v15900_v53  ;;  %v15500_v25 = vld [vmem:[#allocation8 + $0x15d8] sm:$0xf0]  ;;  %v18531_v10 = vld [vmem:[#allocation8 + $0x1884] sm:$0xf]  ;;  %v18521_v7 = vld [vmem:[#allocation8 + $0x1834] sm:$0xf]  ;;  %v19764_v59 = vpop.f32.mrf.mxu0 }
 0x419   :  { %8181 = vmatpush.bf16.msrb.mxu3 %v15619_v17  ;;  %8222 = vmatpush.bf16.msra.mxu2 %v13423_v47  ;;  %v19758_v17 = vpop.f32.mrf.mxu2  ;;  %v14900_v47 = vld [vmem:[#allocation8 + $0x1128] sm:$0xf0] }
 0x41b   :  { %8250 = vmatpush.bf16.msrb.mxu0 %v14063_v52  ;;  %v13383_v52 = vor.u32 %v17911_v54, %v13380_v45  ;;  %v14903_v54 = vor.u32 %v18291_v32, %v14900_v47  ;;  %v13860_v45 = vld [vmem:[#allocation8 + $0x908] sm:$0xf0]  ;;  %v18421_v47 = vld [vmem:[#allocation8 + $0x1514] sm:$0xf] }
 0x41c   :  { %8264 = vmatpush.bf16.msrb.mxu1 %v14383_v21  ;;  %8182 = vmatmul.bf16.vlgmr.msrb.gmra.mxu3 %v19458_v61  ;;  %v15860_v21 = vld [vmem:[#allocation8 + $0x18a8] sm:$0xf0] }
 0x41d   :  { %8230 = vmatpush.bf16.msra.mxu3 %v13983_v5  ;;  %8223 = vmatpush.bf16.msra.mxu2 %v13383_v52  ;;  %v15820_v52 = vld [vmem:[#allocation8 + $0x1858] sm:$0xf0] }
 0x41e   :  { %v15823_v32 = vor.u32 %v18521_v7, %v15820_v52  ;;  %v15380_v7 = vld [vmem:[#allocation8 + $0x14e8] sm:$0xf0]  ;;  %v20262_v52 = vperm.slane %v19554_v8, 2 }
 0x41f   :  { %8251 = vmatpush.bf16.msrb.mxu0 %v14023_v28  ;;  %v18441_v28 = vld [vmem:[#allocation8 + $0x15b4] sm:$0xf] }
 0x420   :  { %8265 = vmatpush.bf16.msrb.mxu1 %v14343_v24  ;;  %v15503_v5 = vor.u32 %v18441_v28, %v15500_v25  ;;  %8224 = vmatmul.bf16.vlgmr.msra.gmra.mxu2 %v19411_v62  ;;  %v13820_v24 = vld [vmem:[#allocation8 + $0x8b8] sm:$0xf0]  ;;  %v18271_v62 = vld [vmem:[#allocation8 + $0x1064] sm:$0xf]  ;;  %v19769_v48 = vpop.f32.mrf.mxu3  ;;  %v19771_v25 = vpop.f32.mrf.mxu1 }
 0x421   :  { %8231 = vmatpush.bf16.msra.mxu3 %v13943_v14  ;;  %8272 = vmatpush.bf16.msrb.mxu2 %v14943_v15  ;;  %v14863_v14 = vor.u32 %v18281_v23, %v14860_v3  ;;  %v15463_v15 = vor.u32 %v18431_v43, %v15460_v40  ;;  %v19767_v16 = vpop.f32.mrf.mxu2  ;;  %v15420_v28 = vld [vmem:[#allocation8 + $0x1538] sm:$0xf0]  ;;  %v20261_v23 = vperm.slane %v19450_v0, 0  ;;  %v18411_v40 = vld [vmem:[#allocation8 + $0x14c4] sm:$0xf] }
 0x422   :  { %8252 = vmatmul.bf16.vlgmr.msrb.gmra.mxu0 %v19415_v50  ;;  %v15863_v50 = vor.u32 %v18531_v10, %v15860_v21  ;;  %v15780_v10 = vld [vmem:[#allocation8 + $0x1808] sm:$0xf0]  ;;  %v14780_v43 = vld [vmem:[#allocation8 + $0x1038] sm:$0xf0] }
 0x423   :  { %8300 = vmatpush.bf16.msra.mxu0 %v15583_v56  ;;  %v18031_v56 = vld [vmem:[#allocation8 + $0x8e4] sm:$0xf]  ;;  %8266 = vmatmul.bf16.vlgmr.msrb.gmra.mxu1 %v19421_v60 }
 0x424   :  { %8314 = vmatpush.bf16.msra.mxu1 %v15903_v44  ;;  %v13863_v53 = vor.u32 %v18031_v56, %v13860_v45  ;;  %v14820_v44 = vld [vmem:[#allocation8 + $0x1088] sm:$0xf0]  ;;  %v18511_v60 = vld [vmem:[#allocation8 + $0x17e4] sm:$0xf]  ;;  %v18261_v45 = vld [vmem:[#allocation8 + $0x1014] sm:$0xf] }
 0x425   :  { %8232 = vmatpush.bf16.msra.mxu3 %v13903_v42  ;;  %8273 = vmatpush.bf16.msrb.mxu2 %v14903_v54  ;;  %v14823_v42 = vor.u32 %v18271_v62, %v14820_v44  ;;  %v15423_v54 = vor.u32 %v18421_v47, %v15420_v28  ;;  %v13780_v56 = vld [vmem:[#allocation8 + $0x868] sm:$0xf0]  ;;  %v15783_v3 = vor.u32 %v18511_v60, %v15780_v10  ;;  %v18001_v44 = vld [vmem:[#allocation8 + $0x7f4] sm:$0xf]  ;;  %v13740_v47 = vld [vmem:[#allocation8 + $0x818] sm:$0xf0] }
 0x426   :  { %v18251_v28 = vld [vmem:[#allocation8 + $0xfc4] sm:$0xf]  ;;  %v20263_v10 = vperm.slane %v19554_v8, 3  ;;  %v13743_v8 = vor.u32 %v18001_v44, %v13740_v47  ;;  %v18664_v44 = vld [vmem:[#allocation11 + $0x3a8] sm:$0xf0] }
 0x427   :  { %8301 = vmatpush.bf16.msra.mxu0 %v15543_v34  ;;  %v18021_v34 = vld [vmem:[#allocation8 + $0x894] sm:$0xf] }
 0x428   :  { %8315 = vmatpush.bf16.msra.mxu1 %v15863_v50  ;;  %v13823_v21 = vor.u32 %v18021_v34, %v13820_v24  ;;  %v6940_v50 = vadd.f32 %v19464_v20, %v20261_v23  ;;  %v19779_v34 = vpop.f32.mrf.mxu0  ;;  %v14783_v20 = vor.u32 %v18261_v45, %v14780_v43 }
 0x429   :  { %8233 = vmatpush.bf16.msra.mxu3 %v13863_v53  ;;  %8274 = vmatpush.bf16.msrb.mxu2 %v14863_v14  ;;  %v7220_v53 = vadd.f32 %v19558_v6, %v20262_v52  ;;  %v18501_v14 = vld [vmem:[#allocation8 + $0x1794] sm:$0xf]  ;;  %v7360_v6 = vadd.f32 %v19612_v55, %v20263_v10  ;;  %v14740_v52 = vld [vmem:[#allocation8 + $0xfe8] sm:$0xf0]  ;;  %v19790_v43 = vpop.f32.mrf.mxu2  ;;  %v17991_v55 = vld [vmem:[#allocation8 + $0x7a4] sm:$0xf] }
 0x42a   :  { %v6954_v60 = vadd.f32 %v19472_v30, %v6940_v50  ;;  %v19792_v30 = vpop.f32.mrf.mxu3  ;;  %v18381_v10 = vld [vmem:[#allocation8 + $0x13d4] sm:$0xf] }
 0x42b   :  { %8302 = vmatpush.bf16.msra.mxu0 %v15503_v5  ;;  %v18011_v5 = vld [vmem:[#allocation8 + $0x844] sm:$0xf]  ;;  %v7234_v62 = vadd.f32 %v19576_v49, %v7220_v53  ;;  %v7374_v45 = vadd.f32 %v19615_v63, %v7360_v6  ;;  %v18241_v53 = vld [vmem:[#allocation8 + $0xf74] sm:$0xf]  ;;  %v15260_v6 = vld [vmem:[#allocation8 + $0x13f8] sm:$0xf0] }
 0x42c   :  { %8316 = vmatpush.bf16.msra.mxu1 %v15823_v32  ;;  %v13783_v24 = vor.u32 %v18011_v5, %v13780_v56  ;;  %v15383_v32 = vor.u32 %v18411_v40, %v15380_v7  ;;  %v15340_v5 = vld [vmem:[#allocation8 + $0x1498] sm:$0xf0]  ;;  %v19786_v56 = vpop.f32.mrf.mxu1  ;;  %v18491_v49 = vld [vmem:[#allocation8 + $0x1744] sm:$0xf]  ;;  %v13700_v7 = vld [vmem:[#allocation8 + $0x7c8] sm:$0xf0] }
 0x42d   :  { %8234 = vmatpush.bf16.msra.mxu3 %v13823_v21  ;;  %8275 = vmatpush.bf16.msrb.mxu2 %v14823_v42  ;;  %v18401_v21 = vld [vmem:[#allocation8 + $0x1474] sm:$0xf]  ;;  %v15700_v42 = vld [vmem:[#allocation8 + $0x1768] sm:$0xf0]  ;;  %v7248_v50 = vadd.f32 %v19562_v22, %v7234_v62  ;;  %v13703_v62 = vor.u32 %v17991_v55, %v13700_v7  ;;  %v16346_v7 = vld [vmem:[#allocation11 + $0x370] sm:$0xf] }
 0x42e   :  { %v15343_v40 = vor.u32 %v18401_v21, %v15340_v5  ;;  %v15703_v63 = vor.u32 %v18491_v49, %v15700_v42  ;;  %v15263_v49 = vor.u32 %v18381_v10, %v15260_v6  ;;  %v14660_v42 = vld [vmem:[#allocation8 + $0xf48] sm:$0xf0]  ;;  %v18584_v55 = vld [vmem:[#allocation11 + $0x128] sm:$0xf0] }
 0x42f   :  { %8303 = vmatpush.bf16.msra.mxu0 %v15463_v15  ;;  %v15740_v15 = vld [vmem:[#allocation8 + $0x17b8] sm:$0xf0]  ;;  %v18704_v10 = vld [vmem:[#allocation11 + $0x4e8] sm:$0xf0] }
 0x430   :  { %8317 = vmatpush.bf16.msra.mxu1 %v15783_v3  ;;  %v15743_v23 = vor.u32 %v18501_v14, %v15740_v15  ;;  %v14743_v3 = vor.u32 %v18251_v28, %v14740_v52  ;;  %v14700_v14 = vld [vmem:[#allocation8 + $0xf98] sm:$0xf0]  ;;  %v18391_v15 = vld [vmem:[#allocation8 + $0x1424] sm:$0xf]  ;;  %v7262_v28 = vadd.f32 %v19564_v37, %v7248_v50  ;;  %v19800_v5 = vpop.f32.mrf.mxu0 }
 0x431   :  { %8235 = vmatpush.bf16.msra.mxu3 %v13783_v24  ;;  %8276 = vmatpush.bf16.msrb.mxu2 %v14783_v20  ;;  %v16366_v24 = vld [vmem:[#allocation11 + $0x398] sm:$0xf]  ;;  %v18481_v20 = vld [vmem:[#allocation8 + $0x16f4] sm:$0xf] }
 0x432   :  { %v18231_v52 = vld [vmem:[#allocation8 + $0xf24] sm:$0xf] }
 0x433   :  { %8304 = vmatpush.bf16.msra.mxu0 %v15423_v54  ;;  %v6968_v54 = vadd.f32 %v19479_v36, %v6954_v60  ;;  %v7388_v36 = vadd.f32 %v19618_v58, %v7374_v45  ;;  %v15300_v60 = vld [vmem:[#allocation8 + $0x1448] sm:$0xf0]  ;;  %v14703_v58 = vor.u32 %v18241_v53, %v14700_v14  ;;  %v18471_v53 = vld [vmem:[#allocation8 + $0x16a4] sm:$0xf] }
 0x434   :  { %8318 = vmatpush.bf16.msra.mxu1 %v15743_v23  ;;  %v15303_v23 = vor.u32 %v18391_v15, %v15300_v60  ;;  %v15620_v14 = vld [vmem:[#allocation8 + $0x16c8] sm:$0xf0]  ;;  %v14663_v15 = vor.u32 %v18231_v52, %v14660_v42  ;;  %v16526_v60 = vld [vmem:[#allocation11 + $0x4d8] sm:$0xf]  ;;  %v20267_v42 = vld [vmem:[#allocation23_spill] sm:$0xff] }
 0x435   :  { %v6982_v47 = vadd.f32 %v19483_v38, %v6968_v54  ;;  %v7402_v22 = vadd.f32 %v19625_v27, %v7388_v36  ;;  %8236 = vmatpush.bf16.msra.mxu3 %v13743_v8  ;;  %8277 = vmatpush.bf16.msrb.mxu2 %v14743_v3  ;;  %v16367_v38 = vor.u32 %v18664_v44, %v16366_v24  ;;  %v18371_v27 = vld [vmem:[#allocation8 + $0x1384] sm:$0xf]  ;;  %v15220_v54 = vld [vmem:[#allocation8 + $0x13a8] sm:$0xf0]  ;;  %v19804_v3 = vpop.f32.mrf.mxu2 }
 0x436   :  { %v16046_v8 = vld [vmem:[#allocation11 + $0x118] sm:$0xf]  ;;  %v7276_v36 = vadd.f32 %v19583_v11, %v7262_v28  ;;  %v15623_v11 = vor.u32 %v18471_v53, %v15620_v14  ;;  %v20265_v28 = vld [vmem:[#allocation22_spill] sm:$0xff]  ;;  %v16527_v52 = vor.u32 %v18704_v10, %v16526_v60  ;;  %v20270_v53 = vld [vmem:[#allocation41_spill] sm:$0xff] }
 0x437   :  { %8305 = vmatpush.bf16.msra.mxu0 %v15383_v32  ;;  %v15660_v32 = vld [vmem:[#allocation8 + $0x1718] sm:$0xf0]  ;;  %v6996_v21 = vadd.f32 %v19502_v4, %v6982_v47  ;;  %v7416_v50 = vadd.f32 %v19627_v9, %v7402_v22  ;;  %v18659_v4 = vld [vmem:[#allocation11 + $0x380] sm:$0xf0]  ;;  %v15223_v9 = vor.u32 %v18371_v27, %v15220_v54  ;;  %v16047_v6 = vor.u32 %v18584_v55, %v16046_v8  ;;  %v18361_v47 = vld [vmem:[#allocation8 + $0x1334] sm:$0xf] }
 0x438   :  { %8319 = vmatpush.bf16.msra.mxu1 %v15703_v63  ;;  %v15663_v45 = vor.u32 %v18481_v20, %v15660_v32  ;;  %v19809_v63 = vpop.f32.mrf.mxu1  ;;  %v7290_v24 = vadd.f32 %v19596_v57, %v7276_v36  ;;  %v16347_v44 = vor.u32 %v18659_v4, %v16346_v7  ;;  %v15180_v22 = vld [vmem:[#allocation8 + $0x1358] sm:$0xf0]  ;;  %v20264_v32 = vperm.slane %v19450_v0, 1  ;;  %v18579_v57 = vld [vmem:[#allocation11 + $0x100] sm:$0xf0]  ;;  %v20268_v54 = vld [vmem:[#allocation20_spill] sm:$0xff] }
 0x439   :  { %v7010_v37 = vadd.f32 %v19515_v13, %v6996_v21  ;;  %8237 = vmatpush.bf16.msra.mxu3 %v13703_v62  ;;  %8278 = vmatpush.bf16.msrb.mxu2 %v14703_v58  ;;  %v16026_v62 = vld [vmem:[#allocation11 + $0xf0] sm:$0xf]  ;;  %v16326_v21 = vld [vmem:[#allocation11 + $0x348] sm:$0xf]  ;;  %v15183_v0 = vor.u32 %v18361_v47, %v15180_v22  ;;  %v16306_v60 = vld [vmem:[#allocation11 + $0x320] sm:$0xf] }
 0x43a   :  { %v20266_v58 = vld [vmem:[#allocation39_spill] sm:$0xff]  ;;  %v20269_v8 = vld [vmem:[#allocation34_spill] sm:$0xff]  ;;  %v18694_v47 = vld [vmem:[#allocation11 + $0x498] sm:$0xf0] }
 0x43b   :  { %8306 = vmatpush.bf16.msra.mxu0 %v15343_v40  ;;  %v19806_v40 = vpop.f32.mrf.mxu3  ;;  %v7024_v13 = vadd.f32 %v19490_v18, %v7010_v37  ;;  %v7080_v18 = vadd.f32 %v20265_v28, %v20264_v32  ;;  %v7304_v55 = vadd.f32 %v20269_v8, %v7290_v24  ;;  %v18351_v37 = vld [vmem:[#allocation8 + $0x12e4] sm:$0xf]  ;;  %v16006_v4 = vld [vmem:[#allocation11 + $0xc8] sm:$0xf]  ;;  %v18649_v10 = vld [vmem:[#allocation11 + $0x330] sm:$0xf0] }
 0x43c   :  { %8320 = vmatpush.bf16.msra.mxu1 %v15663_v45  ;;  %8238 = vmatmul.bf16.vlgmr.msra.gmra.mxu3 %v19413_v2  ;;  %v16506_v2 = vld [vmem:[#allocation11 + $0x4b0] sm:$0xf]  ;;  %v20273_v22 = vld [vmem:[#allocation44_spill] sm:$0xff]  ;;  %v20275_v32 = vld [vmem:[#allocation45_spill] sm:$0xff] }
 0x43d   :  { %8286 = vmatpush.bf16.msrb.mxu3 %v15263_v49  ;;  %v7038_v20 = vadd.f32 %v19492_v46, %v7024_v13  ;;  %v18654_v49 = vld [vmem:[#allocation11 + $0x358] sm:$0xf0]  ;;  %8279 = vmatpush.bf16.msrb.mxu2 %v14663_v15  ;;  %v7094_v27 = vadd.f32 %v20267_v42, %v7080_v18  ;;  %v19822_v46 = vpop.f32.mrf.mxu0  ;;  %v15100_v42 = vld [vmem:[#allocation8 + $0x12b8] sm:$0xf0] }
 0x43e   :  { %v16327_v7 = vor.u32 %v18654_v49, %v16326_v21  ;;  %v18574_v15 = vld [vmem:[#allocation11 + $0xd8] sm:$0xf0]  ;;  %v18569_v8 = vld [vmem:[#allocation11 + $0xb0] sm:$0xf0] }
 0x43f   :  { %8307 = vmatpush.bf16.msra.mxu0 %v15303_v23  ;;  %v7430_v23 = vadd.f32 %v20266_v58, %v7416_v50  ;;  %v7052_v45 = vadd.f32 %v20268_v54, %v7038_v20  ;;  %v15140_v50 = vld [vmem:[#allocation8 + $0x1308] sm:$0xf0]  ;;  %v20274_v20 = vperm.slane %v19647_v35, 4  ;;  %v19837_v28 = vld [vmem:[#allocation10] sm:$0xff]  ;;  %v19840_v58 = vpop.f32.mrf.mxu2  ;;  %v16007_v49 = vor.u32 %v18574_v15, %v16006_v4 }
 0x440   :  { %8321 = vmatpush.bf16.msra.mxu1 %v15623_v11  ;;  %8280 = vmatmul.bf16.vlgmr.msrb.gmra.mxu2 %v19433_v26  ;;  %v20271_v13 = vld [vmem:[#allocation25_spill] sm:$0xff]  ;;  %v16486_v11 = vld [vmem:[#allocation11 + $0x488] sm:$0xf]  ;;  %v2914_v18 = vperm.slane %v19837_v28, 6 }
 0x441   :  { %8287 = vmatpush.bf16.msrb.mxu3 %v15223_v9  ;;  %10970 = vmatpush.bf16.msra.mxu2 %v16047_v6  ;;  %v7444_v14 = vadd.f32 %v20270_v53, %v7430_v23  ;;  %v7108_v9 = vadd.f32 %v20271_v13, %v7094_v27  ;;  %v20272_v6 = vld [vmem:[#allocation24_spill] sm:$0xff]  ;;  %v7500_v26 = vadd.f32 %v20275_v32, %v20274_v20  ;;  %v15986_v27 = vld [vmem:[#allocation11 + $0xa0] sm:$0xf] }
 0x442   :  { %8308 = vmatmul.bf16.vlgmr.msra.gmra.mxu0 %v19444_v29  ;;  %v16027_v29 = vor.u32 %v18579_v57, %v16026_v62  ;;  %v19829_v24 = vadd.f32 %v20272_v6, %v7052_v45  ;;  %v20276_v57 = vld [vmem:[#allocation35_spill] sm:$0xff]  ;;  %v16487_v45 = vor.u32 %v18694_v47, %v16486_v11  ;;  %v16286_v53 = vld [vmem:[#allocation11 + $0x2f8] sm:$0xf]  ;;  %v15060_v11 = vld [vmem:[#allocation8 + $0x1268] sm:$0xf0]  ;;  %v7778_v20 = vadd.f32 %v19747_v19, %v2914_v18 }
 0x443   :  { %10998 = vmatpush.bf16.msrb.mxu0 %v16367_v38  ;;  %v18699_v38 = vld [vmem:[#allocation11 + $0x4c0] sm:$0xf0]  ;;  %v7458_v62 = vadd.f32 %v20273_v22, %v7444_v14  ;;  %v19842_v23 = vpop.f32.mrf.mxu3  ;;  %8322 = vmatmul.bf16.vlgmr.msra.gmra.mxu1 %v19458_v61  ;;  %v7318_v21 = vadd.f32 %v20276_v57, %v7304_v55  ;;  %v7514_v54 = vadd.f32 %v19669_v39, %v7500_v26  ;;  %v18644_v14 = vld [vmem:[#allocation11 + $0x308] sm:$0xf0]  ;;  %v16466_v55 = vld [vmem:[#allocation11 + $0x460] sm:$0xf] }
 0x444   :  { %11012 = vmatpush.bf16.msrb.mxu1 %v16527_v52  ;;  %v16507_v36 = vor.u32 %v18699_v38, %v16506_v2  ;;  %v15143_v52 = vor.u32 %v18351_v37, %v15140_v50  ;;  %v16307_v2 = vor.u32 %v18649_v10, %v16306_v60  ;;  %v18341_v38 = vld [vmem:[#allocation8 + $0x1294] sm:$0xf]  ;;  %vm8338_vm4 = vcmp.gt.f32.partialorder %v19829_v24, 0.0  ;;  %v18331_v6 = vld [vmem:[#allocation8 + $0x1244] sm:$0xf] }
 0x445   :  { %8288 = vmatpush.bf16.msrb.mxu3 %v15183_v0  ;;  %10971 = vmatpush.bf16.msra.mxu2 %v16027_v29  ;;  %v20277_v0 = vld [vmem:[#allocation21_spill] sm:$0xff]  ;;  %v20278_v61 = vld [vmem:[#allocation26_spill] sm:$0xff]  ;;  %v18689_v29 = vld [vmem:[#allocation11 + $0x470] sm:$0xf0]  ;;  %v15103_v39 = vor.u32 %v18341_v38, %v15100_v42  ;;  %v15987_v60 = vor.u32 %v18569_v8, %v15986_v27  ;;  %v16287_v10 = vor.u32 %v18644_v14, %v16286_v53  ;;  %v19859_v32 = vpop.f32.mrf.mxu0 }
 0x446   :  { %v19848_v13 = vmul.f32 0.01, %v20277_v0  ;;  %v7122_v37 = vadd.f32 %v20278_v61, %v7108_v9  ;;  %v20279_v50 = vld [vmem:[#allocation42_spill] sm:$0xff]  ;;  %v15966_v9 = vld [vmem:[#allocation11 + $0x78] sm:$0xf]  ;;  %v16467_v26 = vor.u32 %v18689_v29, %v16466_v55  ;;  %v20282_v38 = vld [vmem:[#allocation27_spill] sm:$0xff]  ;;  %v15063_v29 = vor.u32 %v18331_v6, %v15060_v11 }
 0x447   :  { %10999 = vmatpush.bf16.msrb.mxu0 %v16347_v44  ;;  %v19831_v44 = vpop.f32.mrf.mxu1  ;;  %v7472_v4 = vadd.f32 %v20279_v50, %v7458_v62  ;;  %v20281_v47 = vld [vmem:[#allocation46_spill] sm:$0xff]  ;;  %v16446_v8 = vld [vmem:[#allocation11 + $0x438] sm:$0xf]  ;;  %v20285_v53 = vld [vmem:[#allocation43_spill] sm:$0xff]  ;;  %v19873_v55 = vpop.f32.mrf.mxu2  ;;  %vm8328_vm7 = vcmp.gt.f32.partialorder %v20277_v0, 0.0 }
 0x448   :  { %11013 = vmatpush.bf16.msrb.mxu1 %v16507_v36  ;;  %v20280_v36 = vld [vmem:[#allocation36_spill] sm:$0xff]  ;;  %v7528_v22 = vadd.f32 %v20281_v47, %v7514_v54  ;;  %v18564_v62 = vld [vmem:[#allocation11 + $0x88] sm:$0xf0]  ;;  %v18639_v57 = vld [vmem:[#allocation11 + $0x2e0] sm:$0xf0]  ;;  %v7780_v54 = vadd.f32 %v19758_v17, %v2914_v18 }
 0x449   :  { %8289 = vmatpush.bf16.msrb.mxu3 %v15143_v52  ;;  %v7332_v15 = vadd.f32 %v20280_v36, %v7318_v21  ;;  %10972 = vmatpush.bf16.msra.mxu2 %v16007_v49  ;;  %v16266_v52 = vld [vmem:[#allocation11 + $0x2d0] sm:$0xf]  ;;  %v7136_v21 = vadd.f32 %v20282_v38, %v7122_v37  ;;  %v20283_v49 = vld [vmem:[#allocation37_spill] sm:$0xff]  ;;  %v20284_v42 = vld [vmem:[#allocation38_spill] sm:$0xff]  ;;  %v19869_v14 = vadd.f32 %v20285_v53, %v7472_v4 }
 0x44a   :  { %vm8330_vm5 = vcmp.gt.f32.partialorder %v20283_v49, 0.0  ;;  %v18684_v19 = vld [vmem:[#allocation11 + $0x448] sm:$0xf0]  ;;  %v7794_v50 = vadd.f32 %v19760_v51, %v7780_v54  ;;  %v15967_v17 = vor.u32 %v18564_v62, %v15966_v9  ;;  %v16267_v18 = vor.u32 %v18639_v57, %v16266_v52  ;;  %v15946_v47 = vld [vmem:[#allocation11 + $0x50] sm:$0xf] }
 0x44b   :  { %11000 = vmatpush.bf16.msrb.mxu0 %v16327_v7  ;;  %v19853_v7 = vmul.f32 0.01, %v19829_v24  ;;  %v7346_v27 = vadd.f32 %v20284_v42, %v7332_v15  ;;  %v19875_v37 = vpop.f32.mrf.mxu3  ;;  %v18321_v4 = vld [vmem:[#allocation8 + $0x11f4] sm:$0xf]  ;;  %v15020_v15 = vld [vmem:[#allocation8 + $0x1218] sm:$0xf0]  ;;  %v16447_v38 = vor.u32 %v18684_v19, %v16446_v8 }
 0x44c   :  { %11014 = vmatpush.bf16.msrb.mxu1 %v16487_v45  ;;  %v7792_v45 = vadd.f32 %v19749_v1, %v7778_v20  ;;  %v20286_v1 = vld [vmem:[#allocation47_spill] sm:$0xff]  ;;  %v18559_v42 = vld [vmem:[#allocation11 + $0x60] sm:$0xf0]  ;;  %v16246_v53 = vld [vmem:[#allocation11 + $0x2a8] sm:$0xf]  ;;  %v15023_v9 = vor.u32 %v18321_v4, %v15020_v15  ;;  %vm8341_vm8 = vcmp.gt.f32.partialorder %v19869_v14, 0.0 }
 0x44d   :  { %8290 = vmatpush.bf16.msrb.mxu3 %v15103_v39  ;;  %10973 = vmatpush.bf16.msra.mxu2 %v15987_v60  ;;  %v7542_v20 = vadd.f32 %v20286_v1, %v7528_v22  ;;  %v18634_v61 = vld [vmem:[#allocation11 + $0x2b8] sm:$0xf0]  ;;  %v8360_v11 = vmul.f32 0.01, %v7346_v27  ;;  %v16426_v51 = vld [vmem:[#allocation11 + $0x410] sm:$0xf]  ;;  %v7808_v22 = vadd.f32 %v19764_v59, %v7794_v50 }
 0x44e   :  { %v20287_v39 = vld [vmem:[#allocation28_spill] sm:$0xff]  ;;  %v18679_v54 = vld [vmem:[#allocation11 + $0x420] sm:$0xf0]  ;;  %vm8340_vm6 = vcmp.gt.f32.partialorder %v7346_v27, 0.0  ;;  %v8361_v60 = vmul.f32 0.01, %v19869_v14  ;;  %v16247_v52 = vor.u32 %v18634_v61, %v16246_v53  ;;  %v19896_v61 = vsel %vm8338_vm4, %v19829_v24, %v19853_v7 }
 0x44f   :  { %11001 = vmatpush.bf16.msrb.mxu0 %v16307_v2  ;;  %v19864_v2 = vmul.f32 0.01, %v20283_v49  ;;  %v19878_v36 = vpop.f32.mrf.mxu1  ;;  %v7150_v6 = vadd.f32 %v20287_v39, %v7136_v21  ;;  %v18311_v62 = vld [vmem:[#allocation8 + $0x11a4] sm:$0xf]  ;;  %v14980_v57 = vld [vmem:[#allocation8 + $0x11c8] sm:$0xf0]  ;;  %v7822_v24 = vadd.f32 %v19771_v25, %v7808_v22 }
 0x450   :  { %11015 = vmatpush.bf16.msrb.mxu1 %v16467_v26  ;;  %v15947_v26 = vor.u32 %v18559_v42, %v15946_v47  ;;  %v15926_v21 = vld [vmem:[#allocation11 + $0x28] sm:$0xf]  ;;  %v18554_v8 = vld [vmem:[#allocation11 + $0x38] sm:$0xf0]  ;;  %v20289_v39 = vperm.slane %v19837_v28, 7 }
 0x451   :  { %8291 = vmatpush.bf16.msrb.mxu3 %v15063_v29  ;;  %10974 = vmatpush.bf16.msra.mxu2 %v15967_v17  ;;  %v20288_v19 = vld [vmem:[#allocation50_spill] sm:$0xff]  ;;  %v16427_v29 = vor.u32 %v18679_v54, %v16426_v51  ;;  %v16226_v4 = vld [vmem:[#allocation11 + $0x280] sm:$0xf]  ;;  %v18629_v15 = vld [vmem:[#allocation11 + $0x290] sm:$0xf0]  ;;  %v14983_v51 = vor.u32 %v18311_v62, %v14980_v57 }
 0x452   :  { %v7556_v1 = vadd.f32 %v20288_v19, %v7542_v20  ;;  %v16206_v59 = vld [vmem:[#allocation11 + $0x258] sm:$0xf]  ;;  %v20290_v50 = vld [vmem:[#allocation30_spill] sm:$0xff]  ;;  %v18674_v19 = vld [vmem:[#allocation11 + $0x3f8] sm:$0xf0] }
 0x453   :  { %11002 = vmatpush.bf16.msrb.mxu0 %v16287_v10  ;;  %v7806_v10 = vadd.f32 %v19753_v33, %v7792_v45  ;;  %v7918_v33 = vadd.f32 %v19822_v46, %v20289_v39  ;;  %v19890_v45 = vpop.f32.mrf.mxu0  ;;  %v7164_v17 = vadd.f32 %v20290_v50, %v7150_v6  ;;  %v18624_v47 = vld [vmem:[#allocation11 + $0x268] sm:$0xf0]  ;;  %v17006_v20 = vld [vmem:[#allocation11 + $0x898] sm:$0xf]  ;;  %v16406_v54 = vld [vmem:[#allocation11 + $0x3e8] sm:$0xf]  ;;  %v16227_v6 = vor.u32 %v18629_v15, %v16226_v4 }
 0x454   :  { %11016 = vmatpush.bf16.msrb.mxu1 %v16447_v38  ;;  %v18824_v46 = vld [vmem:[#allocation11 + $0x8a8] sm:$0xf0]  ;;  %v7570_v42 = vadd.f32 %v19689_v41, %v7556_v1  ;;  %v8370_v41 = vsel %vm8330_vm5, %v20283_v49, %v19864_v2  ;;  %v18549_v25 = vld [vmem:[#allocation11 + $0x10] sm:$0xf0]  ;;  %v16186_v22 = vld [vmem:[#allocation11 + $0x230] sm:$0xf] }
 0x455   :  { %v7820_v38 = vadd.f32 %v19755_v12, %v7806_v10  ;;  %v7932_v53 = vadd.f32 %v19831_v44, %v7918_v33  ;;  %8292 = vmatpush.bf16.msrb.mxu3 %v15023_v9  ;;  %10975 = vmatpush.bf16.msra.mxu2 %v15947_v26  ;;  %v7947_v44 = vpop.f32.mrf.mxu2  ;;  %v7961_v10 = vpop.f32.mrf.mxu3  ;;  %v16207_v9 = vor.u32 %v18624_v47, %v16206_v59  ;;  %v18619_v57 = vld [vmem:[#allocation11 + $0x240] sm:$0xf0]  ;;  %v16686_v49 = vld [vmem:[#allocation11 + $0x618] sm:$0xf]  ;;  %v18744_v2 = vld [vmem:[#allocation11 + $0x628] sm:$0xf0] }
 0x456   :  { %v17007_v62 = vor.u32 %v18824_v46, %v17006_v20  ;;  %v20291_v26 = vld [vmem:[#allocation33_spill] sm:$0xff]  ;;  %v8381_v33 = vsel %vm8341_vm8, %v19869_v14, %v8361_v60  ;;  %v18669_v28 = vld [vmem:[#allocation11 + $0x3d0] sm:$0xf0]  ;;  %v7836_v47 = vadd.f32 %v19790_v43, %v7822_v24  ;;  %v17166_v14 = vld [vmem:[#allocation11 + $0x9d8] sm:$0xf] }
 0x457   :  { %11003 = vmatpush.bf16.msrb.mxu0 %v16267_v18  ;;  %v8380_v18 = vsel %vm8340_vm6, %v7346_v27, %v8360_v11  ;;  %v19905_v7 = vpop.f32.mrf.mxu1  ;;  %v15927_v27 = vor.u32 %v18554_v8, %v15926_v21  ;;  %v15906_v11 = vld [vmem:[#allocation11] sm:$0xf]  ;;  %v7946_v12 = vadd.f32 %v19873_v55, %v7932_v53  ;;  %v20292_v8 = vmov %v20289_v39  ;;  %v16986_v55 = vld [vmem:[#allocation11 + $0x870] sm:$0xf]  ;;  %v18819_v50 = vld [vmem:[#allocation11 + $0x880] sm:$0xf0] }
 0x458   :  { %11017 = vmatpush.bf16.msrb.mxu1 %v16427_v29  ;;  %v19913_v21 = vpack.c.bf16 %v8380_v18, %v8370_v41  ;;  %v7920_v1 = vadd.f32 %v19859_v32, %v20292_v8  ;;  %v16407_v39 = vor.u32 %v18674_v19, %v16406_v54  ;;  %v20293_v29 = vld [vmem:[#allocation48_spill] sm:$0xff]  ;;  %v7834_v15 = vadd.f32 %v19767_v16, %v7820_v38  ;;  %v18864_v60 = vld [vmem:[#allocation11 + $0x9e8] sm:$0xf0]  ;;  %v16666_v54 = vld [vmem:[#allocation11 + $0x5f0] sm:$0xf] }
 0x459   :  { %v7584_v4 = vadd.f32 %v20293_v29, %v7570_v42  ;;  %v7960_v59 = vadd.f32 %v19875_v37, %v7946_v12  ;;  %8293 = vmatpush.bf16.msrb.mxu3 %v14983_v51  ;;  %v20294_v18 = vld [vmem:[#allocation40_spill] sm:$0xff]  ;;  %10976 = vmatpush.bf16.msra.mxu2 %v15927_v27  ;;  %v15907_v46 = vor.u32 %v18549_v25, %v15906_v11  ;;  %v18739_v11 = vld [vmem:[#allocation11 + $0x600] sm:$0xf0] }
 0x45a   :  { %v8351_v32 = vmul.f32 0.01, %v20294_v18  ;;  %v7934_v20 = vadd.f32 %v19878_v36, %v7920_v1  ;;  %vm8331_vm9 = vcmp.gt.f32.partialorder %v20294_v18, 0.0  ;;  %v7848_v16 = vadd.f32 %v19769_v48, %v7834_v15  ;;  %v16166_v36 = vld [vmem:[#allocation11 + $0x208] sm:$0xf]  ;;  %v20296_v25 = vld [vmem:[#allocation49_spill] sm:$0xff] }
 0x45b   :  { %11004 = vmatpush.bf16.msrb.mxu0 %v16247_v52  ;;  %v7178_v52 = vadd.f32 %v20291_v26, %v7164_v17  ;;  %v16386_v17 = vld [vmem:[#allocation11 + $0x3c0] sm:$0xf]  ;;  %v16187_v37 = vor.u32 %v18619_v57, %v16186_v22  ;;  %v16687_v42 = vor.u32 %v18744_v2, %v16686_v49  ;;  %v16987_v43 = vor.u32 %v18819_v50, %v16986_v55  ;;  %v18614_v51 = vld [vmem:[#allocation11 + $0x218] sm:$0xf0]  ;;  %v7975_v24 = vpop.f32.mrf.mxu0  ;;  %v18609_v49 = vld [vmem:[#allocation11 + $0x1f0] sm:$0xf0] }
 0x45c   :  { %v7948_v38 = vadd.f32 %v7947_v44, %v7934_v20  ;;  %11018 = vmatpush.bf16.msrb.mxu1 %v16407_v39  ;;  %8294 = vmatmul.bf16.vlgmr.msrb.gmra.mxu3 %v19436_v31  ;;  %v16387_v53 = vor.u32 %v18669_v28, %v16386_v17  ;;  %v8368_v19 = vsel %vm8328_vm7, %v20277_v0, %v19848_v13  ;;  %v16966_v31 = vld [vmem:[#allocation11 + $0x848] sm:$0xf]  ;;  %v18814_v41 = vld [vmem:[#allocation11 + $0x858] sm:$0xf0]  ;;  %v20295_v44 = vld [vmem:[#allocation31_spill] sm:$0xff] }
 0x45d   :  { %10984 = vmatpush.bf16.msra.mxu3 %v16207_v9  ;;  %v7850_v48 = vadd.f32 %v19792_v30, %v7836_v47  ;;  %v7974_v27 = vadd.f32 %v19890_v45, %v7960_v59  ;;  %v19938_v12 = vpack.c.bf16 %v19896_v61, %v8368_v19  ;;  %v7192_v9 = vadd.f32 %v20295_v44, %v7178_v52  ;;  %v17146_v30 = vld [vmem:[#allocation11 + $0x9b0] sm:$0xf]  ;;  %v8001_v57 = vpop.f32.mrf.mxu2  ;;  %v8015_v26 = vpop.f32.mrf.mxu3  ;;  %v16646_v2 = vld [vmem:[#allocation11 + $0x5c8] sm:$0xf]  ;;  %v16946_v15 = vld [vmem:[#allocation11 + $0x820] sm:$0xf] }
 0x45e   :  { %v8371_v0 = vsel %vm8331_vm9, %v20294_v18, %v8351_v32  ;;  %v7962_v13 = vadd.f32 %v7961_v10, %v7948_v38  ;;  %10977 = vmatpush.bf16.msra.mxu2 %v15907_v46  ;;  %v7598_v22 = vadd.f32 %v20296_v25, %v7584_v4  ;;  %v16167_v61 = vor.u32 %v18614_v51, %v16166_v36  ;;  %v16146_v10 = vld [vmem:[#allocation11 + $0x1e0] sm:$0xf]  ;;  %v18734_v4 = vld [vmem:[#allocation11 + $0x5d8] sm:$0xf0]  ;;  %v18809_v59 = vld [vmem:[#allocation11 + $0x830] sm:$0xf0] }
 0x45f   :  { %11005 = vmatpush.bf16.msrb.mxu0 %v16227_v6  ;;  %v17167_v6 = vor.u32 %v18864_v60, %v17166_v14  ;;  %v19944_v45 = vpack.c.bf16 %v8381_v33, %v8371_v0  ;;  %v7862_v8 = vadd.f32 %v19779_v34, %v7848_v16  ;;  %v7989_v52 = vpop.f32.mrf.mxu1  ;;  %v16667_v1 = vor.u32 %v18739_v11, %v16666_v54  ;;  %v17126_v50 = vld [vmem:[#allocation11 + $0x988] sm:$0xf]  ;;  %v18854_v17 = vld [vmem:[#allocation11 + $0x998] sm:$0xf0]  ;;  %v16126_v20 = vld [vmem:[#allocation11 + $0x1b8] sm:$0xf] }
 0x460   :  { %11019 = vmatpush.bf16.msrb.mxu1 %v16387_v53  ;;  %v16967_v39 = vor.u32 %v18814_v41, %v16966_v31  ;;  %v7864_v55 = vadd.f32 %v19800_v5, %v7850_v48  ;;  %v7988_v33 = vadd.f32 %v19905_v7, %v7974_v27  ;;  %v7976_v34 = vadd.f32 %v7975_v24, %v7962_v13  ;;  %v20297_v28 = vld [vmem:[#allocation32_spill] sm:$0xff]  ;;  %v18604_v46 = vld [vmem:[#allocation11 + $0x1c8] sm:$0xf0]  ;;  %v16626_v14 = vld [vmem:[#allocation11 + $0x5a0] sm:$0xf] }
 0x461   :  { %10985 = vmatpush.bf16.msra.mxu3 %v16187_v37  ;;  %10978 = vmatmul.bf16.vlgmr.msra.gmra.mxu2 %v19938_v12  ;;  %v19952_v18 = vadd.f32 %v20297_v28, %v7192_v9  ;;  %v16147_v32 = vor.u32 %v18609_v49, %v16146_v10  ;;  %v7876_v5 = vadd.f32 %v19786_v56, %v7862_v8  ;;  %v20298_v60 = vld [vmem:[#allocation51_spill] sm:$0xff]  ;;  %v16926_v36 = vld [vmem:[#allocation11 + $0x7f8] sm:$0xf]  ;;  %v20299_v54 = vld [vmem:[#allocation29_spill] sm:$0xff] }
 0x462   :  { %11006 = vmatmul.bf16.vlgmr.msrb.gmra.mxu0 %v19913_v21  ;;  %11026 = vmatpush.bf16.msrb.mxu2 %v16687_v42  ;;  %v16647_v7 = vor.u32 %v18734_v4, %v16646_v2  ;;  %v16947_v47 = vor.u32 %v18809_v59, %v16946_v15  ;;  %v7612_v16 = vadd.f32 %v20298_v60, %v7598_v22  ;;  %v18729_v53 = vld [vmem:[#allocation11 + $0x5b0] sm:$0xf0]  ;;  %v18804_v51 = vld [vmem:[#allocation11 + $0x808] sm:$0xf0]  ;;  %v19959_v56 = vmul.f32 0.01, %v20299_v54 }
 0x463   :  { %11054 = vmatpush.bf16.msra.mxu0 %v17007_v62  ;;  %v18859_v62 = vld [vmem:[#allocation11 + $0x9c0] sm:$0xf0]  ;;  %11020 = vmatmul.bf16.vlgmr.msrb.gmra.mxu1 %v19944_v45  ;;  %v7878_v37 = vadd.f32 %v19809_v63, %v7864_v55  ;;  %v8029_v42 = vpop.f32.mrf.mxu0  ;;  %v8002_v38 = vadd.f32 %v8001_v57, %v7988_v33  ;;  %v7990_v19 = vadd.f32 %v7989_v52, %v7976_v34  ;;  %v17106_v48 = vld [vmem:[#allocation11 + $0x960] sm:$0xf]  ;;  %v18849_v24 = vld [vmem:[#allocation11 + $0x970] sm:$0xf0] }
 0x464   :  { %11068 = vmatpush.bf16.msra.mxu1 %v17167_v6  ;;  %v17147_v29 = vor.u32 %v18859_v62, %v17146_v30  ;;  %v19962_v27 = vmul.f32 0.01, %v19952_v18  ;;  %v20300_v6 = vld [vmem:[#allocation53_spill] sm:$0xff]  ;;  %v16127_v31 = vor.u32 %v18604_v46, %v16126_v20  ;;  %v7890_v41 = vadd.f32 %v19804_v3, %v7876_v5  ;;  %v16106_v13 = vld [vmem:[#allocation11 + $0x190] sm:$0xf]  ;;  %v20302_v3 = vld [vmem:[#allocation54_spill] sm:$0xff] }
 0x465   :  { %10986 = vmatpush.bf16.msra.mxu3 %v16167_v61  ;;  %v19965_v11 = vadd.f32 %v20300_v6, %v7612_v16  ;;  %v8016_v63 = vadd.f32 %v8015_v26, %v8002_v38  ;;  %v16627_v9 = vor.u32 %v18729_v53, %v16626_v14  ;;  %v16927_v0 = vor.u32 %v18804_v51, %v16926_v36  ;;  %v18599_v30 = vld [vmem:[#allocation11 + $0x1a0] sm:$0xf0]  ;;  %v16606_v62 = vld [vmem:[#allocation11 + $0x578] sm:$0xf]  ;;  %v8003_v22 = vpop.f32.mrf.mxu2  ;;  %v8017_v57 = vpop.f32.mrf.mxu3  ;;  %v18724_v8 = vld [vmem:[#allocation11 + $0x588] sm:$0xf0] }
 0x466   :  { %11027 = vmatpush.bf16.msrb.mxu2 %v16667_v1  ;;  %v7892_v25 = vadd.f32 %v19840_v58, %v7878_v37  ;;  %v17107_v61 = vor.u32 %v18849_v24, %v17106_v48  ;;  %v16906_v26 = vld [vmem:[#allocation11 + $0x7d0] sm:$0xf]  ;;  %v18799_v52 = vld [vmem:[#allocation11 + $0x7e0] sm:$0xf0]  ;;  %v20301_v1 = vperm.slane %v19647_v35, 5  ;;  %v20303_v10 = vld [vmem:[#allocation52_spill] sm:$0xff]  ;;  %v19976_v2 = vadd.f32 %v19806_v40, %v7890_v41 }
 0x467   :  { %11055 = vmatpush.bf16.msra.mxu0 %v16987_v43  ;;  %v17127_v43 = vor.u32 %v18854_v17, %v17126_v50  ;;  %v8043_v44 = vpop.f32.mrf.mxu1  ;;  %v19973_v49 = vmul.f32 0.01, %v20303_v10  ;;  %v8004_v55 = vadd.f32 %v8003_v22, %v7990_v19  ;;  %v17086_v33 = vld [vmem:[#allocation11 + $0x938] sm:$0xf]  ;;  %v18844_v58 = vld [vmem:[#allocation11 + $0x948] sm:$0xf0]  ;;  %v8030_v15 = vadd.f32 %v8029_v42, %v8016_v63 }
 0x468   :  { %11069 = vmatpush.bf16.msra.mxu1 %v17147_v29  ;;  %v19979_v29 = vmul.f32 0.01, %v19965_v11  ;;  %v19982_v4 = vadd.f32 %v19842_v23, %v7892_v25  ;;  %v16107_v35 = vor.u32 %v18599_v30, %v16106_v13  ;;  %vm8329_vm10 = vcmp.gt.f32.partialorder %v20299_v54, 0.0  ;;  %v16086_v50 = vld [vmem:[#allocation11 + $0x168] sm:$0xf]  ;;  %v20304_v23 = vld [vmem:[#allocation55_spill] sm:$0xff] }
 0x469   :  { %10987 = vmatpush.bf16.msra.mxu3 %v16147_v32  ;;  %v8018_v59 = vadd.f32 %v8017_v57, %v8004_v55  ;;  %v16607_v34 = vor.u32 %v18724_v8, %v16606_v62  ;;  %v16907_v40 = vor.u32 %v18799_v52, %v16906_v26  ;;  %v18594_v17 = vld [vmem:[#allocation11 + $0x178] sm:$0xf0]  ;;  %v16586_v28 = vld [vmem:[#allocation11 + $0x550] sm:$0xf]  ;;  %v17087_v32 = vor.u32 %v18844_v58, %v17086_v33  ;;  %v18719_v5 = vld [vmem:[#allocation11 + $0x560] sm:$0xf0] }
 0x46a   :  { %11028 = vmatpush.bf16.msrb.mxu2 %v16647_v7  ;;  %v16886_v7 = vld [vmem:[#allocation11 + $0x7a8] sm:$0xf]  ;;  %vm8339_vm11 = vcmp.gt.f32.partialorder %v19952_v18, 0.0  ;;  %vm8334_vm12 = vcmp.gt.f32.partialorder %v19976_v2, 0.0  ;;  %v17066_v46 = vld [vmem:[#allocation11 + $0x910] sm:$0xf]  ;;  %v19991_v37 = vadd.f32 %v8043_v44, %v8030_v15  ;;  %v16087_v42 = vor.u32 %v18594_v17, %v16086_v50 }
 0x46b   :  { %11056 = vmatpush.bf16.msra.mxu0 %v16967_v39  ;;  %v7640_v39 = vadd.f32 %v20302_v3, %v20301_v1  ;;  %v18839_v14 = vld [vmem:[#allocation11 + $0x920] sm:$0xf0]  ;;  %vm8342_vm13 = vcmp.gt.f32.partialorder %v19965_v11, 0.0  ;;  %vm8344_vm14 = vcmp.gt.f32.partialorder %v19982_v4, 0.0  ;;  %v8364_v60 = vmul.f32 0.01, %v19982_v4  ;;  %v8031_v16 = vpop.f32.mrf.mxu0 }
 0x46c   :  { %11070 = vmatpush.bf16.msra.mxu1 %v17127_v43  ;;  %v16066_v38 = vld [vmem:[#allocation11 + $0x140] sm:$0xf]  ;;  %v8032_v43 = vadd.f32 %v8031_v16, %v8018_v59  ;;  %v16587_v53 = vor.u32 %v18719_v5, %v16586_v28  ;;  %v18589_v51 = vld [vmem:[#allocation11 + $0x150] sm:$0xf0]  ;;  %v16566_v19 = vld [vmem:[#allocation11 + $0x528] sm:$0xf]  ;;  %v17067_v63 = vor.u32 %v18839_v14, %v17066_v46  ;;  %v8369_v28 = vsel %vm8329_vm10, %v20299_v54, %v19959_v56 }
 0x46d   :  { %10988 = vmatpush.bf16.msra.mxu3 %v16127_v31  ;;  %v7654_v20 = vadd.f32 %v20304_v23, %v7640_v39  ;;  %v18714_v48 = vld [vmem:[#allocation11 + $0x538] sm:$0xf0]  ;;  %vm8332_vm15 = vcmp.gt.f32.partialorder %v20303_v10, 0.0  ;;  %v16866_v31 = vld [vmem:[#allocation11 + $0x780] sm:$0xf]  ;;  %v16067_v57 = vor.u32 %v18589_v51, %v16066_v38  ;;  %vm8335_vm0 = vcmp.gt.f32.partialorder %v19991_v37, 0.0 }
 0x46e   :  { %11029 = vmatpush.bf16.msrb.mxu2 %v16627_v9  ;;  %v20305_v24 = vld [vmem:[#allocation56_spill] sm:$0xff]  ;;  %v18784_v9 = vld [vmem:[#allocation11 + $0x768] sm:$0xf0]  ;;  %v16048_v13 = vld [vmem:[#allocation11 + $0x12c] sm:$0xf0]  ;;  %v16567_v52 = vor.u32 %v18714_v48, %v16566_v19  ;;  %v8379_v39 = vsel %vm8339_vm11, %v19952_v18, %v19962_v27  ;;  %v8384_v55 = vsel %vm8344_vm14, %v19982_v4, %v8364_v60  ;;  %v8382_v16 = vsel %vm8342_vm13, %v19965_v11, %v19979_v29  ;;  %v20024_v48 = vpop.f32.mrf.mxu2 }
 0x46f   :  { %11057 = vmatpush.bf16.msra.mxu0 %v16947_v47  ;;  %v18794_v47 = vld [vmem:[#allocation11 + $0x7b8] sm:$0xf0]  ;;  %v7668_v6 = vadd.f32 %v20305_v24, %v7654_v20  ;;  %v18789_v41 = vld [vmem:[#allocation11 + $0x790] sm:$0xf0]  ;;  %v16846_v44 = vld [vmem:[#allocation11 + $0x758] sm:$0xf]  ;;  %v8045_v22 = vpop.f32.mrf.mxu1  ;;  %v8372_v11 = vsel %vm8332_vm15, %v20303_v10, %v19973_v49 }
 0x470   :  { %11071 = vmatpush.bf16.msra.mxu1 %v17107_v61  ;;  %v16887_v36 = vor.u32 %v18794_v47, %v16886_v7  ;;  %v20306_v30 = vld [vmem:[#allocation57_spill] sm:$0xff]  ;;  %v8354_v25 = vmul.f32 0.01, %v19976_v2  ;;  %v17046_v61 = vld [vmem:[#allocation11 + $0x8e8] sm:$0xf]  ;;  %v8046_v26 = vadd.f32 %v8045_v22, %v8032_v43  ;;  %v16867_v1 = vor.u32 %v18789_v41, %v16866_v31  ;;  %v20308_v51 = vld [vmem:[#allocation59_spill] sm:$0xff] }
 0x471   :  { %10989 = vmatpush.bf16.msra.mxu3 %v16107_v35  ;;  %v7682_v62 = vadd.f32 %v20306_v30, %v7668_v6  ;;  %v18834_v8 = vld [vmem:[#allocation11 + $0x8f8] sm:$0xf0]  ;;  %v16546_v3 = vld [vmem:[#allocation11 + $0x500] sm:$0xf]  ;;  %v16847_v33 = vor.u32 %v18784_v9, %v16846_v44  ;;  %v18709_v15 = vld [vmem:[#allocation11 + $0x510] sm:$0xf0]  ;;  %v20013_v47 = vpack.c.bf16 %v8379_v39, %v8369_v28  ;;  %v20032_v9 = vpack.c.bf16 %v8382_v16, %v8372_v11 }
 0x472   :  { %11030 = vmatpush.bf16.msrb.mxu2 %v16607_v34  ;;  %v16826_v35 = vld [vmem:[#allocation11 + $0x730] sm:$0xf]  ;;  %v18779_v59 = vld [vmem:[#allocation11 + $0x740] sm:$0xf0]  ;;  %v17047_v34 = vor.u32 %v18834_v8, %v17046_v61  ;;  %v18904_v50 = vld [vmem:[#allocation11 + $0xb28] sm:$0xf0]  ;;  %v8374_v4 = vsel %vm8334_vm12, %v19976_v2, %v8354_v25  ;;  %v16547_v46 = vor.u32 %v18709_v15, %v16546_v3  ;;  %v20040_v8 = vpop.f32.mrf.mxu3 }
 0x473   :  { %11058 = vmatpush.bf16.msra.mxu0 %v16927_v0  ;;  %v18582_v0 = vld [vmem:[#allocation11 + $0x11c] sm:$0xf]  ;;  %v18577_v17 = vld [vmem:[#allocation11 + $0xf4] sm:$0xf]  ;;  %v20307_v18 = vld [vmem:[#allocation58_spill] sm:$0xff]  ;;  %v20015_v23 = vpack.c.bf16 %v8384_v55, %v8374_v4  ;;  %vm8345_vm1 = vcmp.gt.f32.partialorder %v8046_v26, 0.0  ;;  %v16827_v2 = vor.u32 %v18779_v59, %v16826_v35 }
 0x474   :  { %11072 = vmatpush.bf16.msra.mxu1 %v17087_v32  ;;  %v16051_v58 = vor.u32 %v18582_v0, %v16048_v13  ;;  %v7696_v27 = vadd.f32 %v20307_v18, %v7682_v62  ;;  %v16028_v32 = vld [vmem:[#allocation11 + $0x104] sm:$0xf0]  ;;  %v17026_v5 = vld [vmem:[#allocation11 + $0x8c0] sm:$0xf]  ;;  %v18829_v7 = vld [vmem:[#allocation11 + $0x8d0] sm:$0xf0] }
 0x475   :  { %10990 = vmatpush.bf16.msra.mxu3 %v16087_v42  ;;  %v8365_v20 = vmul.f32 0.01, %v8046_v26  ;;  %v18622_v14 = vld [vmem:[#allocation11 + $0x25c] sm:$0xf]  ;;  %v16208_v54 = vld [vmem:[#allocation11 + $0x26c] sm:$0xf0]  ;;  %v16031_v42 = vor.u32 %v18577_v17, %v16028_v32  ;;  %v17027_v38 = vor.u32 %v18829_v7, %v17026_v5 }
 0x476   :  { %11031 = vmatpush.bf16.msrb.mxu2 %v16587_v53  ;;  %v8355_v56 = vmul.f32 0.01, %v19991_v37  ;;  %v16806_v43 = vld [vmem:[#allocation11 + $0x708] sm:$0xf]  ;;  %v18774_v53 = vld [vmem:[#allocation11 + $0x718] sm:$0xf0]  ;;  %v7710_v19 = vadd.f32 %v20308_v51, %v7696_v27  ;;  %v16211_v24 = vor.u32 %v18622_v14, %v16208_v54  ;;  %v8059_v14 = vpop.f32.mrf.mxu2 }
 0x477   :  { %11059 = vmatpush.bf16.msra.mxu0 %v16907_v40  ;;  %v17326_v40 = vld [vmem:[#allocation11 + $0xb18] sm:$0xf]  ;;  %v18899_v6 = vld [vmem:[#allocation11 + $0xb00] sm:$0xf0]  ;;  %v16008_v31 = vld [vmem:[#allocation11 + $0xdc] sm:$0xf0]  ;;  %v8385_v29 = vsel %vm8345_vm1, %v8046_v26, %v8365_v20  ;;  %v16807_v0 = vor.u32 %v18774_v53, %v16806_v43  ;;  %v8085_v20 = vpop.f32.mrf.mxu0 }
 0x478   :  { %11073 = vmatpush.bf16.msra.mxu1 %v17067_v63  ;;  %v17327_v60 = vor.u32 %v18904_v50, %v17326_v40  ;;  %v18572_v63 = vld [vmem:[#allocation11 + $0xcc] sm:$0xf]  ;;  %v18617_v41 = vld [vmem:[#allocation11 + $0x234] sm:$0xf]  ;;  %v16188_v44 = vld [vmem:[#allocation11 + $0x244] sm:$0xf0]  ;;  %v8375_v13 = vsel %vm8335_vm0, %v19991_v37, %v8355_v56 }
 0x479   :  { %10991 = vmatpush.bf16.msra.mxu3 %v16067_v57  ;;  %v16011_v62 = vor.u32 %v18572_v63, %v16008_v31  ;;  %v16786_v25 = vld [vmem:[#allocation11 + $0x6e0] sm:$0xf]  ;;  %v18769_v10 = vld [vmem:[#allocation11 + $0x6f0] sm:$0xf0]  ;;  %v17286_v49 = vld [vmem:[#allocation11 + $0xac8] sm:$0xf]  ;;  %v20038_v61 = vpack.c.bf16 %v8385_v29, %v8375_v13  ;;  %v16191_v26 = vor.u32 %v18617_v41, %v16188_v44  ;;  %v8099_v63 = vpop.f32.mrf.mxu1 }
 0x47a   :  { %11032 = vmatpush.bf16.msrb.mxu2 %v16567_v52  ;;  %v20309_v22 = vld [vmem:[#allocation61_spill] sm:$0xff]  ;;  %v15988_v37 = vld [vmem:[#allocation11 + $0xb4] sm:$0xf0]  ;;  %v18612_v3 = vld [vmem:[#allocation11 + $0x20c] sm:$0xf]  ;;  %v16787_v15 = vor.u32 %v18769_v10, %v16786_v25  ;;  %v8073_v31 = vpop.f32.mrf.mxu3 }
 0x47b   :  { %11060 = vmatpush.bf16.msra.mxu0 %v16887_v36  ;;  %v17306_v36 = vld [vmem:[#allocation11 + $0xaf0] sm:$0xf]  ;;  %v7724_v57 = vadd.f32 %v20309_v22, %v7710_v19  ;;  %v18894_v52 = vld [vmem:[#allocation11 + $0xad8] sm:$0xf0]  ;;  %v16168_v39 = vld [vmem:[#allocation11 + $0x21c] sm:$0xf0] }
 0x47c   :  { %11074 = vmatpush.bf16.msra.mxu1 %v17047_v34  ;;  %10992 = vmatmul.bf16.vlgmr.msra.gmra.mxu3 %v20013_v47  ;;  %v17307_v30 = vor.u32 %v18899_v6, %v17306_v36  ;;  %v20310_v55 = vld [vmem:[#allocation62_spill] sm:$0xff]  ;;  %v17287_v35 = vor.u32 %v18894_v52, %v17286_v49  ;;  %v16766_v34 = vld [vmem:[#allocation11 + $0x6b8] sm:$0xf]  ;;  %v17266_v50 = vld [vmem:[#allocation11 + $0xaa0] sm:$0xf]  ;;  %v16171_v17 = vor.u32 %v18612_v3, %v16168_v39 }
 0x47d   :  { %11040 = vmatpush.bf16.msrb.mxu3 %v16847_v33  ;;  %v7738_v33 = vadd.f32 %v20310_v55, %v7724_v57  ;;  %v18764_v40 = vld [vmem:[#allocation11 + $0x6c8] sm:$0xf0]  ;;  %v18889_v28 = vld [vmem:[#allocation11 + $0xab0] sm:$0xf0]  ;;  %v18562_v18 = vld [vmem:[#allocation11 + $0x7c] sm:$0xf] }
 0x47e   :  { %11033 = vmatpush.bf16.msrb.mxu2 %v16547_v46  ;;  %v15968_v27 = vld [vmem:[#allocation11 + $0x8c] sm:$0xf0]  ;;  %v18607_v4 = vld [vmem:[#allocation11 + $0x1e4] sm:$0xf]  ;;  %v16148_v32 = vld [vmem:[#allocation11 + $0x1f4] sm:$0xf0]  ;;  %v16767_v54 = vor.u32 %v18764_v40, %v16766_v34  ;;  %v17267_v56 = vor.u32 %v18889_v28, %v17266_v50 }
 0x47f   :  { %11061 = vmatpush.bf16.msra.mxu0 %v16867_v1  ;;  %v18567_v1 = vld [vmem:[#allocation11 + $0xa4] sm:$0xf]  ;;  %v20311_v5 = vld [vmem:[#allocation63_spill] sm:$0xff]  ;;  %v15948_v36 = vld [vmem:[#allocation11 + $0x64] sm:$0xf0] }
 0x480   :  { %11075 = vmatpush.bf16.msra.mxu1 %v17027_v38  ;;  %v15991_v59 = vor.u32 %v18567_v1, %v15988_v37  ;;  %v7752_v7 = vadd.f32 %v20311_v5, %v7738_v33  ;;  %v18759_v16 = vld [vmem:[#allocation11 + $0x6a0] sm:$0xf0]  ;;  %v16151_v38 = vor.u32 %v18607_v4, %v16148_v32  ;;  %v18884_v43 = vld [vmem:[#allocation11 + $0xa88] sm:$0xf0]  ;;  %v18557_v53 = vld [vmem:[#allocation11 + $0x54] sm:$0xf]  ;;  %v8113_v1 = vpop.f32.mrf.mxu2 }
 0x481   :  { %11041 = vmatpush.bf16.msrb.mxu3 %v16827_v2  ;;  %11034 = vmatmul.bf16.vlgmr.msrb.gmra.mxu2 %v20032_v9  ;;  %v15971_v2 = vor.u32 %v18562_v18, %v15968_v27  ;;  %v18602_v51 = vld [vmem:[#allocation11 + $0x1bc] sm:$0xf]  ;;  %v16128_v19 = vld [vmem:[#allocation11 + $0x1cc] sm:$0xf0]  ;;  %v15951_v44 = vor.u32 %v18557_v53, %v15948_v36  ;;  %v18879_v25 = vld [vmem:[#allocation11 + $0xa60] sm:$0xf0] }
 0x482   :  { %11062 = vmatmul.bf16.vlgmr.msra.gmra.mxu0 %v20015_v23  ;;  %11082 = vmatpush.bf16.msra.mxu2 %v17327_v60  ;;  %v16746_v60 = vld [vmem:[#allocation11 + $0x690] sm:$0xf]  ;;  %v18754_v13 = vld [vmem:[#allocation11 + $0x678] sm:$0xf0]  ;;  %v18552_v10 = vld [vmem:[#allocation11 + $0x2c] sm:$0xf] }
 0x483   :  { %11110 = vmatpush.bf16.msrb.mxu0 %v16051_v58  ;;  %v20044_v58 = vld [vmem:[#allocation10 + $0x8] sm:$0x3]  ;;  %11076 = vmatmul.bf16.vlgmr.msra.gmra.mxu1 %v20038_v61  ;;  %v16747_v11 = vor.u32 %v18759_v16, %v16746_v60  ;;  %v15928_v49 = vld [vmem:[#allocation11 + $0x3c] sm:$0xf0]  ;;  %v18597_v57 = vld [vmem:[#allocation11 + $0x194] sm:$0xf] }
 0x484   :  { %11124 = vmatpush.bf16.msrb.mxu1 %v16211_v24  ;;  %v2916_v46 = vperm.slane %v20044_v58, 0  ;;  %v20312_v24 = vld [vmem:[#allocation64_spill] sm:$0xff]  ;;  %v16706_v37 = vld [vmem:[#allocation11 + $0x640] sm:$0xf]  ;;  %v15931_v55 = vor.u32 %v18552_v10, %v15928_v49  ;;  %v16688_v18 = vld [vmem:[#allocation11 + $0x62c] sm:$0xf0] }
 0x485   :  { %11042 = vmatpush.bf16.msrb.mxu3 %v16807_v0  ;;  %v7766_v6 = vadd.f32 %v20312_v24, %v7752_v7  ;;  %v16726_v0 = vld [vmem:[#allocation11 + $0x668] sm:$0xf]  ;;  %v18749_v33 = vld [vmem:[#allocation11 + $0x650] sm:$0xf0]  ;;  %v15908_v40 = vld [vmem:[#allocation11 + $0x14] sm:$0xf0]  ;;  %v8127_v7 = vpop.f32.mrf.mxu3 }
 0x486   :  { %11083 = vmatpush.bf16.msra.mxu2 %v17307_v30  ;;  %v8058_v29 = vadd.f32 %v20024_v48, %v2916_v46  ;;  %v17226_v30 = vld [vmem:[#allocation11 + $0xa50] sm:$0xf]  ;;  %v16727_v48 = vor.u32 %v18754_v13, %v16726_v0  ;;  %v8060_v3 = vadd.f32 %v8059_v14, %v2916_v46  ;;  %v18742_v50 = vld [vmem:[#allocation11 + $0x61c] sm:$0xf]  ;;  %v18592_v27 = vld [vmem:[#allocation11 + $0x16c] sm:$0xf]  ;;  %v16707_v46 = vor.u32 %v18749_v33, %v16706_v37 }
 0x487   :  { %11111 = vmatpush.bf16.msrb.mxu0 %v16031_v42  ;;  %v17246_v42 = vld [vmem:[#allocation11 + $0xa78] sm:$0xf]  ;;  %vm8343_vm2 = vcmp.gt.f32.partialorder %v7766_v6, 0.0  ;;  %v8363_v52 = vmul.f32 0.01, %v7766_v6  ;;  %v17227_v39 = vor.u32 %v18879_v25, %v17226_v30 }
 0x488   :  { %11125 = vmatpush.bf16.msrb.mxu1 %v16191_v26  ;;  %v17247_v41 = vor.u32 %v18884_v43, %v17246_v42  ;;  %v8072_v22 = vadd.f32 %v20040_v8, %v8058_v29  ;;  %v16108_v26 = vld [vmem:[#allocation11 + $0x1a4] sm:$0xf0]  ;;  %v18547_v8 = vld [vmem:[#allocation11 + $0x4] sm:$0xf]  ;;  %v8074_v28 = vadd.f32 %v8073_v31, %v8060_v3  ;;  %v16088_v4 = vld [vmem:[#allocation11 + $0x17c] sm:$0xf0] }
 0x489   :  { %11043 = vmatpush.bf16.msrb.mxu3 %v16787_v15  ;;  %v17206_v15 = vld [vmem:[#allocation11 + $0xa28] sm:$0xf]  ;;  %v16111_v34 = vor.u32 %v18597_v57, %v16108_v26  ;;  %v20313_v32 = vld [vmem:[#allocation60_spill] sm:$0xff]  ;;  %v16091_v60 = vor.u32 %v18592_v27, %v16088_v4  ;;  %v17186_v16 = vld [vmem:[#allocation11 + $0xa00] sm:$0xf] }
 0x48a   :  { %11084 = vmatpush.bf16.msra.mxu2 %v17287_v35  ;;  %v18874_v35 = vld [vmem:[#allocation11 + $0xa38] sm:$0xf0]  ;;  %v8353_v5 = vmul.f32 0.01, %v20313_v32  ;;  %vm8333_vm3 = vcmp.gt.f32.partialorder %v20313_v32, 0.0 }
 0x48b   :  { %11112 = vmatpush.bf16.msrb.mxu0 %v16011_v62  ;;  %v16131_v62 = vor.u32 %v18602_v51, %v16128_v19  ;;  %v17207_v14 = vor.u32 %v18874_v35, %v17206_v15  ;;  %v18869_v42 = vld [vmem:[#allocation11 + $0xa10] sm:$0xf0]  ;;  %v16368_v36 = vld [vmem:[#allocation11 + $0x3ac] sm:$0xf0]  ;;  %v16668_v19 = vld [vmem:[#allocation11 + $0x604] sm:$0xf0] }
 0x48c   :  { %11126 = vmatpush.bf16.msrb.mxu1 %v16171_v17  ;;  %v8086_v17 = vadd.f32 %v8085_v20, %v8072_v22  ;;  %v16691_v20 = vor.u32 %v18742_v50, %v16688_v18  ;;  %v18737_v51 = vld [vmem:[#allocation11 + $0x5f4] sm:$0xf]  ;;  %v8373_v24 = vsel %vm8333_vm3, %v20313_v32, %v8353_v5  ;;  %v18587_v31 = vld [vmem:[#allocation11 + $0x144] sm:$0xf]  ;;  %v17187_v29 = vor.u32 %v18869_v42, %v17186_v16  ;;  %v16348_v22 = vld [vmem:[#allocation11 + $0x384] sm:$0xf0] }
 0x48d   :  { %11044 = vmatpush.bf16.msrb.mxu3 %v16767_v54  ;;  %v15911_v54 = vor.u32 %v18547_v8, %v15908_v40  ;;  %v16671_v30 = vor.u32 %v18737_v51, %v16668_v19  ;;  %v18657_v49 = vld [vmem:[#allocation11 + $0x374] sm:$0xf]  ;;  %v18732_v57 = vld [vmem:[#allocation11 + $0x5cc] sm:$0xf]  ;;  %v16328_v40 = vld [vmem:[#allocation11 + $0x35c] sm:$0xf0] }
 0x48e   :  { %11085 = vmatpush.bf16.msra.mxu2 %v17267_v56  ;;  %v8383_v56 = vsel %vm8343_vm2, %v7766_v6, %v8363_v52  ;;  %v8100_v43 = vadd.f32 %v8099_v63, %v8086_v17  ;;  %v8115_v63 = vpop.f32.mrf.mxu2  ;;  %v16648_v52 = vld [vmem:[#allocation11 + $0x5dc] sm:$0xf0]  ;;  %v18944_v37 = vld [vmem:[#allocation11 + $0xc68] sm:$0xf0]  ;;  %v16351_v35 = vor.u32 %v18657_v49, %v16348_v22  ;;  %v18727_v50 = vld [vmem:[#allocation11 + $0x5a4] sm:$0xf] }
 0x48f   :  { %11113 = vmatpush.bf16.msrb.mxu0 %v15991_v59  ;;  %v8087_v59 = vpop.f32.mrf.mxu0  ;;  %v20058_v6 = vpack.c.bf16 %v8383_v56, %v8373_v24  ;;  %v18652_v8 = vld [vmem:[#allocation11 + $0x34c] sm:$0xf]  ;;  %v17466_v18 = vld [vmem:[#allocation11 + $0xc30] sm:$0xf]  ;;  %v18939_v27 = vld [vmem:[#allocation11 + $0xc40] sm:$0xf0] }
 0x490   :  { %11127 = vmatpush.bf16.msrb.mxu1 %v16151_v38  ;;  %v18662_v38 = vld [vmem:[#allocation11 + $0x39c] sm:$0xf]  ;;  %v8088_v53 = vadd.f32 %v8087_v59, %v8074_v28  ;;  %v16628_v28 = vld [vmem:[#allocation11 + $0x5b4] sm:$0xf0]  ;;  %v18772_v5 = vld [vmem:[#allocation11 + $0x70c] sm:$0xf] }
 0x491   :  { %11045 = vmatpush.bf16.msrb.mxu3 %v16747_v11  ;;  %v16068_v11 = vld [vmem:[#allocation11 + $0x154] sm:$0xf0]  ;;  %v16371_v13 = vor.u32 %v18662_v38, %v16368_v36  ;;  %v16631_v56 = vor.u32 %v18727_v50, %v16628_v28  ;;  %v16608_v38 = vld [vmem:[#allocation11 + $0x58c] sm:$0xf0]  ;;  %v18767_v19 = vld [vmem:[#allocation11 + $0x6e4] sm:$0xf] }
 0x492   :  { %11086 = vmatpush.bf16.msra.mxu2 %v17247_v41  ;;  %v18782_v41 = vld [vmem:[#allocation11 + $0x75c] sm:$0xf]  ;;  %v16071_v10 = vor.u32 %v18587_v31, %v16068_v11  ;;  %v16788_v24 = vld [vmem:[#allocation11 + $0x6f4] sm:$0xf0]  ;;  %v16748_v50 = vld [vmem:[#allocation11 + $0x6a4] sm:$0xf0] }
 0x493   :  { %11114 = vmatpush.bf16.msrb.mxu0 %v15971_v2  ;;  %v8101_v2 = vpop.f32.mrf.mxu1 }
 0x494   :  { %11128 = vmatpush.bf16.msrb.mxu1 %v16131_v62  ;;  %v8114_v62 = vadd.f32 %v8113_v1, %v8100_v43  ;;  %v8102_v25 = vadd.f32 %v8101_v2, %v8088_v53  ;;  %v8129_v1 = vpop.f32.mrf.mxu3  ;;  %v18647_v2 = vld [vmem:[#allocation11 + $0x324] sm:$0xf]  ;;  %v17446_v43 = vld [vmem:[#allocation11 + $0xc08] sm:$0xf]  ;;  %v18934_v53 = vld [vmem:[#allocation11 + $0xc18] sm:$0xf0] }
 0x495   :  { %11046 = vmatpush.bf16.msrb.mxu3 %v16727_v48  ;;  %v17486_v48 = vld [vmem:[#allocation11 + $0xc58] sm:$0xf]  ;;  %v17447_v31 = vor.u32 %v18934_v53, %v17446_v43 }
 0x496   :  { %11087 = vmatpush.bf16.msra.mxu2 %v17227_v39  ;;  %v8128_v3 = vadd.f32 %v8127_v7, %v8114_v62  ;;  %v18777_v39 = vld [vmem:[#allocation11 + $0x734] sm:$0xf]  ;;  %v17487_v33 = vor.u32 %v18944_v37, %v17486_v48  ;;  %v8116_v59 = vadd.f32 %v8115_v63, %v8102_v25  ;;  %v16808_v7 = vld [vmem:[#allocation11 + $0x71c] sm:$0xf0]  ;;  %v16588_v62 = vld [vmem:[#allocation11 + $0x564] sm:$0xf0] }
 0x497   :  { %11115 = vmatpush.bf16.msrb.mxu0 %v15951_v44  ;;  %v16848_v44 = vld [vmem:[#allocation11 + $0x76c] sm:$0xf0]  ;;  %v8141_v0 = vpop.f32.mrf.mxu0  ;;  %v16811_v42 = vor.u32 %v18772_v5, %v16808_v7  ;;  %v18717_v63 = vld [vmem:[#allocation11 + $0x554] sm:$0xf]  ;;  %v17426_v25 = vld [vmem:[#allocation11 + $0xbe0] sm:$0xf] }
 0x498   :  { %11129 = vmatpush.bf16.msrb.mxu1 %v16111_v34  ;;  %v16851_v26 = vor.u32 %v18782_v41, %v16848_v44  ;;  %v16651_v34 = vor.u32 %v18732_v57, %v16648_v52  ;;  %v8142_v4 = vadd.f32 %v8141_v0, %v8128_v3  ;;  %v8130_v32 = vadd.f32 %v8129_v1, %v8116_v59  ;;  %v18642_v44 = vld [vmem:[#allocation11 + $0x2fc] sm:$0xf]  ;;  %v16288_v0 = vld [vmem:[#allocation11 + $0x30c] sm:$0xf0]  ;;  %v17406_v59 = vld [vmem:[#allocation11 + $0xbb8] sm:$0xf] }
 0x499   :  { %11047 = vmatpush.bf16.msrb.mxu3 %v16707_v46  ;;  %v17467_v46 = vor.u32 %v18939_v27, %v17466_v18  ;;  %v18762_v57 = vld [vmem:[#allocation11 + $0x6bc] sm:$0xf]  ;;  %v16291_v48 = vor.u32 %v18642_v44, %v16288_v0  ;;  %v16591_v3 = vor.u32 %v18717_v63, %v16588_v62  ;;  %v16548_v5 = vld [vmem:[#allocation11 + $0x514] sm:$0xf0]  ;;  %v18897_v63 = vld [vmem:[#allocation11 + $0xaf4] sm:$0xf] }
 0x49a   :  { %11088 = vmatpush.bf16.msra.mxu2 %v17207_v14  ;;  %v8169_v14 = vpop.f32.mrf.mxu2  ;;  %v16708_v62 = vld [vmem:[#allocation11 + $0x654] sm:$0xf0] }
 0x49b   :  { %11116 = vmatpush.bf16.msrb.mxu0 %v15931_v55  ;;  %v16828_v55 = vld [vmem:[#allocation11 + $0x744] sm:$0xf0]  ;;  %v8155_v15 = vpop.f32.mrf.mxu1 }
 0x49c   :  { %11130 = vmatpush.bf16.msrb.mxu1 %v16091_v60  ;;  %11048 = vmatmul.bf16.vlgmr.msrb.gmra.mxu3 %v20058_v6  ;;  %v16831_v17 = vor.u32 %v18777_v39, %v16828_v55  ;;  %v18722_v60 = vld [vmem:[#allocation11 + $0x57c] sm:$0xf]  ;;  %v8156_v36 = vadd.f32 %v8155_v15, %v8142_v4  ;;  %v18637_v39 = vld [vmem:[#allocation11 + $0x2d4] sm:$0xf]  ;;  %v16268_v55 = vld [vmem:[#allocation11 + $0x2e4] sm:$0xf0] }
 0x49d   :  { %11096 = vmatpush.bf16.msra.mxu3 %v17487_v33  ;;  %v16611_v41 = vor.u32 %v18722_v60, %v16608_v38  ;;  %v18712_v33 = vld [vmem:[#allocation11 + $0x52c] sm:$0xf]  ;;  %v16271_v18 = vor.u32 %v18637_v39, %v16268_v55  ;;  %v16248_v4 = vld [vmem:[#allocation11 + $0x2bc] sm:$0xf0]  ;;  %v17386_v60 = vld [vmem:[#allocation11 + $0xb90] sm:$0xf] }
 0x49e   :  { %11089 = vmatpush.bf16.msra.mxu2 %v17187_v29  ;;  %v8170_v49 = vadd.f32 %v8169_v14, %v8156_v36  ;;  %v16728_v38 = vld [vmem:[#allocation11 + $0x67c] sm:$0xf0]  ;;  %v18627_v36 = vld [vmem:[#allocation11 + $0x284] sm:$0xf]  ;;  %v16988_v39 = vld [vmem:[#allocation11 + $0x884] sm:$0xf0] }
 0x49f   :  { %11117 = vmatpush.bf16.msrb.mxu0 %v15911_v54  ;;  %v16331_v54 = vor.u32 %v18652_v8, %v16328_v40  ;;  %v8143_v16 = vpop.f32.mrf.mxu0  ;;  %v8183_v29 = vpop.f32.mrf.mxu3  ;;  %v18757_v40 = vld [vmem:[#allocation11 + $0x694] sm:$0xf]  ;;  %v18892_v55 = vld [vmem:[#allocation11 + $0xacc] sm:$0xf] }
 0x4a0   :  { %11131 = vmatpush.bf16.msrb.mxu1 %v16071_v10  ;;  %v8144_v51 = vadd.f32 %v8143_v16, %v8130_v32  ;;  %v18929_v10 = vld [vmem:[#allocation11 + $0xbf0] sm:$0xf0]  ;;  %v8184_v37 = vadd.f32 %v8183_v29, %v8170_v49  ;;  %v18707_v32 = vld [vmem:[#allocation11 + $0x504] sm:$0xf]  ;;  %v17008_v29 = vld [vmem:[#allocation11 + $0x8ac] sm:$0xf0] }
 0x4a1   :  { %11097 = vmatpush.bf16.msra.mxu3 %v17467_v46  ;;  %v17427_v52 = vor.u32 %v18929_v10, %v17426_v25  ;;  %v18919_v16 = vld [vmem:[#allocation11 + $0xba0] sm:$0xf0]  ;;  %v17366_v25 = vld [vmem:[#allocation11 + $0xb68] sm:$0xf]  ;;  %v18914_v10 = vld [vmem:[#allocation11 + $0xb78] sm:$0xf0] }
 0x4a2   :  { %11118 = vmatmul.bf16.vlgmr.msrb.gmra.mxu0 %v19938_v12  ;;  %11138 = vmatpush.bf16.msrb.mxu2 %v16371_v13  ;;  %v8171_v15 = vpop.f32.mrf.mxu2  ;;  %v8356_v7 = vmul.f32 0.01, %v8184_v37  ;;  %vm8336_vm4 = vcmp.gt.f32.partialorder %v8184_v37, 0.0  ;;  %v17387_v43 = vor.u32 %v18919_v16, %v17386_v60 }
 0x4a3   :  { %11166 = vmatpush.bf16.msra.mxu0 %v16691_v20  ;;  %11132 = vmatmul.bf16.vlgmr.msrb.gmra.mxu1 %v20013_v47  ;;  %v16308_v20 = vld [vmem:[#allocation11 + $0x334] sm:$0xf0]  ;;  %v8157_v13 = vpop.f32.mrf.mxu1 }
 0x4a4   :  { %11180 = vmatpush.bf16.msra.mxu1 %v16851_v26  ;;  %v16311_v11 = vor.u32 %v18647_v2, %v16308_v20  ;;  %v8158_v22 = vadd.f32 %v8157_v13, %v8144_v51  ;;  %v16768_v26 = vld [vmem:[#allocation11 + $0x6cc] sm:$0xf0]  ;;  %v18752_v2 = vld [vmem:[#allocation11 + $0x66c] sm:$0xf]  ;;  %v16751_v20 = vor.u32 %v18757_v40, %v16748_v50  ;;  %v8376_v51 = vsel %vm8336_vm4, %v8184_v37, %v8356_v7  ;;  %v17308_v13 = vld [vmem:[#allocation11 + $0xb04] sm:$0xf0] }
 0x4a5   :  { %11098 = vmatpush.bf16.msra.mxu3 %v17447_v31  ;;  %v16771_v1 = vor.u32 %v18762_v57, %v16768_v26  ;;  %v16228_v31 = vld [vmem:[#allocation11 + $0x294] sm:$0xf0]  ;;  %v16731_v0 = vor.u32 %v18752_v2, %v16728_v38  ;;  %v17488_v57 = vld [vmem:[#allocation11 + $0xc6c] sm:$0xf0]  ;;  %v17367_v26 = vor.u32 %v18914_v10, %v17366_v25  ;;  %v17311_v37 = vor.u32 %v18897_v63, %v17308_v13  ;;  %v18702_v40 = vld [vmem:[#allocation11 + $0x4dc] sm:$0xf] }
 0x4a6   :  { %11139 = vmatpush.bf16.msrb.mxu2 %v16351_v35  ;;  %v16568_v35 = vld [vmem:[#allocation11 + $0x53c] sm:$0xf0]  ;;  %v8172_v8 = vadd.f32 %v8171_v15, %v8158_v22  ;;  %v16231_v49 = vor.u32 %v18627_v36, %v16228_v31  ;;  %v18942_v22 = vld [vmem:[#allocation11 + $0xc5c] sm:$0xf]  ;;  %v16528_v50 = vld [vmem:[#allocation11 + $0x4ec] sm:$0xf0] }
 0x4a7   :  { %11167 = vmatpush.bf16.msra.mxu0 %v16671_v30  ;;  %v16791_v30 = vor.u32 %v18767_v19, %v16788_v24  ;;  %v8185_v27 = vpop.f32.mrf.mxu3  ;;  %v16571_v46 = vor.u32 %v18712_v33, %v16568_v35  ;;  %v16551_v24 = vor.u32 %v18707_v32, %v16548_v5  ;;  %v17288_v33 = vld [vmem:[#allocation11 + $0xadc] sm:$0xf0]  ;;  %v17491_v15 = vor.u32 %v18942_v22, %v17488_v57  ;;  %v18887_v32 = vld [vmem:[#allocation11 + $0xaa4] sm:$0xf]  ;;  %v17268_v5 = vld [vmem:[#allocation11 + $0xab4] sm:$0xf0] }
 0x4a8   :  { %11181 = vmatpush.bf16.msra.mxu1 %v16831_v17  ;;  %v18632_v17 = vld [vmem:[#allocation11 + $0x2ac] sm:$0xf]  ;;  %v8186_v14 = vadd.f32 %v8185_v27, %v8172_v8  ;;  %v17346_v35 = vld [vmem:[#allocation11 + $0xb40] sm:$0xf]  ;;  %v18807_v38 = vld [vmem:[#allocation11 + $0x824] sm:$0xf] }
 0x4a9   :  { %11099 = vmatpush.bf16.msra.mxu3 %v17427_v52  ;;  %v16251_v53 = vor.u32 %v18632_v17, %v16248_v4  ;;  %v18812_v27 = vld [vmem:[#allocation11 + $0x84c] sm:$0xf]  ;;  %v16968_v4 = vld [vmem:[#allocation11 + $0x85c] sm:$0xf0]  ;;  %v17248_v36 = vld [vmem:[#allocation11 + $0xa8c] sm:$0xf0] }
 0x4aa   :  { %11140 = vmatpush.bf16.msrb.mxu2 %v16331_v54  ;;  %v18902_v54 = vld [vmem:[#allocation11 + $0xb1c] sm:$0xf]  ;;  %vm8346_vm5 = vcmp.gt.f32.partialorder %v8186_v14, 0.0  ;;  %v17448_v2 = vld [vmem:[#allocation11 + $0xc1c] sm:$0xf0]  ;;  %v16971_v60 = vor.u32 %v18812_v27, %v16968_v4 }
 0x4ab   :  { %11168 = vmatpush.bf16.msra.mxu0 %v16651_v34  ;;  %v18924_v34 = vld [vmem:[#allocation11 + $0xbc8] sm:$0xf0]  ;;  %v20070_v16 = vpop.f32.mrf.mxu1  ;;  %v18927_v31 = vld [vmem:[#allocation11 + $0xbe4] sm:$0xf]  ;;  %v18802_v63 = vld [vmem:[#allocation11 + $0x7fc] sm:$0xf] }
 0x4ac   :  { %11182 = vmatpush.bf16.msra.mxu1 %v16811_v42  ;;  %v17407_v28 = vor.u32 %v18924_v34, %v17406_v59  ;;  %v8366_v42 = vmul.f32 0.01, %v8186_v14  ;;  %v18909_v59 = vld [vmem:[#allocation11 + $0xb50] sm:$0xf0]  ;;  %v17468_v34 = vld [vmem:[#allocation11 + $0xc44] sm:$0xf0] }
 0x4ad   :  { %v17347_v8 = vor.u32 %v18909_v59, %v17346_v35  ;;  %v16928_v13 = vld [vmem:[#allocation11 + $0x80c] sm:$0xf0]  ;;  %v18922_v10 = vld [vmem:[#allocation11 + $0xbbc] sm:$0xf]  ;;  %v18687_v22 = vld [vmem:[#allocation11 + $0x464] sm:$0xf] }
 0x4ae   :  { %11141 = vmatpush.bf16.msrb.mxu2 %v16311_v11  ;;  %11100 = vmatpush.bf16.msra.mxu3 %v17407_v28  ;;  %v8386_v19 = vsel %vm8346_vm5, %v8186_v14, %v8366_v42  ;;  %v18822_v11 = vld [vmem:[#allocation11 + $0x89c] sm:$0xf]  ;;  %v16531_v28 = vor.u32 %v18702_v40, %v16528_v50  ;;  %v16508_v14 = vld [vmem:[#allocation11 + $0x4c4] sm:$0xf0]  ;;  %v17271_v42 = vor.u32 %v18887_v32, %v17268_v5  ;;  %v16468_v57 = vld [vmem:[#allocation11 + $0x474] sm:$0xf0] }
 0x4af   :  { %11169 = vmatpush.bf16.msra.mxu0 %v16631_v56  ;;  %v17328_v56 = vld [vmem:[#allocation11 + $0xb2c] sm:$0xf0]  ;;  %v17011_v52 = vor.u32 %v18822_v11, %v17008_v29  ;;  %v17428_v11 = vld [vmem:[#allocation11 + $0xbf4] sm:$0xf0]  ;;  %v17388_v59 = vld [vmem:[#allocation11 + $0xba4] sm:$0xf0] }
 0x4b0   :  { %11183 = vmatpush.bf16.msra.mxu1 %v16791_v30  ;;  %v17331_v44 = vor.u32 %v18902_v54, %v17328_v56  ;;  %v18747_v30 = vld [vmem:[#allocation11 + $0x644] sm:$0xf]  ;;  %v20067_v54 = vpop.f32.mrf.mxu0  ;;  %v18932_v56 = vld [vmem:[#allocation11 + $0xc0c] sm:$0xf]  ;;  %v17431_v25 = vor.u32 %v18927_v31, %v17428_v11  ;;  %v2917_v40 = vperm.slane %v20044_v58, 1 }
 0x4b1   :  { %v16888_v4 = vld [vmem:[#allocation11 + $0x7bc] sm:$0xf0]  ;;  %v18867_v32 = vld [vmem:[#allocation11 + $0xa04] sm:$0xf]  ;;  %v17188_v5 = vld [vmem:[#allocation11 + $0xa14] sm:$0xf0] }
 0x4b2   :  { %11142 = vmatpush.bf16.msrb.mxu2 %v16291_v48  ;;  %11101 = vmatpush.bf16.msra.mxu3 %v17387_v43  ;;  %v18817_v48 = vld [vmem:[#allocation11 + $0x874] sm:$0xf]  ;;  %v16948_v43 = vld [vmem:[#allocation11 + $0x834] sm:$0xf0]  ;;  %v16054_v31 = vld [vmem:[#allocation11 + $0x120] sm:$0xf] }
 0x4b3   :  { %11170 = vmatpush.bf16.msra.mxu0 %v16611_v41  ;;  %v20063_v41 = vpack.c.bf16 %v8386_v19, %v8376_v51  ;;  %v16991_v17 = vor.u32 %v18817_v48, %v16988_v39  ;;  %v17451_v51 = vor.u32 %v18932_v56, %v17448_v2  ;;  %v18692_v19 = vld [vmem:[#allocation11 + $0x48c] sm:$0xf]  ;;  %v16908_v39 = vld [vmem:[#allocation11 + $0x7e4] sm:$0xf0]  ;;  %v20075_v35 = vpop.f32.mrf.mxu1  ;;  %v17368_v2 = vld [vmem:[#allocation11 + $0xb7c] sm:$0xf0] }
 0x4b4   :  { %11184 = vmatpush.bf16.msra.mxu1 %v16771_v1  ;;  %v18937_v1 = vld [vmem:[#allocation11 + $0xc34] sm:$0xf]  ;;  %v18912_v56 = vld [vmem:[#allocation11 + $0xb6c] sm:$0xf] }
 0x4b5   :  { %11090 = vmatmul.bf16.vlgmr.msra.gmra.mxu2 %v20063_v41  ;;  %v17471_v7 = vor.u32 %v18937_v1, %v17468_v34  ;;  %v18917_v1 = vld [vmem:[#allocation11 + $0xb94] sm:$0xf]  ;;  %v18682_v34 = vld [vmem:[#allocation11 + $0x43c] sm:$0xf] }
 0x4b6   :  { %11143 = vmatpush.bf16.msrb.mxu2 %v16271_v18  ;;  %11102 = vmatpush.bf16.msra.mxu3 %v17367_v26  ;;  %v17291_v18 = vor.u32 %v18892_v55, %v17288_v33  ;;  %v16931_v26 = vor.u32 %v18802_v63, %v16928_v13  ;;  %v18872_v55 = vld [vmem:[#allocation11 + $0xa2c] sm:$0xf]  ;;  %v17208_v33 = vld [vmem:[#allocation11 + $0xa3c] sm:$0xf0]  ;;  %v18585_v11 = vld [vmem:[#allocation11 + $0x130] sm:$0xf0] }
 0x4b7   :  { %11171 = vmatpush.bf16.msra.mxu0 %v16591_v3  ;;  %v16711_v3 = vor.u32 %v18747_v30, %v16708_v62  ;;  %v18877_v30 = vld [vmem:[#allocation11 + $0xa54] sm:$0xf]  ;;  %v17228_v62 = vld [vmem:[#allocation11 + $0xa64] sm:$0xf0]  ;;  %v17211_v27 = vor.u32 %v18872_v55, %v17208_v33  ;;  %v16354_v63 = vld [vmem:[#allocation11 + $0x378] sm:$0xf] }
 0x4b8   :  { %11185 = vmatpush.bf16.msra.mxu1 %v16751_v20  ;;  %v20072_v48 = vpop.f32.mrf.mxu0  ;;  %v18660_v13 = vld [vmem:[#allocation11 + $0x388] sm:$0xf0]  ;;  %v16034_v55 = vld [vmem:[#allocation11 + $0xf8] sm:$0xf] }
 0x4b9   :  { %v18580_v33 = vld [vmem:[#allocation11 + $0x108] sm:$0xf0] }
 0x4ba   :  { %11144 = vmatpush.bf16.msrb.mxu2 %v16251_v53  ;;  %11103 = vmatpush.bf16.msra.mxu3 %v17347_v8  ;;  %v18882_v53 = vld [vmem:[#allocation11 + $0xa7c] sm:$0xf]  ;;  %v16448_v8 = vld [vmem:[#allocation11 + $0x44c] sm:$0xf0] }
 0x4bb   :  { %11172 = vmatpush.bf16.msra.mxu0 %v16571_v46  ;;  %v18697_v46 = vld [vmem:[#allocation11 + $0x4b4] sm:$0xf] }
 0x4bc   :  { %11186 = vmatpush.bf16.msra.mxu1 %v16731_v0  ;;  %v16511_v20 = vor.u32 %v18697_v46, %v16508_v14  ;;  %v17251_v0 = vor.u32 %v18882_v53, %v17248_v36  ;;  %v16374_v46 = vld [vmem:[#allocation11 + $0x3a0] sm:$0xf]  ;;  %v18665_v14 = vld [vmem:[#allocation11 + $0x3b0] sm:$0xf0] }
 0x4be   :  { %11145 = vmatpush.bf16.msrb.mxu2 %v16231_v49  ;;  %11152 = vmatpush.bf16.msrb.mxu3 %v16531_v28  ;;  %v17408_v49 = vld [vmem:[#allocation11 + $0xbcc] sm:$0xf0]  ;;  %v16451_v28 = vor.u32 %v18682_v34, %v16448_v8  ;;  %v18667_v8 = vld [vmem:[#allocation11 + $0x3c4] sm:$0xf] }
 0x4bf   :  { %11173 = vmatpush.bf16.msra.mxu0 %v16551_v24  ;;  %v16488_v24 = vld [vmem:[#allocation11 + $0x49c] sm:$0xf0] }
 0x4c0   :  { %11187 = vmatpush.bf16.msra.mxu1 %v16711_v3  ;;  %v16491_v29 = vor.u32 %v18692_v19, %v16488_v24  ;;  %v18797_v3 = vld [vmem:[#allocation11 + $0x7d4] sm:$0xf]  ;;  %v8253_v36 = vpop.f32.mrf.mxu0  ;;  %v17191_v19 = vor.u32 %v18867_v32, %v17188_v5  ;;  %v16868_v24 = vld [vmem:[#allocation11 + $0x794] sm:$0xf0] }
 0x4c1   :  { %v16911_v50 = vor.u32 %v18797_v3, %v16908_v39  ;;  %v16355_v3 = vor.u32 %v18660_v13, %v16354_v63 }
 0x4c2   :  { %11174 = vmatmul.bf16.vlgmr.msra.gmra.mxu0 %v20032_v9  ;;  %11194 = vmatpush.bf16.msra.mxu2 %v17011_v52  ;;  %v16471_v52 = vor.u32 %v18687_v22, %v16468_v57  ;;  %v16534_v57 = vld [vmem:[#allocation11 + $0x4e0] sm:$0xf] }
 0x4c3   :  { %11222 = vmatpush.bf16.msrb.mxu0 %v17331_v44  ;;  %11188 = vmatmul.bf16.vlgmr.msra.gmra.mxu1 %v20058_v6  ;;  %v16951_v44 = vor.u32 %v18807_v38, %v16948_v43  ;;  %v18787_v43 = vld [vmem:[#allocation11 + $0x784] sm:$0xf] }
 0x4c4   :  { %11236 = vmatpush.bf16.msrb.mxu1 %v17491_v15  ;;  %11153 = vmatpush.bf16.msrb.mxu3 %v16511_v20  ;;  %v17411_v15 = vor.u32 %v18922_v10, %v17408_v49  ;;  %v18677_v20 = vld [vmem:[#allocation11 + $0x414] sm:$0xf]  ;;  %v16408_v10 = vld [vmem:[#allocation11 + $0x3fc] sm:$0xf0]  ;;  %v16871_v22 = vor.u32 %v18787_v43, %v16868_v24 }
 0x4c5   :  { %11146 = vmatmul.bf16.vlgmr.msrb.gmra.mxu2 %v19913_v21 }
 0x4c6   :  { %11195 = vmatpush.bf16.msra.mxu2 %v16991_v17  ;;  %v18792_v17 = vld [vmem:[#allocation11 + $0x7ac] sm:$0xf] }
 0x4c7   :  { %11223 = vmatpush.bf16.msrb.mxu0 %v17311_v37  ;;  %v17231_v37 = vor.u32 %v18877_v30, %v17228_v62  ;;  %v16891_v38 = vor.u32 %v18792_v17, %v16888_v4  ;;  %v18907_v30 = vld [vmem:[#allocation11 + $0xb44] sm:$0xf]  ;;  %v17348_v62 = vld [vmem:[#allocation11 + $0xb54] sm:$0xf0]  ;;  %v8200_v17 = vadd.f32 %v20072_v48, %v2917_v40  ;;  %v16035_v4 = vor.u32 %v18580_v33, %v16034_v55  ;;  %v16314_v48 = vld [vmem:[#allocation11 + $0x328] sm:$0xf] }
 0x4c8   :  { %11237 = vmatpush.bf16.msrb.mxu1 %v17471_v7  ;;  %11154 = vmatpush.bf16.msrb.mxu3 %v16491_v29  ;;  %v17391_v7 = vor.u32 %v18917_v1, %v17388_v59  ;;  %v17351_v39 = vor.u32 %v18907_v30, %v17348_v62  ;;  %v18655_v59 = vld [vmem:[#allocation11 + $0x360] sm:$0xf0] }
 0x4c9   :  { %v8214_v32 = vadd.f32 %v20075_v35, %v8200_v17  ;;  %v16434_v17 = vld [vmem:[#allocation11 + $0x418] sm:$0xf] }
 0x4ca   :  { %11196 = vmatpush.bf16.msra.mxu2 %v16971_v60  ;;  %v16428_v60 = vld [vmem:[#allocation11 + $0x424] sm:$0xf0] }
 0x4cb   :  { %11224 = vmatpush.bf16.msrb.mxu0 %v17291_v18  ;;  %v8225_v18 = vpop.f32.mrf.mxu2  ;;  %v16431_v53 = vor.u32 %v18677_v20, %v16428_v60  ;;  %v16494_v60 = vld [vmem:[#allocation11 + $0x490] sm:$0xf] }
 0x4cc   :  { %11238 = vmatpush.bf16.msrb.mxu1 %v17451_v51  ;;  %11155 = vmatpush.bf16.msrb.mxu3 %v16471_v52  ;;  %v8239_v51 = vpop.f32.mrf.mxu3 }
 0x4ce   :  { %11197 = vmatpush.bf16.msra.mxu2 %v16951_v44  ;;  %v16375_v44 = vor.u32 %v18665_v14, %v16374_v46  ;;  %v16014_v46 = vld [vmem:[#allocation11 + $0xd0] sm:$0xf]  ;;  %v18575_v14 = vld [vmem:[#allocation11 + $0xe0] sm:$0xf0] }
 0x4cf   :  { %11225 = vmatpush.bf16.msrb.mxu0 %v17271_v42  ;;  %v8198_v42 = vadd.f32 %v20067_v54, %v2917_v40  ;;  %v8267_v54 = vpop.f32.mrf.mxu1  ;;  %v18650_v40 = vld [vmem:[#allocation11 + $0x338] sm:$0xf0]  ;;  %v16015_v35 = vor.u32 %v18575_v14, %v16014_v46  ;;  %v16234_v14 = vld [vmem:[#allocation11 + $0x288] sm:$0xf] }
 0x4d0   :  { %11239 = vmatpush.bf16.msrb.mxu1 %v17431_v25  ;;  %11156 = vmatpush.bf16.msrb.mxu3 %v16451_v28  ;;  %v18672_v25 = vld [vmem:[#allocation11 + $0x3ec] sm:$0xf]  ;;  %v16514_v28 = vld [vmem:[#allocation11 + $0x4b8] sm:$0xf] }
 0x4d1   :  { %v8212_v29 = vadd.f32 %v20070_v16, %v8198_v42  ;;  %v16411_v52 = vor.u32 %v18672_v25, %v16408_v10  ;;  %v18695_v42 = vld [vmem:[#allocation11 + $0x4a0] sm:$0xf0]  ;;  %v15974_v25 = vld [vmem:[#allocation11 + $0x80] sm:$0xf] }
 0x4d2   :  { %11198 = vmatpush.bf16.msra.mxu2 %v16931_v26  ;;  %v18705_v26 = vld [vmem:[#allocation11 + $0x4f0] sm:$0xf0] }
 0x4d3   :  { %11226 = vmatpush.bf16.msrb.mxu0 %v17251_v0  ;;  %v17371_v0 = vor.u32 %v18912_v56, %v17368_v2  ;;  %v8226_v49 = vadd.f32 %v8225_v18, %v8212_v29  ;;  %v8227_v1 = vpop.f32.mrf.mxu2  ;;  %v16535_v34 = vor.u32 %v18705_v26, %v16534_v57  ;;  %v18700_v18 = vld [vmem:[#allocation11 + $0x4c8] sm:$0xf0]  ;;  %v8255_v56 = vpop.f32.mrf.mxu0  ;;  %v16495_v29 = vor.u32 %v18695_v42, %v16494_v60  ;;  %v16414_v60 = vld [vmem:[#allocation11 + $0x3f0] sm:$0xf]  ;;  %v18675_v42 = vld [vmem:[#allocation11 + $0x400] sm:$0xf0] }
 0x4d4   :  { %11240 = vmatpush.bf16.msrb.mxu1 %v17411_v15  ;;  %11157 = vmatpush.bf16.msrb.mxu3 %v16431_v53  ;;  %v16334_v15 = vld [vmem:[#allocation11 + $0x350] sm:$0xf]  ;;  %v8241_v58 = vpop.f32.mrf.mxu3  ;;  %v16515_v2 = vor.u32 %v18700_v18, %v16514_v28  ;;  %v8228_v20 = vadd.f32 %v8227_v1, %v8214_v32  ;;  %v18640_v57 = vld [vmem:[#allocation11 + $0x2e8] sm:$0xf0] }
 0x4d5   :  { %v8240_v16 = vadd.f32 %v8239_v51, %v8226_v49  ;;  %v15994_v51 = vld [vmem:[#allocation11 + $0xa8] sm:$0xf]  ;;  %v18560_v1 = vld [vmem:[#allocation11 + $0x68] sm:$0xf0] }
 0x4d6   :  { %11199 = vmatpush.bf16.msra.mxu2 %v16911_v50  ;;  %v16388_v50 = vld [vmem:[#allocation11 + $0x3d4] sm:$0xf0]  ;;  %v8242_v53 = vadd.f32 %v8241_v58, %v8228_v20  ;;  %v18680_v28 = vld [vmem:[#allocation11 + $0x428] sm:$0xf0]  ;;  %v18825_v20 = vld [vmem:[#allocation11 + $0x8b0] sm:$0xf0] }
 0x4d7   :  { %11227 = vmatpush.bf16.msrb.mxu0 %v17231_v37  ;;  %v16055_v37 = vor.u32 %v18585_v11, %v16054_v31  ;;  %v8254_v5 = vadd.f32 %v8253_v36, %v8240_v16  ;;  %v16315_v36 = vor.u32 %v18650_v40, %v16314_v48  ;;  %v16294_v31 = vld [vmem:[#allocation11 + $0x300] sm:$0xf]  ;;  %v18645_v11 = vld [vmem:[#allocation11 + $0x310] sm:$0xf0]  ;;  %v16435_v58 = vor.u32 %v18680_v28, %v16434_v17  ;;  %v17148_v17 = vld [vmem:[#allocation11 + $0x9c4] sm:$0xf0] }
 0x4d8   :  { %11241 = vmatpush.bf16.msrb.mxu1 %v17391_v7  ;;  %11158 = vmatpush.bf16.msrb.mxu3 %v16411_v52  ;;  %v16335_v7 = vor.u32 %v18655_v59, %v16334_v15  ;;  %v8256_v30 = vadd.f32 %v8255_v56, %v8242_v53  ;;  %v16295_v62 = vor.u32 %v18645_v11, %v16294_v31  ;;  %v18685_v16 = vld [vmem:[#allocation11 + $0x450] sm:$0xf0]  ;;  %v15954_v15 = vld [vmem:[#allocation11 + $0x58] sm:$0xf]  ;;  %v16254_v59 = vld [vmem:[#allocation11 + $0x2b0] sm:$0xf] }
 0x4d9   :  { %v8268_v43 = vadd.f32 %v8267_v54, %v8254_v5  ;;  %v18565_v54 = vld [vmem:[#allocation11 + $0x90] sm:$0xf0]  ;;  %v15934_v5 = vld [vmem:[#allocation11 + $0x30] sm:$0xf]  ;;  %v18630_v56 = vld [vmem:[#allocation11 + $0x298] sm:$0xf0]  ;;  %v16415_v11 = vor.u32 %v18675_v42, %v16414_v60 }
 0x4da   :  { %11200 = vmatpush.bf16.msra.mxu2 %v16891_v38  ;;  %v8269_v38 = vpop.f32.mrf.mxu1  ;;  %v17014_v48 = vld [vmem:[#allocation11 + $0x8a0] sm:$0xf]  ;;  %v16235_v53 = vor.u32 %v18630_v56, %v16234_v14  ;;  %v16654_v28 = vld [vmem:[#allocation11 + $0x5d0] sm:$0xf]  ;;  %v18855_v42 = vld [vmem:[#allocation11 + $0x9a0] sm:$0xf0] }
 0x4db   :  { %11228 = vmatpush.bf16.msrb.mxu0 %v17211_v27  ;;  %v16391_v27 = vor.u32 %v18667_v8, %v16388_v50  ;;  %v8281_v24 = vpop.f32.mrf.mxu2  ;;  %v8309_v10 = vpop.f32.mrf.mxu0  ;;  %v8270_v55 = vadd.f32 %v8269_v38, %v8256_v30  ;;  %v17015_v31 = vor.u32 %v18825_v20, %v17014_v48  ;;  %v16394_v30 = vld [vmem:[#allocation11 + $0x3c8] sm:$0xf]  ;;  %v17128_v48 = vld [vmem:[#allocation11 + $0x99c] sm:$0xf0]  ;;  %v18730_v20 = vld [vmem:[#allocation11 + $0x5b8] sm:$0xf0] }
 0x4dc   :  { %11242 = vmatpush.bf16.msrb.mxu1 %v17371_v0  ;;  %v18690_v0 = vld [vmem:[#allocation11 + $0x478] sm:$0xf0]  ;;  %v8282_v13 = vadd.f32 %v8281_v24, %v8268_v43  ;;  %v17134_v60 = vld [vmem:[#allocation11 + $0x990] sm:$0xf] }
 0x4dd   :  { %11159 = vmatpush.bf16.msrb.mxu3 %v16391_v27  ;;  %v15955_v27 = vor.u32 %v18560_v1, %v15954_v15  ;;  %v18815_v15 = vld [vmem:[#allocation11 + $0x860] sm:$0xf0] }
 0x4de   :  { %11201 = vmatpush.bf16.msra.mxu2 %v16871_v22  ;;  %v16274_v22 = vld [vmem:[#allocation11 + $0x2d8] sm:$0xf] }
 0x4df   :  { %11229 = vmatpush.bf16.msrb.mxu0 %v17191_v19  ;;  %v18570_v19 = vld [vmem:[#allocation11 + $0xb8] sm:$0xf0]  ;;  %v8295_v49 = vpop.f32.mrf.mxu3  ;;  %v16275_v33 = vor.u32 %v18640_v57, %v16274_v22  ;;  %v16674_v57 = vld [vmem:[#allocation11 + $0x5f8] sm:$0xf] }
 0x4e0   :  { %11243 = vmatpush.bf16.msrb.mxu1 %v17351_v39  ;;  %v15995_v63 = vor.u32 %v18570_v19, %v15994_v51  ;;  %v8296_v52 = vadd.f32 %v8295_v49, %v8282_v13  ;;  %v15975_v39 = vor.u32 %v18565_v54, %v15974_v25  ;;  %v18550_v51 = vld [vmem:[#allocation11 + $0x18] sm:$0xf0]  ;;  %v16694_v19 = vld [vmem:[#allocation11 + $0x620] sm:$0xf] }
 0x4e1   :  { %11202 = vmatmul.bf16.vlgmr.msra.gmra.mxu2 %v20015_v23  ;;  %v18862_v54 = vld [vmem:[#allocation11 + $0x9dc] sm:$0xf] }
 0x4e2   :  { %11230 = vmatmul.bf16.vlgmr.msrb.gmra.mxu0 %v20063_v41  ;;  %11250 = vmatpush.bf16.msrb.mxu2 %v16055_v37  ;;  %v16454_v37 = vld [vmem:[#allocation11 + $0x440] sm:$0xf]  ;;  %v8310_v50 = vadd.f32 %v8309_v10, %v8296_v52  ;;  %v17168_v10 = vld [vmem:[#allocation11 + $0x9ec] sm:$0xf0] }
 0x4e3   :  { %11278 = vmatpush.bf16.msra.mxu0 %v16375_v44  ;;  %v16474_v44 = vld [vmem:[#allocation11 + $0x468] sm:$0xf]  ;;  %v16455_v8 = vor.u32 %v18685_v16, %v16454_v37  ;;  %v8283_v18 = vpop.f32.mrf.mxu2  ;;  %v8311_v38 = vpop.f32.mrf.mxu0  ;;  %v18740_v37 = vld [vmem:[#allocation11 + $0x608] sm:$0xf0]  ;;  %v17174_v16 = vld [vmem:[#allocation11 + $0x9e0] sm:$0xf] }
 0x4e4   :  { %11292 = vmatpush.bf16.msra.mxu1 %v16535_v34  ;;  %v16475_v26 = vor.u32 %v18690_v0, %v16474_v44  ;;  %v18635_v34 = vld [vmem:[#allocation11 + $0x2c0] sm:$0xf0]  ;;  %v16994_v44 = vld [vmem:[#allocation11 + $0x878] sm:$0xf]  ;;  %v18820_v0 = vld [vmem:[#allocation11 + $0x888] sm:$0xf0] }
 0x4e5   :  { %v16255_v32 = vor.u32 %v18635_v34, %v16254_v59  ;;  %v17171_v59 = vor.u32 %v18862_v54, %v17168_v10  ;;  %v16675_v34 = vor.u32 %v18740_v37, %v16674_v57  ;;  %v17088_v54 = vld [vmem:[#allocation11 + $0x94c] sm:$0xf0]  ;;  %v16594_v10 = vld [vmem:[#allocation11 + $0x558] sm:$0xf]  ;;  %v17094_v57 = vld [vmem:[#allocation11 + $0x940] sm:$0xf] }
 0x4e6   :  { %11251 = vmatpush.bf16.msrb.mxu2 %v16035_v4  ;;  %v8284_v4 = vadd.f32 %v8283_v18, %v8270_v55  ;;  %v18795_v37 = vld [vmem:[#allocation11 + $0x7c0] sm:$0xf0] }
 0x4e7   :  { %11279 = vmatpush.bf16.msra.mxu0 %v16355_v3  ;;  %v8323_v3 = vpop.f32.mrf.mxu1  ;;  %v8297_v46 = vpop.f32.mrf.mxu3 }
 0x4e8   :  { %11293 = vmatpush.bf16.msra.mxu1 %v16515_v2  ;;  %v8324_v40 = vadd.f32 %v8323_v3, %v8310_v50  ;;  %v8298_v2 = vadd.f32 %v8297_v46, %v8284_v4  ;;  %v18865_v3 = vld [vmem:[#allocation11 + $0x9f0] sm:$0xf0]  ;;  %v17154_v4 = vld [vmem:[#allocation11 + $0x9b8] sm:$0xf] }
 0x4e9   :  { %v18857_v50 = vld [vmem:[#allocation11 + $0x9b4] sm:$0xf] }
 0x4ea   :  { %11252 = vmatpush.bf16.msrb.mxu2 %v16015_v35  ;;  %v8312_v43 = vadd.f32 %v8311_v38, %v8298_v2  ;;  %vm8337_vm6 = vcmp.gt.f32.partialorder %v8324_v40, 0.0  ;;  %v17151_v46 = vor.u32 %v18857_v50, %v17148_v17  ;;  %v16934_v38 = vld [vmem:[#allocation11 + $0x800] sm:$0xf]  ;;  %v18840_v50 = vld [vmem:[#allocation11 + $0x928] sm:$0xf0] }
 0x4eb   :  { %11280 = vmatpush.bf16.msra.mxu0 %v16335_v7  ;;  %v18555_v7 = vld [vmem:[#allocation11 + $0x40] sm:$0xf0]  ;;  %v16874_v17 = vld [vmem:[#allocation11 + $0x788] sm:$0xf] }
 0x4ec   :  { %11294 = vmatpush.bf16.msra.mxu1 %v16495_v29  ;;  %v15935_v35 = vor.u32 %v18555_v7, %v15934_v5  ;;  %v18745_v29 = vld [vmem:[#allocation11 + $0x630] sm:$0xf0]  ;;  %v16954_v5 = vld [vmem:[#allocation11 + $0x828] sm:$0xf]  ;;  %v18810_v7 = vld [vmem:[#allocation11 + $0x838] sm:$0xf0] }
 0x4ed   :  { %v16695_v22 = vor.u32 %v18745_v29, %v16694_v19  ;;  %v16955_v2 = vor.u32 %v18810_v7, %v16954_v5  ;;  %v17108_v19 = vld [vmem:[#allocation11 + $0x974] sm:$0xf0]  ;;  %v17114_v29 = vld [vmem:[#allocation11 + $0x968] sm:$0xf]  ;;  %v18832_v7 = vld [vmem:[#allocation11 + $0x8ec] sm:$0xf] }
 0x4ee   :  { %11253 = vmatpush.bf16.msrb.mxu2 %v15995_v63  ;;  %v8357_v63 = vmul.f32 0.01, %v8324_v40 }
 0x4ef   :  { %11281 = vmatpush.bf16.msra.mxu0 %v16315_v36  ;;  %v15914_v36 = vld [vmem:[#allocation11 + $0x8] sm:$0xf]  ;;  %v8325_v24 = vpop.f32.mrf.mxu1 }
 0x4f0   :  { %11295 = vmatpush.bf16.msra.mxu1 %v16475_v26  ;;  %v8326_v13 = vadd.f32 %v8325_v24, %v8312_v43  ;;  %v15915_v25 = vor.u32 %v18550_v51, %v15914_v36  ;;  %v16995_v26 = vor.u32 %v18820_v0, %v16994_v44  ;;  %v17135_v36 = vor.u32 %v18855_v42, %v17134_v60  ;;  %v18847_v51 = vld [vmem:[#allocation11 + $0x964] sm:$0xf]  ;;  %v16614_v24 = vld [vmem:[#allocation11 + $0x580] sm:$0xf]  ;;  %v18850_v44 = vld [vmem:[#allocation11 + $0x978] sm:$0xf0] }
 0x4f1   :  { %v16914_v0 = vld [vmem:[#allocation11 + $0x7d8] sm:$0xf]  ;;  %v18905_v60 = vld [vmem:[#allocation11 + $0xb30] sm:$0xf0] }
 0x4f2   :  { %11254 = vmatpush.bf16.msrb.mxu2 %v15975_v39  ;;  %vm8347_vm7 = vcmp.gt.f32.partialorder %v8326_v13, 0.0  ;;  %v8367_v49 = vmul.f32 0.01, %v8326_v13  ;;  %v8377_v39 = vsel %vm8337_vm6, %v8324_v40, %v8357_v63  ;;  %v16634_v40 = vld [vmem:[#allocation11 + $0x5a8] sm:$0xf] }
 0x4f3   :  { %11282 = vmatpush.bf16.msra.mxu0 %v16295_v62  ;;  %v18670_v62 = vld [vmem:[#allocation11 + $0x3d8] sm:$0xf0]  ;;  %v18800_v63 = vld [vmem:[#allocation11 + $0x7e8] sm:$0xf0] }
 0x4f4   :  { %11296 = vmatpush.bf16.msra.mxu1 %v16455_v8  ;;  %v16395_v52 = vor.u32 %v18670_v62, %v16394_v30  ;;  %v8387_v55 = vsel %vm8347_vm7, %v8326_v13, %v8367_v49  ;;  %v17175_v8 = vor.u32 %v18865_v3, %v17174_v16  ;;  %v17111_v13 = vor.u32 %v18847_v51, %v17108_v19  ;;  %v17034_v51 = vld [vmem:[#allocation11 + $0x8c8] sm:$0xf] }
 0x4f5   :  { %v20089_v1 = vpack.c.bf16 %v8387_v55, %v8377_v39  ;;  %v17115_v62 = vor.u32 %v18850_v44, %v17114_v29  ;;  %v16915_v49 = vor.u32 %v18800_v63, %v16914_v0  ;;  %v18837_v55 = vld [vmem:[#allocation11 + $0x914] sm:$0xf]  ;;  %v17314_v0 = vld [vmem:[#allocation11 + $0xaf8] sm:$0xf]  ;;  %v18900_v63 = vld [vmem:[#allocation11 + $0xb08] sm:$0xf0] }
 0x4f6   :  { %11255 = vmatpush.bf16.msrb.mxu2 %v15955_v27  ;;  %v18735_v27 = vld [vmem:[#allocation11 + $0x5e0] sm:$0xf0]  ;;  %v18625_v29 = vld [vmem:[#allocation11 + $0x270] sm:$0xf0] }
 0x4f7   :  { %11283 = vmatpush.bf16.msra.mxu0 %v16275_v33  ;;  %v16974_v33 = vld [vmem:[#allocation11 + $0x850] sm:$0xf]  ;;  %11104 = vmatmul.bf16.vlgmr.msra.gmra.mxu3 %v20089_v1  ;;  %v16655_v14 = vor.u32 %v18735_v27, %v16654_v28  ;;  %v18790_v28 = vld [vmem:[#allocation11 + $0x798] sm:$0xf0]  ;;  %v18583_v27 = vld [vmem:[#allocation11 + $0x124] sm:$0xf] }
 0x4f8   :  { %11297 = vmatpush.bf16.msra.mxu1 %v16435_v58  ;;  %v16975_v18 = vor.u32 %v18815_v15, %v16974_v33  ;;  %11208 = vmatpush.bf16.msra.mxu3 %v17171_v59  ;;  %v18852_v58 = vld [vmem:[#allocation11 + $0x98c] sm:$0xf]  ;;  %v17068_v33 = vld [vmem:[#allocation11 + $0x924] sm:$0xf0]  ;;  %v16574_v15 = vld [vmem:[#allocation11 + $0x530] sm:$0xf] }
 0x4f9   :  { %11244 = vmatmul.bf16.vlgmr.msrb.gmra.mxu1 %v20089_v1  ;;  %v17131_v43 = vor.u32 %v18852_v58, %v17128_v48  ;;  %v18710_v58 = vld [vmem:[#allocation11 + $0x518] sm:$0xf0]  ;;  %v17054_v48 = vld [vmem:[#allocation11 + $0x8f0] sm:$0xf] }
 0x4fa   :  { %11256 = vmatpush.bf16.msrb.mxu2 %v15935_v35  ;;  %v18805_v35 = vld [vmem:[#allocation11 + $0x810] sm:$0xf0] }
 0x4fb   :  { %11284 = vmatpush.bf16.msra.mxu0 %v16255_v32  ;;  %v18860_v32 = vld [vmem:[#allocation11 + $0x9c8] sm:$0xf0] }
 0x4fc   :  { %11298 = vmatpush.bf16.msra.mxu1 %v16415_v11  ;;  %v17155_v56 = vor.u32 %v18860_v32, %v17154_v4  ;;  %11209 = vmatpush.bf16.msra.mxu3 %v17151_v46  ;;  %v18725_v11 = vld [vmem:[#allocation11 + $0x590] sm:$0xf0]  ;;  %v16056_v4 = vld [vmem:[#allocation11 + $0x134] sm:$0xf0]  ;;  %v17048_v46 = vld [vmem:[#allocation11 + $0x8fc] sm:$0xf0] }
 0x4fd   :  { %v16615_v30 = vor.u32 %v18725_v11, %v16614_v24  ;;  %v17051_v42 = vor.u32 %v18832_v7, %v17048_v46  ;;  %v16214_v11 = vld [vmem:[#allocation11 + $0x260] sm:$0xf]  ;;  %v16176_v7 = vld [vmem:[#allocation11 + $0x224] sm:$0xf0] }
 0x4fe   :  { %11257 = vmatpush.bf16.msrb.mxu2 %v15915_v25  ;;  %v18842_v25 = vld [vmem:[#allocation11 + $0x93c] sm:$0xf] }
 0x4ff   :  { %11285 = vmatpush.bf16.msra.mxu0 %v16235_v53  ;;  %v16635_v53 = vor.u32 %v18730_v20, %v16634_v40  ;;  %v17091_v16 = vor.u32 %v18842_v25, %v17088_v54  ;;  %v16059_v40 = vor.u32 %v18583_v27, %v16056_v4  ;;  %v17334_v20 = vld [vmem:[#allocation11 + $0xb20] sm:$0xf]  ;;  %v18623_v25 = vld [vmem:[#allocation11 + $0x264] sm:$0xf]  ;;  %v16216_v54 = vld [vmem:[#allocation11 + $0x274] sm:$0xf0] }
 0x500   :  { %11299 = vmatpush.bf16.msra.mxu1 %v16395_v52  ;;  %11210 = vmatpush.bf16.msra.mxu3 %v17131_v43  ;;  %v16894_v52 = vld [vmem:[#allocation11 + $0x7b0] sm:$0xf]  ;;  %v17335_v24 = vor.u32 %v18905_v60, %v17334_v20  ;;  %v18890_v27 = vld [vmem:[#allocation11 + $0xab8] sm:$0xf0]  ;;  %v18563_v4 = vld [vmem:[#allocation11 + $0x84] sm:$0xf] }
 0x501   :  { %11258 = vmatmul.bf16.vlgmr.msrb.gmra.mxu2 %v19938_v12  ;;  %v16895_v59 = vor.u32 %v18795_v37, %v16894_v52  ;;  %v16219_v37 = vor.u32 %v18623_v25, %v16216_v54  ;;  %v18885_v20 = vld [vmem:[#allocation11 + $0xa90] sm:$0xf0]  ;;  %v18558_v60 = vld [vmem:[#allocation11 + $0x5c] sm:$0xf]  ;;  %v18600_v25 = vld [vmem:[#allocation11 + $0x1a8] sm:$0xf0] }
 0x502   :  { %11286 = vmatmul.bf16.vlgmr.msra.gmra.mxu0 %v19913_v21  ;;  %11306 = vmatpush.bf16.msra.mxu2 %v16695_v22  ;;  %v18720_v22 = vld [vmem:[#allocation11 + $0x568] sm:$0xf0] }
 0x503   :  { %11334 = vmatpush.bf16.msrb.mxu0 %v17015_v31  ;;  %v16935_v31 = vor.u32 %v18805_v35, %v16934_v38  ;;  %v16595_v3 = vor.u32 %v18720_v22, %v16594_v10  ;;  %v18578_v38 = vld [vmem:[#allocation11 + $0xfc] sm:$0xf]  ;;  %v16036_v35 = vld [vmem:[#allocation11 + $0x10c] sm:$0xf0]  ;;  %v16215_v10 = vor.u32 %v18625_v29, %v16214_v11  ;;  %v17315_v22 = vor.u32 %v18900_v63, %v17314_v0  ;;  %v18880_v11 = vld [vmem:[#allocation11 + $0xa68] sm:$0xf0] }
 0x504   :  { %11348 = vmatpush.bf16.msrb.mxu1 %v17175_v8  ;;  %11211 = vmatpush.bf16.msra.mxu3 %v17111_v13  ;;  %v17074_v8 = vld [vmem:[#allocation11 + $0x918] sm:$0xf]  ;;  %v16039_v44 = vor.u32 %v18578_v38, %v16036_v35  ;;  %v18573_v13 = vld [vmem:[#allocation11 + $0xd4] sm:$0xf]  ;;  %v18608_v38 = vld [vmem:[#allocation11 + $0x1ec] sm:$0xf] }
 0x505   :  { %v17075_v5 = vor.u32 %v18840_v50, %v17074_v8  ;;  %v16174_v8 = vld [vmem:[#allocation11 + $0x210] sm:$0xf]  ;;  %v18615_v50 = vld [vmem:[#allocation11 + $0x220] sm:$0xf0]  ;;  %v16156_v35 = vld [vmem:[#allocation11 + $0x1fc] sm:$0xf0] }
 0x506   :  { %11307 = vmatpush.bf16.msra.mxu2 %v16675_v34  ;;  %v18715_v34 = vld [vmem:[#allocation11 + $0x540] sm:$0xf0]  ;;  %v16175_v46 = vor.u32 %v18615_v50, %v16174_v8  ;;  %v18553_v29 = vld [vmem:[#allocation11 + $0x34] sm:$0xf]  ;;  %v16136_v63 = vld [vmem:[#allocation11 + $0x1d4] sm:$0xf0] }
 0x507   :  { %11335 = vmatpush.bf16.msrb.mxu0 %v16995_v26  ;;  %v18845_v26 = vld [vmem:[#allocation11 + $0x950] sm:$0xf0]  ;;  %11160 = vmatmul.bf16.vlgmr.msrb.gmra.mxu3 %v19944_v45  ;;  %v16575_v32 = vor.u32 %v18715_v34, %v16574_v15  ;;  %v16196_v15 = vld [vmem:[#allocation11 + $0x24c] sm:$0xf0]  ;;  %v18603_v0 = vld [vmem:[#allocation11 + $0x1c4] sm:$0xf] }
 0x508   :  { %11349 = vmatpush.bf16.msrb.mxu1 %v17155_v56  ;;  %v17095_v39 = vor.u32 %v18845_v26, %v17094_v57  ;;  %11212 = vmatpush.bf16.msra.mxu3 %v17091_v16  ;;  %v16554_v56 = vld [vmem:[#allocation11 + $0x508] sm:$0xf]  ;;  %v16194_v57 = vld [vmem:[#allocation11 + $0x238] sm:$0xf]  ;;  %v18620_v26 = vld [vmem:[#allocation11 + $0x248] sm:$0xf0] }
 0x509   :  { %11300 = vmatmul.bf16.vlgmr.msra.gmra.mxu1 %v19944_v45  ;;  %v16555_v43 = vor.u32 %v18710_v58, %v16554_v56  ;;  %v17294_v16 = vld [vmem:[#allocation11 + $0xad0] sm:$0xf]  ;;  %v16154_v56 = vld [vmem:[#allocation11 + $0x1e8] sm:$0xf]  ;;  %v18610_v58 = vld [vmem:[#allocation11 + $0x1f8] sm:$0xf0] }
 0x50a   :  { %11308 = vmatpush.bf16.msra.mxu2 %v16655_v14  ;;  %v16875_v14 = vor.u32 %v18790_v28, %v16874_v17  ;;  %v17194_v8 = vld [vmem:[#allocation11 + $0xa08] sm:$0xf]  ;;  %v18870_v50 = vld [vmem:[#allocation11 + $0xa18] sm:$0xf0] }
 0x50b   :  { %11336 = vmatpush.bf16.msrb.mxu0 %v16975_v18  ;;  %v17071_v18 = vor.u32 %v18837_v55, %v17068_v33  ;;  %v15996_v55 = vld [vmem:[#allocation11 + $0xbc] sm:$0xf0]  ;;  %v18618_v33 = vld [vmem:[#allocation11 + $0x23c] sm:$0xf] }
 0x50c   :  { %11350 = vmatpush.bf16.msrb.mxu1 %v17135_v36  ;;  %v17028_v36 = vld [vmem:[#allocation11 + $0x8d4] sm:$0xf0]  ;;  %v16199_v28 = vor.u32 %v18618_v33, %v16196_v15  ;;  %v16094_v33 = vld [vmem:[#allocation11 + $0x170] sm:$0xf]  ;;  %v18595_v15 = vld [vmem:[#allocation11 + $0x180] sm:$0xf0] }
 0x50d   :  { %11213 = vmatpush.bf16.msra.mxu3 %v17071_v18  ;;  %v17274_v18 = vld [vmem:[#allocation11 + $0xaa8] sm:$0xf] }
 0x50e   :  { %11309 = vmatpush.bf16.msra.mxu2 %v16635_v53  ;;  %v18827_v53 = vld [vmem:[#allocation11 + $0x8c4] sm:$0xf] }
 0x50f   :  { %11337 = vmatpush.bf16.msrb.mxu0 %v16955_v2  ;;  %v18835_v2 = vld [vmem:[#allocation11 + $0x900] sm:$0xf0] }
 0x510   :  { %11351 = vmatpush.bf16.msrb.mxu1 %v17115_v62  ;;  %v17055_v19 = vor.u32 %v18835_v2, %v17054_v48  ;;  %v16016_v62 = vld [vmem:[#allocation11 + $0xe4] sm:$0xf0]  ;;  %v17254_v2 = vld [vmem:[#allocation11 + $0xa80] sm:$0xf] }
 0x511   :  { %11214 = vmatpush.bf16.msra.mxu3 %v17051_v42  ;;  %v16019_v52 = vor.u32 %v18573_v13, %v16016_v62  ;;  %v15956_v42 = vld [vmem:[#allocation11 + $0x6c] sm:$0xf0]  ;;  %v16114_v62 = vld [vmem:[#allocation11 + $0x198] sm:$0xf] }
 0x512   :  { %11310 = vmatpush.bf16.msra.mxu2 %v16615_v30  ;;  %v17031_v30 = vor.u32 %v18827_v53, %v17028_v36  ;;  %v17255_v53 = vor.u32 %v18885_v20, %v17254_v2  ;;  %v16134_v36 = vld [vmem:[#allocation11 + $0x1c0] sm:$0xf] }
 0x513   :  { %11338 = vmatpush.bf16.msrb.mxu0 %v16935_v31  ;;  %v18830_v31 = vld [vmem:[#allocation11 + $0x8d8] sm:$0xf0]  ;;  %v16076_v2 = vld [vmem:[#allocation11 + $0x15c] sm:$0xf0] }
 0x514   :  { %11352 = vmatpush.bf16.msrb.mxu1 %v17095_v39  ;;  %v18568_v39 = vld [vmem:[#allocation11 + $0xac] sm:$0xf]  ;;  %v16854_v20 = vld [vmem:[#allocation11 + $0x760] sm:$0xf] }
 0x515   :  { %11215 = vmatpush.bf16.msra.mxu3 %v17031_v30  ;;  %v15999_v17 = vor.u32 %v18568_v39, %v15996_v55  ;;  %v16696_v39 = vld [vmem:[#allocation11 + $0x634] sm:$0xf0] }
 0x516   :  { %11311 = vmatpush.bf16.msra.mxu2 %v16595_v3  ;;  %v18895_v3 = vld [vmem:[#allocation11 + $0xae0] sm:$0xf0] }
 0x517   :  { %11339 = vmatpush.bf16.msrb.mxu0 %v16915_v49  ;;  %v17035_v49 = vor.u32 %v18830_v31, %v17034_v51  ;;  %v17295_v34 = vor.u32 %v18895_v3, %v17294_v16  ;;  %v18605_v51 = vld [vmem:[#allocation11 + $0x1d0] sm:$0xf0]  ;;  %v17234_v31 = vld [vmem:[#allocation11 + $0xa58] sm:$0xf]  ;;  %v16115_v16 = vor.u32 %v18600_v25, %v16114_v62  ;;  %v18743_v3 = vld [vmem:[#allocation11 + $0x624] sm:$0xf] }
 0x518   :  { %11353 = vmatpush.bf16.msrb.mxu1 %v17075_v5  ;;  %11216 = vmatmul.bf16.vlgmr.msra.gmra.mxu3 %v20038_v61  ;;  %v18613_v5 = vld [vmem:[#allocation11 + $0x214] sm:$0xf]  ;;  %v16135_v13 = vor.u32 %v18605_v51, %v16134_v36  ;;  %v17235_v30 = vor.u32 %v18880_v11, %v17234_v31  ;;  %v16656_v36 = vld [vmem:[#allocation11 + $0x5e4] sm:$0xf0]  ;;  %v18783_v51 = vld [vmem:[#allocation11 + $0x764] sm:$0xf] }
 0x519   :  { %11264 = vmatpush.bf16.msrb.mxu3 %v16215_v10  ;;  %v16139_v10 = vor.u32 %v18603_v0, %v16136_v63  ;;  %v18728_v62 = vld [vmem:[#allocation11 + $0x5ac] sm:$0xf]  ;;  %v16636_v25 = vld [vmem:[#allocation11 + $0x5bc] sm:$0xf0] }
 0x51a   :  { %11312 = vmatpush.bf16.msra.mxu2 %v16575_v32  ;;  %v15976_v32 = vld [vmem:[#allocation11 + $0x94] sm:$0xf0] }
 0x51b   :  { %11340 = vmatpush.bf16.msrb.mxu0 %v16895_v59  ;;  %v16195_v59 = vor.u32 %v18620_v26, %v16194_v57  ;;  %v15979_v48 = vor.u32 %v18563_v4, %v15976_v32  ;;  %v18548_v57 = vld [vmem:[#allocation11 + $0xc] sm:$0xf]  ;;  %v15916_v26 = vld [vmem:[#allocation11 + $0x1c] sm:$0xf0]  ;;  %v16376_v4 = vld [vmem:[#allocation11 + $0x3b4] sm:$0xf0]  ;;  %v16095_v32 = vor.u32 %v18595_v15, %v16094_v33 }
 0x51c   :  { %11354 = vmatpush.bf16.msrb.mxu1 %v17055_v19  ;;  %v15959_v19 = vor.u32 %v18558_v60, %v15956_v42  ;;  %v18785_v60 = vld [vmem:[#allocation11 + $0x770] sm:$0xf0]  ;;  %v16816_v15 = vld [vmem:[#allocation11 + $0x724] sm:$0xf0] }
 0x51d   :  { %11265 = vmatpush.bf16.msrb.mxu3 %v16195_v59  ;;  %v15919_v59 = vor.u32 %v18548_v57, %v15916_v26  ;;  %v16814_v57 = vld [vmem:[#allocation11 + $0x710] sm:$0xf]  ;;  %v18775_v26 = vld [vmem:[#allocation11 + $0x720] sm:$0xf0]  ;;  %v18773_v33 = vld [vmem:[#allocation11 + $0x714] sm:$0xf] }
 0x51e   :  { %11313 = vmatpush.bf16.msra.mxu2 %v16555_v43  ;;  %v16155_v43 = vor.u32 %v18610_v58, %v16154_v56  ;;  %v18590_v56 = vld [vmem:[#allocation11 + $0x158] sm:$0xf0]  ;;  %v18588_v58 = vld [vmem:[#allocation11 + $0x14c] sm:$0xf] }
 0x51f   :  { %11341 = vmatpush.bf16.msrb.mxu0 %v16875_v14  ;;  %v17275_v14 = vor.u32 %v18890_v27, %v17274_v18  ;;  %v16096_v18 = vld [vmem:[#allocation11 + $0x184] sm:$0xf0]  ;;  %v18663_v27 = vld [vmem:[#allocation11 + $0x3a4] sm:$0xf]  ;;  %v16079_v31 = vor.u32 %v18588_v58, %v16076_v2  ;;  %v18765_v58 = vld [vmem:[#allocation11 + $0x6d0] sm:$0xf0] }
 0x520   :  { %11355 = vmatpush.bf16.msrb.mxu1 %v17035_v49  ;;  %v17214_v49 = vld [vmem:[#allocation11 + $0xa30] sm:$0xf]  ;;  %v18638_v2 = vld [vmem:[#allocation11 + $0x2dc] sm:$0xf] }
 0x521   :  { %11314 = vmatmul.bf16.vlgmr.msra.gmra.mxu2 %v20032_v9  ;;  %11266 = vmatpush.bf16.msrb.mxu3 %v16175_v46  ;;  %v17195_v46 = vor.u32 %v18870_v50, %v17194_v8  ;;  %v16794_v8 = vld [vmem:[#allocation11 + $0x6e8] sm:$0xf]  ;;  %v18770_v50 = vld [vmem:[#allocation11 + $0x6f8] sm:$0xf0] }
 0x522   :  { %11342 = vmatmul.bf16.vlgmr.msrb.gmra.mxu0 %v20015_v23  ;;  %11362 = vmatpush.bf16.msrb.mxu2 %v17335_v24  ;;  %v16159_v24 = vor.u32 %v18608_v38, %v16156_v35  ;;  %v18658_v38 = vld [vmem:[#allocation11 + $0x37c] sm:$0xf]  ;;  %v16356_v35 = vld [vmem:[#allocation11 + $0x38c] sm:$0xf0] }
 0x523   :  { %11390 = vmatpush.bf16.msra.mxu0 %v16059_v40  ;;  %11356 = vmatmul.bf16.vlgmr.msrb.gmra.mxu1 %v20038_v61  ;;  %v16179_v40 = vor.u32 %v18613_v5, %v16176_v7  ;;  %v18738_v5 = vld [vmem:[#allocation11 + $0x5fc] sm:$0xf]  ;;  %v16676_v7 = vld [vmem:[#allocation11 + $0x60c] sm:$0xf0]  ;;  %v16359_v11 = vor.u32 %v18658_v38, %v16356_v35  ;;  %v18763_v38 = vld [vmem:[#allocation11 + $0x6c4] sm:$0xf] }
 0x524   :  { %11404 = vmatpush.bf16.msra.mxu1 %v16219_v37  ;;  %v16116_v37 = vld [vmem:[#allocation11 + $0x1ac] sm:$0xf0]  ;;  %v16679_v42 = vor.u32 %v18738_v5, %v16676_v7  ;;  %v18768_v5 = vld [vmem:[#allocation11 + $0x6ec] sm:$0xf]  ;;  %v16796_v7 = vld [vmem:[#allocation11 + $0x6fc] sm:$0xf0] }
 0x525   :  { %11267 = vmatpush.bf16.msrb.mxu3 %v16155_v43  ;;  %v18733_v43 = vld [vmem:[#allocation11 + $0x5d4] sm:$0xf]  ;;  %v16776_v35 = vld [vmem:[#allocation11 + $0x6d4] sm:$0xf0] }
 0x526   :  { %11363 = vmatpush.bf16.msrb.mxu2 %v17315_v22  ;;  %v18875_v22 = vld [vmem:[#allocation11 + $0xa40] sm:$0xf0]  ;;  %v16659_v0 = vor.u32 %v18733_v43, %v16656_v36  ;;  %v16754_v36 = vld [vmem:[#allocation11 + $0x698] sm:$0xf] }
 0x527   :  { %11391 = vmatpush.bf16.msra.mxu0 %v16039_v44  ;;  %v15936_v44 = vld [vmem:[#allocation11 + $0x44] sm:$0xf0]  ;;  %v17215_v55 = vor.u32 %v18875_v22, %v17214_v49 }
 0x528   :  { %11405 = vmatpush.bf16.msra.mxu1 %v16199_v28  ;;  %v15939_v54 = vor.u32 %v18553_v29, %v15936_v44  ;;  %v16699_v28 = vor.u32 %v18743_v3, %v16696_v39  ;;  %v16834_v29 = vld [vmem:[#allocation11 + $0x738] sm:$0xf]  ;;  %v18780_v44 = vld [vmem:[#allocation11 + $0x748] sm:$0xf0]  ;;  %v16316_v3 = vld [vmem:[#allocation11 + $0x33c] sm:$0xf0] }
 0x529   :  { %11268 = vmatpush.bf16.msrb.mxu3 %v16135_v13  ;;  %v18653_v13 = vld [vmem:[#allocation11 + $0x354] sm:$0xf]  ;;  %v16835_v49 = vor.u32 %v18780_v44, %v16834_v29  ;;  %v18723_v39 = vld [vmem:[#allocation11 + $0x584] sm:$0xf]  ;;  %v18708_v29 = vld [vmem:[#allocation11 + $0x50c] sm:$0xf] }
 0x52a   :  { %11364 = vmatpush.bf16.msrb.mxu2 %v17295_v34  ;;  %v16556_v44 = vld [vmem:[#allocation11 + $0x51c] sm:$0xf0] }
 0x52b   :  { %11392 = vmatpush.bf16.msra.mxu0 %v16019_v52  ;;  %v18598_v52 = vld [vmem:[#allocation11 + $0x19c] sm:$0xf] }
 0x52c   :  { %11406 = vmatpush.bf16.msra.mxu1 %v16179_v40  ;;  %v16119_v34 = vor.u32 %v18598_v52, %v16116_v37  ;;  %v16379_v40 = vor.u32 %v18663_v27, %v16376_v4  ;;  %v16639_v52 = vor.u32 %v18728_v62, %v16636_v25  ;;  %v16296_v27 = vld [vmem:[#allocation11 + $0x314] sm:$0xf0]  ;;  %v18718_v4 = vld [vmem:[#allocation11 + $0x55c] sm:$0xf] }
 0x52d   :  { %11269 = vmatpush.bf16.msrb.mxu3 %v16115_v16  ;;  %v18648_v16 = vld [vmem:[#allocation11 + $0x32c] sm:$0xf]  ;;  %v17336_v62 = vld [vmem:[#allocation11 + $0xb34] sm:$0xf0] }
 0x52e   :  { %11365 = vmatpush.bf16.msrb.mxu2 %v17275_v14  ;;  %v16074_v14 = vld [vmem:[#allocation11 + $0x148] sm:$0xf] }
 0x52f   :  { %11393 = vmatpush.bf16.msra.mxu0 %v15999_v17  ;;  %v18593_v17 = vld [vmem:[#allocation11 + $0x174] sm:$0xf] }
 0x530   :  { %11407 = vmatpush.bf16.msra.mxu1 %v16159_v24  ;;  %v16855_v24 = vor.u32 %v18785_v60, %v16854_v20  ;;  %v16276_v20 = vld [vmem:[#allocation11 + $0x2ec] sm:$0xf0]  ;;  %v18713_v60 = vld [vmem:[#allocation11 + $0x534] sm:$0xf] }
 0x531   :  { %11270 = vmatpush.bf16.msrb.mxu3 %v16095_v32  ;;  %v16596_v32 = vld [vmem:[#allocation11 + $0x56c] sm:$0xf0] }
 0x532   :  { %11366 = vmatpush.bf16.msrb.mxu2 %v17255_v53  ;;  %v16075_v53 = vor.u32 %v18590_v56, %v16074_v14  ;;  %v16774_v56 = vld [vmem:[#allocation11 + $0x6c0] sm:$0xf] }
 0x533   :  { %11394 = vmatpush.bf16.msra.mxu0 %v15979_v48  ;;  %v16099_v48 = vor.u32 %v18593_v17, %v16096_v18  ;;  %v18643_v18 = vld [vmem:[#allocation11 + $0x304] sm:$0xf]  ;;  %v16775_v43 = vor.u32 %v18765_v58, %v16774_v56  ;;  %v17296_v56 = vld [vmem:[#allocation11 + $0xae4] sm:$0xf0] }
 0x534   :  { %11408 = vmatpush.bf16.msra.mxu1 %v16139_v10  ;;  %v16836_v10 = vld [vmem:[#allocation11 + $0x74c] sm:$0xf0]  ;;  %v16299_v14 = vor.u32 %v18643_v18, %v16296_v27  ;;  %v16716_v18 = vld [vmem:[#allocation11 + $0x65c] sm:$0xf0]  ;;  %v18943_v58 = vld [vmem:[#allocation11 + $0xc64] sm:$0xf] }
 0x535   :  { %11271 = vmatpush.bf16.msrb.mxu3 %v16075_v53  ;;  %v16279_v53 = vor.u32 %v18638_v2, %v16276_v20  ;;  %v17494_v27 = vld [vmem:[#allocation11 + $0xc60] sm:$0xf] }
 0x536   :  { %11367 = vmatpush.bf16.msrb.mxu2 %v17235_v30  ;;  %v16336_v30 = vld [vmem:[#allocation11 + $0x364] sm:$0xf0] }
 0x537   :  { %11395 = vmatpush.bf16.msra.mxu0 %v15959_v19  ;;  %v16856_v19 = vld [vmem:[#allocation11 + $0x774] sm:$0xf0]  ;;  %v16339_v22 = vor.u32 %v18653_v13, %v16336_v30  ;;  %v18903_v30 = vld [vmem:[#allocation11 + $0xb24] sm:$0xf] }
 0x538   :  { %11409 = vmatpush.bf16.msra.mxu1 %v16119_v34  ;;  %v16859_v63 = vor.u32 %v18783_v51, %v16856_v19  ;;  %11272 = vmatmul.bf16.vlgmr.msrb.gmra.mxu3 %v20013_v47  ;;  %v16319_v34 = vor.u32 %v18648_v16, %v16316_v3  ;;  %v18760_v51 = vld [vmem:[#allocation11 + $0x6a8] sm:$0xf0]  ;;  %v16736_v16 = vld [vmem:[#allocation11 + $0x684] sm:$0xf0]  ;;  %v18823_v3 = vld [vmem:[#allocation11 + $0x8a4] sm:$0xf] }
 0x539   :  { %11320 = vmatpush.bf16.msra.mxu3 %v16855_v24  ;;  %v16779_v24 = vor.u32 %v18763_v38, %v16776_v35  ;;  %v16755_v13 = vor.u32 %v18760_v51, %v16754_v36  ;;  %v18940_v38 = vld [vmem:[#allocation11 + $0xc48] sm:$0xf0]  ;;  %v16976_v36 = vld [vmem:[#allocation11 + $0x864] sm:$0xf0] }
 0x53a   :  { %11368 = vmatpush.bf16.msrb.mxu2 %v17215_v55  ;;  %v16616_v55 = vld [vmem:[#allocation11 + $0x594] sm:$0xf0]  ;;  %v18888_v51 = vld [vmem:[#allocation11 + $0xaac] sm:$0xf] }
 0x53b   :  { %11396 = vmatpush.bf16.msra.mxu0 %v15939_v54  ;;  %v18778_v54 = vld [vmem:[#allocation11 + $0x73c] sm:$0xf]  ;;  %v16619_v17 = vor.u32 %v18723_v39, %v16616_v55  ;;  %v17016_v39 = vld [vmem:[#allocation11 + $0x8b4] sm:$0xf0] }
 0x53c   :  { %11410 = vmatpush.bf16.msra.mxu1 %v16099_v48  ;;  %v16839_v37 = vor.u32 %v18778_v54, %v16836_v10  ;;  %v16599_v48 = vor.u32 %v18718_v4, %v16596_v32  ;;  %v16734_v54 = vld [vmem:[#allocation11 + $0x670] sm:$0xf]  ;;  %v18755_v10 = vld [vmem:[#allocation11 + $0x680] sm:$0xf0]  ;;  %v18945_v4 = vld [vmem:[#allocation11 + $0xc70] sm:$0xf0] }
 0x53d   :  { %11321 = vmatpush.bf16.msra.mxu3 %v16835_v49  ;;  %v16559_v49 = vor.u32 %v18708_v29, %v16556_v44  ;;  %v16735_v55 = vor.u32 %v18755_v10, %v16734_v54  ;;  %v17495_v2 = vor.u32 %v18945_v4, %v17494_v27  ;;  %v17454_v44 = vld [vmem:[#allocation11 + $0xc10] sm:$0xf]  ;;  %v17256_v54 = vld [vmem:[#allocation11 + $0xa94] sm:$0xf0]  ;;  %v18933_v10 = vld [vmem:[#allocation11 + $0xc14] sm:$0xf] }
 0x53e   :  { %11369 = vmatpush.bf16.msrb.mxu2 %v17195_v46  ;;  %v16795_v46 = vor.u32 %v18770_v50, %v16794_v8  ;;  %v18750_v8 = vld [vmem:[#allocation11 + $0x658] sm:$0xf0]  ;;  %v18748_v50 = vld [vmem:[#allocation11 + $0x64c] sm:$0xf] }
 0x53f   :  { %11397 = vmatpush.bf16.msra.mxu0 %v15919_v59  ;;  %v16815_v59 = vor.u32 %v18775_v26, %v16814_v57  ;;  %v18628_v57 = vld [vmem:[#allocation11 + $0x28c] sm:$0xf]  ;;  %v16236_v26 = vld [vmem:[#allocation11 + $0x29c] sm:$0xf0]  ;;  %v16719_v20 = vor.u32 %v18748_v50, %v16716_v18  ;;  %v17236_v50 = vld [vmem:[#allocation11 + $0xa6c] sm:$0xf0] }
 0x540   :  { %11411 = vmatpush.bf16.msra.mxu1 %v16079_v31  ;;  %v18633_v31 = vld [vmem:[#allocation11 + $0x2b4] sm:$0xf] }
 0x541   :  { %11370 = vmatmul.bf16.vlgmr.msrb.gmra.mxu2 %v20063_v41  ;;  %11322 = vmatpush.bf16.msra.mxu3 %v16815_v59  ;;  %v16239_v59 = vor.u32 %v18628_v57, %v16236_v26  ;;  %v20113_v26 = vld [vmem:[#allocation13] sm:$0x1f] }
 0x542   :  { %11398 = vmatmul.bf16.vlgmr.msra.gmra.mxu0 %v19938_v12  ;;  %11418 = vmatpush.bf16.msra.mxu2 %v16379_v40  ;;  %v16799_v40 = vor.u32 %v18768_v5, %v16796_v7  ;;  %v18818_v5 = vld [vmem:[#allocation11 + $0x87c] sm:$0xf]  ;;  %v16996_v7 = vld [vmem:[#allocation11 + $0x88c] sm:$0xf0]  ;;  %v8880_v27 = vperm.slane %v20113_v26, 0 }
 0x543   :  { %11446 = vmatpush.bf16.msrb.mxu0 %v16699_v28  ;;  %11412 = vmatmul.bf16.vlgmr.msra.gmra.mxu1 %v20013_v47  ;;  %v16819_v28 = vor.u32 %v18773_v33, %v16816_v15  ;;  %v18898_v33 = vld [vmem:[#allocation11 + $0xafc] sm:$0xf]  ;;  %v17316_v15 = vld [vmem:[#allocation11 + $0xb0c] sm:$0xf0] }
 0x544   :  { %11460 = vmatpush.bf16.msrb.mxu1 %v16859_v63  ;;  %v16756_v63 = vld [vmem:[#allocation11 + $0x6ac] sm:$0xf0]  ;;  %v17319_v32 = vor.u32 %v18898_v33, %v17316_v15  ;;  %v18803_v15 = vld [vmem:[#allocation11 + $0x804] sm:$0xf] }
 0x545   :  { %11323 = vmatpush.bf16.msra.mxu3 %v16795_v46  ;;  %v18893_v46 = vld [vmem:[#allocation11 + $0xad4] sm:$0xf] }
 0x546   :  { %11419 = vmatpush.bf16.msra.mxu2 %v16359_v11  ;;  %v16256_v11 = vld [vmem:[#allocation11 + $0x2c4] sm:$0xf0]  ;;  %v17299_v35 = vor.u32 %v18893_v46, %v17296_v56  ;;  %v16916_v56 = vld [vmem:[#allocation11 + $0x7ec] sm:$0xf0] }
 0x547   :  { %11447 = vmatpush.bf16.msrb.mxu0 %v16679_v42  ;;  %v16576_v42 = vld [vmem:[#allocation11 + $0x544] sm:$0xf0]  ;;  %v16259_v25 = vor.u32 %v18633_v31, %v16256_v11  ;;  %v17476_v31 = vld [vmem:[#allocation11 + $0xc4c] sm:$0xf0] }
 0x548   :  { %11461 = vmatpush.bf16.msrb.mxu1 %v16839_v37  ;;  %v16579_v19 = vor.u32 %v18713_v60, %v16576_v42  ;;  %v17339_v37 = vor.u32 %v18903_v30, %v17336_v62  ;;  %v16999_v60 = vor.u32 %v18818_v5, %v16996_v7  ;;  %v17474_v42 = vld [vmem:[#allocation11 + $0xc38] sm:$0xf]  ;;  %v18808_v30 = vld [vmem:[#allocation11 + $0x82c] sm:$0xf]  ;;  %v16956_v62 = vld [vmem:[#allocation11 + $0x83c] sm:$0xf0] }
 0x549   :  { %11324 = vmatpush.bf16.msra.mxu3 %v16775_v43  ;;  %v17475_v11 = vor.u32 %v18940_v38, %v17474_v42  ;;  %v18925_v5 = vld [vmem:[#allocation11 + $0xbd0] sm:$0xf0]  ;;  %v17394_v38 = vld [vmem:[#allocation11 + $0xb98] sm:$0xf] }
 0x54a   :  { %11420 = vmatpush.bf16.msra.mxu2 %v16339_v22 }
 0x54b   :  { %11448 = vmatpush.bf16.msrb.mxu0 %v16659_v0  ;;  %v18758_v0 = vld [vmem:[#allocation11 + $0x69c] sm:$0xf] }
 0x54c   :  { %11462 = vmatpush.bf16.msrb.mxu1 %v16819_v28  ;;  %v16759_v22 = vor.u32 %v18758_v0, %v16756_v63  ;;  %v17019_v28 = vor.u32 %v18823_v3, %v17016_v39  ;;  %v18935_v0 = vld [vmem:[#allocation11 + $0xc20] sm:$0xf0]  ;;  %v20115_v3 = vpop.f32.mrf.mxu1 }
 0x54d   :  { %11325 = vmatpush.bf16.msra.mxu3 %v16755_v13  ;;  %v17455_v57 = vor.u32 %v18935_v0, %v17454_v44  ;;  %v18918_v44 = vld [vmem:[#allocation11 + $0xb9c] sm:$0xf]  ;;  %v17396_v0 = vld [vmem:[#allocation11 + $0xbac] sm:$0xf0] }
 0x54e   :  { %11421 = vmatpush.bf16.msra.mxu2 %v16319_v34  ;;  %v16714_v34 = vld [vmem:[#allocation11 + $0x648] sm:$0xf] }
 0x54f   :  { %11449 = vmatpush.bf16.msrb.mxu0 %v16639_v52  ;;  %v18753_v52 = vld [vmem:[#allocation11 + $0x674] sm:$0xf] }
 0x550   :  { %11463 = vmatpush.bf16.msrb.mxu1 %v16799_v40  ;;  %v20105_v40 = vpop.f32.mrf.mxu2 }
 0x551   :  { %11326 = vmatpush.bf16.msra.mxu3 %v16735_v55 }
 0x552   :  { %11422 = vmatpush.bf16.msra.mxu2 %v16299_v14  ;;  %v16715_v14 = vor.u32 %v18750_v8, %v16714_v34  ;;  %v18878_v34 = vld [vmem:[#allocation11 + $0xa5c] sm:$0xf]  ;;  %v10993_v8 = vpop.f32.mrf.mxu3 }
 0x553   :  { %11450 = vmatpush.bf16.msrb.mxu0 %v16619_v17  ;;  %v16739_v17 = vor.u32 %v18753_v52, %v16736_v16  ;;  %v16959_v52 = vor.u32 %v18808_v30, %v16956_v62  ;;  %v18930_v16 = vld [vmem:[#allocation11 + $0xbf8] sm:$0xf0]  ;;  %v17239_v7 = vor.u32 %v18878_v34, %v17236_v50  ;;  %v16382_v30 = vld [vmem:[#allocation11 + $0x3a8] sm:$0xf] }
 0x554   :  { %11464 = vmatpush.bf16.msrb.mxu1 %v16779_v24  ;;  %v18938_v24 = vld [vmem:[#allocation11 + $0xc3c] sm:$0xf] }
 0x555   :  { %11327 = vmatpush.bf16.msra.mxu3 %v16715_v14  ;;  %v17479_v13 = vor.u32 %v18938_v24, %v17476_v31  ;;  %v18798_v14 = vld [vmem:[#allocation11 + $0x7dc] sm:$0xf]  ;;  %v16896_v24 = vld [vmem:[#allocation11 + $0x7c4] sm:$0xf0]  ;;  %v18868_v31 = vld [vmem:[#allocation11 + $0xa0c] sm:$0xf] }
 0x556   :  { %11423 = vmatpush.bf16.msra.mxu2 %v16279_v53  ;;  %v18813_v53 = vld [vmem:[#allocation11 + $0x854] sm:$0xf]  ;;  %v16919_v42 = vor.u32 %v18798_v14, %v16916_v56  ;;  %v18666_v62 = vld [vmem:[#allocation11 + $0x3b8] sm:$0xf0]  ;;  %v17356_v56 = vld [vmem:[#allocation11 + $0xb5c] sm:$0xf0] }
 0x557   :  { %11451 = vmatpush.bf16.msrb.mxu0 %v16599_v48  ;;  %v17496_v48 = vld [vmem:[#allocation11 + $0xc74] sm:$0xf0]  ;;  %v16979_v29 = vor.u32 %v18813_v53, %v16976_v36  ;;  %v18586_v34 = vld [vmem:[#allocation11 + $0x138] sm:$0xf0] }
 0x558   :  { %11465 = vmatpush.bf16.msrb.mxu1 %v16759_v22  ;;  %v17499_v43 = vor.u32 %v18943_v58, %v17496_v48  ;;  %11328 = vmatmul.bf16.vlgmr.msra.gmra.mxu3 %v20058_v6  ;;  %v20110_v22 = vpop.f32.mrf.mxu0  ;;  %v20117_v39 = vpop.f32.mrf.mxu2  ;;  %v18873_v58 = vld [vmem:[#allocation11 + $0xa34] sm:$0xf]  ;;  %v17216_v48 = vld [vmem:[#allocation11 + $0xa44] sm:$0xf0] }
 0x559   :  { %11376 = vmatpush.bf16.msrb.mxu3 %v17495_v2  ;;  %v18923_v2 = vld [vmem:[#allocation11 + $0xbc4] sm:$0xf]  ;;  %v17219_v36 = vor.u32 %v18873_v58, %v17216_v48  ;;  %v16536_v48 = vld [vmem:[#allocation11 + $0x4f4] sm:$0xf0] }
 0x55a   :  { %11424 = vmatpush.bf16.msra.mxu2 %v16259_v25  ;;  %v18883_v25 = vld [vmem:[#allocation11 + $0xa84] sm:$0xf] }
 0x55b   :  { %11452 = vmatpush.bf16.msrb.mxu0 %v16579_v19  ;;  %v17276_v19 = vld [vmem:[#allocation11 + $0xabc] sm:$0xf0]  ;;  %v17259_v55 = vor.u32 %v18883_v25, %v17256_v54  ;;  %v10995_v54 = vpop.f32.mrf.mxu3  ;;  %v18703_v58 = vld [vmem:[#allocation11 + $0x4e4] sm:$0xf] }
 0x55c   :  { %11466 = vmatpush.bf16.msrb.mxu1 %v16739_v17  ;;  %v17279_v63 = vor.u32 %v18888_v51, %v17276_v19  ;;  %v18928_v17 = vld [vmem:[#allocation11 + $0xbec] sm:$0xf]  ;;  %v18793_v19 = vld [vmem:[#allocation11 + $0x7b4] sm:$0xf] }
 0x55d   :  { %11377 = vmatpush.bf16.msrb.mxu3 %v17475_v11  ;;  %v10980_v11 = vadd.f32 %v20105_v40, %v8880_v27  ;;  %v18788_v40 = vld [vmem:[#allocation11 + $0x78c] sm:$0xf] }
 0x55e   :  { %11425 = vmatpush.bf16.msra.mxu2 %v16239_v59  ;;  %v16936_v59 = vld [vmem:[#allocation11 + $0x814] sm:$0xf0] }
 0x55f   :  { %11453 = vmatpush.bf16.msrb.mxu0 %v16559_v49  ;;  %v17456_v49 = vld [vmem:[#allocation11 + $0xc24] sm:$0xf0]  ;;  %v16939_v4 = vor.u32 %v18803_v15, %v16936_v59  ;;  %v10994_v25 = vadd.f32 %v10993_v8, %v10980_v11  ;;  %v18661_v8 = vld [vmem:[#allocation11 + $0x390] sm:$0xf0] }
 0x560   :  { %11467 = vmatpush.bf16.msrb.mxu1 %v16719_v20  ;;  %v17459_v33 = vor.u32 %v18933_v10, %v17456_v49  ;;  %v17416_v20 = vld [vmem:[#allocation11 + $0xbd4] sm:$0xf0]  ;;  %v20122_v53 = vpop.f32.mrf.mxu2  ;;  %v16899_v10 = vor.u32 %v18793_v19, %v16896_v24  ;;  %v17374_v49 = vld [vmem:[#allocation11 + $0xb70] sm:$0xf]  ;;  %v17376_v15 = vld [vmem:[#allocation11 + $0xb84] sm:$0xf0] }
 0x561   :  { %11426 = vmatmul.bf16.vlgmr.msra.gmra.mxu2 %v19913_v21  ;;  %11378 = vmatpush.bf16.msrb.mxu3 %v17455_v57  ;;  %v17419_v51 = vor.u32 %v18923_v2, %v17416_v20  ;;  %v18915_v57 = vld [vmem:[#allocation11 + $0xb80] sm:$0xf0]  ;;  %v16062_v59 = vld [vmem:[#allocation11 + $0x128] sm:$0xf]  ;;  %v16042_v20 = vld [vmem:[#allocation11 + $0x100] sm:$0xf] }
 0x562   :  { %11454 = vmatmul.bf16.vlgmr.msrb.gmra.mxu0 %v20032_v9  ;;  %11474 = vmatpush.bf16.msrb.mxu2 %v17019_v28  ;;  %v17436_v28 = vld [vmem:[#allocation11 + $0xbfc] sm:$0xf0]  ;;  %v17375_v50 = vor.u32 %v18915_v57, %v17374_v49  ;;  %v16063_v14 = vor.u32 %v18586_v34, %v16062_v59  ;;  %v16542_v19 = vld [vmem:[#allocation11 + $0x4e8] sm:$0xf]  ;;  %v18706_v24 = vld [vmem:[#allocation11 + $0x4f8] sm:$0xf0] }
 0x563   :  { %11502 = vmatpush.bf16.msra.mxu0 %v17339_v37  ;;  %11468 = vmatmul.bf16.vlgmr.msrb.gmra.mxu1 %v20058_v6  ;;  %v17434_v37 = vld [vmem:[#allocation11 + $0xbe8] sm:$0xf]  ;;  %v17439_v46 = vor.u32 %v18928_v17, %v17436_v28  ;;  %v16362_v17 = vld [vmem:[#allocation11 + $0x380] sm:$0xf]  ;;  %v11008_v28 = vadd.f32 %v20110_v22, %v10994_v25  ;;  %v10982_v22 = vadd.f32 %v20117_v39, %v8880_v27  ;;  %v11049_v11 = vpop.f32.mrf.mxu3  ;;  %v16022_v25 = vld [vmem:[#allocation11 + $0xd8] sm:$0xf] }
 0x564   :  { %11516 = vmatpush.bf16.msra.mxu1 %v17499_v43  ;;  %v17435_v18 = vor.u32 %v18930_v16, %v17434_v37  ;;  %v20120_v43 = vpop.f32.mrf.mxu0  ;;  %v17399_v37 = vor.u32 %v18918_v44, %v17396_v0  ;;  %v16876_v16 = vld [vmem:[#allocation11 + $0x79c] sm:$0xf0]  ;;  %v16363_v2 = vor.u32 %v18661_v8, %v16362_v17  ;;  %v18698_v0 = vld [vmem:[#allocation11 + $0x4bc] sm:$0xf]  ;;  %v16322_v49 = vld [vmem:[#allocation11 + $0x330] sm:$0xf] }
 0x565   :  { %v10996_v44 = vadd.f32 %v10995_v54, %v10982_v22  ;;  %v16522_v57 = vld [vmem:[#allocation11 + $0x4c0] sm:$0xf]  ;;  %v16002_v34 = vld [vmem:[#allocation11 + $0xb0] sm:$0xf]  ;;  %v16302_v17 = vld [vmem:[#allocation11 + $0x308] sm:$0xf] }
 0x566   :  { %11475 = vmatpush.bf16.msrb.mxu2 %v16999_v60  ;;  %11379 = vmatpush.bf16.msrb.mxu3 %v17435_v18  ;;  %v16879_v18 = vor.u32 %v18788_v40, %v16876_v16  ;;  %v16282_v22 = vld [vmem:[#allocation11 + $0x2e0] sm:$0xf] }
 0x567   :  { %11503 = vmatpush.bf16.msra.mxu0 %v17319_v32  ;;  %v17414_v32 = vld [vmem:[#allocation11 + $0xbc0] sm:$0xf]  ;;  %v11010_v40 = vadd.f32 %v20120_v43, %v10996_v44  ;;  %v16502_v43 = vld [vmem:[#allocation11 + $0x498] sm:$0xf] }
 0x568   :  { %11517 = vmatpush.bf16.msra.mxu1 %v17479_v13  ;;  %v17415_v60 = vor.u32 %v18925_v5, %v17414_v32  ;;  %v18910_v32 = vld [vmem:[#allocation11 + $0xb58] sm:$0xf0]  ;;  %v18908_v5 = vld [vmem:[#allocation11 + $0xb4c] sm:$0xf]  ;;  %v16456_v44 = vld [vmem:[#allocation11 + $0x454] sm:$0xf0] }
 0x569   :  { %v17359_v39 = vor.u32 %v18908_v5, %v17356_v56  ;;  %v18688_v56 = vld [vmem:[#allocation11 + $0x46c] sm:$0xf] }
 0x56a   :  { %11476 = vmatpush.bf16.msrb.mxu2 %v16979_v29  ;;  %v17196_v29 = vld [vmem:[#allocation11 + $0xa1c] sm:$0xf0]  ;;  %11380 = vmatpush.bf16.msrb.mxu3 %v17415_v60  ;;  %v18581_v60 = vld [vmem:[#allocation11 + $0x110] sm:$0xf0] }
 0x56b   :  { %11504 = vmatpush.bf16.msra.mxu0 %v17299_v35  ;;  %v18920_v35 = vld [vmem:[#allocation11 + $0xba8] sm:$0xf0]  ;;  %v16043_v27 = vor.u32 %v18581_v60, %v16042_v20  ;;  %v15982_v60 = vld [vmem:[#allocation11 + $0x88] sm:$0xf] }
 0x56c   :  { %11518 = vmatpush.bf16.msra.mxu1 %v17459_v33  ;;  %v17395_v13 = vor.u32 %v18920_v35, %v17394_v38  ;;  %v16383_v33 = vor.u32 %v18666_v62, %v16382_v30  ;;  %v20137_v35 = vpop.f32.mrf.mxu2  ;;  %v16543_v62 = vor.u32 %v18706_v24, %v16542_v19  ;;  %v16482_v19 = vld [vmem:[#allocation11 + $0x470] sm:$0xf]  ;;  %v18691_v24 = vld [vmem:[#allocation11 + $0x480] sm:$0xf0] }
 0x56e   :  { %11477 = vmatpush.bf16.msrb.mxu2 %v16959_v52  ;;  %v17199_v52 = vor.u32 %v18868_v31, %v17196_v29  ;;  %11381 = vmatpush.bf16.msrb.mxu3 %v17395_v13  ;;  %v11022_v31 = vadd.f32 %v20115_v3, %v11008_v28  ;;  %v16539_v29 = vor.u32 %v18703_v58, %v16536_v48  ;;  %v16516_v13 = vld [vmem:[#allocation11 + $0x4cc] sm:$0xf0]  ;;  %v18651_v3 = vld [vmem:[#allocation11 + $0x340] sm:$0xf0]  ;;  %v16476_v58 = vld [vmem:[#allocation11 + $0x47c] sm:$0xf0]  ;;  %v11051_v48 = vpop.f32.mrf.mxu3 }
 0x56f   :  { %11505 = vmatpush.bf16.msra.mxu0 %v17279_v63  ;;  %v20127_v63 = vpop.f32.mrf.mxu1  ;;  %v16519_v54 = vor.u32 %v18698_v0, %v16516_v13  ;;  %v15962_v0 = vld [vmem:[#allocation11 + $0x60] sm:$0xf]  ;;  %v18561_v13 = vld [vmem:[#allocation11 + $0x70] sm:$0xf0] }
 0x570   :  { %11519 = vmatpush.bf16.msra.mxu1 %v17439_v46 }
 0x572   :  { %11478 = vmatpush.bf16.msrb.mxu2 %v16939_v4  ;;  %v17354_v4 = vld [vmem:[#allocation11 + $0xb48] sm:$0xf]  ;;  %11382 = vmatpush.bf16.msrb.mxu3 %v17375_v50  ;;  %v18571_v50 = vld [vmem:[#allocation11 + $0xc0] sm:$0xf0] }
 0x573   :  { %11506 = vmatpush.bf16.msra.mxu0 %v17259_v55  ;;  %v18913_v55 = vld [vmem:[#allocation11 + $0xb74] sm:$0xf] }
 0x574   :  { %11520 = vmatpush.bf16.msra.mxu1 %v17419_v51  ;;  %v17379_v46 = vor.u32 %v18913_v55, %v17376_v15  ;;  %v18656_v51 = vld [vmem:[#allocation11 + $0x368] sm:$0xf0]  ;;  %v18693_v55 = vld [vmem:[#allocation11 + $0x494] sm:$0xf]  ;;  %v16323_v15 = vor.u32 %v18651_v3, %v16322_v49  ;;  %v16462_v49 = vld [vmem:[#allocation11 + $0x448] sm:$0xf] }
 0x575   :  { %v18686_v3 = vld [vmem:[#allocation11 + $0x458] sm:$0xf0] }
 0x576   :  { %11479 = vmatpush.bf16.msrb.mxu2 %v16919_v42  ;;  %v16342_v42 = vld [vmem:[#allocation11 + $0x358] sm:$0xf] }
 0x577   :  { %11507 = vmatpush.bf16.msra.mxu0 %v17239_v7  ;;  %v20130_v7 = vpop.f32.mrf.mxu0  ;;  %v20135_v38 = vpop.f32.mrf.mxu1  ;;  %v16343_v30 = vor.u32 %v18656_v51, %v16342_v42  ;;  %v18566_v42 = vld [vmem:[#allocation11 + $0x98] sm:$0xf0]  ;;  %v18641_v51 = vld [vmem:[#allocation11 + $0x2f0] sm:$0xf0] }
 0x578   :  { %11521 = vmatpush.bf16.msra.mxu1 %v17399_v37  ;;  %v11036_v37 = vadd.f32 %v20122_v53, %v11022_v31  ;;  %v18646_v53 = vld [vmem:[#allocation11 + $0x318] sm:$0xf0]  ;;  %v16479_v31 = vor.u32 %v18688_v56, %v16476_v58  ;;  %v16416_v58 = vld [vmem:[#allocation11 + $0x404] sm:$0xf0] }
 0x57a   :  { %11480 = vmatpush.bf16.msrb.mxu2 %v16899_v10  ;;  %v18576_v10 = vld [vmem:[#allocation11 + $0xe8] sm:$0xf0]  ;;  %v11050_v28 = vadd.f32 %v11049_v11, %v11036_v37  ;;  %v15983_v11 = vor.u32 %v18566_v42, %v15982_v60  ;;  %v15963_v37 = vor.u32 %v18561_v13, %v15962_v0  ;;  %v16422_v60 = vld [vmem:[#allocation11 + $0x3f8] sm:$0xf]  ;;  %v16396_v13 = vld [vmem:[#allocation11 + $0x3dc] sm:$0xf0] }
 0x57b   :  { %11508 = vmatpush.bf16.msra.mxu0 %v17219_v36  ;;  %v17355_v36 = vor.u32 %v18910_v32, %v17354_v4  ;;  %v16023_v16 = vor.u32 %v18576_v10, %v16022_v25  ;;  %v18696_v4 = vld [vmem:[#allocation11 + $0x4a8] sm:$0xf0] }
 0x57c   :  { %11522 = vmatpush.bf16.msra.mxu1 %v17379_v46  ;;  %v11024_v46 = vadd.f32 %v20127_v63, %v11010_v40  ;;  %v16503_v20 = vor.u32 %v18696_v4, %v16502_v43  ;;  %v18636_v10 = vld [vmem:[#allocation11 + $0x2c8] sm:$0xf0]  ;;  %v18678_v40 = vld [vmem:[#allocation11 + $0x41c] sm:$0xf]  ;;  %v18681_v43 = vld [vmem:[#allocation11 + $0x430] sm:$0xf0] }
 0x57d   :  { %11383 = vmatpush.bf16.msrb.mxu3 %v17355_v36  ;;  %v11064_v36 = vadd.f32 %v20130_v7, %v11050_v28  ;;  %v18631_v28 = vld [vmem:[#allocation11 + $0x2a0] sm:$0xf0]  ;;  %v17022_v4 = vld [vmem:[#allocation11 + $0x8a8] sm:$0xf]  ;;  %v18668_v0 = vld [vmem:[#allocation11 + $0x3cc] sm:$0xf] }
 0x57e   :  { %11481 = vmatpush.bf16.msrb.mxu2 %v16879_v18  ;;  %v11091_v18 = vpop.f32.mrf.mxu2  ;;  %v11038_v63 = vadd.f32 %v20137_v35, %v11024_v46  ;;  %v18673_v46 = vld [vmem:[#allocation11 + $0x3f4] sm:$0xf] }
 0x57f   :  { %11509 = vmatpush.bf16.msra.mxu0 %v17199_v52  ;;  %v18701_v52 = vld [vmem:[#allocation11 + $0x4d0] sm:$0xf0]  ;;  %v20144_v8 = vpop.f32.mrf.mxu0  ;;  %v20148_v5 = vpop.f32.mrf.mxu1  ;;  %v11078_v25 = vadd.f32 %v20135_v38, %v11064_v36  ;;  %v18556_v38 = vld [vmem:[#allocation11 + $0x48] sm:$0xf0] }
 0x580   :  { %11523 = vmatpush.bf16.msra.mxu1 %v17359_v39  ;;  %v16523_v59 = vor.u32 %v18701_v52, %v16522_v57  ;;  %11384 = vmatmul.bf16.vlgmr.msrb.gmra.mxu3 %v20089_v1  ;;  %v16283_v39 = vor.u32 %v18641_v51, %v16282_v22  ;;  %v11052_v7 = vadd.f32 %v11051_v48, %v11038_v63  ;;  %v18676_v51 = vld [vmem:[#allocation11 + $0x408] sm:$0xf0] }
 0x581   :  { %11482 = vmatmul.bf16.vlgmr.msrb.gmra.mxu2 %v20015_v23  ;;  %11432 = vmatpush.bf16.msra.mxu3 %v16539_v29  ;;  %v18683_v29 = vld [vmem:[#allocation11 + $0x444] sm:$0xf]  ;;  %v11092_v52 = vadd.f32 %v11091_v18, %v11078_v25  ;;  %v16419_v63 = vor.u32 %v18673_v46, %v16416_v58 }
 0x582   :  { %11510 = vmatmul.bf16.vlgmr.msra.gmra.mxu0 %v20063_v41  ;;  %11530 = vmatpush.bf16.msra.mxu2 %v16063_v14  ;;  %v16003_v14 = vor.u32 %v18571_v50, %v16002_v34  ;;  %v16459_v35 = vor.u32 %v18683_v29, %v16456_v44  ;;  %v16242_v34 = vld [vmem:[#allocation11 + $0x290] sm:$0xf]  ;;  %v11066_v50 = vadd.f32 %v20144_v8, %v11052_v7  ;;  %v18551_v8 = vld [vmem:[#allocation11 + $0x20] sm:$0xf0]  ;;  %v18821_v29 = vld [vmem:[#allocation11 + $0x890] sm:$0xf0] }
 0x583   :  { %11558 = vmatpush.bf16.msrb.mxu0 %v16383_v33  ;;  %v16496_v33 = vld [vmem:[#allocation11 + $0x4a4] sm:$0xf0]  ;;  %11524 = vmatmul.bf16.vlgmr.msra.gmra.mxu1 %v20089_v1  ;;  %v16243_v48 = vor.u32 %v18631_v28, %v16242_v34  ;;  %v16423_v7 = vor.u32 %v18676_v51, %v16422_v60  ;;  %v18811_v58 = vld [vmem:[#allocation11 + $0x840] sm:$0xf0] }
 0x584   :  { %11572 = vmatpush.bf16.msrb.mxu1 %v16543_v62  ;;  %v16499_v32 = vor.u32 %v18693_v55, %v16496_v33  ;;  %v11105_v55 = vpop.f32.mrf.mxu3  ;;  %v11080_v42 = vadd.f32 %v20148_v5, %v11066_v50  ;;  %v16402_v5 = vld [vmem:[#allocation11 + $0x3d0] sm:$0xf]  ;;  %v17136_v51 = vld [vmem:[#allocation11 + $0x9a4] sm:$0xf0] }
 0x585   :  { %11433 = vmatpush.bf16.msra.mxu3 %v16519_v54 }
 0x586   :  { %11531 = vmatpush.bf16.msra.mxu2 %v16043_v27  ;;  %v16483_v27 = vor.u32 %v18691_v24, %v16482_v19  ;;  %v11093_v54 = vpop.f32.mrf.mxu2  ;;  %v16702_v19 = vld [vmem:[#allocation11 + $0x628] sm:$0xf]  ;;  %v18746_v24 = vld [vmem:[#allocation11 + $0x638] sm:$0xf0] }
 0x587   :  { %11559 = vmatpush.bf16.msrb.mxu0 %v16363_v2  ;;  %v16303_v2 = vor.u32 %v18646_v53, %v16302_v17  ;;  %v20153_v62 = vpop.f32.mrf.mxu0  ;;  %v20156_v57 = vpop.f32.mrf.mxu1  ;;  %v11106_v17 = vadd.f32 %v11105_v55, %v11092_v52  ;;  %v16442_v53 = vld [vmem:[#allocation11 + $0x420] sm:$0xf]  ;;  %v16703_v25 = vor.u32 %v18746_v24, %v16702_v19  ;;  %v16982_v55 = vld [vmem:[#allocation11 + $0x858] sm:$0xf] }
 0x588   :  { %11573 = vmatpush.bf16.msrb.mxu1 %v16523_v59  ;;  %v15942_v59 = vld [vmem:[#allocation11 + $0x38] sm:$0xf] }
 0x589   :  { %11434 = vmatpush.bf16.msra.mxu3 %v16499_v32  ;;  %v18826_v32 = vld [vmem:[#allocation11 + $0x8b8] sm:$0xf0]  ;;  %vm11670_vm8 = vcmp.gt.f32.partialorder %v11106_v17, 0.0  ;;  %v15943_v56 = vor.u32 %v18556_v38, %v15942_v59  ;;  %v17182_v59 = vld [vmem:[#allocation11 + $0x9e8] sm:$0xf] }
 0x58a   :  { %11532 = vmatpush.bf16.msra.mxu2 %v16023_v16  ;;  %v16436_v16 = vld [vmem:[#allocation11 + $0x42c] sm:$0xf0]  ;;  %v17023_v36 = vor.u32 %v18826_v32, %v17022_v4  ;;  %v18866_v38 = vld [vmem:[#allocation11 + $0x9f8] sm:$0xf0] }
 0x58b   :  { %11560 = vmatpush.bf16.msrb.mxu0 %v16343_v30  ;;  %v16262_v30 = vld [vmem:[#allocation11 + $0x2b8] sm:$0xf]  ;;  %v16439_v18 = vor.u32 %v18678_v40, %v16436_v16  ;;  %v18741_v16 = vld [vmem:[#allocation11 + $0x610] sm:$0xf0]  ;;  %v17183_v46 = vor.u32 %v18866_v38, %v17182_v59 }
 0x58c   :  { %11574 = vmatpush.bf16.msrb.mxu1 %v16503_v20  ;;  %v16263_v33 = vor.u32 %v18636_v10, %v16262_v30  ;;  %v15922_v20 = vld [vmem:[#allocation11 + $0x10] sm:$0xf]  ;;  %v11107_v30 = vpop.f32.mrf.mxu3  ;;  %v18671_v10 = vld [vmem:[#allocation11 + $0x3e0] sm:$0xf0] }
 0x58d   :  { %11435 = vmatpush.bf16.msra.mxu3 %v16479_v31  ;;  %v8881_v31 = vperm.slane %v20113_v26, 1 }
 0x58e   :  { %11533 = vmatpush.bf16.msra.mxu2 %v16003_v14  ;;  %v11680_v14 = vmul.f32 0.01, %v11106_v17  ;;  %v11147_v52 = vpop.f32.mrf.mxu2 }
 0x58f   :  { %11561 = vmatpush.bf16.msrb.mxu0 %v16323_v15  ;;  %v16463_v15 = vor.u32 %v18686_v3, %v16462_v49  ;;  %v20161_v44 = vpop.f32.mrf.mxu0  ;;  %v18863_v49 = vld [vmem:[#allocation11 + $0x9e4] sm:$0xf]  ;;  %v17176_v3 = vld [vmem:[#allocation11 + $0x9f4] sm:$0xf0] }
 0x590   :  { %11575 = vmatpush.bf16.msrb.mxu1 %v16483_v27  ;;  %v11690_v22 = vsel %vm11670_vm8, %v11106_v17, %v11680_v14  ;;  %v15923_v27 = vor.u32 %v18551_v8, %v15922_v20  ;;  %v17179_v50 = vor.u32 %v18863_v49, %v17176_v3  ;;  %v16403_v17 = vor.u32 %v18671_v10, %v16402_v5  ;;  %v18736_v14 = vld [vmem:[#allocation11 + $0x5e8] sm:$0xf0]  ;;  %v16622_v3 = vld [vmem:[#allocation11 + $0x588] sm:$0xf] }
 0x591   :  { %11436 = vmatpush.bf16.msra.mxu3 %v16459_v35  ;;  %11700 = vst [vmem:[#allocation14] sm:$0xff] %v11690_v22  ;;  %v20163_v35 = vpop.f32.mrf.mxu1 }
 0x592   :  { %11534 = vmatpush.bf16.msra.mxu2 %v15983_v11  ;;  %v17002_v11 = vld [vmem:[#allocation11 + $0x880] sm:$0xf] }
 0x593   :  { %11562 = vmatpush.bf16.msrb.mxu0 %v16303_v2  ;;  %v16443_v2 = vor.u32 %v18681_v43, %v16442_v53  ;;  %v17003_v40 = vor.u32 %v18821_v29, %v17002_v11  ;;  %v18858_v53 = vld [vmem:[#allocation11 + $0x9bc] sm:$0xf]  ;;  %v17156_v43 = vld [vmem:[#allocation11 + $0x9cc] sm:$0xf0]  ;;  %v16942_v11 = vld [vmem:[#allocation11 + $0x808] sm:$0xf] }
 0x594   :  { %11576 = vmatpush.bf16.msrb.mxu1 %v16463_v15  ;;  %v18816_v15 = vld [vmem:[#allocation11 + $0x868] sm:$0xf0]  ;;  %v17159_v8 = vor.u32 %v18858_v53, %v17156_v43  ;;  %v16602_v53 = vld [vmem:[#allocation11 + $0x560] sm:$0xf] }
 0x595   :  { %11437 = vmatpush.bf16.msra.mxu3 %v16439_v18  ;;  %v16662_v18 = vld [vmem:[#allocation11 + $0x5d8] sm:$0xf]  ;;  %v16983_v32 = vor.u32 %v18816_v15, %v16982_v55 }
 0x596   :  { %11535 = vmatpush.bf16.msra.mxu2 %v15963_v37  ;;  %v16663_v22 = vor.u32 %v18736_v14, %v16662_v18  ;;  %v18796_v18 = vld [vmem:[#allocation11 + $0x7c8] sm:$0xf0] }
 0x597   :  { %11563 = vmatpush.bf16.msrb.mxu0 %v16283_v39  ;;  %v11094_v39 = vadd.f32 %v11093_v54, %v11080_v42  ;;  %v16682_v54 = vld [vmem:[#allocation11 + $0x600] sm:$0xf]  ;;  %v11175_v20 = vpop.f32.mrf.mxu0  ;;  %v11161_v42 = vpop.f32.mrf.mxu3 }
 0x598   :  { %11577 = vmatpush.bf16.msrb.mxu1 %v16443_v2  ;;  %v16683_v28 = vor.u32 %v18741_v16, %v16682_v54  ;;  %v18861_v2 = vld [vmem:[#allocation11 + $0x9d0] sm:$0xf0]  ;;  %v18851_v16 = vld [vmem:[#allocation11 + $0x980] sm:$0xf0] }
 0x599   :  { %v11108_v37 = vadd.f32 %v11107_v30, %v11094_v39  ;;  %11438 = vmatpush.bf16.msra.mxu3 %v16419_v63  ;;  %v11189_v19 = vpop.f32.mrf.mxu1  ;;  %v18731_v63 = vld [vmem:[#allocation11 + $0x5c0] sm:$0xf0]  ;;  %v18806_v39 = vld [vmem:[#allocation11 + $0x818] sm:$0xf0]  ;;  %v18801_v54 = vld [vmem:[#allocation11 + $0x7f0] sm:$0xf0] }
 0x59a   :  { %11536 = vmatpush.bf16.msra.mxu2 %v15943_v56  ;;  %v16962_v56 = vld [vmem:[#allocation11 + $0x830] sm:$0xf]  ;;  %v16943_v10 = vor.u32 %v18806_v39, %v16942_v11 }
 0x59b   :  { %11564 = vmatpush.bf16.msrb.mxu0 %v16263_v33  ;;  %v16399_v33 = vor.u32 %v18668_v0, %v16396_v13  ;;  %vm11675_vm9 = vcmp.gt.f32.partialorder %v11108_v37, 0.0  ;;  %v11685_v34 = vmul.f32 0.01, %v11108_v37  ;;  %v11149_v0 = vpop.f32.mrf.mxu2 }
 0x59c   :  { %11578 = vmatpush.bf16.msrb.mxu1 %v16423_v7  ;;  %v18848_v7 = vld [vmem:[#allocation11 + $0x96c] sm:$0xf] }
 0x59d   :  { %v11695_v4 = vsel %vm11675_vm9, %v11108_v37, %v11685_v34  ;;  %11439 = vmatpush.bf16.msra.mxu3 %v16399_v33  ;;  %v16922_v37 = vld [vmem:[#allocation11 + $0x7e0] sm:$0xf]  ;;  %v18843_v34 = vld [vmem:[#allocation11 + $0x944] sm:$0xf] }
 0x59e   :  { %11537 = vmatpush.bf16.msra.mxu2 %v15923_v27  ;;  %11705 = vst [vmem:[#allocation14 + $0x28] sm:$0xff] %v11695_v4  ;;  %v17142_v27 = vld [vmem:[#allocation11 + $0x998] sm:$0xf]  ;;  %v17102_v4 = vld [vmem:[#allocation11 + $0x948] sm:$0xf] }
 0x59f   :  { %11565 = vmatpush.bf16.msrb.mxu0 %v16243_v48  ;;  %v17162_v48 = vld [vmem:[#allocation11 + $0x9c0] sm:$0xf]  ;;  %v11163_v59 = vpop.f32.mrf.mxu3 }
 0x5a0   :  { %11579 = vmatpush.bf16.msrb.mxu1 %v16403_v17  ;;  %v17163_v24 = vor.u32 %v18861_v2, %v17162_v48  ;;  %11440 = vmatmul.bf16.vlgmr.msra.gmra.mxu3 %v19944_v45  ;;  %v11177_v17 = vpop.f32.mrf.mxu0  ;;  %v17076_v48 = vld [vmem:[#allocation11 + $0x92c] sm:$0xf0] }
 0x5a1   :  { %11538 = vmatmul.bf16.vlgmr.msra.gmra.mxu2 %v19938_v12  ;;  %11488 = vmatpush.bf16.msrb.mxu3 %v17179_v50  ;;  %v16642_v12 = vld [vmem:[#allocation11 + $0x5b0] sm:$0xf]  ;;  %v17096_v50 = vld [vmem:[#allocation11 + $0x954] sm:$0xf0] }
 0x5a2   :  { %11566 = vmatmul.bf16.vlgmr.msrb.gmra.mxu0 %v19913_v21  ;;  %11586 = vmatpush.bf16.msrb.mxu2 %v16703_v25  ;;  %v11120_v21 = vadd.f32 %v20153_v62, %v8881_v31  ;;  %v16963_v62 = vor.u32 %v18811_v58, %v16962_v56  ;;  %v16643_v30 = vor.u32 %v18731_v63, %v16642_v12  ;;  %v17116_v25 = vld [vmem:[#allocation11 + $0x97c] sm:$0xf0] }
 0x5a3   :  { %11614 = vmatpush.bf16.msra.mxu0 %v17023_v36  ;;  %v18853_v36 = vld [vmem:[#allocation11 + $0x994] sm:$0xf]  ;;  %11580 = vmatmul.bf16.vlgmr.msrb.gmra.mxu1 %v19944_v45  ;;  %v17122_v45 = vld [vmem:[#allocation11 + $0x970] sm:$0xf]  ;;  %v17119_v55 = vor.u32 %v18848_v7, %v17116_v25  ;;  %v11203_v2 = vpop.f32.mrf.mxu2  ;;  %v18836_v25 = vld [vmem:[#allocation11 + $0x908] sm:$0xf0] }
 0x5a4   :  { %v11134_v60 = vadd.f32 %v20156_v57, %v11120_v21  ;;  %11628 = vmatpush.bf16.msra.mxu1 %v17183_v46  ;;  %v18856_v57 = vld [vmem:[#allocation11 + $0x9a8] sm:$0xf0]  ;;  %v17139_v13 = vor.u32 %v18853_v36, %v17136_v51  ;;  %v17123_v26 = vor.u32 %v18851_v16, %v17122_v45  ;;  %v11191_v46 = vpop.f32.mrf.mxu1  ;;  %v18838_v21 = vld [vmem:[#allocation11 + $0x91c] sm:$0xf]  ;;  %v18791_v36 = vld [vmem:[#allocation11 + $0x7a0] sm:$0xf0] }
 0x5a5   :  { %11489 = vmatpush.bf16.msrb.mxu3 %v17159_v8  ;;  %v17143_v49 = vor.u32 %v18856_v57, %v17142_v27  ;;  %v17082_v51 = vld [vmem:[#allocation11 + $0x920] sm:$0xf]  ;;  %v18828_v45 = vld [vmem:[#allocation11 + $0x8cc] sm:$0xf] }
 0x5a6   :  { %11587 = vmatpush.bf16.msrb.mxu2 %v16683_v28  ;;  %v11148_v29 = vadd.f32 %v11147_v52, %v11134_v60  ;;  %v18726_v52 = vld [vmem:[#allocation11 + $0x598] sm:$0xf0]  ;;  %v16923_v28 = vor.u32 %v18801_v54, %v16922_v37  ;;  %v16582_v60 = vld [vmem:[#allocation11 + $0x538] sm:$0xf]  ;;  %v17036_v16 = vld [vmem:[#allocation11 + $0x8dc] sm:$0xf0] }
 0x5a7   :  { %11615 = vmatpush.bf16.msra.mxu0 %v17003_v40  ;;  %v11122_v40 = vadd.f32 %v20161_v44, %v8881_v31  ;;  %v16623_v38 = vor.u32 %v18726_v52, %v16622_v3  ;;  %v18721_v31 = vld [vmem:[#allocation11 + $0x570] sm:$0xf0]  ;;  %v16902_v44 = vld [vmem:[#allocation11 + $0x7b8] sm:$0xf]  ;;  %v11217_v27 = vpop.f32.mrf.mxu3 }
 0x5a8   :  { %v11162_v5 = vadd.f32 %v11161_v42, %v11148_v29  ;;  %11629 = vmatpush.bf16.msra.mxu1 %v17163_v24  ;;  %v16603_v56 = vor.u32 %v18721_v31, %v16602_v53  ;;  %v18716_v42 = vld [vmem:[#allocation11 + $0x548] sm:$0xf0]  ;;  %v17079_v24 = vor.u32 %v18838_v21, %v17076_v48  ;;  %v17056_v29 = vld [vmem:[#allocation11 + $0x904] sm:$0xf0]  ;;  %v11231_v39 = vpop.f32.mrf.mxu0  ;;  %v17039_v53 = vor.u32 %v18828_v45, %v17036_v16  ;;  %v18871_v45 = vld [vmem:[#allocation11 + $0xa20] sm:$0xf0] }
 0x5a9   :  { %11490 = vmatpush.bf16.msrb.mxu3 %v17139_v13  ;;  %v11136_v33 = vadd.f32 %v20163_v35, %v11122_v40  ;;  %v17099_v35 = vor.u32 %v18843_v34, %v17096_v50  ;;  %v16583_v11 = vor.u32 %v18716_v42, %v16582_v60  ;;  %v16562_v13 = vld [vmem:[#allocation11 + $0x510] sm:$0xf]  ;;  %v18831_v50 = vld [vmem:[#allocation11 + $0x8e0] sm:$0xf0]  ;;  %v18896_v21 = vld [vmem:[#allocation11 + $0xae8] sm:$0xf0] }
 0x5aa   :  { %11588 = vmatpush.bf16.msrb.mxu2 %v16663_v22  ;;  %v11176_v15 = vadd.f32 %v11175_v20, %v11162_v5  ;;  %v16903_v20 = vor.u32 %v18796_v18, %v16902_v44  ;;  %v16882_v22 = vld [vmem:[#allocation11 + $0x790] sm:$0xf]  ;;  %v18711_v5 = vld [vmem:[#allocation11 + $0x520] sm:$0xf0]  ;;  %v16182_v60 = vld [vmem:[#allocation11 + $0x218] sm:$0xf] }
 0x5ab   :  { %11616 = vmatpush.bf16.msra.mxu0 %v16983_v32  ;;  %v11150_v43 = vadd.f32 %v11149_v0, %v11136_v33  ;;  %v18846_v32 = vld [vmem:[#allocation11 + $0x958] sm:$0xf0]  ;;  %v16883_v57 = vor.u32 %v18791_v36, %v16882_v22  ;;  %v16563_v40 = vor.u32 %v18711_v5, %v16562_v13  ;;  %v18616_v42 = vld [vmem:[#allocation11 + $0x228] sm:$0xf0]  ;;  %v17282_v36 = vld [vmem:[#allocation11 + $0xab0] sm:$0xf] }
 0x5ac   :  { %11630 = vmatpush.bf16.msra.mxu1 %v17143_v49  ;;  %v11190_v58 = vadd.f32 %v11189_v19, %v11176_v15  ;;  %v17103_v8 = vor.u32 %v18846_v32, %v17102_v4  ;;  %v18833_v19 = vld [vmem:[#allocation11 + $0x8f4] sm:$0xf]  ;;  %v18906_v49 = vld [vmem:[#allocation11 + $0xb38] sm:$0xf0]  ;;  %v11245_v3 = vpop.f32.mrf.mxu1  ;;  %v17042_v15 = vld [vmem:[#allocation11 + $0x8d0] sm:$0xf] }
 0x5ad   :  { %11491 = vmatpush.bf16.msrb.mxu3 %v17119_v55  ;;  %v11164_v14 = vadd.f32 %v11163_v59, %v11150_v43  ;;  %v17059_v52 = vor.u32 %v18833_v19, %v17056_v29  ;;  %v16222_v59 = vld [vmem:[#allocation11 + $0x268] sm:$0xf]  ;;  %v17043_v4 = vor.u32 %v18831_v50, %v17042_v15  ;;  %v18886_v29 = vld [vmem:[#allocation11 + $0xa98] sm:$0xf0]  ;;  %v17242_v13 = vld [vmem:[#allocation11 + $0xa60] sm:$0xf] }
 0x5ae   :  { %11589 = vmatpush.bf16.msrb.mxu2 %v16643_v30  ;;  %v11204_v63 = vadd.f32 %v11203_v2, %v11190_v58  ;;  %v17062_v30 = vld [vmem:[#allocation11 + $0x8f8] sm:$0xf]  ;;  %v17262_v19 = vld [vmem:[#allocation11 + $0xa88] sm:$0xf]  ;;  %v18881_v5 = vld [vmem:[#allocation11 + $0xa70] sm:$0xf0] }
 0x5af   :  { %11617 = vmatpush.bf16.msra.mxu0 %v16963_v62  ;;  %v18841_v62 = vld [vmem:[#allocation11 + $0x930] sm:$0xf0]  ;;  %v11178_v12 = vadd.f32 %v11177_v17, %v11164_v14  ;;  %v17063_v55 = vor.u32 %v18836_v25, %v17062_v30  ;;  %v17322_v17 = vld [vmem:[#allocation11 + $0xb00] sm:$0xf]  ;;  %v11219_v18 = vpop.f32.mrf.mxu3  ;;  %v17302_v58 = vld [vmem:[#allocation11 + $0xad8] sm:$0xf]  ;;  %v17243_v30 = vor.u32 %v18881_v5, %v17242_v13 }
 0x5b0   :  { %11631 = vmatpush.bf16.msra.mxu1 %v17123_v26  ;;  %v17083_v0 = vor.u32 %v18841_v62, %v17082_v51  ;;  %v11218_v7 = vadd.f32 %v11217_v27, %v11204_v63  ;;  %v11205_v26 = vpop.f32.mrf.mxu2  ;;  %v11233_v48 = vpop.f32.mrf.mxu0  ;;  %v18891_v51 = vld [vmem:[#allocation11 + $0xac0] sm:$0xf0]  ;;  %v17263_v27 = vor.u32 %v18886_v29, %v17262_v19  ;;  %v18601_v25 = vld [vmem:[#allocation11 + $0x1b0] sm:$0xf0] }
 0x5b1   :  { %11492 = vmatpush.bf16.msrb.mxu3 %v17099_v35  ;;  %v11192_v54 = vadd.f32 %v11191_v46, %v11178_v12  ;;  %v16202_v46 = vld [vmem:[#allocation11 + $0x240] sm:$0xf]  ;;  %v18621_v35 = vld [vmem:[#allocation11 + $0x250] sm:$0xf0]  ;;  %v16162_v12 = vld [vmem:[#allocation11 + $0x1f0] sm:$0xf] }
 0x5b2   :  { %11590 = vmatpush.bf16.msrb.mxu2 %v16623_v38  ;;  %v11232_v37 = vadd.f32 %v11231_v39, %v11218_v7  ;;  %v18626_v38 = vld [vmem:[#allocation11 + $0x278] sm:$0xf0]  ;;  %v16203_v2 = vor.u32 %v18621_v35, %v16202_v46  ;;  %v18611_v63 = vld [vmem:[#allocation11 + $0x200] sm:$0xf0]  ;;  %v16122_v7 = vld [vmem:[#allocation11 + $0x1a0] sm:$0xf] }
 0x5b3   :  { %11618 = vmatpush.bf16.msra.mxu0 %v16943_v10  ;;  %v17342_v10 = vld [vmem:[#allocation11 + $0xb28] sm:$0xf]  ;;  %v11206_v44 = vadd.f32 %v11205_v26, %v11192_v54  ;;  %v16223_v43 = vor.u32 %v18626_v38, %v16222_v59  ;;  %v16163_v39 = vor.u32 %v18611_v63, %v16162_v12  ;;  %v17202_v54 = vld [vmem:[#allocation11 + $0xa10] sm:$0xf]  ;;  %v18591_v15 = vld [vmem:[#allocation11 + $0x160] sm:$0xf0] }
 0x5b4   :  { %11632 = vmatpush.bf16.msra.mxu1 %v17103_v8  ;;  %v17343_v33 = vor.u32 %v18906_v49, %v17342_v10  ;;  %v11246_v34 = vadd.f32 %v11245_v3, %v11232_v37  ;;  %v17303_v8 = vor.u32 %v18896_v21, %v17302_v58  ;;  %v17222_v10 = vld [vmem:[#allocation11 + $0xa38] sm:$0xf]  ;;  %v18876_v49 = vld [vmem:[#allocation11 + $0xa48] sm:$0xf0]  ;;  %v16123_v3 = vor.u32 %v18601_v25, %v16122_v7  ;;  %v16862_v59 = vld [vmem:[#allocation11 + $0x768] sm:$0xf] }
 0x5b5   :  { %11493 = vmatpush.bf16.msrb.mxu3 %v17079_v24  ;;  %v17283_v24 = vor.u32 %v18891_v51, %v17282_v36  ;;  %v16102_v37 = vld [vmem:[#allocation11 + $0x178] sm:$0xf]  ;;  %v18786_v38 = vld [vmem:[#allocation11 + $0x778] sm:$0xf0]  ;;  %v16782_v46 = vld [vmem:[#allocation11 + $0x6c8] sm:$0xf] }
 0x5b6   :  { %11591 = vmatpush.bf16.msrb.mxu2 %v16603_v56  ;;  %vm11671_vm10 = vcmp.gt.f32.partialorder %v11246_v34, 0.0  ;;  %v11681_v31 = vmul.f32 0.01, %v11246_v34  ;;  %v11220_v56 = vadd.f32 %v11219_v18, %v11206_v44  ;;  %v16863_v50 = vor.u32 %v18786_v38, %v16862_v59  ;;  %v18771_v18 = vld [vmem:[#allocation11 + $0x700] sm:$0xf0] }
 0x5b7   :  { %11619 = vmatpush.bf16.msra.mxu0 %v16923_v28  ;;  %v18901_v28 = vld [vmem:[#allocation11 + $0xb10] sm:$0xf0]  ;;  %v18766_v35 = vld [vmem:[#allocation11 + $0x6d8] sm:$0xf0]  ;;  %v20183_v21 = vld [vmem:[#allocation13] sm:$0x1f] }
 0x5b8   :  { %11633 = vmatpush.bf16.msra.mxu1 %v17083_v0  ;;  %v17323_v32 = vor.u32 %v18901_v28, %v17322_v17  ;;  %v11691_v14 = vsel %vm11671_vm10, %v11246_v34, %v11681_v31  ;;  %v18606_v0 = vld [vmem:[#allocation11 + $0x1d8] sm:$0xf0]  ;;  %v16842_v17 = vld [vmem:[#allocation11 + $0x740] sm:$0xf]  ;;  %v18781_v28 = vld [vmem:[#allocation11 + $0x750] sm:$0xf0] }
 0x5b9   :  { %11494 = vmatpush.bf16.msrb.mxu3 %v17059_v52  ;;  %11701 = vst [vmem:[#allocation14 + $0x8] sm:$0xff] %v11691_v14  ;;  %v17223_v52 = vor.u32 %v18876_v49, %v17222_v10  ;;  %v16843_v26 = vor.u32 %v18781_v28, %v16842_v17  ;;  %v18776_v31 = vld [vmem:[#allocation11 + $0x728] sm:$0xf0]  ;;  %v18761_v58 = vld [vmem:[#allocation11 + $0x6b0] sm:$0xf0] }
 0x5ba   :  { %11592 = vmatpush.bf16.msrb.mxu2 %v16583_v11  ;;  %v18946_v12 = vld [vmem:[#allocation11 + $0xc78] sm:$0xf0]  ;;  %v17462_v25 = vld [vmem:[#allocation11 + $0xc18] sm:$0xf]  ;;  %v18936_v10 = vld [vmem:[#allocation11 + $0xc28] sm:$0xf0] }
 0x5bb   :  { %11620 = vmatpush.bf16.msra.mxu0 %v16903_v20  ;;  %v11247_v20 = vpop.f32.mrf.mxu1  ;;  %v11273_v14 = vpop.f32.mrf.mxu3  ;;  %v17422_v59 = vld [vmem:[#allocation11 + $0xbc8] sm:$0xf]  ;;  %v18926_v38 = vld [vmem:[#allocation11 + $0xbd8] sm:$0xf0] }
 0x5bc   :  { %11634 = vmatpush.bf16.msra.mxu1 %v17063_v55  ;;  %v17203_v55 = vor.u32 %v18871_v45, %v17202_v54  ;;  %v18931_v54 = vld [vmem:[#allocation11 + $0xc00] sm:$0xf0] }
 0x5bd   :  { %11495 = vmatpush.bf16.msrb.mxu3 %v17039_v53  ;;  %v16822_v53 = vld [vmem:[#allocation11 + $0x718] sm:$0xf] }
 0x5be   :  { %11593 = vmatpush.bf16.msrb.mxu2 %v16563_v40  ;;  %v18596_v40 = vld [vmem:[#allocation11 + $0x188] sm:$0xf0]  ;;  %v16823_v44 = vor.u32 %v18776_v31, %v16822_v53  ;;  %v17402_v53 = vld [vmem:[#allocation11 + $0xba0] sm:$0xf]  ;;  %v18921_v31 = vld [vmem:[#allocation11 + $0xbb0] sm:$0xf0] }
 0x5bf   :  { %11621 = vmatpush.bf16.msra.mxu0 %v16883_v57  ;;  %v16142_v57 = vld [vmem:[#allocation11 + $0x1c8] sm:$0xf]  ;;  %v16103_v16 = vor.u32 %v18596_v40, %v16102_v37  ;;  %v17442_v40 = vld [vmem:[#allocation11 + $0xbf0] sm:$0xf] }
 0x5c0   :  { %11635 = vmatpush.bf16.msra.mxu1 %v17043_v4  ;;  %11496 = vmatmul.bf16.vlgmr.msrb.gmra.mxu3 %v20038_v61  ;;  %v11259_v4 = vpop.f32.mrf.mxu2 }
 0x5c1   :  { %11594 = vmatmul.bf16.vlgmr.msrb.gmra.mxu2 %v20032_v9  ;;  %11544 = vmatpush.bf16.msra.mxu3 %v16223_v43  ;;  %v16183_v9 = vor.u32 %v18616_v42, %v16182_v60  ;;  %v16802_v43 = vld [vmem:[#allocation11 + $0x6f0] sm:$0xf] }
 0x5c2   :  { %11622 = vmatmul.bf16.vlgmr.msra.gmra.mxu0 %v20015_v23  ;;  %11642 = vmatpush.bf16.msra.mxu2 %v17343_v33  ;;  %v11234_v23 = vadd.f32 %v11233_v48, %v11220_v56  ;;  %v16082_v33 = vld [vmem:[#allocation11 + $0x150] sm:$0xf]  ;;  %v16783_v56 = vor.u32 %v18766_v35, %v16782_v46  ;;  %v8882_v48 = vperm.slane %v20183_v21, 2  ;;  %v17382_v46 = vld [vmem:[#allocation11 + $0xb78] sm:$0xf] }
 0x5c3   :  { %11636 = vmatmul.bf16.vlgmr.msra.gmra.mxu1 %v20038_v61  ;;  %v16143_v61 = vor.u32 %v18606_v0, %v16142_v57  ;;  %v16083_v34 = vor.u32 %v18591_v15, %v16082_v33  ;;  %v11301_v42 = vpop.f32.mrf.mxu1  ;;  %v11275_v51 = vpop.f32.mrf.mxu3  ;;  %v18941_v57 = vld [vmem:[#allocation11 + $0xc50] sm:$0xf0]  ;;  %v17443_v33 = vor.u32 %v18931_v54, %v17442_v40  ;;  %v18916_v35 = vld [vmem:[#allocation11 + $0xb88] sm:$0xf0] }
 0x5c4   :  { %v11248_v22 = vadd.f32 %v11247_v20, %v11234_v23  ;;  %v11287_v23 = vpop.f32.mrf.mxu0  ;;  %v16742_v20 = vld [vmem:[#allocation11 + $0x678] sm:$0xf]  ;;  %v11260_v60 = vadd.f32 %v11259_v4, %v8882_v48 }
 0x5c5   :  { %11545 = vmatpush.bf16.msra.mxu3 %v16203_v2 }
 0x5c6   :  { %11643 = vmatpush.bf16.msra.mxu2 %v17323_v32  ;;  %vm11676_vm11 = vcmp.gt.f32.partialorder %v11248_v22, 0.0  ;;  %v11686_v62 = vmul.f32 0.01, %v11248_v22  ;;  %v16803_v32 = vor.u32 %v18771_v18, %v16802_v43  ;;  %v17403_v18 = vor.u32 %v18921_v31, %v17402_v53 }
 0x5c8   :  { %v11696_v11 = vsel %vm11676_vm11, %v11248_v22, %v11686_v62  ;;  %v11261_v2 = vpop.f32.mrf.mxu2  ;;  %v11274_v22 = vadd.f32 %v11273_v14, %v11260_v60  ;;  %v16722_v62 = vld [vmem:[#allocation11 + $0x650] sm:$0xf] }
 0x5c9   :  { %11706 = vst [vmem:[#allocation14 + $0x30] sm:$0xff] %v11696_v11  ;;  %11546 = vmatpush.bf16.msra.mxu3 %v16183_v9  ;;  %v18751_v9 = vld [vmem:[#allocation11 + $0x660] sm:$0xf0] }
 0x5ca   :  { %11644 = vmatpush.bf16.msra.mxu2 %v17303_v8  ;;  %v18756_v8 = vld [vmem:[#allocation11 + $0x688] sm:$0xf0]  ;;  %v11288_v63 = vadd.f32 %v11287_v23, %v11274_v22  ;;  %v16723_v11 = vor.u32 %v18751_v9, %v16722_v62 }
 0x5cb   :  { %v16743_v36 = vor.u32 %v18756_v8, %v16742_v20 }
 0x5cc   :  { %v11289_v0 = vpop.f32.mrf.mxu0  ;;  %v11302_v5 = vadd.f32 %v11301_v42, %v11288_v63 }
 0x5cd   :  { %11547 = vmatpush.bf16.msra.mxu3 %v16163_v39  ;;  %v11262_v39 = vadd.f32 %v11261_v2, %v8882_v48  ;;  %v17362_v48 = vld [vmem:[#allocation11 + $0xb50] sm:$0xf]  ;;  %v18911_v2 = vld [vmem:[#allocation11 + $0xb60] sm:$0xf0] }
 0x5ce   :  { %11645 = vmatpush.bf16.msra.mxu2 %v17283_v24  ;;  %v17502_v24 = vld [vmem:[#allocation11 + $0xc68] sm:$0xf]  ;;  %v17363_v60 = vor.u32 %v18911_v2, %v17362_v48 }
 0x5cf   :  { %v17503_v29 = vor.u32 %v18946_v12, %v17502_v24  ;;  %v11276_v13 = vadd.f32 %v11275_v51, %v11262_v39 }
 0x5d0   :  { %v11315_v19 = vpop.f32.mrf.mxu2 }
 0x5d1   :  { %11548 = vmatpush.bf16.msra.mxu3 %v16143_v61  ;;  %v11303_v61 = vpop.f32.mrf.mxu1  ;;  %v11290_v49 = vadd.f32 %v11289_v0, %v11276_v13 }
 0x5d2   :  { %11646 = vmatpush.bf16.msra.mxu2 %v17263_v27  ;;  %v17482_v27 = vld [vmem:[#allocation11 + $0xc40] sm:$0xf] }
 0x5d3   :  { %v17483_v7 = vor.u32 %v18941_v57, %v17482_v27 }
 0x5d4   :  { %v11343_v45 = vpop.f32.mrf.mxu0 }
 0x5d5   :  { %11549 = vmatpush.bf16.msra.mxu3 %v16123_v3  ;;  %v11316_v3 = vadd.f32 %v11315_v19, %v11302_v5 }
 0x5d6   :  { %11647 = vmatpush.bf16.msra.mxu2 %v17243_v30 }
 0x5d9   :  { %11550 = vmatpush.bf16.msra.mxu3 %v16103_v16  ;;  %v11317_v16 = vpop.f32.mrf.mxu2 }
 0x5da   :  { %11648 = vmatpush.bf16.msra.mxu2 %v17223_v52  ;;  %v17463_v52 = vor.u32 %v18936_v10, %v17462_v25 }
 0x5db   :  { %v11329_v30 = vpop.f32.mrf.mxu3 }
 0x5dc   :  { %v11330_v37 = vadd.f32 %v11329_v30, %v11316_v3  ;;  %v11345_v43 = vpop.f32.mrf.mxu0 }
 0x5dd   :  { %11551 = vmatpush.bf16.msra.mxu3 %v16083_v34  ;;  %v11357_v34 = vpop.f32.mrf.mxu1 }
 0x5de   :  { %11649 = vmatpush.bf16.msra.mxu2 %v17203_v55  ;;  %v11304_v55 = vadd.f32 %v11303_v61, %v11290_v49  ;;  %v11344_v15 = vadd.f32 %v11343_v45, %v11330_v37 }
 0x5e0   :  { %11552 = vmatmul.bf16.vlgmr.msra.gmra.mxu3 %v20013_v47  ;;  %v11318_v17 = vadd.f32 %v11317_v16, %v11304_v55 }
 0x5e1   :  { %11650 = vmatmul.bf16.vlgmr.msra.gmra.mxu2 %v20063_v41  ;;  %11600 = vmatpush.bf16.msrb.mxu3 %v16863_v50  ;;  %v16762_v41 = vld [vmem:[#allocation11 + $0x6a0] sm:$0xf] }
 0x5e2   :  { %v16763_v47 = vor.u32 %v18761_v58, %v16762_v41  ;;  %v17383_v58 = vor.u32 %v18916_v35, %v17382_v46 }
 0x5e3   :  { %v11331_v50 = vpop.f32.mrf.mxu3 }
 0x5e4   :  { %v11332_v28 = vadd.f32 %v11331_v50, %v11318_v17  ;;  %v11399_v9 = vpop.f32.mrf.mxu0 }
 0x5e5   :  { %11601 = vmatpush.bf16.msrb.mxu3 %v16843_v26  ;;  %v11358_v26 = vadd.f32 %v11357_v34, %v11344_v15  ;;  %v11359_v41 = vpop.f32.mrf.mxu1 }
 0x5e6   :  { %v11346_v4 = vadd.f32 %v11345_v43, %v11332_v28 }
 0x5e8   :  { %v11360_v23 = vadd.f32 %v11359_v41, %v11346_v4 }
 0x5e9   :  { %11602 = vmatpush.bf16.msrb.mxu3 %v16823_v44  ;;  %v11371_v44 = vpop.f32.mrf.mxu2 }
 0x5ec   :  { %v11401_v12 = vpop.f32.mrf.mxu0 }
 0x5ed   :  { %11603 = vmatpush.bf16.msrb.mxu3 %v16803_v32  ;;  %v11372_v32 = vadd.f32 %v11371_v44, %v11358_v26  ;;  %v11413_v24 = vpop.f32.mrf.mxu1 }
 0x5f1   :  { %11604 = vmatpush.bf16.msrb.mxu3 %v16783_v56  ;;  %v11373_v8 = vpop.f32.mrf.mxu2 }
 0x5f2   :  { %v11374_v42 = vadd.f32 %v11373_v8, %v11360_v23 }
 0x5f4   :  { %v11455_v39 = vpop.f32.mrf.mxu0 }
 0x5f5   :  { %11605 = vmatpush.bf16.msrb.mxu3 %v16763_v47  ;;  %v11415_v63 = vpop.f32.mrf.mxu1 }
 0x5f9   :  { %11606 = vmatpush.bf16.msrb.mxu3 %v16743_v36  ;;  %v11427_v19 = vpop.f32.mrf.mxu2 }
 0x5fd   :  { %11607 = vmatpush.bf16.msrb.mxu3 %v16723_v11  ;;  %v8883_v11 = vperm.slane %v20183_v21, 3  ;;  %v11469_v0 = vpop.f32.mrf.mxu1 }
 0x5ff   :  { %v11402_v30 = vadd.f32 %v11401_v12, %v8883_v11 }
 0x600   :  { %11608 = vmatmul.bf16.vlgmr.msrb.gmra.mxu3 %v20058_v6  ;;  %v17423_v6 = vor.u32 %v18926_v38, %v17422_v59 }
 0x601   :  { %11656 = vmatpush.bf16.msra.mxu3 %v17503_v29  ;;  %v11400_v29 = vadd.f32 %v11399_v9, %v8883_v11  ;;  %v11429_v61 = vpop.f32.mrf.mxu2 }
 0x603   :  { %v11385_v14 = vpop.f32.mrf.mxu3  ;;  %v11414_v57 = vadd.f32 %v11413_v24, %v11400_v29 }
 0x604   :  { %v11386_v56 = vadd.f32 %v11385_v14, %v11372_v32  ;;  %v8884_v14 = vperm.slane %v20183_v21, 4 }
 0x605   :  { %11657 = vmatpush.bf16.msra.mxu3 %v17483_v7  ;;  %v11428_v13 = vadd.f32 %v11427_v19, %v11414_v57  ;;  %v11416_v7 = vadd.f32 %v11415_v63, %v11402_v30  ;;  %v11471_v3 = vpop.f32.mrf.mxu1 }
 0x606   :  { %vm11672_vm12 = vcmp.gt.f32.partialorder %v11386_v56, 0.0  ;;  %v11682_v47 = vmul.f32 0.01, %v11386_v56 }
 0x607   :  { %v11430_v49 = vadd.f32 %v11429_v61, %v11416_v7 }
 0x608   :  { %v11692_v20 = vsel %vm11672_vm12, %v11386_v56, %v11682_v47 }
 0x609   :  { %11658 = vmatpush.bf16.msra.mxu3 %v17463_v52  ;;  %11702 = vst [vmem:[#allocation14 + $0x10] sm:$0xff] %v11692_v20  ;;  %v11483_v40 = vpop.f32.mrf.mxu2 }
 0x60b   :  { %v11387_v22 = vpop.f32.mrf.mxu3 }
 0x60c   :  { %v11388_v36 = vadd.f32 %v11387_v22, %v11374_v42 }
 0x60d   :  { %11659 = vmatpush.bf16.msra.mxu3 %v17443_v33  ;;  %v11525_v15 = vpop.f32.mrf.mxu1 }
 0x60e   :  { %vm11677_vm13 = vcmp.gt.f32.partialorder %v11388_v36, 0.0  ;;  %v11687_v51 = vmul.f32 0.01, %v11388_v36 }
 0x610   :  { %v11697_v62 = vsel %vm11677_vm13, %v11388_v36, %v11687_v51 }
 0x611   :  { %11660 = vmatpush.bf16.msra.mxu3 %v17423_v6  ;;  %11707 = vst [vmem:[#allocation14 + $0x38] sm:$0xff] %v11697_v62  ;;  %v11485_v50 = vpop.f32.mrf.mxu2 }
 0x615   :  { %11661 = vmatpush.bf16.msra.mxu3 %v17403_v18  ;;  %v11527_v43 = vpop.f32.mrf.mxu1 }
 0x619   :  { %11662 = vmatpush.bf16.msra.mxu3 %v17383_v58 }
 0x61d   :  { %11663 = vmatpush.bf16.msra.mxu3 %v17363_v60 }
 0x620   :  { %11664 = vmatmul.bf16.vlgmr.msra.gmra.mxu3 %v20089_v1  ;;  %v11457_v1 = vpop.f32.mrf.mxu0  ;;  %v11581_v47 = vpop.f32.mrf.mxu1 }
 0x623   :  { %v11441_v27 = vpop.f32.mrf.mxu3 }
 0x624   :  { %v11442_v5 = vadd.f32 %v11441_v27, %v11428_v13  ;;  %v11539_v46 = vpop.f32.mrf.mxu2 }
 0x625   :  { %v11540_v58 = vadd.f32 %v11539_v46, %v8884_v14 }
 0x626   :  { %v11456_v25 = vadd.f32 %v11455_v39, %v11442_v5 }
 0x628   :  { %v11470_v37 = vadd.f32 %v11469_v0, %v11456_v25  ;;  %v11511_v16 = vpop.f32.mrf.mxu0  ;;  %v11583_v51 = vpop.f32.mrf.mxu1 }
 0x62a   :  { %v11484_v45 = vadd.f32 %v11483_v40, %v11470_v37 }
 0x62b   :  { %v11443_v10 = vpop.f32.mrf.mxu3 }
 0x62c   :  { %v11444_v52 = vadd.f32 %v11443_v10, %v11430_v49  ;;  %v11541_v41 = vpop.f32.mrf.mxu2 }
 0x62d   :  { %v11542_v8 = vadd.f32 %v11541_v41, %v8884_v14 }
 0x62e   :  { %v11458_v54 = vadd.f32 %v11457_v1, %v11444_v52 }
 0x630   :  { %v11472_v38 = vadd.f32 %v11471_v3, %v11458_v54  ;;  %v11513_v31 = vpop.f32.mrf.mxu0 }
 0x632   :  { %v11486_v6 = vadd.f32 %v11485_v50, %v11472_v38 }
 0x638   :  { %v11567_v56 = vpop.f32.mrf.mxu0 }
 0x640   :  { %v11569_v60 = vpop.f32.mrf.mxu0  ;;  %v11637_v19 = vpop.f32.mrf.mxu1 }
 0x643   :  { %v11497_v55 = vpop.f32.mrf.mxu3 }
 0x644   :  { %v11498_v33 = vadd.f32 %v11497_v55, %v11484_v45  ;;  %v11595_v20 = vpop.f32.mrf.mxu2 }
 0x646   :  { %v11512_v59 = vadd.f32 %v11511_v16, %v11498_v33 }
 0x648   :  { %v11526_v34 = vadd.f32 %v11525_v15, %v11512_v59  ;;  %v11623_v12 = vpop.f32.mrf.mxu0  ;;  %v11639_v25 = vpop.f32.mrf.mxu1 }
 0x64a   :  { %vm11673_vm14 = vcmp.gt.f32.partialorder %v11526_v34, 0.0  ;;  %v11683_v17 = vmul.f32 0.01, %v11526_v34 }
 0x64b   :  { %v11499_v28 = vpop.f32.mrf.mxu3 }
 0x64c   :  { %v11693_v26 = vsel %vm11673_vm14, %v11526_v34, %v11683_v17  ;;  %v11500_v53 = vadd.f32 %v11499_v28, %v11486_v6  ;;  %v11597_v63 = vpop.f32.mrf.mxu2 }
 0x64d   :  { %11703 = vst [vmem:[#allocation14 + $0x18] sm:$0xff] %v11693_v26 }
 0x64e   :  { %v11514_v44 = vadd.f32 %v11513_v31, %v11500_v53 }
 0x650   :  { %v11528_v18 = vadd.f32 %v11527_v43, %v11514_v44  ;;  %v11625_v13 = vpop.f32.mrf.mxu0 }
 0x652   :  { %vm11678_vm15 = vcmp.gt.f32.partialorder %v11528_v18, 0.0  ;;  %v11688_v4 = vmul.f32 0.01, %v11528_v18 }
 0x654   :  { %v11698_v32 = vsel %vm11678_vm15, %v11528_v18, %v11688_v4 }
 0x655   :  { %11708 = vst [vmem:[#allocation14 + $0x40] sm:$0xff] %v11698_v32 }
 0x663   :  { %v11553_v35 = vpop.f32.mrf.mxu3 }
 0x664   :  { %v11554_v48 = vadd.f32 %v11553_v35, %v11540_v58  ;;  %v11651_v0 = vpop.f32.mrf.mxu2 }
 0x666   :  { %v11568_v2 = vadd.f32 %v11567_v56, %v11554_v48 }
 0x668   :  { %v11582_v22 = vadd.f32 %v11581_v47, %v11568_v2 }
 0x66a   :  { %v11596_v9 = vadd.f32 %v11595_v20, %v11582_v22 }
 0x66b   :  { %v11555_v23 = vpop.f32.mrf.mxu3 }
 0x66c   :  { %v11556_v42 = vadd.f32 %v11555_v23, %v11542_v8  ;;  %v11653_v3 = vpop.f32.mrf.mxu2 }
 0x66e   :  { %v11570_v62 = vadd.f32 %v11569_v60, %v11556_v42 }
 0x670   :  { %v11584_v21 = vadd.f32 %v11583_v51, %v11570_v62 }
 0x672   :  { %v11598_v39 = vadd.f32 %v11597_v63, %v11584_v21 }
 0x683   :  { %v11609_v36 = vpop.f32.mrf.mxu3 }
 0x684   :  { %v11610_v24 = vadd.f32 %v11609_v36, %v11596_v9 }
 0x686   :  { %v11624_v11 = vadd.f32 %v11623_v12, %v11610_v24 }
 0x688   :  { %v11638_v57 = vadd.f32 %v11637_v19, %v11624_v11 }
 0x68a   :  { %v11652_v61 = vadd.f32 %v11651_v0, %v11638_v57 }
 0x68b   :  { %v11611_v29 = vpop.f32.mrf.mxu3 }
 0x68c   :  { %v11612_v27 = vadd.f32 %v11611_v29, %v11598_v39 }
 0x68e   :  { %v11626_v5 = vadd.f32 %v11625_v13, %v11612_v27 }
 0x690   :  { %v11640_v10 = vadd.f32 %v11639_v25, %v11626_v5 }
 0x692   :  { %v11654_v52 = vadd.f32 %v11653_v3, %v11640_v10 }
 0x6a3   :  { %v11665_v30 = vpop.f32.mrf.mxu3 }
 0x6a4   :  { %v11666_v7 = vadd.f32 %v11665_v30, %v11652_v61 }
 0x6a6   :  { %vm11674_vm0 = vcmp.gt.f32.partialorder %v11666_v7, 0.0  ;;  %v11684_v1 = vmul.f32 0.01, %v11666_v7 }
 0x6a8   :  { %v11694_v49 = vsel %vm11674_vm0, %v11666_v7, %v11684_v1 }
 0x6a9   :  { %11704 = vst [vmem:[#allocation14 + $0x20] sm:$0xff] %v11694_v49 }
 0x6ab   :  { %v11667_v37 = vpop.f32.mrf.mxu3 }
 0x6ac   :  { %v11668_v40 = vadd.f32 %v11667_v37, %v11654_v52 }
 0x6ae   :  { %vm11679_vm1 = vcmp.gt.f32.partialorder %v11668_v40, 0.0  ;;  %v11689_v54 = vmul.f32 0.01, %v11668_v40 }
 0x6b0   :  { %v11699_v45 = vsel %vm11679_vm1, %v11668_v40, %v11689_v54 }
 0x6b1   :  { %11709 = vst [vmem:[#allocation14 + $0x48] sm:$0xff] %v11699_v45 }
 0x6b2   :  { %11722 = dma.vmem_to_hbm [thread:$0]  %s11715_s6, 1280, %s11717_s16, [#allocation4], %s19169_s9, %s19169_s9, %s19170_s10  }
 0x6b3   :  { %19166 = dma.done.wait [#allocation4], 1280  }
 0x6b4   :  { %19167 = vsyncadd [#allocation4], 4294966016 }
 0x6b5   :  { %11727 = vsyncpa [#allocation3], 1 }
 0x6b6   :  { %11728 = vsyncpa [#allocation6], 1 }
 0x6b7   :  { %11729 = vsyncpa [#allocation9], 1 }
 0x6b8   :  { %11730 = vsyncpa [#allocation12], 1 }
 0x6b9   :  { %11731 = vsyncpa [#allocation4], 1 }

</bundles_post_ra>
